<compile_context>
chip_gen: v7x
topology: tpu7x:2x2x1
jax: 0.10.0
libtpu: 0.0.40
codegen_flags: <defaults>
</compile_context>

<pallas_src>
import functools

import jax
import jax.numpy as jnp
from jax import lax
from jax.experimental import pallas as pl
from jax.experimental.pallas import tpu as pltpu

LANE = 128  # TPU lane width: channel axes are zero-padded to this.


# ----------------------------------------------------------------------------
# Fused DenseBlock kernel (one grid step == one image)
# ----------------------------------------------------------------------------
def _dense_block_kernel(x_ref, w1_ref, b1_ref, w2_ref, b2_ref, o_ref,
                        bot_ref, feat_ref, *, H, W):
    """
    x_ref   : (H*W, C_in)           f32   unpadded input image rows
    w1_ref  : (L, C_PAD, P_PAD)     bf16  1x1 conv weights (BN1 scale folded)
    b1_ref  : (L, 1, P_PAD)         f32   folded BN1 bias (zero in padding)
    w2_ref  : (L, 9, P_PAD, C_PAD)  bf16  3x3 conv weights, tap-major, output
                                          columns pre-placed at the layer's
                                          destination lanes (BN2 scale folded)
    b2_ref  : (L, 1, C_PAD)         f32   folded BN2 bias at destination lanes
    o_ref   : (H*W, C_PAD)          f32   channel-packed [x | f_1 | ... | f_L | 0]
    bot_ref : (3, H+2, W, P_PAD)    bf16  column-shifted bottleneck variants
                                          with a 1-row zero halo (row halo only)
    feat_ref: (H*W, C_PAD)          bf16  MXU-operand shadow of o_ref
    """
    HW = H * W
    c_in = x_ref.shape[-1]
    c_pad = o_ref.shape[-1]
    p_pad = w1_ref.shape[-1]
    blocks = w1_ref.shape[0]

    # Layer-invariant column-edge masks for the +/-1 w shift (hoisted).
    w_idx = lax.broadcasted_iota(jnp.int32, (HW, 1), 0) % W
    has_left = w_idx != 0            # a (w-1) neighbour exists
    has_right = w_idx != (W - 1)     # a (w+1) neighbour exists

    # Init packed feature buffer: f32 master in o_ref, bf16 shadow in feat_ref.
    # Zeroing first keeps the implicit-concat invariant (all unwritten lanes are
    # exactly 0) now that channel padding happens here, not in the wrapper.
    o_ref[...] = jnp.zeros_like(o_ref)
    o_ref[:, :c_in] = x_ref[...]                      # narrow store, once per image
    feat_ref[...] = o_ref[...].astype(jnp.bfloat16)
    bot_ref[...] = jnp.zeros_like(bot_ref)            # halo rows stay zero forever

    for i in range(blocks):
        # ---- 1x1 conv + folded-BN1 bias + ReLU -----------------------------
        # torch.cat(features, 1) is implicit: lanes of not-yet-written layers
        # are zero and their w1 rows are zero, so one K=128 matmul suffices.
        y1 = jnp.dot(feat_ref[...], w1_ref[i],
                     preferred_element_type=jnp.float32)
        y1 = jnp.maximum(y1 + b1_ref[i], 0.0)                 # (HW, P_PAD) f32

        # ---- stage the 3 column-shifted bottleneck variants (bf16) --------
        # variant v holds y1[h, w + v - 1] (zero outside the image).  The
        # column shift is an XLU sublane roll on the f32 value + edge mask;
        # the row (kh) shift below is an aligned leading-axis slice, so no
        # (8,128)-tile-crossing slice is ever materialized.
        left = jnp.where(has_left, pltpu.roll(y1, shift=1, axis=0), 0.0)
        right = jnp.where(has_right, pltpu.roll(y1, shift=HW - 1, axis=0), 0.0)
        bot_ref[0, 1:H + 1] = left.astype(jnp.bfloat16).reshape(H, W, p_pad)
        bot_ref[1, 1:H + 1] = y1.astype(jnp.bfloat16).reshape(H, W, p_pad)
        bot_ref[2, 1:H + 1] = right.astype(jnp.bfloat16).reshape(H, W, p_pad)

        # ---- 3x3 conv (padding=1): 9 lane-dense MXU dots -------------------
        # Each tap's weights already carry this layer's destination lanes, so
        # every push is a full 128-wide output; tap results (and the final
        # "append") merge with plain full-lane adds.  b2 is folded into the
        # accumulator init (padded lanes are zero so ReLU keeps them zero).
        acc = jnp.broadcast_to(b2_ref[i], (HW, c_pad))
        for kh in range(3):
            for kw in range(3):
                tap = bot_ref[kw, kh:kh + H].reshape(HW, p_pad)   # aligned view
                acc = acc + jnp.dot(tap, w2_ref[i, kh * 3 + kw],
                                    preferred_element_type=jnp.float32)
        new_full = jnp.maximum(acc, 0.0)      # nonzero only in this layer's lanes

        # ---- append: full-lane updates of f32 master + bf16 shadow ---------
        o_ref[...] = o_ref[...] + new_full
        if i + 1 < blocks:
            feat_ref[...] = feat_ref[...] + new_full.astype(jnp.bfloat16)


# ----------------------------------------------------------------------------
# Wrapper: NCHW in/out, single pallas_call for the whole block
# ----------------------------------------------------------------------------
def dense_block_forward(x_nchw, packed, *, growth):
    w1_all, b1_all, w2_all, b2_all = packed
    blocks, c_pad, p_pad = w1_all.shape
    N, C, H, W = x_nchw.shape
    hw = H * W
    c_out = C + blocks * growth

    # NCHW -> (N, H*W, C) rows.  The 128-lane channel padding now happens
    # inside the kernel, so HBM only carries the real C channels.
    x = jnp.transpose(x_nchw, (0, 2, 3, 1)).reshape(N, hw, C).astype(jnp.float32)

    # Explicit scoped-VMEM budget: double-buffered in/out blocks + replicated
    # weights + scratches, with headroom.
    weight_bytes = (w1_all.size * 2 + b1_all.size * 4 +
                    w2_all.size * 2 + b2_all.size * 4)
    io_bytes = hw * C * 4 + hw * c_pad * 4
    scratch_bytes = 3 * (H + 2) * W * p_pad * 2 + hw * c_pad * 2
    vmem_bytes = int(2 * (weight_bytes + io_bytes) + scratch_bytes + (8 << 20))

    kernel = functools.partial(_dense_block_kernel, H=H, W=W)
    out = pl.pallas_call(
        kernel,
        out_shape=jax.ShapeDtypeStruct((N, hw, c_pad), jnp.float32),
        grid=(N,),
        in_specs=[
            pl.BlockSpec((None, hw, C), lambda n: (n, 0, 0)),
            pl.BlockSpec((blocks, c_pad, p_pad), lambda n: (0, 0, 0)),
            pl.BlockSpec((blocks, 1, p_pad), lambda n: (0, 0, 0)),
            pl.BlockSpec((blocks, 9, p_pad, c_pad), lambda n: (0, 0, 0, 0)),
            pl.BlockSpec((blocks, 1, c_pad), lambda n: (0, 0, 0)),
        ],
        out_specs=pl.BlockSpec((None, hw, c_pad), lambda n: (n, 0, 0)),
        scratch_shapes=[
            pltpu.VMEM((3, H + 2, W, p_pad), jnp.bfloat16),   # shifted bottleneck
            pltpu.VMEM((hw, c_pad), jnp.bfloat16),            # bf16 feature shadow
        ],
        compiler_params=pltpu.CompilerParams(
            dimension_semantics=("parallel",),
            vmem_limit_bytes=vmem_bytes),
    )(x, w1_all, b1_all, w2_all, b2_all)

    # In-kernel store stays lane-dense (unmasked full-lane vst); the slice back
    # to the real c_out channels is a single cheap XLA op here.
    out = out[:, :, :c_out].reshape(N, H, W, c_out)
    return jnp.transpose(out, (0, 3, 1, 2))                  # back to NCHW


# ----------------------------------------------------------------------------
# Parameter construction (deterministic, synthetic) and packing
# ----------------------------------------------------------------------------
def _fold_bn(gamma, beta, mean, var, eps=1e-5):
    scale = gamma / jnp.sqrt(var + eps)
    return scale, beta - mean * scale


def make_dense_block_params(key, inplanes, blocks, expansion, growth_rate):
    params = []
    planes = expansion * growth_rate
    for i in range(blocks):
        in_ch = inplanes + i * growth_rate
        key, *ks = jax.random.split(key, 11)
        w1 = jax.random.normal(ks[0], (in_ch, planes), jnp.float32) * 0.1
        g1 = 1.0 + 0.1 * jax.random.normal(ks[1], (planes,), jnp.float32)
        be1 = 0.1 * jax.random.normal(ks[2], (planes,), jnp.float32)
        m1 = 0.1 * jax.random.normal(ks[3], (planes,), jnp.float32)
        v1 = jax.random.uniform(ks[4], (planes,), jnp.float32, 0.5, 1.5)
        s1, b1 = _fold_bn(g1, be1, m1, v1)
        w2 = jax.random.normal(ks[5], (3, 3, planes, growth_rate), jnp.float32) * 0.1
        g2 = 1.0 + 0.1 * jax.random.normal(ks[6], (growth_rate,), jnp.float32)
        be2 = 0.1 * jax.random.normal(ks[7], (growth_rate,), jnp.float32)
        m2 = 0.1 * jax.random.normal(ks[8], (growth_rate,), jnp.float32)
        v2 = jax.random.uniform(ks[9], (growth_rate,), jnp.float32, 0.5, 1.5)
        s2, b2 = _fold_bn(g2, be2, m2, v2)
        params.append(dict(w1=w1, s1=s1, b1=b1, w2=w2, s2=s2, b2=b2))
    return params


def pack_dense_block_params(params, inplanes, blocks, expansion, growth,
                            c_pad=LANE, p_pad=LANE):
    """Fold BN scales into conv weights, place each layer's 3x3 output columns
    at that layer's destination lanes of the packed feature buffer, zero-pad
    the contraction axes to the lane width, cast weights to bf16, and stack."""
    planes = expansion * growth
    assert c_pad >= inplanes + blocks * growth and p_pad >= planes
    w1_all = jnp.zeros((blocks, c_pad, p_pad), jnp.float32)
    b1_all = jnp.zeros((blocks, 1, p_pad), jnp.float32)
    w2_all = jnp.zeros((blocks, 9, p_pad, c_pad), jnp.float32)
    b2_all = jnp.zeros((blocks, 1, c_pad), jnp.float32)
    for i, p in enumerate(params):
        cin = inplanes + i * growth
        c0 = cin                                       # destination lanes of layer i
        w1 = p["w1"] * p["s1"][None, :]                # BN1 scale folded
        w2 = p["w2"] * p["s2"][None, None, None, :]    # BN2 scale folded
        w1_all = w1_all.at[i, :cin, :planes].set(w1)
        b1_all = b1_all.at[i, 0, :planes].set(p["b1"])
        w2_all = w2_all.at[i, :, :planes, c0:c0 + growth].set(
            w2.reshape(9, planes, growth))
        b2_all = b2_all.at[i, 0, c0:c0 + growth].set(p["b2"])
    return (w1_all.astype(jnp.bfloat16), b1_all,
            w2_all.astype(jnp.bfloat16), b2_all)


# ----------------------------------------------------------------------------
# Pure-JAX reference (lax.conv, same bf16-rounded folded weights)
# ----------------------------------------------------------------------------
def dense_block_reference(x_nchw, packed, *, inplanes, blocks, growth, expansion):
    w1_all, b1_all, w2_all, b2_all = packed
    planes = expansion * growth
    x = jnp.transpose(x_nchw, (0, 2, 3, 1)).astype(jnp.float32)
    feats = [x]
    dn = ("NHWC", "HWIO", "NHWC")
    for i in range(blocks):
        cin = inplanes + i * growth
        c0 = cin
        cat = jnp.concatenate(feats, axis=-1)
        w1 = w1_all[i, :cin, :planes][None, None]                        # (1,1,Cin,P) bf16
        y = lax.conv_general_dilated(cat.astype(jnp.bfloat16), w1, (1, 1), "VALID",
                                     dimension_numbers=dn,
                                     preferred_element_type=jnp.float32)
        y = jnp.maximum(y + b1_all[i, 0, :planes], 0.0)
        w2 = w2_all[i, :, :planes, c0:c0 + growth].reshape(3, 3, planes, growth)
        z = lax.conv_general_dilated(y.astype(jnp.bfloat16), w2, (1, 1), "SAME",
                                     dimension_numbers=dn,
                                     preferred_element_type=jnp.float32)
        feats.append(jnp.maximum(z + b2_all[i, 0, c0:c0 + growth], 0.0))
    out = jnp.concatenate(feats, axis=-1)
    return jnp.transpose(out, (0, 3, 1, 2))


if __name__ == "__main__":
    # DenseBlock(inplanes=4, blocks=3, expansion=4, growth_rate=4, efficient=False)
    # -> out channels = 4 + 3*4 = 16
    N, C, H, W = 2, 4, 16, 16
    blocks, expansion, growth = 3, 4, 4

    key = jax.random.PRNGKey(0)
    kx, kp = jax.random.split(key)
    x = jax.random.normal(kx, (N, C, H, W), jnp.float32)
    params = make_dense_block_params(kp, C, blocks, expansion, growth)
    packed = pack_dense_block_params(params, C, blocks, expansion, growth)

    fwd = jax.jit(functools.partial(dense_block_forward, growth=growth))
    out = jax.block_until_ready(fwd(x, packed))
    assert out.shape == (N, C + blocks * growth, H, W), out.shape

    ref = jax.block_until_ready(
        dense_block_reference(x, packed, inplanes=C, blocks=blocks,
                              growth=growth, expansion=expansion))
    max_err = float(jnp.max(jnp.abs(out - ref)))
    assert jnp.allclose(out, ref, rtol=1e-2, atol=1e-2), max_err

    print("KERNEL_OK")
</pallas_src>

<mosaic_0001>
module attributes {stable_mosaic.version = 11 : i64} {
  func.func @_dense_block_kernel(%arg0: i32, %arg1: memref<1x256x4xf32, #tpu.memory_space<vmem>>, %arg2: memref<3x128x128xbf16, #tpu.memory_space<vmem>>, %arg3: memref<3x1x128xf32, #tpu.memory_space<vmem>>, %arg4: memref<3x9x128x128xbf16, #tpu.memory_space<vmem>>, %arg5: memref<3x1x128xf32, #tpu.memory_space<vmem>>, %arg6: memref<1x256x128xf32, #tpu.memory_space<vmem>>, %arg7: memref<3x18x16x128xbf16, #tpu.memory_space<vmem>>, %arg8: memref<256x128xbf16, #tpu.memory_space<vmem>>) attributes {dimension_semantics = [#tpu.dimension_semantics<parallel>], iteration_bounds = array<i64: 2>, scalar_prefetch = 0 : i64, scratch_operands = 2 : i64, tpu.core_type = #tpu.core_type<tc>, window_params = [{transform_indices = @transform_0, window_bounds = array<i64: 1, 256, 4>}, {pipeline_mode = #tpu.pipeline_mode<synchronous>, transform_indices = @transform_1, window_bounds = array<i64: 3, 128, 128>}, {pipeline_mode = #tpu.pipeline_mode<synchronous>, transform_indices = @transform_2, window_bounds = array<i64: 3, 1, 128>}, {pipeline_mode = #tpu.pipeline_mode<synchronous>, transform_indices = @transform_3, window_bounds = array<i64: 3, 9, 128, 128>}, {pipeline_mode = #tpu.pipeline_mode<synchronous>, transform_indices = @transform_4, window_bounds = array<i64: 3, 1, 128>}, {transform_indices = @transform_5, window_bounds = array<i64: 1, 256, 128>}]} {
    %0 = tpu.iota {dimensions = array<i32: 0>} : vector<256x1xi32>
    %c16_i32 = arith.constant 16 : i32
    %c0_i32 = arith.constant 0 : i32
    %1 = arith.cmpi eq, %c16_i32, %c0_i32 : i32
    %c1_i32 = arith.constant 1 : i32
    %2 = arith.select %1, %c1_i32, %c16_i32 : i32
    %3 = vector.broadcast %2 : i32 to vector<256x1xi32>
    %4 = arith.remsi %0, %3 : vector<256x1xi32>
    %c0_i32_0 = arith.constant 0 : i32
    %5 = vector.broadcast %c0_i32_0 : i32 to vector<256x1xi32>
    %6 = arith.cmpi ne, %4, %5 : vector<256x1xi32>
    %c0_i32_1 = arith.constant 0 : i32
    %7 = vector.broadcast %c0_i32_1 : i32 to vector<256x1xi32>
    %8 = arith.cmpi slt, %4, %7 : vector<256x1xi32>
    %c0_i32_2 = arith.constant 0 : i32
    %9 = arith.cmpi slt, %2, %c0_i32_2 : i32
    %10 = vector.broadcast %9 : i1 to vector<256x1xi1>
    %11 = vector.broadcast %10 : vector<256x1xi1> to vector<256x1xi1>
    %12 = arith.xori %8, %11 : vector<256x1xi1>
    %13 = arith.andi %12, %6 : vector<256x1xi1>
    %14 = vector.broadcast %2 : i32 to vector<256x1xi32>
    %15 = arith.addi %4, %14 : vector<256x1xi32>
    %16 = arith.select %13, %15, %4 : vector<256x1xi1>, vector<256x1xi32>
    %c0_i32_3 = arith.constant 0 : i32
    %17 = vector.broadcast %c0_i32_3 : i32 to vector<256x1xi32>
    %18 = arith.cmpi ne, %16, %17 : vector<256x1xi32>
    %c15_i32 = arith.constant 15 : i32
    %19 = vector.broadcast %c15_i32 : i32 to vector<256x1xi32>
    %20 = arith.cmpi ne, %16, %19 : vector<256x1xi32>
    %cst = arith.constant 0.000000e+00 : f32
    %21 = vector.broadcast %cst : f32 to vector<256x128xf32>
    %c0 = arith.constant 0 : index
    %c0_4 = arith.constant 0 : index
    %c0_5 = arith.constant 0 : index
    %22 = vector.load %arg6[%c0, %c0_4, %c0_5] : memref<1x256x128xf32, #tpu.memory_space<vmem>>, vector<1x256x128xf32>
    %23 = vector.shape_cast %22 : vector<1x256x128xf32> to vector<256x128xf32>
    %24 = vector.shape_cast %21 : vector<256x128xf32> to vector<1x256x128xf32>
    tpu.vector_store %arg6[%c0, %c0_4, %c0_5], %24 {strides = array<i32>} : memref<1x256x128xf32, #tpu.memory_space<vmem>>, vector<1x256x128xf32>,
    %c0_6 = arith.constant 0 : index
    %c0_7 = arith.constant 0 : index
    %c0_8 = arith.constant 0 : index
    %25 = vector.load %arg1[%c0_6, %c0_7, %c0_8] : memref<1x256x4xf32, #tpu.memory_space<vmem>>, vector<1x256x4xf32>
    %26 = vector.shape_cast %25 : vector<1x256x4xf32> to vector<256x4xf32>
    %c0_9 = arith.constant 0 : index
    %c0_10 = arith.constant 0 : index
    %c0_11 = arith.constant 0 : index
    %27 = vector.load %arg6[%c0_9, %c0_10, %c0_11] : memref<1x256x128xf32, #tpu.memory_space<vmem>>, vector<1x256x4xf32>
    %28 = vector.shape_cast %27 : vector<1x256x4xf32> to vector<256x4xf32>
    %29 = vector.shape_cast %26 : vector<256x4xf32> to vector<1x256x4xf32>
    tpu.vector_store %arg6[%c0_9, %c0_10, %c0_11], %29 {strides = array<i32>} : memref<1x256x128xf32, #tpu.memory_space<vmem>>, vector<1x256x4xf32>,
    %c0_12 = arith.constant 0 : index
    %c0_13 = arith.constant 0 : index
    %c0_14 = arith.constant 0 : index
    %30 = vector.load %arg6[%c0_12, %c0_13, %c0_14] : memref<1x256x128xf32, #tpu.memory_space<vmem>>, vector<1x256x128xf32>
    %31 = vector.shape_cast %30 : vector<1x256x128xf32> to vector<256x128xf32>
    %32 = arith.truncf %31 : vector<256x128xf32> to vector<256x128xbf16>
    %c0_15 = arith.constant 0 : index
    %c0_16 = arith.constant 0 : index
    %33 = vector.load %arg8[%c0_15, %c0_16] : memref<256x128xbf16, #tpu.memory_space<vmem>>, vector<256x128xbf16>
    tpu.vector_store %arg8[%c0_15, %c0_16], %32 {strides = array<i32>} : memref<256x128xbf16, #tpu.memory_space<vmem>>, vector<256x128xbf16>,
    %cst_17 = arith.constant 0.000000e+00 : bf16
    %34 = vector.broadcast %cst_17 : bf16 to vector<3x18x16x128xbf16>
    %c0_18 = arith.constant 0 : index
    %c0_19 = arith.constant 0 : index
    %c0_20 = arith.constant 0 : index
    %c0_21 = arith.constant 0 : index
    %35 = vector.load %arg7[%c0_18, %c0_19, %c0_20, %c0_21] : memref<3x18x16x128xbf16, #tpu.memory_space<vmem>>, vector<3x18x16x128xbf16>
    tpu.vector_store %arg7[%c0_18, %c0_19, %c0_20, %c0_21], %34 {strides = array<i32>} : memref<3x18x16x128xbf16, #tpu.memory_space<vmem>>, vector<3x18x16x128xbf16>,
    %c0_22 = arith.constant 0 : index
    %c0_23 = arith.constant 0 : index
    %36 = vector.load %arg8[%c0_22, %c0_23] : memref<256x128xbf16, #tpu.memory_space<vmem>>, vector<256x128xbf16>
    %c0_24 = arith.constant 0 : index
    %c0_25 = arith.constant 0 : index
    %c0_26 = arith.constant 0 : index
    %37 = vector.load %arg2[%c0_24, %c0_25, %c0_26] : memref<3x128x128xbf16, #tpu.memory_space<vmem>>, vector<1x128x128xbf16>
    %38 = vector.shape_cast %37 : vector<1x128x128xbf16> to vector<128x128xbf16>
    %cst_27 = arith.constant dense<0.000000e+00> : vector<256x128xf32>
    %39 = tpu.matmul %36, %38, %cst_27 {dimension_numbers = #tpu.dot_dimension_numbers<[1], [0], [0], [1], [0, 0, 1, 1], [], []>} : vector<256x128xbf16>, vector<128x128xbf16>, vector<256x128xf32> -> vector<256x128xf32>
    %c0_28 = arith.constant 0 : index
    %c0_29 = arith.constant 0 : index
    %c0_30 = arith.constant 0 : index
    %40 = vector.load %arg3[%c0_28, %c0_29, %c0_30] : memref<3x1x128xf32, #tpu.memory_space<vmem>>, vector<1x1x128xf32>
    %41 = vector.shape_cast %40 : vector<1x1x128xf32> to vector<1x128xf32>
    %42 = vector.broadcast %41 : vector<1x128xf32> to vector<256x128xf32>
    %43 = arith.addf %39, %42 : vector<256x128xf32>
    %cst_31 = arith.constant 0.000000e+00 : f32
    %44 = vector.broadcast %cst_31 : f32 to vector<256x128xf32>
    %45 = arith.maximumf %43, %44 : vector<256x128xf32>
    %c1_i32_32 = arith.constant 1 : i32
    %46 = tpu.dynamic_rotate %45 by %c1_i32_32 dim 0 : vector<256x128xf32>, i32 -> vector<256x128xf32>
    %cst_33 = arith.constant 0.000000e+00 : f32
    %47 = vector.shape_cast %18 : vector<256x1xi1> to vector<256x1xi1>
    %48 = vector.broadcast %47 : vector<256x1xi1> to vector<256x128xi1>
    %49 = vector.broadcast %cst_33 : f32 to vector<256x128xf32>
    %50 = arith.select %48, %46, %49 : vector<256x128xi1>, vector<256x128xf32>
    %c255_i32 = arith.constant 255 : i32
    %51 = tpu.dynamic_rotate %45 by %c255_i32 dim 0 : vector<256x128xf32>, i32 -> vector<256x128xf32>
    %cst_34 = arith.constant 0.000000e+00 : f32
    %52 = vector.shape_cast %20 : vector<256x1xi1> to vector<256x1xi1>
    %53 = vector.broadcast %52 : vector<256x1xi1> to vector<256x128xi1>
    %54 = vector.broadcast %cst_34 : f32 to vector<256x128xf32>
    %55 = arith.select %53, %51, %54 : vector<256x128xi1>, vector<256x128xf32>
    %56 = arith.truncf %50 : vector<256x128xf32> to vector<256x128xbf16>
    %57 = vector.shape_cast %56 : vector<256x128xbf16> to vector<16x16x128xbf16>
    %c0_35 = arith.constant 0 : index
    %c1 = arith.constant 1 : index
    %c0_36 = arith.constant 0 : index
    %c0_37 = arith.constant 0 : index
    %58 = vector.load %arg7[%c0_35, %c1, %c0_36, %c0_37] : memref<3x18x16x128xbf16, #tpu.memory_space<vmem>>, vector<1x16x16x128xbf16>
    %59 = vector.shape_cast %58 : vector<1x16x16x128xbf16> to vector<16x16x128xbf16>
    %60 = vector.shape_cast %57 : vector<16x16x128xbf16> to vector<1x16x16x128xbf16>
    tpu.vector_store %arg7[%c0_35, %c1, %c0_36, %c0_37], %60 {strides = array<i32>} : memref<3x18x16x128xbf16, #tpu.memory_space<vmem>>, vector<1x16x16x128xbf16>,
    %61 = arith.truncf %45 : vector<256x128xf32> to vector<256x128xbf16>
    %62 = vector.shape_cast %61 : vector<256x128xbf16> to vector<16x16x128xbf16>
    %c1_38 = arith.constant 1 : index
    %c1_39 = arith.constant 1 : index
    %c0_40 = arith.constant 0 : index
    %c0_41 = arith.constant 0 : index
    %63 = vector.load %arg7[%c1_38, %c1_39, %c0_40, %c0_41] : memref<3x18x16x128xbf16, #tpu.memory_space<vmem>>, vector<1x16x16x128xbf16>
    %64 = vector.shape_cast %63 : vector<1x16x16x128xbf16> to vector<16x16x128xbf16>
    %65 = vector.shape_cast %62 : vector<16x16x128xbf16> to vector<1x16x16x128xbf16>
    tpu.vector_store %arg7[%c1_38, %c1_39, %c0_40, %c0_41], %65 {strides = array<i32>} : memref<3x18x16x128xbf16, #tpu.memory_space<vmem>>, vector<1x16x16x128xbf16>,
    %66 = arith.truncf %55 : vector<256x128xf32> to vector<256x128xbf16>
    %67 = vector.shape_cast %66 : vector<256x128xbf16> to vector<16x16x128xbf16>
    %c2 = arith.constant 2 : index
    %c1_42 = arith.constant 1 : index
    %c0_43 = arith.constant 0 : index
    %c0_44 = arith.constant 0 : index
    %68 = vector.load %arg7[%c2, %c1_42, %c0_43, %c0_44] : memref<3x18x16x128xbf16, #tpu.memory_space<vmem>>, vector<1x16x16x128xbf16>
    %69 = vector.shape_cast %68 : vector<1x16x16x128xbf16> to vector<16x16x128xbf16>
    %70 = vector.shape_cast %67 : vector<16x16x128xbf16> to vector<1x16x16x128xbf16>
    tpu.vector_store %arg7[%c2, %c1_42, %c0_43, %c0_44], %70 {strides = array<i32>} : memref<3x18x16x128xbf16, #tpu.memory_space<vmem>>, vector<1x16x16x128xbf16>,
    %c0_45 = arith.constant 0 : index
    %c0_46 = arith.constant 0 : index
    %c0_47 = arith.constant 0 : index
    %71 = vector.load %arg5[%c0_45, %c0_46, %c0_47] : memref<3x1x128xf32, #tpu.memory_space<vmem>>, vector<1x1x128xf32>
    %72 = vector.shape_cast %71 : vector<1x1x128xf32> to vector<1x128xf32>
    %73 = vector.shape_cast %72 : vector<1x128xf32> to vector<1x128xf32>
    %74 = vector.broadcast %73 : vector<1x128xf32> to vector<256x128xf32>
    %c0_48 = arith.constant 0 : index
    %c0_49 = arith.constant 0 : index
    %c0_50 = arith.constant 0 : index
    %c0_51 = arith.constant 0 : index
    %75 = vector.load %arg7[%c0_48, %c0_49, %c0_50, %c0_51] : memref<3x18x16x128xbf16, #tpu.memory_space<vmem>>, vector<1x16x16x128xbf16>
    %76 = vector.shape_cast %75 : vector<1x16x16x128xbf16> to vector<16x16x128xbf16>
    %77 = vector.shape_cast %76 : vector<16x16x128xbf16> to vector<256x128xbf16>
    %c0_52 = arith.constant 0 : index
    %c0_53 = arith.constant 0 : index
    %c0_54 = arith.constant 0 : index
    %c0_55 = arith.constant 0 : index
    %78 = vector.load %arg4[%c0_52, %c0_53, %c0_54, %c0_55] : memref<3x9x128x128xbf16, #tpu.memory_space<vmem>>, vector<1x1x128x128xbf16>
    %79 = vector.shape_cast %78 : vector<1x1x128x128xbf16> to vector<128x128xbf16>
    %cst_56 = arith.constant dense<0.000000e+00> : vector<256x128xf32>
    %80 = tpu.matmul %77, %79, %cst_56 {dimension_numbers = #tpu.dot_dimension_numbers<[1], [0], [0], [1], [0, 0, 1, 1], [], []>} : vector<256x128xbf16>, vector<128x128xbf16>, vector<256x128xf32> -> vector<256x128xf32>
    %81 = arith.addf %74, %80 : vector<256x128xf32>
    %c1_57 = arith.constant 1 : index
    %c0_58 = arith.constant 0 : index
    %c0_59 = arith.constant 0 : index
    %c0_60 = arith.constant 0 : index
    %82 = vector.load %arg7[%c1_57, %c0_58, %c0_59, %c0_60] : memref<3x18x16x128xbf16, #tpu.memory_space<vmem>>, vector<1x16x16x128xbf16>
    %83 = vector.shape_cast %82 : vector<1x16x16x128xbf16> to vector<16x16x128xbf16>
    %84 = vector.shape_cast %83 : vector<16x16x128xbf16> to vector<256x128xbf16>
    %c0_61 = arith.constant 0 : index
    %c1_62 = arith.constant 1 : index
    %c0_63 = arith.constant 0 : index
    %c0_64 = arith.constant 0 : index
    %85 = vector.load %arg4[%c0_61, %c1_62, %c0_63, %c0_64] : memref<3x9x128x128xbf16, #tpu.memory_space<vmem>>, vector<1x1x128x128xbf16>
    %86 = vector.shape_cast %85 : vector<1x1x128x128xbf16> to vector<128x128xbf16>
    %cst_65 = arith.constant dense<0.000000e+00> : vector<256x128xf32>
    %87 = tpu.matmul %84, %86, %cst_65 {dimension_numbers = #tpu.dot_dimension_numbers<[1], [0], [0], [1], [0, 0, 1, 1], [], []>} : vector<256x128xbf16>, vector<128x128xbf16>, vector<256x128xf32> -> vector<256x128xf32>
    %88 = arith.addf %81, %87 : vector<256x128xf32>
    %c2_66 = arith.constant 2 : index
    %c0_67 = arith.constant 0 : index
    %c0_68 = arith.constant 0 : index
    %c0_69 = arith.constant 0 : index
    %89 = vector.load %arg7[%c2_66, %c0_67, %c0_68, %c0_69] : memref<3x18x16x128xbf16, #tpu.memory_space<vmem>>, vector<1x16x16x128xbf16>
    %90 = vector.shape_cast %89 : vector<1x16x16x128xbf16> to vector<16x16x128xbf16>
    %91 = vector.shape_cast %90 : vector<16x16x128xbf16> to vector<256x128xbf16>
    %c0_70 = arith.constant 0 : index
    %c2_71 = arith.constant 2 : index
    %c0_72 = arith.constant 0 : index
    %c0_73 = arith.constant 0 : index
    %92 = vector.load %arg4[%c0_70, %c2_71, %c0_72, %c0_73] : memref<3x9x128x128xbf16, #tpu.memory_space<vmem>>, vector<1x1x128x128xbf16>
    %93 = vector.shape_cast %92 : vector<1x1x128x128xbf16> to vector<128x128xbf16>
    %cst_74 = arith.constant dense<0.000000e+00> : vector<256x128xf32>
    %94 = tpu.matmul %91, %93, %cst_74 {dimension_numbers = #tpu.dot_dimension_numbers<[1], [0], [0], [1], [0, 0, 1, 1], [], []>} : vector<256x128xbf16>, vector<128x128xbf16>, vector<256x128xf32> -> vector<256x128xf32>
    %95 = arith.addf %88, %94 : vector<256x128xf32>
    %c0_75 = arith.constant 0 : index
    %c1_76 = arith.constant 1 : index
    %c0_77 = arith.constant 0 : index
    %c0_78 = arith.constant 0 : index
    %96 = vector.load %arg7[%c0_75, %c1_76, %c0_77, %c0_78] : memref<3x18x16x128xbf16, #tpu.memory_space<vmem>>, vector<1x16x16x128xbf16>
    %97 = vector.shape_cast %96 : vector<1x16x16x128xbf16> to vector<16x16x128xbf16>
    %98 = vector.shape_cast %97 : vector<16x16x128xbf16> to vector<256x128xbf16>
    %c0_79 = arith.constant 0 : index
    %c3 = arith.constant 3 : index
    %c0_80 = arith.constant 0 : index
    %c0_81 = arith.constant 0 : index
    %99 = vector.load %arg4[%c0_79, %c3, %c0_80, %c0_81] : memref<3x9x128x128xbf16, #tpu.memory_space<vmem>>, vector<1x1x128x128xbf16>
    %100 = vector.shape_cast %99 : vector<1x1x128x128xbf16> to vector<128x128xbf16>
    %cst_82 = arith.constant dense<0.000000e+00> : vector<256x128xf32>
    %101 = tpu.matmul %98, %100, %cst_82 {dimension_numbers = #tpu.dot_dimension_numbers<[1], [0], [0], [1], [0, 0, 1, 1], [], []>} : vector<256x128xbf16>, vector<128x128xbf16>, vector<256x128xf32> -> vector<256x128xf32>
    %102 = arith.addf %95, %101 : vector<256x128xf32>
    %c1_83 = arith.constant 1 : index
    %c1_84 = arith.constant 1 : index
    %c0_85 = arith.constant 0 : index
    %c0_86 = arith.constant 0 : index
    %103 = vector.load %arg7[%c1_83, %c1_84, %c0_85, %c0_86] : memref<3x18x16x128xbf16, #tpu.memory_space<vmem>>, vector<1x16x16x128xbf16>
    %104 = vector.shape_cast %103 : vector<1x16x16x128xbf16> to vector<16x16x128xbf16>
    %105 = vector.shape_cast %104 : vector<16x16x128xbf16> to vector<256x128xbf16>
    %c0_87 = arith.constant 0 : index
    %c4 = arith.constant 4 : index
    %c0_88 = arith.constant 0 : index
    %c0_89 = arith.constant 0 : index
    %106 = vector.load %arg4[%c0_87, %c4, %c0_88, %c0_89] : memref<3x9x128x128xbf16, #tpu.memory_space<vmem>>, vector<1x1x128x128xbf16>
    %107 = vector.shape_cast %106 : vector<1x1x128x128xbf16> to vector<128x128xbf16>
    %cst_90 = arith.constant dense<0.000000e+00> : vector<256x128xf32>
    %108 = tpu.matmul %105, %107, %cst_90 {dimension_numbers = #tpu.dot_dimension_numbers<[1], [0], [0], [1], [0, 0, 1, 1], [], []>} : vector<256x128xbf16>, vector<128x128xbf16>, vector<256x128xf32> -> vector<256x128xf32>
    %109 = arith.addf %102, %108 : vector<256x128xf32>
    %c2_91 = arith.constant 2 : index
    %c1_92 = arith.constant 1 : index
    %c0_93 = arith.constant 0 : index
    %c0_94 = arith.constant 0 : index
    %110 = vector.load %arg7[%c2_91, %c1_92, %c0_93, %c0_94] : memref<3x18x16x128xbf16, #tpu.memory_space<vmem>>, vector<1x16x16x128xbf16>
    %111 = vector.shape_cast %110 : vector<1x16x16x128xbf16> to vector<16x16x128xbf16>
    %112 = vector.shape_cast %111 : vector<16x16x128xbf16> to vector<256x128xbf16>
    %c0_95 = arith.constant 0 : index
    %c5 = arith.constant 5 : index
    %c0_96 = arith.constant 0 : index
    %c0_97 = arith.constant 0 : index
    %113 = vector.load %arg4[%c0_95, %c5, %c0_96, %c0_97] : memref<3x9x128x128xbf16, #tpu.memory_space<vmem>>, vector<1x1x128x128xbf16>
    %114 = vector.shape_cast %113 : vector<1x1x128x128xbf16> to vector<128x128xbf16>
    %cst_98 = arith.constant dense<0.000000e+00> : vector<256x128xf32>
    %115 = tpu.matmul %112, %114, %cst_98 {dimension_numbers = #tpu.dot_dimension_numbers<[1], [0], [0], [1], [0, 0, 1, 1], [], []>} : vector<256x128xbf16>, vector<128x128xbf16>, vector<256x128xf32> -> vector<256x128xf32>
    %116 = arith.addf %109, %115 : vector<256x128xf32>
    %c0_99 = arith.constant 0 : index
    %c2_100 = arith.constant 2 : index
    %c0_101 = arith.constant 0 : index
    %c0_102 = arith.constant 0 : index
    %117 = vector.load %arg7[%c0_99, %c2_100, %c0_101, %c0_102] : memref<3x18x16x128xbf16, #tpu.memory_space<vmem>>, vector<1x16x16x128xbf16>
    %118 = vector.shape_cast %117 : vector<1x16x16x128xbf16> to vector<16x16x128xbf16>
    %119 = vector.shape_cast %118 : vector<16x16x128xbf16> to vector<256x128xbf16>
    %c0_103 = arith.constant 0 : index
    %c6 = arith.constant 6 : index
    %c0_104 = arith.constant 0 : index
    %c0_105 = arith.constant 0 : index
    %120 = vector.load %arg4[%c0_103, %c6, %c0_104, %c0_105] : memref<3x9x128x128xbf16, #tpu.memory_space<vmem>>, vector<1x1x128x128xbf16>
    %121 = vector.shape_cast %120 : vector<1x1x128x128xbf16> to vector<128x128xbf16>
    %cst_106 = arith.constant dense<0.000000e+00> : vector<256x128xf32>
    %122 = tpu.matmul %119, %121, %cst_106 {dimension_numbers = #tpu.dot_dimension_numbers<[1], [0], [0], [1], [0, 0, 1, 1], [], []>} : vector<256x128xbf16>, vector<128x128xbf16>, vector<256x128xf32> -> vector<256x128xf32>
    %123 = arith.addf %116, %122 : vector<256x128xf32>
    %c1_107 = arith.constant 1 : index
    %c2_108 = arith.constant 2 : index
    %c0_109 = arith.constant 0 : index
    %c0_110 = arith.constant 0 : index
    %124 = vector.load %arg7[%c1_107, %c2_108, %c0_109, %c0_110] : memref<3x18x16x128xbf16, #tpu.memory_space<vmem>>, vector<1x16x16x128xbf16>
    %125 = vector.shape_cast %124 : vector<1x16x16x128xbf16> to vector<16x16x128xbf16>
    %126 = vector.shape_cast %125 : vector<16x16x128xbf16> to vector<256x128xbf16>
    %c0_111 = arith.constant 0 : index
    %c7 = arith.constant 7 : index
    %c0_112 = arith.constant 0 : index
    %c0_113 = arith.constant 0 : index
    %127 = vector.load %arg4[%c0_111, %c7, %c0_112, %c0_113] : memref<3x9x128x128xbf16, #tpu.memory_space<vmem>>, vector<1x1x128x128xbf16>
    %128 = vector.shape_cast %127 : vector<1x1x128x128xbf16> to vector<128x128xbf16>
    %cst_114 = arith.constant dense<0.000000e+00> : vector<256x128xf32>
    %129 = tpu.matmul %126, %128, %cst_114 {dimension_numbers = #tpu.dot_dimension_numbers<[1], [0], [0], [1], [0, 0, 1, 1], [], []>} : vector<256x128xbf16>, vector<128x128xbf16>, vector<256x128xf32> -> vector<256x128xf32>
    %130 = arith.addf %123, %129 : vector<256x128xf32>
    %c2_115 = arith.constant 2 : index
    %c2_116 = arith.constant 2 : index
    %c0_117 = arith.constant 0 : index
    %c0_118 = arith.constant 0 : index
    %131 = vector.load %arg7[%c2_115, %c2_116, %c0_117, %c0_118] : memref<3x18x16x128xbf16, #tpu.memory_space<vmem>>, vector<1x16x16x128xbf16>
    %132 = vector.shape_cast %131 : vector<1x16x16x128xbf16> to vector<16x16x128xbf16>
    %133 = vector.shape_cast %132 : vector<16x16x128xbf16> to vector<256x128xbf16>
    %c0_119 = arith.constant 0 : index
    %c8 = arith.constant 8 : index
    %c0_120 = arith.constant 0 : index
    %c0_121 = arith.constant 0 : index
    %134 = vector.load %arg4[%c0_119, %c8, %c0_120, %c0_121] : memref<3x9x128x128xbf16, #tpu.memory_space<vmem>>, vector<1x1x128x128xbf16>
    %135 = vector.shape_cast %134 : vector<1x1x128x128xbf16> to vector<128x128xbf16>
    %cst_122 = arith.constant dense<0.000000e+00> : vector<256x128xf32>
    %136 = tpu.matmul %133, %135, %cst_122 {dimension_numbers = #tpu.dot_dimension_numbers<[1], [0], [0], [1], [0, 0, 1, 1], [], []>} : vector<256x128xbf16>, vector<128x128xbf16>, vector<256x128xf32> -> vector<256x128xf32>
    %137 = arith.addf %130, %136 : vector<256x128xf32>
    %cst_123 = arith.constant 0.000000e+00 : f32
    %138 = vector.broadcast %cst_123 : f32 to vector<256x128xf32>
    %139 = arith.maximumf %137, %138 : vector<256x128xf32>
    %c0_124 = arith.constant 0 : index
    %c0_125 = arith.constant 0 : index
    %c0_126 = arith.constant 0 : index
    %140 = vector.load %arg6[%c0_124, %c0_125, %c0_126] : memref<1x256x128xf32, #tpu.memory_space<vmem>>, vector<1x256x128xf32>
    %141 = vector.shape_cast %140 : vector<1x256x128xf32> to vector<256x128xf32>
    %142 = arith.addf %141, %139 : vector<256x128xf32>
    %c0_127 = arith.constant 0 : index
    %c0_128 = arith.constant 0 : index
    %c0_129 = arith.constant 0 : index
    %143 = vector.load %arg6[%c0_127, %c0_128, %c0_129] : memref<1x256x128xf32, #tpu.memory_space<vmem>>, vector<1x256x128xf32>
    %144 = vector.shape_cast %143 : vector<1x256x128xf32> to vector<256x128xf32>
    %145 = vector.shape_cast %142 : vector<256x128xf32> to vector<1x256x128xf32>
    tpu.vector_store %arg6[%c0_127, %c0_128, %c0_129], %145 {strides = array<i32>} : memref<1x256x128xf32, #tpu.memory_space<vmem>>, vector<1x256x128xf32>,
    %c0_130 = arith.constant 0 : index
    %c0_131 = arith.constant 0 : index
    %146 = vector.load %arg8[%c0_130, %c0_131] : memref<256x128xbf16, #tpu.memory_space<vmem>>, vector<256x128xbf16>
    %147 = arith.truncf %139 : vector<256x128xf32> to vector<256x128xbf16>
    %148 = arith.addf %146, %147 : vector<256x128xbf16>
    %c0_132 = arith.constant 0 : index
    %c0_133 = arith.constant 0 : index
    %149 = vector.load %arg8[%c0_132, %c0_133] : memref<256x128xbf16, #tpu.memory_space<vmem>>, vector<256x128xbf16>
    tpu.vector_store %arg8[%c0_132, %c0_133], %148 {strides = array<i32>} : memref<256x128xbf16, #tpu.memory_space<vmem>>, vector<256x128xbf16>,
    %c0_134 = arith.constant 0 : index
    %c0_135 = arith.constant 0 : index
    %150 = vector.load %arg8[%c0_134, %c0_135] : memref<256x128xbf16, #tpu.memory_space<vmem>>, vector<256x128xbf16>
    %c1_136 = arith.constant 1 : index
    %c0_137 = arith.constant 0 : index
    %c0_138 = arith.constant 0 : index
    %151 = vector.load %arg2[%c1_136, %c0_137, %c0_138] : memref<3x128x128xbf16, #tpu.memory_space<vmem>>, vector<1x128x128xbf16>
    %152 = vector.shape_cast %151 : vector<1x128x128xbf16> to vector<128x128xbf16>
    %cst_139 = arith.constant dense<0.000000e+00> : vector<256x128xf32>
    %153 = tpu.matmul %150, %152, %cst_139 {dimension_numbers = #tpu.dot_dimension_numbers<[1], [0], [0], [1], [0, 0, 1, 1], [], []>} : vector<256x128xbf16>, vector<128x128xbf16>, vector<256x128xf32> -> vector<256x128xf32>
    %c1_140 = arith.constant 1 : index
    %c0_141 = arith.constant 0 : index
    %c0_142 = arith.constant 0 : index
    %154 = vector.load %arg3[%c1_140, %c0_141, %c0_142] : memref<3x1x128xf32, #tpu.memory_space<vmem>>, vector<1x1x128xf32>
    %155 = vector.shape_cast %154 : vector<1x1x128xf32> to vector<1x128xf32>
    %156 = vector.broadcast %155 : vector<1x128xf32> to vector<256x128xf32>
    %157 = arith.addf %153, %156 : vector<256x128xf32>
    %cst_143 = arith.constant 0.000000e+00 : f32
    %158 = vector.broadcast %cst_143 : f32 to vector<256x128xf32>
    %159 = arith.maximumf %157, %158 : vector<256x128xf32>
    %c1_i32_144 = arith.constant 1 : i32
    %160 = tpu.dynamic_rotate %159 by %c1_i32_144 dim 0 : vector<256x128xf32>, i32 -> vector<256x128xf32>
    %cst_145 = arith.constant 0.000000e+00 : f32
    %161 = vector.shape_cast %18 : vector<256x1xi1> to vector<256x1xi1>
    %162 = vector.broadcast %161 : vector<256x1xi1> to vector<256x128xi1>
    %163 = vector.broadcast %cst_145 : f32 to vector<256x128xf32>
    %164 = arith.select %162, %160, %163 : vector<256x128xi1>, vector<256x128xf32>
    %c255_i32_146 = arith.constant 255 : i32
    %165 = tpu.dynamic_rotate %159 by %c255_i32_146 dim 0 : vector<256x128xf32>, i32 -> vector<256x128xf32>
    %cst_147 = arith.constant 0.000000e+00 : f32
    %166 = vector.shape_cast %20 : vector<256x1xi1> to vector<256x1xi1>
    %167 = vector.broadcast %166 : vector<256x1xi1> to vector<256x128xi1>
    %168 = vector.broadcast %cst_147 : f32 to vector<256x128xf32>
    %169 = arith.select %167, %165, %168 : vector<256x128xi1>, vector<256x128xf32>
    %170 = arith.truncf %164 : vector<256x128xf32> to vector<256x128xbf16>
    %171 = vector.shape_cast %170 : vector<256x128xbf16> to vector<16x16x128xbf16>
    %c0_148 = arith.constant 0 : index
    %c1_149 = arith.constant 1 : index
    %c0_150 = arith.constant 0 : index
    %c0_151 = arith.constant 0 : index
    %172 = vector.load %arg7[%c0_148, %c1_149, %c0_150, %c0_151] : memref<3x18x16x128xbf16, #tpu.memory_space<vmem>>, vector<1x16x16x128xbf16>
    %173 = vector.shape_cast %172 : vector<1x16x16x128xbf16> to vector<16x16x128xbf16>
    %174 = vector.shape_cast %171 : vector<16x16x128xbf16> to vector<1x16x16x128xbf16>
    tpu.vector_store %arg7[%c0_148, %c1_149, %c0_150, %c0_151], %174 {strides = array<i32>} : memref<3x18x16x128xbf16, #tpu.memory_space<vmem>>, vector<1x16x16x128xbf16>,
    %175 = arith.truncf %159 : vector<256x128xf32> to vector<256x128xbf16>
    %176 = vector.shape_cast %175 : vector<256x128xbf16> to vector<16x16x128xbf16>
    %c1_152 = arith.constant 1 : index
    %c1_153 = arith.constant 1 : index
    %c0_154 = arith.constant 0 : index
    %c0_155 = arith.constant 0 : index
    %177 = vector.load %arg7[%c1_152, %c1_153, %c0_154, %c0_155] : memref<3x18x16x128xbf16, #tpu.memory_space<vmem>>, vector<1x16x16x128xbf16>
    %178 = vector.shape_cast %177 : vector<1x16x16x128xbf16> to vector<16x16x128xbf16>
    %179 = vector.shape_cast %176 : vector<16x16x128xbf16> to vector<1x16x16x128xbf16>
    tpu.vector_store %arg7[%c1_152, %c1_153, %c0_154, %c0_155], %179 {strides = array<i32>} : memref<3x18x16x128xbf16, #tpu.memory_space<vmem>>, vector<1x16x16x128xbf16>,
    %180 = arith.truncf %169 : vector<256x128xf32> to vector<256x128xbf16>
    %181 = vector.shape_cast %180 : vector<256x128xbf16> to vector<16x16x128xbf16>
    %c2_156 = arith.constant 2 : index
    %c1_157 = arith.constant 1 : index
    %c0_158 = arith.constant 0 : index
    %c0_159 = arith.constant 0 : index
    %182 = vector.load %arg7[%c2_156, %c1_157, %c0_158, %c0_159] : memref<3x18x16x128xbf16, #tpu.memory_space<vmem>>, vector<1x16x16x128xbf16>
    %183 = vector.shape_cast %182 : vector<1x16x16x128xbf16> to vector<16x16x128xbf16>
    %184 = vector.shape_cast %181 : vector<16x16x128xbf16> to vector<1x16x16x128xbf16>
    tpu.vector_store %arg7[%c2_156, %c1_157, %c0_158, %c0_159], %184 {strides = array<i32>} : memref<3x18x16x128xbf16, #tpu.memory_space<vmem>>, vector<1x16x16x128xbf16>,
    %c1_160 = arith.constant 1 : index
    %c0_161 = arith.constant 0 : index
    %c0_162 = arith.constant 0 : index
    %185 = vector.load %arg5[%c1_160, %c0_161, %c0_162] : memref<3x1x128xf32, #tpu.memory_space<vmem>>, vector<1x1x128xf32>
    %186 = vector.shape_cast %185 : vector<1x1x128xf32> to vector<1x128xf32>
    %187 = vector.shape_cast %186 : vector<1x128xf32> to vector<1x128xf32>
    %188 = vector.broadcast %187 : vector<1x128xf32> to vector<256x128xf32>
    %c0_163 = arith.constant 0 : index
    %c0_164 = arith.constant 0 : index
    %c0_165 = arith.constant 0 : index
    %c0_166 = arith.constant 0 : index
    %189 = vector.load %arg7[%c0_163, %c0_164, %c0_165, %c0_166] : memref<3x18x16x128xbf16, #tpu.memory_space<vmem>>, vector<1x16x16x128xbf16>
    %190 = vector.shape_cast %189 : vector<1x16x16x128xbf16> to vector<16x16x128xbf16>
    %191 = vector.shape_cast %190 : vector<16x16x128xbf16> to vector<256x128xbf16>
    %c1_167 = arith.constant 1 : index
    %c0_168 = arith.constant 0 : index
    %c0_169 = arith.constant 0 : index
    %c0_170 = arith.constant 0 : index
    %192 = vector.load %arg4[%c1_167, %c0_168, %c0_169, %c0_170] : memref<3x9x128x128xbf16, #tpu.memory_space<vmem>>, vector<1x1x128x128xbf16>
    %193 = vector.shape_cast %192 : vector<1x1x128x128xbf16> to vector<128x128xbf16>
    %cst_171 = arith.constant dense<0.000000e+00> : vector<256x128xf32>
    %194 = tpu.matmul %191, %193, %cst_171 {dimension_numbers = #tpu.dot_dimension_numbers<[1], [0], [0], [1], [0, 0, 1, 1], [], []>} : vector<256x128xbf16>, vector<128x128xbf16>, vector<256x128xf32> -> vector<256x128xf32>
    %195 = arith.addf %188, %194 : vector<256x128xf32>
    %c1_172 = arith.constant 1 : index
    %c0_173 = arith.constant 0 : index
    %c0_174 = arith.constant 0 : index
    %c0_175 = arith.constant 0 : index
    %196 = vector.load %arg7[%c1_172, %c0_173, %c0_174, %c0_175] : memref<3x18x16x128xbf16, #tpu.memory_space<vmem>>, vector<1x16x16x128xbf16>
    %197 = vector.shape_cast %196 : vector<1x16x16x128xbf16> to vector<16x16x128xbf16>
    %198 = vector.shape_cast %197 : vector<16x16x128xbf16> to vector<256x128xbf16>
    %c1_176 = arith.constant 1 : index
    %c1_177 = arith.constant 1 : index
    %c0_178 = arith.constant 0 : index
    %c0_179 = arith.constant 0 : index
    %199 = vector.load %arg4[%c1_176, %c1_177, %c0_178, %c0_179] : memref<3x9x128x128xbf16, #tpu.memory_space<vmem>>, vector<1x1x128x128xbf16>
    %200 = vector.shape_cast %199 : vector<1x1x128x128xbf16> to vector<128x128xbf16>
    %cst_180 = arith.constant dense<0.000000e+00> : vector<256x128xf32>
    %201 = tpu.matmul %198, %200, %cst_180 {dimension_numbers = #tpu.dot_dimension_numbers<[1], [0], [0], [1], [0, 0, 1, 1], [], []>} : vector<256x128xbf16>, vector<128x128xbf16>, vector<256x128xf32> -> vector<256x128xf32>
    %202 = arith.addf %195, %201 : vector<256x128xf32>
    %c2_181 = arith.constant 2 : index
    %c0_182 = arith.constant 0 : index
    %c0_183 = arith.constant 0 : index
    %c0_184 = arith.constant 0 : index
    %203 = vector.load %arg7[%c2_181, %c0_182, %c0_183, %c0_184] : memref<3x18x16x128xbf16, #tpu.memory_space<vmem>>, vector<1x16x16x128xbf16>
    %204 = vector.shape_cast %203 : vector<1x16x16x128xbf16> to vector<16x16x128xbf16>
    %205 = vector.shape_cast %204 : vector<16x16x128xbf16> to vector<256x128xbf16>
    %c1_185 = arith.constant 1 : index
    %c2_186 = arith.constant 2 : index
    %c0_187 = arith.constant 0 : index
    %c0_188 = arith.constant 0 : index
    %206 = vector.load %arg4[%c1_185, %c2_186, %c0_187, %c0_188] : memref<3x9x128x128xbf16, #tpu.memory_space<vmem>>, vector<1x1x128x128xbf16>
    %207 = vector.shape_cast %206 : vector<1x1x128x128xbf16> to vector<128x128xbf16>
    %cst_189 = arith.constant dense<0.000000e+00> : vector<256x128xf32>
    %208 = tpu.matmul %205, %207, %cst_189 {dimension_numbers = #tpu.dot_dimension_numbers<[1], [0], [0], [1], [0, 0, 1, 1], [], []>} : vector<256x128xbf16>, vector<128x128xbf16>, vector<256x128xf32> -> vector<256x128xf32>
    %209 = arith.addf %202, %208 : vector<256x128xf32>
    %c0_190 = arith.constant 0 : index
    %c1_191 = arith.constant 1 : index
    %c0_192 = arith.constant 0 : index
    %c0_193 = arith.constant 0 : index
    %210 = vector.load %arg7[%c0_190, %c1_191, %c0_192, %c0_193] : memref<3x18x16x128xbf16, #tpu.memory_space<vmem>>, vector<1x16x16x128xbf16>
    %211 = vector.shape_cast %210 : vector<1x16x16x128xbf16> to vector<16x16x128xbf16>
    %212 = vector.shape_cast %211 : vector<16x16x128xbf16> to vector<256x128xbf16>
    %c1_194 = arith.constant 1 : index
    %c3_195 = arith.constant 3 : index
    %c0_196 = arith.constant 0 : index
    %c0_197 = arith.constant 0 : index
    %213 = vector.load %arg4[%c1_194, %c3_195, %c0_196, %c0_197] : memref<3x9x128x128xbf16, #tpu.memory_space<vmem>>, vector<1x1x128x128xbf16>
    %214 = vector.shape_cast %213 : vector<1x1x128x128xbf16> to vector<128x128xbf16>
    %cst_198 = arith.constant dense<0.000000e+00> : vector<256x128xf32>
    %215 = tpu.matmul %212, %214, %cst_198 {dimension_numbers = #tpu.dot_dimension_numbers<[1], [0], [0], [1], [0, 0, 1, 1], [], []>} : vector<256x128xbf16>, vector<128x128xbf16>, vector<256x128xf32> -> vector<256x128xf32>
    %216 = arith.addf %209, %215 : vector<256x128xf32>
    %c1_199 = arith.constant 1 : index
    %c1_200 = arith.constant 1 : index
    %c0_201 = arith.constant 0 : index
    %c0_202 = arith.constant 0 : index
    %217 = vector.load %arg7[%c1_199, %c1_200, %c0_201, %c0_202] : memref<3x18x16x128xbf16, #tpu.memory_space<vmem>>, vector<1x16x16x128xbf16>
    %218 = vector.shape_cast %217 : vector<1x16x16x128xbf16> to vector<16x16x128xbf16>
    %219 = vector.shape_cast %218 : vector<16x16x128xbf16> to vector<256x128xbf16>
    %c1_203 = arith.constant 1 : index
    %c4_204 = arith.constant 4 : index
    %c0_205 = arith.constant 0 : index
    %c0_206 = arith.constant 0 : index
    %220 = vector.load %arg4[%c1_203, %c4_204, %c0_205, %c0_206] : memref<3x9x128x128xbf16, #tpu.memory_space<vmem>>, vector<1x1x128x128xbf16>
    %221 = vector.shape_cast %220 : vector<1x1x128x128xbf16> to vector<128x128xbf16>
    %cst_207 = arith.constant dense<0.000000e+00> : vector<256x128xf32>
    %222 = tpu.matmul %219, %221, %cst_207 {dimension_numbers = #tpu.dot_dimension_numbers<[1], [0], [0], [1], [0, 0, 1, 1], [], []>} : vector<256x128xbf16>, vector<128x128xbf16>, vector<256x128xf32> -> vector<256x128xf32>
    %223 = arith.addf %216, %222 : vector<256x128xf32>
    %c2_208 = arith.constant 2 : index
    %c1_209 = arith.constant 1 : index
    %c0_210 = arith.constant 0 : index
    %c0_211 = arith.constant 0 : index
    %224 = vector.load %arg7[%c2_208, %c1_209, %c0_210, %c0_211] : memref<3x18x16x128xbf16, #tpu.memory_space<vmem>>, vector<1x16x16x128xbf16>
    %225 = vector.shape_cast %224 : vector<1x16x16x128xbf16> to vector<16x16x128xbf16>
    %226 = vector.shape_cast %225 : vector<16x16x128xbf16> to vector<256x128xbf16>
    %c1_212 = arith.constant 1 : index
    %c5_213 = arith.constant 5 : index
    %c0_214 = arith.constant 0 : index
    %c0_215 = arith.constant 0 : index
    %227 = vector.load %arg4[%c1_212, %c5_213, %c0_214, %c0_215] : memref<3x9x128x128xbf16, #tpu.memory_space<vmem>>, vector<1x1x128x128xbf16>
    %228 = vector.shape_cast %227 : vector<1x1x128x128xbf16> to vector<128x128xbf16>
    %cst_216 = arith.constant dense<0.000000e+00> : vector<256x128xf32>
    %229 = tpu.matmul %226, %228, %cst_216 {dimension_numbers = #tpu.dot_dimension_numbers<[1], [0], [0], [1], [0, 0, 1, 1], [], []>} : vector<256x128xbf16>, vector<128x128xbf16>, vector<256x128xf32> -> vector<256x128xf32>
    %230 = arith.addf %223, %229 : vector<256x128xf32>
    %c0_217 = arith.constant 0 : index
    %c2_218 = arith.constant 2 : index
    %c0_219 = arith.constant 0 : index
    %c0_220 = arith.constant 0 : index
    %231 = vector.load %arg7[%c0_217, %c2_218, %c0_219, %c0_220] : memref<3x18x16x128xbf16, #tpu.memory_space<vmem>>, vector<1x16x16x128xbf16>
    %232 = vector.shape_cast %231 : vector<1x16x16x128xbf16> to vector<16x16x128xbf16>
    %233 = vector.shape_cast %232 : vector<16x16x128xbf16> to vector<256x128xbf16>
    %c1_221 = arith.constant 1 : index
    %c6_222 = arith.constant 6 : index
    %c0_223 = arith.constant 0 : index
    %c0_224 = arith.constant 0 : index
    %234 = vector.load %arg4[%c1_221, %c6_222, %c0_223, %c0_224] : memref<3x9x128x128xbf16, #tpu.memory_space<vmem>>, vector<1x1x128x128xbf16>
    %235 = vector.shape_cast %234 : vector<1x1x128x128xbf16> to vector<128x128xbf16>
    %cst_225 = arith.constant dense<0.000000e+00> : vector<256x128xf32>
    %236 = tpu.matmul %233, %235, %cst_225 {dimension_numbers = #tpu.dot_dimension_numbers<[1], [0], [0], [1], [0, 0, 1, 1], [], []>} : vector<256x128xbf16>, vector<128x128xbf16>, vector<256x128xf32> -> vector<256x128xf32>
    %237 = arith.addf %230, %236 : vector<256x128xf32>
    %c1_226 = arith.constant 1 : index
    %c2_227 = arith.constant 2 : index
    %c0_228 = arith.constant 0 : index
    %c0_229 = arith.constant 0 : index
    %238 = vector.load %arg7[%c1_226, %c2_227, %c0_228, %c0_229] : memref<3x18x16x128xbf16, #tpu.memory_space<vmem>>, vector<1x16x16x128xbf16>
    %239 = vector.shape_cast %238 : vector<1x16x16x128xbf16> to vector<16x16x128xbf16>
    %240 = vector.shape_cast %239 : vector<16x16x128xbf16> to vector<256x128xbf16>
    %c1_230 = arith.constant 1 : index
    %c7_231 = arith.constant 7 : index
    %c0_232 = arith.constant 0 : index
    %c0_233 = arith.constant 0 : index
    %241 = vector.load %arg4[%c1_230, %c7_231, %c0_232, %c0_233] : memref<3x9x128x128xbf16, #tpu.memory_space<vmem>>, vector<1x1x128x128xbf16>
    %242 = vector.shape_cast %241 : vector<1x1x128x128xbf16> to vector<128x128xbf16>
    %cst_234 = arith.constant dense<0.000000e+00> : vector<256x128xf32>
    %243 = tpu.matmul %240, %242, %cst_234 {dimension_numbers = #tpu.dot_dimension_numbers<[1], [0], [0], [1], [0, 0, 1, 1], [], []>} : vector<256x128xbf16>, vector<128x128xbf16>, vector<256x128xf32> -> vector<256x128xf32>
    %244 = arith.addf %237, %243 : vector<256x128xf32>
    %c2_235 = arith.constant 2 : index
    %c2_236 = arith.constant 2 : index
    %c0_237 = arith.constant 0 : index
    %c0_238 = arith.constant 0 : index
    %245 = vector.load %arg7[%c2_235, %c2_236, %c0_237, %c0_238] : memref<3x18x16x128xbf16, #tpu.memory_space<vmem>>, vector<1x16x16x128xbf16>
    %246 = vector.shape_cast %245 : vector<1x16x16x128xbf16> to vector<16x16x128xbf16>
    %247 = vector.shape_cast %246 : vector<16x16x128xbf16> to vector<256x128xbf16>
    %c1_239 = arith.constant 1 : index
    %c8_240 = arith.constant 8 : index
    %c0_241 = arith.constant 0 : index
    %c0_242 = arith.constant 0 : index
    %248 = vector.load %arg4[%c1_239, %c8_240, %c0_241, %c0_242] : memref<3x9x128x128xbf16, #tpu.memory_space<vmem>>, vector<1x1x128x128xbf16>
    %249 = vector.shape_cast %248 : vector<1x1x128x128xbf16> to vector<128x128xbf16>
    %cst_243 = arith.constant dense<0.000000e+00> : vector<256x128xf32>
    %250 = tpu.matmul %247, %249, %cst_243 {dimension_numbers = #tpu.dot_dimension_numbers<[1], [0], [0], [1], [0, 0, 1, 1], [], []>} : vector<256x128xbf16>, vector<128x128xbf16>, vector<256x128xf32> -> vector<256x128xf32>
    %251 = arith.addf %244, %250 : vector<256x128xf32>
    %cst_244 = arith.constant 0.000000e+00 : f32
    %252 = vector.broadcast %cst_244 : f32 to vector<256x128xf32>
    %253 = arith.maximumf %251, %252 : vector<256x128xf32>
    %c0_245 = arith.constant 0 : index
    %c0_246 = arith.constant 0 : index
    %c0_247 = arith.constant 0 : index
    %254 = vector.load %arg6[%c0_245, %c0_246, %c0_247] : memref<1x256x128xf32, #tpu.memory_space<vmem>>, vector<1x256x128xf32>
    %255 = vector.shape_cast %254 : vector<1x256x128xf32> to vector<256x128xf32>
    %256 = arith.addf %255, %253 : vector<256x128xf32>
    %c0_248 = arith.constant 0 : index
    %c0_249 = arith.constant 0 : index
    %c0_250 = arith.constant 0 : index
    %257 = vector.load %arg6[%c0_248, %c0_249, %c0_250] : memref<1x256x128xf32, #tpu.memory_space<vmem>>, vector<1x256x128xf32>
    %258 = vector.shape_cast %257 : vector<1x256x128xf32> to vector<256x128xf32>
    %259 = vector.shape_cast %256 : vector<256x128xf32> to vector<1x256x128xf32>
    tpu.vector_store %arg6[%c0_248, %c0_249, %c0_250], %259 {strides = array<i32>} : memref<1x256x128xf32, #tpu.memory_space<vmem>>, vector<1x256x128xf32>,
    %c0_251 = arith.constant 0 : index
    %c0_252 = arith.constant 0 : index
    %260 = vector.load %arg8[%c0_251, %c0_252] : memref<256x128xbf16, #tpu.memory_space<vmem>>, vector<256x128xbf16>
    %261 = arith.truncf %253 : vector<256x128xf32> to vector<256x128xbf16>
    %262 = arith.addf %260, %261 : vector<256x128xbf16>
    %c0_253 = arith.constant 0 : index
    %c0_254 = arith.constant 0 : index
    %263 = vector.load %arg8[%c0_253, %c0_254] : memref<256x128xbf16, #tpu.memory_space<vmem>>, vector<256x128xbf16>
    tpu.vector_store %arg8[%c0_253, %c0_254], %262 {strides = array<i32>} : memref<256x128xbf16, #tpu.memory_space<vmem>>, vector<256x128xbf16>,
    %c0_255 = arith.constant 0 : index
    %c0_256 = arith.constant 0 : index
    %264 = vector.load %arg8[%c0_255, %c0_256] : memref<256x128xbf16, #tpu.memory_space<vmem>>, vector<256x128xbf16>
    %c2_257 = arith.constant 2 : index
    %c0_258 = arith.constant 0 : index
    %c0_259 = arith.constant 0 : index
    %265 = vector.load %arg2[%c2_257, %c0_258, %c0_259] : memref<3x128x128xbf16, #tpu.memory_space<vmem>>, vector<1x128x128xbf16>
    %266 = vector.shape_cast %265 : vector<1x128x128xbf16> to vector<128x128xbf16>
    %cst_260 = arith.constant dense<0.000000e+00> : vector<256x128xf32>
    %267 = tpu.matmul %264, %266, %cst_260 {dimension_numbers = #tpu.dot_dimension_numbers<[1], [0], [0], [1], [0, 0, 1, 1], [], []>} : vector<256x128xbf16>, vector<128x128xbf16>, vector<256x128xf32> -> vector<256x128xf32>
    %c2_261 = arith.constant 2 : index
    %c0_262 = arith.constant 0 : index
    %c0_263 = arith.constant 0 : index
    %268 = vector.load %arg3[%c2_261, %c0_262, %c0_263] : memref<3x1x128xf32, #tpu.memory_space<vmem>>, vector<1x1x128xf32>
    %269 = vector.shape_cast %268 : vector<1x1x128xf32> to vector<1x128xf32>
    %270 = vector.broadcast %269 : vector<1x128xf32> to vector<256x128xf32>
    %271 = arith.addf %267, %270 : vector<256x128xf32>
    %cst_264 = arith.constant 0.000000e+00 : f32
    %272 = vector.broadcast %cst_264 : f32 to vector<256x128xf32>
    %273 = arith.maximumf %271, %272 : vector<256x128xf32>
    %c1_i32_265 = arith.constant 1 : i32
    %274 = tpu.dynamic_rotate %273 by %c1_i32_265 dim 0 : vector<256x128xf32>, i32 -> vector<256x128xf32>
    %cst_266 = arith.constant 0.000000e+00 : f32
    %275 = vector.shape_cast %18 : vector<256x1xi1> to vector<256x1xi1>
    %276 = vector.broadcast %275 : vector<256x1xi1> to vector<256x128xi1>
    %277 = vector.broadcast %cst_266 : f32 to vector<256x128xf32>
    %278 = arith.select %276, %274, %277 : vector<256x128xi1>, vector<256x128xf32>
    %c255_i32_267 = arith.constant 255 : i32
    %279 = tpu.dynamic_rotate %273 by %c255_i32_267 dim 0 : vector<256x128xf32>, i32 -> vector<256x128xf32>
    %cst_268 = arith.constant 0.000000e+00 : f32
    %280 = vector.shape_cast %20 : vector<256x1xi1> to vector<256x1xi1>
    %281 = vector.broadcast %280 : vector<256x1xi1> to vector<256x128xi1>
    %282 = vector.broadcast %cst_268 : f32 to vector<256x128xf32>
    %283 = arith.select %281, %279, %282 : vector<256x128xi1>, vector<256x128xf32>
    %284 = arith.truncf %278 : vector<256x128xf32> to vector<256x128xbf16>
    %285 = vector.shape_cast %284 : vector<256x128xbf16> to vector<16x16x128xbf16>
    %c0_269 = arith.constant 0 : index
    %c1_270 = arith.constant 1 : index
    %c0_271 = arith.constant 0 : index
    %c0_272 = arith.constant 0 : index
    %286 = vector.load %arg7[%c0_269, %c1_270, %c0_271, %c0_272] : memref<3x18x16x128xbf16, #tpu.memory_space<vmem>>, vector<1x16x16x128xbf16>
    %287 = vector.shape_cast %286 : vector<1x16x16x128xbf16> to vector<16x16x128xbf16>
    %288 = vector.shape_cast %285 : vector<16x16x128xbf16> to vector<1x16x16x128xbf16>
    tpu.vector_store %arg7[%c0_269, %c1_270, %c0_271, %c0_272], %288 {strides = array<i32>} : memref<3x18x16x128xbf16, #tpu.memory_space<vmem>>, vector<1x16x16x128xbf16>,
    %289 = arith.truncf %273 : vector<256x128xf32> to vector<256x128xbf16>
    %290 = vector.shape_cast %289 : vector<256x128xbf16> to vector<16x16x128xbf16>
    %c1_273 = arith.constant 1 : index
    %c1_274 = arith.constant 1 : index
    %c0_275 = arith.constant 0 : index
    %c0_276 = arith.constant 0 : index
    %291 = vector.load %arg7[%c1_273, %c1_274, %c0_275, %c0_276] : memref<3x18x16x128xbf16, #tpu.memory_space<vmem>>, vector<1x16x16x128xbf16>
    %292 = vector.shape_cast %291 : vector<1x16x16x128xbf16> to vector<16x16x128xbf16>
    %293 = vector.shape_cast %290 : vector<16x16x128xbf16> to vector<1x16x16x128xbf16>
    tpu.vector_store %arg7[%c1_273, %c1_274, %c0_275, %c0_276], %293 {strides = array<i32>} : memref<3x18x16x128xbf16, #tpu.memory_space<vmem>>, vector<1x16x16x128xbf16>,
    %294 = arith.truncf %283 : vector<256x128xf32> to vector<256x128xbf16>
    %295 = vector.shape_cast %294 : vector<256x128xbf16> to vector<16x16x128xbf16>
    %c2_277 = arith.constant 2 : index
    %c1_278 = arith.constant 1 : index
    %c0_279 = arith.constant 0 : index
    %c0_280 = arith.constant 0 : index
    %296 = vector.load %arg7[%c2_277, %c1_278, %c0_279, %c0_280] : memref<3x18x16x128xbf16, #tpu.memory_space<vmem>>, vector<1x16x16x128xbf16>
    %297 = vector.shape_cast %296 : vector<1x16x16x128xbf16> to vector<16x16x128xbf16>
    %298 = vector.shape_cast %295 : vector<16x16x128xbf16> to vector<1x16x16x128xbf16>
    tpu.vector_store %arg7[%c2_277, %c1_278, %c0_279, %c0_280], %298 {strides = array<i32>} : memref<3x18x16x128xbf16, #tpu.memory_space<vmem>>, vector<1x16x16x128xbf16>,
    %c2_281 = arith.constant 2 : index
    %c0_282 = arith.constant 0 : index
    %c0_283 = arith.constant 0 : index
    %299 = vector.load %arg5[%c2_281, %c0_282, %c0_283] : memref<3x1x128xf32, #tpu.memory_space<vmem>>, vector<1x1x128xf32>
    %300 = vector.shape_cast %299 : vector<1x1x128xf32> to vector<1x128xf32>
    %301 = vector.shape_cast %300 : vector<1x128xf32> to vector<1x128xf32>
    %302 = vector.broadcast %301 : vector<1x128xf32> to vector<256x128xf32>
    %c0_284 = arith.constant 0 : index
    %c0_285 = arith.constant 0 : index
    %c0_286 = arith.constant 0 : index
    %c0_287 = arith.constant 0 : index
    %303 = vector.load %arg7[%c0_284, %c0_285, %c0_286, %c0_287] : memref<3x18x16x128xbf16, #tpu.memory_space<vmem>>, vector<1x16x16x128xbf16>
    %304 = vector.shape_cast %303 : vector<1x16x16x128xbf16> to vector<16x16x128xbf16>
    %305 = vector.shape_cast %304 : vector<16x16x128xbf16> to vector<256x128xbf16>
    %c2_288 = arith.constant 2 : index
    %c0_289 = arith.constant 0 : index
    %c0_290 = arith.constant 0 : index
    %c0_291 = arith.constant 0 : index
    %306 = vector.load %arg4[%c2_288, %c0_289, %c0_290, %c0_291] : memref<3x9x128x128xbf16, #tpu.memory_space<vmem>>, vector<1x1x128x128xbf16>
    %307 = vector.shape_cast %306 : vector<1x1x128x128xbf16> to vector<128x128xbf16>
    %cst_292 = arith.constant dense<0.000000e+00> : vector<256x128xf32>
    %308 = tpu.matmul %305, %307, %cst_292 {dimension_numbers = #tpu.dot_dimension_numbers<[1], [0], [0], [1], [0, 0, 1, 1], [], []>} : vector<256x128xbf16>, vector<128x128xbf16>, vector<256x128xf32> -> vector<256x128xf32>
    %309 = arith.addf %302, %308 : vector<256x128xf32>
    %c1_293 = arith.constant 1 : index
    %c0_294 = arith.constant 0 : index
    %c0_295 = arith.constant 0 : index
    %c0_296 = arith.constant 0 : index
    %310 = vector.load %arg7[%c1_293, %c0_294, %c0_295, %c0_296] : memref<3x18x16x128xbf16, #tpu.memory_space<vmem>>, vector<1x16x16x128xbf16>
    %311 = vector.shape_cast %310 : vector<1x16x16x128xbf16> to vector<16x16x128xbf16>
    %312 = vector.shape_cast %311 : vector<16x16x128xbf16> to vector<256x128xbf16>
    %c2_297 = arith.constant 2 : index
    %c1_298 = arith.constant 1 : index
    %c0_299 = arith.constant 0 : index
    %c0_300 = arith.constant 0 : index
    %313 = vector.load %arg4[%c2_297, %c1_298, %c0_299, %c0_300] : memref<3x9x128x128xbf16, #tpu.memory_space<vmem>>, vector<1x1x128x128xbf16>
    %314 = vector.shape_cast %313 : vector<1x1x128x128xbf16> to vector<128x128xbf16>
    %cst_301 = arith.constant dense<0.000000e+00> : vector<256x128xf32>
    %315 = tpu.matmul %312, %314, %cst_301 {dimension_numbers = #tpu.dot_dimension_numbers<[1], [0], [0], [1], [0, 0, 1, 1], [], []>} : vector<256x128xbf16>, vector<128x128xbf16>, vector<256x128xf32> -> vector<256x128xf32>
    %316 = arith.addf %309, %315 : vector<256x128xf32>
    %c2_302 = arith.constant 2 : index
    %c0_303 = arith.constant 0 : index
    %c0_304 = arith.constant 0 : index
    %c0_305 = arith.constant 0 : index
    %317 = vector.load %arg7[%c2_302, %c0_303, %c0_304, %c0_305] : memref<3x18x16x128xbf16, #tpu.memory_space<vmem>>, vector<1x16x16x128xbf16>
    %318 = vector.shape_cast %317 : vector<1x16x16x128xbf16> to vector<16x16x128xbf16>
    %319 = vector.shape_cast %318 : vector<16x16x128xbf16> to vector<256x128xbf16>
    %c2_306 = arith.constant 2 : index
    %c2_307 = arith.constant 2 : index
    %c0_308 = arith.constant 0 : index
    %c0_309 = arith.constant 0 : index
    %320 = vector.load %arg4[%c2_306, %c2_307, %c0_308, %c0_309] : memref<3x9x128x128xbf16, #tpu.memory_space<vmem>>, vector<1x1x128x128xbf16>
    %321 = vector.shape_cast %320 : vector<1x1x128x128xbf16> to vector<128x128xbf16>
    %cst_310 = arith.constant dense<0.000000e+00> : vector<256x128xf32>
    %322 = tpu.matmul %319, %321, %cst_310 {dimension_numbers = #tpu.dot_dimension_numbers<[1], [0], [0], [1], [0, 0, 1, 1], [], []>} : vector<256x128xbf16>, vector<128x128xbf16>, vector<256x128xf32> -> vector<256x128xf32>
    %323 = arith.addf %316, %322 : vector<256x128xf32>
    %c0_311 = arith.constant 0 : index
    %c1_312 = arith.constant 1 : index
    %c0_313 = arith.constant 0 : index
    %c0_314 = arith.constant 0 : index
    %324 = vector.load %arg7[%c0_311, %c1_312, %c0_313, %c0_314] : memref<3x18x16x128xbf16, #tpu.memory_space<vmem>>, vector<1x16x16x128xbf16>
    %325 = vector.shape_cast %324 : vector<1x16x16x128xbf16> to vector<16x16x128xbf16>
    %326 = vector.shape_cast %325 : vector<16x16x128xbf16> to vector<256x128xbf16>
    %c2_315 = arith.constant 2 : index
    %c3_316 = arith.constant 3 : index
    %c0_317 = arith.constant 0 : index
    %c0_318 = arith.constant 0 : index
    %327 = vector.load %arg4[%c2_315, %c3_316, %c0_317, %c0_318] : memref<3x9x128x128xbf16, #tpu.memory_space<vmem>>, vector<1x1x128x128xbf16>
    %328 = vector.shape_cast %327 : vector<1x1x128x128xbf16> to vector<128x128xbf16>
    %cst_319 = arith.constant dense<0.000000e+00> : vector<256x128xf32>
    %329 = tpu.matmul %326, %328, %cst_319 {dimension_numbers = #tpu.dot_dimension_numbers<[1], [0], [0], [1], [0, 0, 1, 1], [], []>} : vector<256x128xbf16>, vector<128x128xbf16>, vector<256x128xf32> -> vector<256x128xf32>
    %330 = arith.addf %323, %329 : vector<256x128xf32>
    %c1_320 = arith.constant 1 : index
    %c1_321 = arith.constant 1 : index
    %c0_322 = arith.constant 0 : index
    %c0_323 = arith.constant 0 : index
    %331 = vector.load %arg7[%c1_320, %c1_321, %c0_322, %c0_323] : memref<3x18x16x128xbf16, #tpu.memory_space<vmem>>, vector<1x16x16x128xbf16>
    %332 = vector.shape_cast %331 : vector<1x16x16x128xbf16> to vector<16x16x128xbf16>
    %333 = vector.shape_cast %332 : vector<16x16x128xbf16> to vector<256x128xbf16>
    %c2_324 = arith.constant 2 : index
    %c4_325 = arith.constant 4 : index
    %c0_326 = arith.constant 0 : index
    %c0_327 = arith.constant 0 : index
    %334 = vector.load %arg4[%c2_324, %c4_325, %c0_326, %c0_327] : memref<3x9x128x128xbf16, #tpu.memory_space<vmem>>, vector<1x1x128x128xbf16>
    %335 = vector.shape_cast %334 : vector<1x1x128x128xbf16> to vector<128x128xbf16>
    %cst_328 = arith.constant dense<0.000000e+00> : vector<256x128xf32>
    %336 = tpu.matmul %333, %335, %cst_328 {dimension_numbers = #tpu.dot_dimension_numbers<[1], [0], [0], [1], [0, 0, 1, 1], [], []>} : vector<256x128xbf16>, vector<128x128xbf16>, vector<256x128xf32> -> vector<256x128xf32>
    %337 = arith.addf %330, %336 : vector<256x128xf32>
    %c2_329 = arith.constant 2 : index
    %c1_330 = arith.constant 1 : index
    %c0_331 = arith.constant 0 : index
    %c0_332 = arith.constant 0 : index
    %338 = vector.load %arg7[%c2_329, %c1_330, %c0_331, %c0_332] : memref<3x18x16x128xbf16, #tpu.memory_space<vmem>>, vector<1x16x16x128xbf16>
    %339 = vector.shape_cast %338 : vector<1x16x16x128xbf16> to vector<16x16x128xbf16>
    %340 = vector.shape_cast %339 : vector<16x16x128xbf16> to vector<256x128xbf16>
    %c2_333 = arith.constant 2 : index
    %c5_334 = arith.constant 5 : index
    %c0_335 = arith.constant 0 : index
    %c0_336 = arith.constant 0 : index
    %341 = vector.load %arg4[%c2_333, %c5_334, %c0_335, %c0_336] : memref<3x9x128x128xbf16, #tpu.memory_space<vmem>>, vector<1x1x128x128xbf16>
    %342 = vector.shape_cast %341 : vector<1x1x128x128xbf16> to vector<128x128xbf16>
    %cst_337 = arith.constant dense<0.000000e+00> : vector<256x128xf32>
    %343 = tpu.matmul %340, %342, %cst_337 {dimension_numbers = #tpu.dot_dimension_numbers<[1], [0], [0], [1], [0, 0, 1, 1], [], []>} : vector<256x128xbf16>, vector<128x128xbf16>, vector<256x128xf32> -> vector<256x128xf32>
    %344 = arith.addf %337, %343 : vector<256x128xf32>
    %c0_338 = arith.constant 0 : index
    %c2_339 = arith.constant 2 : index
    %c0_340 = arith.constant 0 : index
    %c0_341 = arith.constant 0 : index
    %345 = vector.load %arg7[%c0_338, %c2_339, %c0_340, %c0_341] : memref<3x18x16x128xbf16, #tpu.memory_space<vmem>>, vector<1x16x16x128xbf16>
    %346 = vector.shape_cast %345 : vector<1x16x16x128xbf16> to vector<16x16x128xbf16>
    %347 = vector.shape_cast %346 : vector<16x16x128xbf16> to vector<256x128xbf16>
    %c2_342 = arith.constant 2 : index
    %c6_343 = arith.constant 6 : index
    %c0_344 = arith.constant 0 : index
    %c0_345 = arith.constant 0 : index
    %348 = vector.load %arg4[%c2_342, %c6_343, %c0_344, %c0_345] : memref<3x9x128x128xbf16, #tpu.memory_space<vmem>>, vector<1x1x128x128xbf16>
    %349 = vector.shape_cast %348 : vector<1x1x128x128xbf16> to vector<128x128xbf16>
    %cst_346 = arith.constant dense<0.000000e+00> : vector<256x128xf32>
    %350 = tpu.matmul %347, %349, %cst_346 {dimension_numbers = #tpu.dot_dimension_numbers<[1], [0], [0], [1], [0, 0, 1, 1], [], []>} : vector<256x128xbf16>, vector<128x128xbf16>, vector<256x128xf32> -> vector<256x128xf32>
    %351 = arith.addf %344, %350 : vector<256x128xf32>
    %c1_347 = arith.constant 1 : index
    %c2_348 = arith.constant 2 : index
    %c0_349 = arith.constant 0 : index
    %c0_350 = arith.constant 0 : index
    %352 = vector.load %arg7[%c1_347, %c2_348, %c0_349, %c0_350] : memref<3x18x16x128xbf16, #tpu.memory_space<vmem>>, vector<1x16x16x128xbf16>
    %353 = vector.shape_cast %352 : vector<1x16x16x128xbf16> to vector<16x16x128xbf16>
    %354 = vector.shape_cast %353 : vector<16x16x128xbf16> to vector<256x128xbf16>
    %c2_351 = arith.constant 2 : index
    %c7_352 = arith.constant 7 : index
    %c0_353 = arith.constant 0 : index
    %c0_354 = arith.constant 0 : index
    %355 = vector.load %arg4[%c2_351, %c7_352, %c0_353, %c0_354] : memref<3x9x128x128xbf16, #tpu.memory_space<vmem>>, vector<1x1x128x128xbf16>
    %356 = vector.shape_cast %355 : vector<1x1x128x128xbf16> to vector<128x128xbf16>
    %cst_355 = arith.constant dense<0.000000e+00> : vector<256x128xf32>
    %357 = tpu.matmul %354, %356, %cst_355 {dimension_numbers = #tpu.dot_dimension_numbers<[1], [0], [0], [1], [0, 0, 1, 1], [], []>} : vector<256x128xbf16>, vector<128x128xbf16>, vector<256x128xf32> -> vector<256x128xf32>
    %358 = arith.addf %351, %357 : vector<256x128xf32>
    %c2_356 = arith.constant 2 : index
    %c2_357 = arith.constant 2 : index
    %c0_358 = arith.constant 0 : index
    %c0_359 = arith.constant 0 : index
    %359 = vector.load %arg7[%c2_356, %c2_357, %c0_358, %c0_359] : memref<3x18x16x128xbf16, #tpu.memory_space<vmem>>, vector<1x16x16x128xbf16>
    %360 = vector.shape_cast %359 : vector<1x16x16x128xbf16> to vector<16x16x128xbf16>
    %361 = vector.shape_cast %360 : vector<16x16x128xbf16> to vector<256x128xbf16>
    %c2_360 = arith.constant 2 : index
    %c8_361 = arith.constant 8 : index
    %c0_362 = arith.constant 0 : index
    %c0_363 = arith.constant 0 : index
    %362 = vector.load %arg4[%c2_360, %c8_361, %c0_362, %c0_363] : memref<3x9x128x128xbf16, #tpu.memory_space<vmem>>, vector<1x1x128x128xbf16>
    %363 = vector.shape_cast %362 : vector<1x1x128x128xbf16> to vector<128x128xbf16>
    %cst_364 = arith.constant dense<0.000000e+00> : vector<256x128xf32>
    %364 = tpu.matmul %361, %363, %cst_364 {dimension_numbers = #tpu.dot_dimension_numbers<[1], [0], [0], [1], [0, 0, 1, 1], [], []>} : vector<256x128xbf16>, vector<128x128xbf16>, vector<256x128xf32> -> vector<256x128xf32>
    %365 = arith.addf %358, %364 : vector<256x128xf32>
    %cst_365 = arith.constant 0.000000e+00 : f32
    %366 = vector.broadcast %cst_365 : f32 to vector<256x128xf32>
    %367 = arith.maximumf %365, %366 : vector<256x128xf32>
    %c0_366 = arith.constant 0 : index
    %c0_367 = arith.constant 0 : index
    %c0_368 = arith.constant 0 : index
    %368 = vector.load %arg6[%c0_366, %c0_367, %c0_368] : memref<1x256x128xf32, #tpu.memory_space<vmem>>, vector<1x256x128xf32>
    %369 = vector.shape_cast %368 : vector<1x256x128xf32> to vector<256x128xf32>
    %370 = arith.addf %369, %367 : vector<256x128xf32>
    %c0_369 = arith.constant 0 : index
    %c0_370 = arith.constant 0 : index
    %c0_371 = arith.constant 0 : index
    %371 = vector.load %arg6[%c0_369, %c0_370, %c0_371] : memref<1x256x128xf32, #tpu.memory_space<vmem>>, vector<1x256x128xf32>
    %372 = vector.shape_cast %371 : vector<1x256x128xf32> to vector<256x128xf32>
    %373 = vector.shape_cast %370 : vector<256x128xf32> to vector<1x256x128xf32>
    tpu.vector_store %arg6[%c0_369, %c0_370, %c0_371], %373 {strides = array<i32>} : memref<1x256x128xf32, #tpu.memory_space<vmem>>, vector<1x256x128xf32>,
    return
  }
  func.func @transform_0(%arg0: i32) -> (i32, i32, i32) {
    %c0_i32 = arith.constant 0 : i32
    %c0_i32_0 = arith.constant 0 : i32
    %c0_i32_1 = arith.constant 0 : i32
    return %arg0, %c0_i32, %c0_i32_0 : i32, i32, i32
  }
  func.func @transform_1(%arg0: i32) -> (i32, i32, i32) {
    %c0_i32 = arith.constant 0 : i32
    %c0_i32_0 = arith.constant 0 : i32
    %c0_i32_1 = arith.constant 0 : i32
    %c0_i32_2 = arith.constant 0 : i32
    return %c0_i32, %c0_i32_0, %c0_i32_1 : i32, i32, i32
  }
  func.func @transform_2(%arg0: i32) -> (i32, i32, i32) {
    %c0_i32 = arith.constant 0 : i32
    %c0_i32_0 = arith.constant 0 : i32
    %c0_i32_1 = arith.constant 0 : i32
    %c0_i32_2 = arith.constant 0 : i32
    return %c0_i32, %c0_i32_0, %c0_i32_1 : i32, i32, i32
  }
  func.func @transform_3(%arg0: i32) -> (i32, i32, i32, i32) {
    %c0_i32 = arith.constant 0 : i32
    %c0_i32_0 = arith.constant 0 : i32
    %c0_i32_1 = arith.constant 0 : i32
    %c0_i32_2 = arith.constant 0 : i32
    %c0_i32_3 = arith.constant 0 : i32
    return %c0_i32, %c0_i32_0, %c0_i32_1, %c0_i32_2 : i32, i32, i32, i32
  }
  func.func @transform_4(%arg0: i32) -> (i32, i32, i32) {
    %c0_i32 = arith.constant 0 : i32
    %c0_i32_0 = arith.constant 0 : i32
    %c0_i32_1 = arith.constant 0 : i32
    %c0_i32_2 = arith.constant 0 : i32
    return %c0_i32, %c0_i32_0, %c0_i32_1 : i32, i32, i32
  }
  func.func @transform_5(%arg0: i32) -> (i32, i32, i32) {
    %c0_i32 = arith.constant 0 : i32
    %c0_i32_0 = arith.constant 0 : i32
    %c0_i32_1 = arith.constant 0 : i32
    return %arg0, %c0_i32, %c0_i32_0 : i32, i32, i32
  }
}

</mosaic_0001>

<bundles_post_ra>
// kernel: dense_block_forward.1
= control target key start
LH: loop header
LB: loop body
LE: loop exit
PB: predicated region body
PF: predicated region fallthrough
CT: control target
= control target key end

     0   :  { %10 = vsyncpa [#allocation5], 0  ;;  %s15271_s18 = smov 0   ;;  %s18116_s0 = inlined_call_operand.vmem [shape: f32[2,256,4], index: 0, kind: input, shape index: {}]   ;;  %s18117_s1 = inlined_call_operand.vmem [shape: bf16[3,128,128], index: 1, kind: input, shape index: {}]   ;;  %s18118_s2 = inlined_call_operand.vmem [shape: f32[3,1,128], index: 2, kind: input, shape index: {}]   ;;  %s18119_s3 = inlined_call_operand.hbm [shape: bf16[3,9,128,128], index: 3, kind: input, shape index: {}]   ;;  %s18120_s4 = inlined_call_operand.vmem [shape: f32[3,1,128], index: 4, kind: input, shape index: {}]   ;;  %s18121_s5 = inlined_call_operand.vmem [shape: f32[2,256,128], index: 5, kind: output, shape index: {}]  }
   0x1 LB: > { %s15277_s19 = sadd.s32 4294967295, %s15233_s18   ;;  %p10784_p0 = scmp.ge.s32.totalorder %s15233_s18, 1  ;;  %s15233_s18 = sphi %s15271_s18, %s16_s18  }
   0x2   : > { %p157_p1 = scmp.lt.s32.totalorder %s15233_s18, 3  ;;  %s15235_s20 = smov [#allocation4]  }
   0x3   : > { %s175_s21 = sshll.u32 %s15235_s20, 4  ;;  %p18122_p3 = scmp.eq.s32.totalorder %s15277_s19, 0  ;;  %s176_s21 = int_to_ptr.vmem [resolvable:$true] %s175_s21 }
   0x4   : > { %p15281_p2 = pnand %p10784_p0, %p157_p1  ;;  %s15195_s26 = scalar_lea.hbm %s18119_s3, 27648 }
   0x5   : > { %p15196_p6 = scmp.ne.s32.totalorder %s18119_s3, %s15195_s26  ;;  %p15202_p10 = scmp.lt.u32.totalorder %s15195_s26, %s18119_s3 }
   0x6   : > { %s18419_s22 = scalar_select %p15281_p2, 1, 0 }
   0x7   : > { %p14935_p4 = pneg %p15281_p2 }
   0x9   : > { %p15290_p5 = pnand %p18122_p3, %p14935_p4 }
   0xb   : > { %p15197_p7 = pneg %p15290_p5 }
   0xd   : > { %p15198_p8 = pnand %p15197_p7, %p15196_p6 }
   0xf   : > { %p15199_p9 = pneg %p15198_p8 }
  0x11   : > { %p15204_p11 = pnand %p15202_p10, %p15199_p9 }
  0x13   : > { %15207 = shalt.err (!%p15204_p11)
}
  0x14   : > { %s15208_s6 = scalar_lea.vmem %s176_s21, 27648  ;;  %p15216_p1 = scmp.lt.s32.totalorder %s176_s21, %s176_s21 }
  0x15   : > { %p15209_p12 = scmp.ne.s32.totalorder %s176_s21, %s15208_s6  ;;  %p15217_p4 = scmp.lt.s32.totalorder %s15208_s6, %s15208_s6 }
  0x17   : > { %p15211_p13 = pnand %p15209_p12, %p15197_p7  ;;  %p15218_p3 = por %p15217_p4, %p15216_p1 }
  0x19   : > { %p15212_p0 = pneg %p15211_p13 }
  0x1b   : > { %p15219_p2 = pnand %p15218_p3, %p15212_p0 }
  0x1d   : > { %15222 = shalt.err (!%p15219_p2)
}
  0x1e   : > { %s15236_s7 = smov 64   ;;  %s15237_s8 = smov 4  }
  0x1f   : > { %14938 = dma.hbm_to_vmem [thread:$0]  (!%p15290_p5), %s18119_s3, 27648, %s176_s21, [#allocation5], %s15236_s7, %s15236_s7, %s15237_s8  }
  0x20   : > { %p18421_p6 = scmp.ne.s32.totalorder %s18419_s22, 0 }
  0x22   : > { %202 = sbr.rel (%p18421_p6) target bundleno = 2868 (0xb34), region = 40 }
  0x29   : > { %p18422_p8 = scmp.eq.s32.totalorder %s15277_s19, 0 }
  0x2b   : > { %15228 = dma.done.wait (%p18422_p8), [#allocation5], 27648   ;;  %p18423_p7 = pmov %p18422_p8 }
  0x2c   : > { %p230_p2 = scmp.lt.s32.totalorder %s15277_s19, 1  ;;  %v15238_v0 = vmov 0.0   ;;  %v14955_v1 = vld [vmem:[%s18117_s1] sm:$0xff]   ;;  %v14956_v2 = vld [vmem:[%s18117_s1 + $0x8] sm:$0xff]   ;;  %v14957_v3 = vld [vmem:[%s18117_s1 + $0x10] sm:$0xff]   ;;  %vm786_vm0 = vcmask 31744  }
  0x2d   : > { %15230 = vsyncadd (%p18423_p7), [#allocation5], 4294939648  ;;  %12627 = vmatprep.subr.bf16.mxu0 %v14955_v1  ;;  %v14958_v4 = vld [vmem:[%s18117_s1 + $0x18] sm:$0xff]   ;;  %v14959_v11 = vld [vmem:[%s18117_s1 + $0x20] sm:$0xff]   ;;  %vm18238_vm7 = vmmov 1  }
  0x2e   : > { %s19083_s19 = smov (!%p230_p2, %s15277_s19), 1  ;;  %12628 = vmatpush3.bf16.msra.mxu0 %v14955_v1  ;;  %v14960_v30 = vld [vmem:[%s18117_s1 + $0x28] sm:$0xff]   ;;  %v14961_v34 = vld [vmem:[%s18117_s1 + $0x30] sm:$0xff]   ;;  %v14962_v35 = vld [vmem:[%s18117_s1 + $0x38] sm:$0xff]  }
  0x2f   : > { %s11077_s11 = sshll.u32 %s19083_s19, 8  ;;  %12629 = vmatprep.subr.bf16.mxu0 %v14956_v2  ;;  %v14963_v48 = vld [vmem:[#allocation4 + $0x100] sm:$0xff]   ;;  %v14964_v49 = vld [vmem:[#allocation4 + $0x108] sm:$0xff]   ;;  %v14965_v52 = vld [vmem:[#allocation4 + $0x110] sm:$0xff]  }
  0x30   : > { %s15326_s14 = scalar_lea.vmem %s18121_s5, %s11077_s11  ;;  %s15374_s25 = scalar_lea.vmem %s18116_s0, %s11077_s11  ;;  %12867 = vmatprep.subr.bf16.mxu1 %v14963_v48  ;;  %v14966_v57 = vld [vmem:[#allocation4 + $0x118] sm:$0xff]   ;;  %v14967_v58 = vld [vmem:[#allocation4 + $0x120] sm:$0xff]   ;;  %v14968_v63 = vld [vmem:[#allocation4 + $0x128] sm:$0xff]  }
  0x31   : > { %722 = vst [vmem:[%s15326_s14] sm:$0xff] %v15238_v0  ;;  %723 = vst [vmem:[%s15326_s14 + $0x8] sm:$0xff] %v15238_v0  ;;  %v754_v5 = vld [vmem:[%s15374_s25] sm:$0xff]  ;;  %v755_v6 = vld [vmem:[%s15374_s25 + $0x8] sm:$0xff]  ;;  %12868 = vmatpush3.bf16.msra.mxu1 %v14963_v48 }
  0x32   : > { %724 = vst [vmem:[%s15326_s14 + $0x10] sm:$0xff] %v15238_v0  ;;  %725 = vst [vmem:[%s15326_s14 + $0x18] sm:$0xff] %v15238_v0  ;;  %12630 = vmatpush3.bf16.msra.mxu0 %v14956_v2  ;;  %v756_v7 = vld [vmem:[%s15374_s25 + $0x10] sm:$0xff]  ;;  %v757_v8 = vld [vmem:[%s15374_s25 + $0x18] sm:$0xff]  ;;  %12869 = vmatprep.subr.bf16.mxu1 %v14964_v49 }
  0x33   : > { %726 = vst [vmem:[%s15326_s14 + $0x20] sm:$0xff] %v15238_v0  ;;  %727 = vst [vmem:[%s15326_s14 + $0x28] sm:$0xff] %v15238_v0  ;;  %12631 = vmatprep.subr.bf16.mxu0 %v14957_v3  ;;  %v758_v9 = vld [vmem:[%s15374_s25 + $0x20] sm:$0xff]  ;;  %v759_v10 = vld [vmem:[%s15374_s25 + $0x28] sm:$0xff] }
  0x34   : > { %728 = vst [vmem:[%s15326_s14 + $0x30] sm:$0xff] %v15238_v0  ;;  %729 = vst [vmem:[%s15326_s14 + $0x38] sm:$0xff] %v15238_v0  ;;  %v760_v12 = vld [vmem:[%s15374_s25 + $0x30] sm:$0xff]  ;;  %v761_v13 = vld [vmem:[%s15374_s25 + $0x38] sm:$0xff] }
  0x35   : > { %730 = vst [vmem:[%s15326_s14 + $0x40] sm:$0xff] %v15238_v0  ;;  %731 = vst [vmem:[%s15326_s14 + $0x48] sm:$0xff] %v15238_v0  ;;  %v762_v14 = vld [vmem:[%s15374_s25 + $0x40] sm:$0xff]  ;;  %v763_v15 = vld [vmem:[%s15374_s25 + $0x48] sm:$0xff]  ;;  %12870 = vmatpush3.bf16.msra.mxu1 %v14964_v49 }
  0x36   : > { %732 = vst [vmem:[%s15326_s14 + $0x50] sm:$0xff] %v15238_v0  ;;  %733 = vst [vmem:[%s15326_s14 + $0x58] sm:$0xff] %v15238_v0  ;;  %12632 = vmatpush3.bf16.msra.mxu0 %v14957_v3  ;;  %v764_v16 = vld [vmem:[%s15374_s25 + $0x50] sm:$0xff]  ;;  %v765_v17 = vld [vmem:[%s15374_s25 + $0x58] sm:$0xff]  ;;  %12871 = vmatprep.subr.bf16.mxu1 %v14965_v52 }
  0x37   : > { %734 = vst [vmem:[%s15326_s14 + $0x60] sm:$0xff] %v15238_v0  ;;  %735 = vst [vmem:[%s15326_s14 + $0x68] sm:$0xff] %v15238_v0  ;;  %12633 = vmatprep.subr.bf16.mxu0 %v14958_v4  ;;  %v766_v18 = vld [vmem:[%s15374_s25 + $0x60] sm:$0xff]  ;;  %v767_v19 = vld [vmem:[%s15374_s25 + $0x68] sm:$0xff] }
  0x38   : > { %736 = vst [vmem:[%s15326_s14 + $0x70] sm:$0xff] %v15238_v0  ;;  %737 = vst [vmem:[%s15326_s14 + $0x78] sm:$0xff] %v15238_v0  ;;  %v768_v20 = vld [vmem:[%s15374_s25 + $0x70] sm:$0xff]  ;;  %v769_v21 = vld [vmem:[%s15374_s25 + $0x78] sm:$0xff] }
  0x39   : > { %738 = vst [vmem:[%s15326_s14 + $0x80] sm:$0xff] %v15238_v0  ;;  %739 = vst [vmem:[%s15326_s14 + $0x88] sm:$0xff] %v15238_v0  ;;  %v770_v22 = vld [vmem:[%s15374_s25 + $0x80] sm:$0xff]  ;;  %v771_v23 = vld [vmem:[%s15374_s25 + $0x88] sm:$0xff]  ;;  %12872 = vmatpush3.bf16.msra.mxu1 %v14965_v52 }
  0x3a   : > { %740 = vst [vmem:[%s15326_s14 + $0x90] sm:$0xff] %v15238_v0  ;;  %741 = vst [vmem:[%s15326_s14 + $0x98] sm:$0xff] %v15238_v0  ;;  %v772_v24 = vld [vmem:[%s15374_s25 + $0x90] sm:$0xff]  ;;  %v773_v25 = vld [vmem:[%s15374_s25 + $0x98] sm:$0xff]  ;;  %12634 = vmatpush3.bf16.msra.mxu0 %v14958_v4  ;;  %12873 = vmatprep.subr.bf16.mxu1 %v14966_v57 }
  0x3b   : > { %742 = vst [vmem:[%s15326_s14 + $0xa0] sm:$0xff] %v15238_v0  ;;  %743 = vst [vmem:[%s15326_s14 + $0xa8] sm:$0xff] %v15238_v0  ;;  %v774_v26 = vld [vmem:[%s15374_s25 + $0xa0] sm:$0xff]  ;;  %v775_v27 = vld [vmem:[%s15374_s25 + $0xa8] sm:$0xff]  ;;  %12635 = vmatprep.subr.bf16.mxu0 %v14959_v11 }
  0x3c   : > { %744 = vst [vmem:[%s15326_s14 + $0xb0] sm:$0xff] %v15238_v0  ;;  %745 = vst [vmem:[%s15326_s14 + $0xb8] sm:$0xff] %v15238_v0  ;;  %v776_v28 = vld [vmem:[%s15374_s25 + $0xb0] sm:$0xff]  ;;  %v777_v29 = vld [vmem:[%s15374_s25 + $0xb8] sm:$0xff] }
  0x3d   : > { %746 = vst [vmem:[%s15326_s14 + $0xc0] sm:$0xff] %v15238_v0  ;;  %747 = vst [vmem:[%s15326_s14 + $0xc8] sm:$0xff] %v15238_v0  ;;  %v778_v36 = vld [vmem:[%s15374_s25 + $0xc0] sm:$0xff]  ;;  %v779_v37 = vld [vmem:[%s15374_s25 + $0xc8] sm:$0xff]  ;;  %12874 = vmatpush3.bf16.msra.mxu1 %v14966_v57 }
  0x3e   : > { %748 = vst [vmem:[%s15326_s14 + $0xd0] sm:$0xff] %v15238_v0  ;;  %749 = vst [vmem:[%s15326_s14 + $0xd8] sm:$0xff] %v15238_v0  ;;  %12636 = vmatpush3.bf16.msra.mxu0 %v14959_v11  ;;  %v780_v38 = vld [vmem:[%s15374_s25 + $0xd0] sm:$0xff]  ;;  %v781_v41 = vld [vmem:[%s15374_s25 + $0xd8] sm:$0xff]  ;;  %12875 = vmatprep.subr.bf16.mxu1 %v14967_v58 }
  0x3f   : > { %750 = vst [vmem:[%s15326_s14 + $0xe0] sm:$0xff] %v15238_v0  ;;  %751 = vst [vmem:[%s15326_s14 + $0xe8] sm:$0xff] %v15238_v0  ;;  %12637 = vmatprep.subr.bf16.mxu0 %v14960_v30  ;;  %v782_v42 = vld [vmem:[%s15374_s25 + $0xe0] sm:$0xff]  ;;  %v783_v43 = vld [vmem:[%s15374_s25 + $0xe8] sm:$0xff] }
  0x40   : > { %752 = vst [vmem:[%s15326_s14 + $0xf0] sm:$0xff] %v15238_v0  ;;  %753 = vst [vmem:[%s15326_s14 + $0xf8] sm:$0xff] %v15238_v0  ;;  %v784_v46 = vld [vmem:[%s15374_s25 + $0xf0] sm:$0xff]  ;;  %v785_v47 = vld [vmem:[%s15374_s25 + $0xf8] sm:$0xff] }
  0x41   : > { %787 = vst.msk [vmem:[%s15326_s14] sm:$0xff] %vm786_vm0, %v754_v5  ;;  %788 = vst.msk [vmem:[%s15326_s14 + $0x8] sm:$0xff] %vm786_vm0, %v755_v6  ;;  %12876 = vmatpush3.bf16.msra.mxu1 %v14967_v58 }
  0x42   : > { %789 = vst.msk [vmem:[%s15326_s14 + $0x10] sm:$0xff] %vm786_vm0, %v756_v7  ;;  %790 = vst.msk [vmem:[%s15326_s14 + $0x18] sm:$0xff] %vm786_vm0, %v757_v8  ;;  %12638 = vmatpush3.bf16.msra.mxu0 %v14960_v30  ;;  %12877 = vmatprep.subr.bf16.mxu1 %v14968_v63 }
  0x43   : > { %791 = vst.msk [vmem:[%s15326_s14 + $0x20] sm:$0xff] %vm786_vm0, %v758_v9  ;;  %792 = vst.msk [vmem:[%s15326_s14 + $0x28] sm:$0xff] %vm786_vm0, %v759_v10  ;;  %12639 = vmatprep.subr.bf16.mxu0 %v14961_v34 }
  0x44   : > { %793 = vst.msk [vmem:[%s15326_s14 + $0x30] sm:$0xff] %vm786_vm0, %v760_v12  ;;  %794 = vst.msk [vmem:[%s15326_s14 + $0x38] sm:$0xff] %vm786_vm0, %v761_v13 }
  0x45   : > { %795 = vst.msk [vmem:[%s15326_s14 + $0x40] sm:$0xff] %vm786_vm0, %v762_v14  ;;  %796 = vst.msk [vmem:[%s15326_s14 + $0x48] sm:$0xff] %vm786_vm0, %v763_v15  ;;  %12878 = vmatpush3.bf16.msra.mxu1 %v14968_v63 }
  0x46   : > { %797 = vst.msk [vmem:[%s15326_s14 + $0x50] sm:$0xff] %vm786_vm0, %v764_v16  ;;  %798 = vst.msk [vmem:[%s15326_s14 + $0x58] sm:$0xff] %vm786_vm0, %v765_v17  ;;  %12640 = vmatpush3.bf16.msra.mxu0 %v14961_v34  ;;  %v14971_v34 = vld [vmem:[#allocation4] sm:$0xff]  }
  0x47   : > { %799 = vst.msk [vmem:[%s15326_s14 + $0x60] sm:$0xff] %vm786_vm0, %v766_v18  ;;  %800 = vst.msk [vmem:[%s15326_s14 + $0x68] sm:$0xff] %vm786_vm0, %v767_v19  ;;  %12641 = vmatprep.subr.bf16.mxu0 %v14962_v35 }
  0x48   : > { %801 = vst.msk [vmem:[%s15326_s14 + $0x70] sm:$0xff] %vm786_vm0, %v768_v20  ;;  %802 = vst.msk [vmem:[%s15326_s14 + $0x78] sm:$0xff] %vm786_vm0, %v769_v21  ;;  %v819_v31 = vld [vmem:[%s15326_s14] sm:$0xff]  ;;  %v820_v32 = vld [vmem:[%s15326_s14 + $0x8] sm:$0xff] }
  0x49   : > { %803 = vst.msk [vmem:[%s15326_s14 + $0x80] sm:$0xff] %vm786_vm0, %v770_v22  ;;  %804 = vst.msk [vmem:[%s15326_s14 + $0x88] sm:$0xff] %vm786_vm0, %v771_v23  ;;  %v15459_v33 = vpack.c.bf16 %v820_v32, %v819_v31  ;;  %v821_v39 = vld [vmem:[%s15326_s14 + $0x10] sm:$0xff]  ;;  %v822_v40 = vld [vmem:[%s15326_s14 + $0x18] sm:$0xff] }
  0x4a   : > { %805 = vst.msk [vmem:[%s15326_s14 + $0x90] sm:$0xff] %vm786_vm0, %v772_v24  ;;  %806 = vst.msk [vmem:[%s15326_s14 + $0x98] sm:$0xff] %vm786_vm0, %v773_v25  ;;  %v823_v44 = vld [vmem:[%s15326_s14 + $0x20] sm:$0xff]  ;;  %v824_v45 = vld [vmem:[%s15326_s14 + $0x28] sm:$0xff]  ;;  %v15496_v50 = vpack.c.bf16 %v822_v40, %v821_v39  ;;  %12642 = vmatpush3.bf16.msra.mxu0 %v14962_v35 }
  0x4b   : > { %807 = vst.msk [vmem:[%s15326_s14 + $0xa0] sm:$0xff] %vm786_vm0, %v774_v26  ;;  %808 = vst.msk [vmem:[%s15326_s14 + $0xa8] sm:$0xff] %vm786_vm0, %v775_v27  ;;  %12643 = vmatprep.mubr.bf16.mxu0 %v15459_v33  ;;  %v15498_v51 = vpack.c.bf16 %v824_v45, %v823_v44  ;;  %v825_v53 = vld [vmem:[%s15326_s14 + $0x30] sm:$0xff]  ;;  %v826_v54 = vld [vmem:[%s15326_s14 + $0x38] sm:$0xff]  ;;  %12675 = vmatprep.subr.bf16.mxu0 %v14971_v34  ;;  %v241_v45 = vlaneseq }
  0x4c   : > { %809 = vst.msk [vmem:[%s15326_s14 + $0xb0] sm:$0xff] %vm786_vm0, %v776_v28  ;;  %810 = vst.msk [vmem:[%s15326_s14 + $0xb8] sm:$0xff] %vm786_vm0, %v777_v29  ;;  %v827_v55 = vld [vmem:[%s15326_s14 + $0x40] sm:$0xff]  ;;  %v828_v56 = vld [vmem:[%s15326_s14 + $0x48] sm:$0xff]  ;;  %v15506_v59 = vpack.c.bf16 %v826_v54, %v825_v53 }
  0x4d   : > { %18424 = vst [vmem:[#allocation7_spill] sm:$0xff] %v15459_v33  ;;  %811 = vst.msk [vmem:[%s15326_s14 + $0xc0] sm:$0xff] %vm786_vm0, %v778_v36  ;;  %12644 = vmatmul.mubr.bf16.vlgmr.msra.gmra.mrb[0].mxu0 %v15496_v50  ;;  %v15508_v60 = vpack.c.bf16 %v828_v56, %v827_v55  ;;  %v829_v61 = vld [vmem:[%s15326_s14 + $0x50] sm:$0xff]  ;;  %v830_v62 = vld [vmem:[%s15326_s14 + $0x58] sm:$0xff]  ;;  %v15580_v52 = vshrl.u32 %v241_v45, 7 }
  0x4e   : > { %812 = vst.msk [vmem:[%s15326_s14 + $0xc8] sm:$0xff] %vm786_vm0, %v779_v37  ;;  %813 = vst.msk [vmem:[%s15326_s14 + $0xd0] sm:$0xff] %vm786_vm0, %v780_v38  ;;  %12647 = vmatprep.mubr.bf16.mxu0 %v15498_v51  ;;  %v831_v0 = vld [vmem:[%s15326_s14 + $0x60] sm:$0xff]  ;;  %v832_v1 = vld [vmem:[%s15326_s14 + $0x68] sm:$0xff]  ;;  %v15516_v2 = vpack.c.bf16 %v830_v62, %v829_v61  ;;  %12676 = vmatpush3.bf16.msra.mxu0 %v14971_v34 }
  0x4f   : > { %814 = vst.msk [vmem:[%s15326_s14 + $0xd8] sm:$0xff] %vm786_vm0, %v781_v41  ;;  %815 = vst.msk [vmem:[%s15326_s14 + $0xe0] sm:$0xff] %vm786_vm0, %v782_v42  ;;  %v15518_v3 = vpack.c.bf16 %v832_v1, %v831_v0  ;;  %v833_v4 = vld [vmem:[%s15326_s14 + $0x70] sm:$0xff]  ;;  %v834_v5 = vld [vmem:[%s15326_s14 + $0x78] sm:$0xff]  ;;  %vm18168_vm1 = vcmp.lt.s32.totalorder %v15580_v52, 7  ;;  %vm18169_vm2 = vcmp.lt.s32.totalorder %v15580_v52, 1 }
  0x50   : > { %816 = vst.msk [vmem:[%s15326_s14 + $0xe8] sm:$0xff] %vm786_vm0, %v783_v43  ;;  %817 = vst.msk [vmem:[%s15326_s14 + $0xf0] sm:$0xff] %vm786_vm0, %v784_v46  ;;  %v835_v6 = vld [vmem:[%s15326_s14 + $0x80] sm:$0xff]  ;;  %v836_v7 = vld [vmem:[%s15326_s14 + $0x88] sm:$0xff]  ;;  %v15526_v8 = vpack.c.bf16 %v834_v5, %v833_v4  ;;  %v18124_v43 = vmov 0  }
  0x51   : > { %818 = vst.msk [vmem:[%s15326_s14 + $0xf8] sm:$0xff] %vm786_vm0, %v785_v47  ;;  %18425 = vst [vmem:[#allocation8_spill] sm:$0xff] %v15496_v50  ;;  %v15528_v9 = vpack.c.bf16 %v836_v7, %v835_v6  ;;  %v837_v10 = vld [vmem:[%s15326_s14 + $0x90] sm:$0xff]  ;;  %v838_v11 = vld [vmem:[%s15326_s14 + $0x98] sm:$0xff] }
  0x52   : > { %18426 = vst [vmem:[#allocation9_spill] sm:$0xff] %v15498_v51  ;;  %18427 = vst [vmem:[#allocation10_spill] sm:$0xff] %v15506_v59  ;;  %v839_v12 = vld [vmem:[%s15326_s14 + $0xa0] sm:$0xff]  ;;  %v840_v13 = vld [vmem:[%s15326_s14 + $0xa8] sm:$0xff]  ;;  %v15536_v14 = vpack.c.bf16 %v838_v11, %v837_v10 }
  0x53   : > { %18428 = vst [vmem:[#allocation11_spill] sm:$0xff] %v15508_v60  ;;  %18429 = vst [vmem:[#allocation12_spill] sm:$0xff] %v15516_v2  ;;  %v15538_v15 = vpack.c.bf16 %v840_v13, %v839_v12  ;;  %v841_v16 = vld [vmem:[%s15326_s14 + $0xb0] sm:$0xff]  ;;  %v842_v17 = vld [vmem:[%s15326_s14 + $0xb8] sm:$0xff] }
  0x54   : > { %18430 = vst [vmem:[#allocation13_spill] sm:$0xff] %v15518_v3  ;;  %18431 = vst [vmem:[#allocation14_spill] sm:$0xff] %v15526_v8  ;;  %v843_v18 = vld [vmem:[%s15326_s14 + $0xc0] sm:$0xff]  ;;  %v15546_v20 = vpack.c.bf16 %v842_v17, %v841_v16  ;;  %v14969_v31 = vld [vmem:[#allocation4 + $0x130] sm:$0xff]  }
  0x55   : > { %12648 = vmatmul.mubr.bf16.gmra.mrb[4].mxu0 %v15506_v59  ;;  %18432 = vst [vmem:[#allocation15_spill] sm:$0xff] %v15528_v9  ;;  %18433 = vst [vmem:[#allocation16_spill] sm:$0xff] %v15536_v14  ;;  %v844_v19 = vld [vmem:[%s15326_s14 + $0xc8] sm:$0xff]  ;;  %v845_v22 = vld [vmem:[%s15326_s14 + $0xd0] sm:$0xff]  ;;  %12879 = vmatprep.subr.bf16.mxu1 %v14969_v31 }
  0x56   : > { %12651 = vmatprep.mubr.bf16.mxu0 %v15508_v60  ;;  %18434 = vst [vmem:[#allocation17_spill] sm:$0xff] %v15538_v15  ;;  %18435 = vst [vmem:[#allocation18_spill] sm:$0xff] %v15546_v20  ;;  %v15548_v21 = vpack.c.bf16 %v844_v19, %v843_v18  ;;  %v846_v23 = vld [vmem:[%s15326_s14 + $0xd8] sm:$0xff]  ;;  %v847_v24 = vld [vmem:[%s15326_s14 + $0xe0] sm:$0xff]  ;;  %12880 = vmatpush3.bf16.msra.mxu1 %v14969_v31 }
  0x57   : > { %v848_v25 = vld [vmem:[%s15326_s14 + $0xe8] sm:$0xff]  ;;  %v15556_v26 = vpack.c.bf16 %v846_v23, %v845_v22  ;;  %v849_v28 = vld [vmem:[%s15326_s14 + $0xf0] sm:$0xff]  ;;  %v14970_v32 = vld [vmem:[#allocation4 + $0x138] sm:$0xff]   ;;  %18440 = vst [vmem:[#allocation23_spill] sm:$0xff] %v15580_v52 }
  0x58   : > { %18436 = vst [vmem:[#allocation19_spill] sm:$0xff] %v15548_v21  ;;  %v15558_v27 = vpack.c.bf16 %v848_v25, %v847_v24  ;;  %v850_v29 = vld [vmem:[%s15326_s14 + $0xf8] sm:$0xff]  ;;  %12881 = vmatprep.subr.bf16.mxu1 %v14970_v32  ;;  %v15567_v35 = vld [vmem:[#allocation4 + $0x140] sm:$0xff]   ;;  %v14973_v36 = vld [vmem:[#allocation4 + $0x8] sm:$0xff]  }
  0x59   : > { %18437 = vst [vmem:[#allocation20_spill] sm:$0xff] %v15556_v26  ;;  %v15564_v30 = vpack.c.bf16 %v850_v29, %v849_v28  ;;  %12677 = vmatprep.subr.bf16.mxu0 %v14973_v36  ;;  %v14975_v37 = vld [vmem:[#allocation4 + $0x10] sm:$0xff]   ;;  %v14977_v38 = vld [vmem:[#allocation4 + $0x18] sm:$0xff]   ;;  %v14979_v39 = vld [vmem:[#allocation4 + $0x20] sm:$0xff]  }
  0x5a   : > { %18438 = vst [vmem:[#allocation21_spill] sm:$0xff] %v15558_v27  ;;  %12882 = vmatpush3.bf16.msra.mxu1 %v14970_v32  ;;  %12678 = vmatpush3.bf16.msra.mxu0 %v14973_v36  ;;  %v14981_v40 = vld [vmem:[#allocation4 + $0x28] sm:$0xff]   ;;  %v14983_v41 = vld [vmem:[#allocation4 + $0x30] sm:$0xff]   ;;  %v14985_v42 = vld [vmem:[#allocation4 + $0x38] sm:$0xff]  }
  0x5b   : > { %18439 = vst [vmem:[#allocation22_spill] sm:$0xff] %v15564_v30  ;;  %12915 = vmatprep.subr.bf16.mxu1 %v15567_v35  ;;  %12679 = vmatprep.subr.bf16.mxu0 %v14975_v37  ;;  %v15571_v44 = vld [vmem:[#allocation4 + $0x40] sm:$0xff]   ;;  %v14974_v22 = vld [vmem:[#allocation4 + $0x148] sm:$0xff]   ;;  %v14976_v45 = vld [vmem:[#allocation4 + $0x150] sm:$0xff]  }
  0x5c   : > { %v15577_v46 = vld [vmem:[%s18118_s2] ss:$0 sm:$0xff] }
  0x5d   : > { %12652 = vmatmul.mubr.bf16.gmra.mrb[8].mxu0 %v15516_v2 }
  0x5e   : > { %12655 = vmatprep.mubr.bf16.mxu0 %v15518_v3  ;;  %12680 = vmatpush3.bf16.msra.mxu0 %v14975_v37 }
  0x5f   : > { %12681 = vmatprep.subr.bf16.mxu0 %v14977_v38 }
  0x62   : > { %12682 = vmatpush3.bf16.msra.mxu0 %v14977_v38 }
  0x63   : > { %12683 = vmatprep.subr.bf16.mxu0 %v14979_v39 }
  0x65   : > { %12656 = vmatmul.mubr.bf16.gmra.mrb[12].mxu0 %v15526_v8 }
  0x66   : > { %12659 = vmatprep.mubr.bf16.mxu0 %v15528_v9  ;;  %12684 = vmatpush3.bf16.msra.mxu0 %v14979_v39 }
  0x67   : > { %12685 = vmatprep.subr.bf16.mxu0 %v14981_v40 }
  0x6a   : > { %12686 = vmatpush3.bf16.msra.mxu0 %v14981_v40 }
  0x6b   : > { %12687 = vmatprep.subr.bf16.mxu0 %v14983_v41 }
  0x6d   : > { %12660 = vmatmul.mubr.bf16.gmra.mrb[16].mxu0 %v15536_v14 }
  0x6e   : > { %12663 = vmatprep.mubr.bf16.mxu0 %v15538_v15  ;;  %12688 = vmatpush3.bf16.msra.mxu0 %v14983_v41 }
  0x6f   : > { %12689 = vmatprep.subr.bf16.mxu0 %v14985_v42 }
  0x72   : > { %12690 = vmatpush3.bf16.msra.mxu0 %v14985_v42 }
  0x73   : > { %12723 = vmatprep.subr.bf16.mxu0 %v15571_v44 }
  0x75   : > { %12664 = vmatmul.mubr.bf16.gmra.mrb[20].mxu0 %v15546_v20 }
  0x76   : > { %12667 = vmatprep.mubr.bf16.mxu0 %v15548_v21 }
  0x7d   : > { %12668 = vmatmul.mubr.bf16.gmra.mrb[24].mxu0 %v15556_v26 }
  0x7e   : > { %12671 = vmatprep.mubr.bf16.mxu0 %v15558_v27 }
  0x85   : > { %12672 = vmatmul.mubr.bf16.gmra.mrb[28].mxu0 %v15564_v30 }
  0x86   : > { %12691 = vmatprep.mubr.bf16.mxu0 %v18124_v43 }
 0x120   : > { %v12645_v47 = vpop.f32.mrb[0].mxu0 }
 0x121   : > { %v1067_v48 = vadd.f32 %v12645_v47, %v15577_v46  ;;  %v1058_v49 = vpop.f32.mrb[1].mxu0 }
 0x122   : > { %v1059_v53 = vadd.f32 %v15577_v46, %v1058_v49  ;;  %v12646_v54 = vpop.f32.mrb[2].mxu0 }
 0x123   : > { %v1187_v55 = vmax.f32 %v1067_v48, 0.0  ;;  %v1070_v56 = vadd.f32 %v12646_v54, %v15577_v46  ;;  %v1061_v57 = vpop.f32.mrb[3].mxu0 }
 0x124   : > { %v15584_v58 = vmax.f32 %v1059_v53, 0.0  ;;  %v1062_v61 = vadd.f32 %v15577_v46, %v1061_v57 }
 0x125   : > { %v1188_v62 = vmax.f32 %v1070_v56, 0.0  ;;  %v1219_v63 = vrot.slane %v1187_v55, 7  ;;  %v1380_v0 = vrot.slane %v1187_v55, 1 }
 0x126   : > { %v1186_v1 = vmax.f32 %v1062_v61, 0.0  ;;  %v18127_v4 = vrot.slane %v15584_v58, 7  ;;  %v18126_v10 = vrot.slane %v15584_v58, 1 }
 0x127   : > { %v1220_v5 = vrot.slane %v1188_v62, 7  ;;  %v1381_v6 = vrot.slane %v1188_v62, 1  ;;  %v15590_v7 = vpack.c.bf16 %v1188_v62, %v1187_v55 }
 0x128   : > { %v1218_v11 = vrot.slane %v1186_v1, 7  ;;  %v1379_v12 = vrot.slane %v1186_v1, 1  ;;  %v12649_v13 = vpop.f32.mrb[4].mxu0  ;;  %v15594_v16 = vpack.c.bf16 %v1186_v1, %v15584_v58 }
 0x129   : > { %v1439_v17 = vsel %vm18168_vm1, %v1380_v0, %v1381_v6  ;;  %v1083_v18 = vadd.f32 %v12649_v13, %v15577_v46  ;;  %v1074_v19 = vpop.f32.mrb[5].mxu0  ;;  %v1278_v23 = vsel %vm18169_vm2, %v1219_v63, %v1220_v5  ;;  %v14978_v13 = vld [vmem:[#allocation4 + $0x158] sm:$0xff]  }
 0x12a   : > { %v15605_v24 = vsel %vm18169_vm2, %v18127_v4, %v1218_v11  ;;  %v1075_v25 = vadd.f32 %v15577_v46, %v1074_v19  ;;  %v12650_v28 = vpop.f32.mrb[6].mxu0  ;;  %12883 = vmatprep.mubr.bf16.mxu1 %v15594_v16  ;;  %v1440_v29 = vsel %vm18168_vm1, %v1379_v12, %v1380_v0  ;;  %v1441_v31 = vsel %vm18168_vm1, %v18126_v10, %v1379_v12 }
 0x12b   : > { %v1191_v32 = vmax.f32 %v1083_v18, 0.0  ;;  %v1086_v34 = vadd.f32 %v12650_v28, %v15577_v46  ;;  %v1077_v36 = vpop.f32.mrb[7].mxu0  ;;  %12884 = vmatmul.mubr.bf16.vlgmr.msra.gmra.mrb[0].mxu1 %v15590_v7  ;;  %v15617_v37 = vpack.c.bf16 %v1440_v29, %v1441_v31  ;;  %v1279_v38 = vsel %vm18169_vm2, %v1218_v11, %v1219_v63 }
 0x12c   : > { %v1189_v39 = vmax.f32 %v1075_v25, 0.0  ;;  %v1078_v40 = vadd.f32 %v15577_v46, %v1077_v36  ;;  %12916 = vmatpush3.bf16.msra.mxu1 %v15567_v35  ;;  %v15623_v41 = vpack.c.bf16 %v1278_v23, %v1279_v38 }
 0x12d   : > { %v15625_v42 = vmax.f32 %v1086_v34, 0.0  ;;  %12917 = vmatprep.subr.bf16.mxu1 %v14974_v22  ;;  %v1223_v47 = vrot.slane %v1191_v32, 7  ;;  %v1384_v54 = vrot.slane %v1191_v32, 1 }
 0x12e   : > { %v1221_v48 = vrot.slane %v1189_v39, 7  ;;  %v1382_v49 = vrot.slane %v1189_v39, 1  ;;  %v1190_v53 = vmax.f32 %v1078_v40, 0.0 }
 0x12f   : > { %v1224_v55 = vrot.slane %v15625_v42, 7  ;;  %v1385_v56 = vrot.slane %v15625_v42, 1  ;;  %v15630_v57 = vpack.c.bf16 %v15625_v42, %v1191_v32  ;;  %v14980_v42 = vld [vmem:[#allocation4 + $0x160] sm:$0xff]  }
 0x130   : > { %v1438_v35 = vsel %vm18168_vm1, %v1381_v6, %v1382_v49  ;;  %v1222_v61 = vrot.slane %v1190_v53, 7  ;;  %v1383_v62 = vrot.slane %v1190_v53, 1  ;;  %v12653_v63 = vpop.f32.mrb[8].mxu0  ;;  %v15634_v0 = vpack.c.bf16 %v1190_v53, %v1189_v39  ;;  %12918 = vmatpush3.bf16.msra.mxu1 %v14974_v22 }
 0x131   : > { %18441 = vst [vmem:[#allocation24_spill] sm:$0xff] %v15630_v57  ;;  %v15636_v1 = vpack.c.bf16 %v1438_v35, %v1439_v17  ;;  %v1099_v11 = vadd.f32 %v12653_v63, %v15577_v46  ;;  %v1090_v12 = vpop.f32.mrb[9].mxu0  ;;  %12919 = vmatprep.subr.bf16.mxu1 %v14976_v45  ;;  %v1277_v18 = vsel %vm18169_vm2, %v1220_v5, %v1221_v48 }
 0x132   : > { %18442 = vst [vmem:[#allocation25_spill] sm:$0xff] %v15634_v0  ;;  %v1274_v19 = vsel %vm18169_vm2, %v1223_v47, %v1224_v55  ;;  %v1091_v6 = vadd.f32 %v15577_v46, %v1090_v12  ;;  %v12654_v23 = vpop.f32.mrb[10].mxu0  ;;  %12887 = vmatprep.mubr.bf16.mxu1 %v15634_v0  ;;  %v1276_v17 = vsel %vm18169_vm2, %v1221_v48, %v1222_v61  ;;  %v15665_v48 = vadd.s32 8, %v15580_v52 }
 0x133   : > { %v1436_v22 = vsel %vm18168_vm1, %v1383_v62, %v1384_v54  ;;  %v1437_v25 = vsel %vm18168_vm1, %v1382_v49, %v1383_v62  ;;  %v1195_v28 = vmax.f32 %v1099_v11, 0.0  ;;  %v1102_v5 = vadd.f32 %v12654_v23, %v15577_v46  ;;  %v1093_v29 = vpop.f32.mrb[11].mxu0  ;;  %12888 = vmatmul.mubr.bf16.gmra.mrb[4].mxu1 %v15630_v57 }
 0x134   : > { %v15653_v31 = vpack.c.bf16 %v1276_v17, %v1277_v18  ;;  %v15655_v32 = vpack.c.bf16 %v1436_v22, %v1437_v25  ;;  %v1193_v34 = vmax.f32 %v1091_v6, 0.0  ;;  %v1094_v36 = vadd.f32 %v15577_v46, %v1093_v29  ;;  %12920 = vmatpush3.bf16.msra.mxu1 %v14976_v45  ;;  %v14982_v25 = vld [vmem:[#allocation4 + $0x168] sm:$0xff]  }
 0x135   : > { %v1275_v38 = vsel %vm18169_vm2, %v1222_v61, %v1223_v47  ;;  %v1435_v39 = vsel %vm18168_vm1, %v1384_v54, %v1385_v56  ;;  %v15662_v40 = vmax.f32 %v1102_v5, 0.0  ;;  %12921 = vmatprep.subr.bf16.mxu1 %v14978_v13  ;;  %v15668_v49 = vadd.s32 16, %v15580_v52 }
 0x136   : > { %18443 = vst [vmem:[#allocation26_spill] sm:$0xff] %v15653_v31  ;;  %v15670_v53 = vpack.c.bf16 %v1274_v19, %v1275_v38  ;;  %v1227_v35 = vrot.slane %v1195_v28, 7  ;;  %v1225_v45 = vrot.slane %v1193_v34, 7  ;;  %v1386_v62 = vrot.slane %v1193_v34, 1 }
 0x137   : > { %v1194_v63 = vmax.f32 %v1094_v36, 0.0  ;;  %v1388_v47 = vrot.slane %v1195_v28, 1  ;;  %v1228_v61 = vrot.slane %v15662_v40, 7  ;;  %v1389_v54 = vrot.slane %v15662_v40, 1 }
 0x138   : > { %v15675_v11 = vpack.c.bf16 %v15662_v40, %v1195_v28  ;;  %v12657_v6 = vpop.f32.mrb[12].mxu0  ;;  %12922 = vmatpush3.bf16.msra.mxu1 %v14978_v13  ;;  %v1434_v19 = vsel %vm18168_vm1, %v1385_v56, %v1386_v62  ;;  %v1273_v28 = vsel %vm18169_vm2, %v1224_v55, %v1225_v45 }
 0x139   : > { %v1226_v12 = vrot.slane %v1194_v63, 7  ;;  %v1387_v18 = vrot.slane %v1194_v63, 1  ;;  %v15677_v23 = vpack.c.bf16 %v1194_v63, %v1193_v34  ;;  %v1115_v17 = vadd.f32 %v12657_v6, %v15577_v46  ;;  %v1106_v22 = vpop.f32.mrb[13].mxu0  ;;  %12923 = vmatprep.subr.bf16.mxu1 %v14980_v42 }
 0x13a   : > { %18444 = vst [vmem:[#allocation27_spill] sm:$0xff] %v15675_v11  ;;  %v15682_v5 = vpack.c.bf16 %v1434_v19, %v1435_v39  ;;  %v1270_v29 = vsel %vm18169_vm2, %v1227_v35, %v1228_v61  ;;  %v1107_v34 = vadd.f32 %v15577_v46, %v1106_v22  ;;  %v12658_v36 = vpop.f32.mrb[14].mxu0 }
 0x13b   : > { %18445 = vst [vmem:[#allocation28_spill] sm:$0xff] %v15677_v23  ;;  %12891 = vmatprep.mubr.bf16.mxu1 %v15677_v23  ;;  %v1272_v56 = vsel %vm18169_vm2, %v1225_v45, %v1226_v12  ;;  %v1432_v13 = vsel %vm18168_vm1, %v1387_v18, %v1388_v47  ;;  %v1433_v38 = vsel %vm18168_vm1, %v1386_v62, %v1387_v18  ;;  %v1199_v39 = vmax.f32 %v1115_v17, 0.0  ;;  %v1109_v40 = vpop.f32.mrb[15].mxu0  ;;  %v14984_v17 = vld [vmem:[#allocation4 + $0x170] sm:$0xff]  }
 0x13c   : > { %v1118_v55 = vadd.f32 %v12658_v36, %v15577_v46  ;;  %12892 = vmatmul.mubr.bf16.gmra.mrb[8].mxu1 %v15675_v11  ;;  %v15698_v63 = vpack.c.bf16 %v1272_v56, %v1273_v28  ;;  %v15700_v6 = vpack.c.bf16 %v1432_v13, %v1433_v38  ;;  %v1197_v19 = vmax.f32 %v1107_v34, 0.0  ;;  %v14986_v28 = vld [vmem:[#allocation4 + $0x178] sm:$0xff]  }
 0x13d   : > { %v1110_v22 = vadd.f32 %v15577_v46, %v1109_v40  ;;  %12924 = vmatpush3.bf16.msra.mxu1 %v14980_v42  ;;  %v1271_v45 = vsel %vm18169_vm2, %v1226_v12, %v1227_v35  ;;  %v1431_v62 = vsel %vm18168_vm1, %v1388_v47, %v1389_v54  ;;  %v1231_v34 = vrot.slane %v1199_v39, 7 }
 0x13e   : > { %v15707_v18 = vmax.f32 %v1118_v55, 0.0  ;;  %12925 = vmatprep.subr.bf16.mxu1 %v14982_v25  ;;  %v15711_v56 = vpack.c.bf16 %v1270_v29, %v1271_v45  ;;  %v1229_v13 = vrot.slane %v1197_v19, 7  ;;  %v1390_v38 = vrot.slane %v1197_v19, 1 }
 0x13f   : > { %v1198_v42 = vmax.f32 %v1110_v22, 0.0  ;;  %v1392_v40 = vrot.slane %v1199_v39, 1 }
 0x140   : > { %v1232_v35 = vrot.slane %v15707_v18, 7  ;;  %v1393_v12 = vrot.slane %v15707_v18, 1  ;;  %v15716_v47 = vpack.c.bf16 %v15707_v18, %v1199_v39  ;;  %v12661_v10 = vpop.f32.mrb[16].mxu0  ;;  %v1430_v29 = vsel %vm18168_vm1, %v1389_v54, %v1390_v38 }
 0x141   : > { %v1230_v55 = vrot.slane %v1198_v42, 7  ;;  %v1391_v43 = vrot.slane %v1198_v42, 1  ;;  %v15718_v4 = vpack.c.bf16 %v1198_v42, %v1197_v19  ;;  %12926 = vmatpush3.bf16.msra.mxu1 %v14982_v25  ;;  %v1131_v45 = vadd.f32 %v12661_v10, %v15577_v46  ;;  %v1122_v22 = vpop.f32.mrb[17].mxu0 }
 0x142   : > { %18446 = vst [vmem:[#allocation29_spill] sm:$0xff] %v15716_v47  ;;  %12927 = vmatprep.subr.bf16.mxu1 %v14984_v17  ;;  %v15723_v36 = vpack.c.bf16 %v1430_v29, %v1431_v62  ;;  %v1269_v39 = vsel %vm18169_vm2, %v1228_v61, %v1229_v13  ;;  %v1266_v18 = vsel %vm18169_vm2, %v1231_v34, %v1232_v35  ;;  %v12662_v42 = vpop.f32.mrb[18].mxu0 }
 0x143   : > { %18447 = vst [vmem:[#allocation30_spill] sm:$0xff] %v15718_v4  ;;  %v1123_v19 = vadd.f32 %v15577_v46, %v1122_v22  ;;  %12895 = vmatprep.mubr.bf16.mxu1 %v15718_v4  ;;  %v1268_v54 = vsel %vm18169_vm2, %v1229_v13, %v1230_v55  ;;  %v1428_v10 = vsel %vm18168_vm1, %v1391_v43, %v1392_v40  ;;  %v1203_v62 = vmax.f32 %v1131_v45, 0.0  ;;  %v1125_v29 = vpop.f32.mrb[19].mxu0 }
 0x144   : > { %v1429_v25 = vsel %vm18168_vm1, %v1390_v38, %v1391_v43  ;;  %v1134_v61 = vadd.f32 %v12662_v42, %v15577_v46  ;;  %12896 = vmatmul.mubr.bf16.gmra.mrb[12].mxu1 %v15716_v47  ;;  %v15739_v30 = vpack.c.bf16 %v1268_v54, %v1269_v39  ;;  %v1126_v26 = vadd.f32 %v15577_v46, %v1125_v29  ;;  %v15751_v42 = vld [vmem:[#allocation4 + $0x180] sm:$0xff]  }
 0x145   : > { %v15741_v22 = vpack.c.bf16 %v1428_v10, %v1429_v25  ;;  %v1201_v27 = vmax.f32 %v1123_v19, 0.0  ;;  %12928 = vmatpush3.bf16.msra.mxu1 %v14984_v17  ;;  %v1267_v13 = vsel %vm18169_vm2, %v1230_v55, %v1231_v34  ;;  %v1427_v43 = vsel %vm18168_vm1, %v1392_v40, %v1393_v12 }
 0x146   : > { %v15748_v38 = vmax.f32 %v1134_v61, 0.0  ;;  %12929 = vmatprep.subr.bf16.mxu1 %v14986_v28  ;;  %v15754_v39 = vadd.s32 24, %v15580_v52  ;;  %v15756_v19 = vpack.c.bf16 %v1266_v18, %v1267_v13  ;;  %v1235_v54 = vrot.slane %v1203_v62, 7 }
 0x147   : > { %v1233_v17 = vrot.slane %v1201_v27, 7  ;;  %v1394_v10 = vrot.slane %v1201_v27, 1  ;;  %v1202_v25 = vmax.f32 %v1126_v26, 0.0  ;;  %v1396_v34 = vrot.slane %v1203_v62, 1 }
 0x148   : > { %v1236_v55 = vrot.slane %v15748_v38, 7  ;;  %v1397_v40 = vrot.slane %v15748_v38, 1  ;;  %v15761_v61 = vpack.c.bf16 %v15748_v38, %v1203_v62  ;;  %v12665_v21 = vpop.f32.mrb[20].mxu0 }
 0x149   : > { %v1234_v29 = vrot.slane %v1202_v25, 7  ;;  %v1395_v45 = vrot.slane %v1202_v25, 1  ;;  %v15763_v20 = vpack.c.bf16 %v1202_v25, %v1201_v27  ;;  %12930 = vmatpush3.bf16.msra.mxu1 %v14986_v28  ;;  %v1426_v18 = vsel %vm18168_vm1, %v1393_v12, %v1394_v10  ;;  %v1138_v26 = vpop.f32.mrb[21].mxu0 }
 0x14a   : > { %18448 = vst [vmem:[#allocation31_spill] sm:$0xff] %v15761_v61  ;;  %v1147_v13 = vadd.f32 %v12665_v21, %v15577_v46  ;;  %12963 = vmatprep.subr.bf16.mxu1 %v15751_v42  ;;  %v15769_v15 = vpack.c.bf16 %v1426_v18, %v1427_v43  ;;  %v1265_v62 = vsel %vm18169_vm2, %v1232_v35, %v1233_v17  ;;  %v12666_v25 = vpop.f32.mrb[22].mxu0 }
 0x14b   : > { %18449 = vst [vmem:[#allocation32_spill] sm:$0xff] %v15763_v20  ;;  %v1262_v38 = vsel %vm18169_vm2, %v1235_v54, %v1236_v55  ;;  %v1139_v27 = vadd.f32 %v15577_v46, %v1138_v26  ;;  %12899 = vmatprep.mubr.bf16.mxu1 %v15763_v20  ;;  %v1264_v28 = vsel %vm18169_vm2, %v1233_v17, %v1234_v29  ;;  %v1141_v18 = vpop.f32.mrb[23].mxu0 }
 0x14c   : > { %v1424_v21 = vsel %vm18168_vm1, %v1395_v45, %v1396_v34  ;;  %v1425_v12 = vsel %vm18168_vm1, %v1394_v10, %v1395_v45  ;;  %v1207_v43 = vmax.f32 %v1147_v13, 0.0  ;;  %v1150_v35 = vadd.f32 %v12666_v25, %v15577_v46  ;;  %12900 = vmatmul.mubr.bf16.gmra.mrb[16].mxu1 %v15761_v61 }
 0x14d   : > { %v15785_v14 = vpack.c.bf16 %v1264_v28, %v1265_v62  ;;  %v15787_v26 = vpack.c.bf16 %v1424_v21, %v1425_v12  ;;  %v1205_v9 = vmax.f32 %v1139_v27, 0.0  ;;  %v1142_v8 = vadd.f32 %v15577_v46, %v1141_v18 }
 0x14e   : > { %v1263_v17 = vsel %vm18169_vm2, %v1234_v29, %v1235_v54  ;;  %v1423_v3 = vsel %vm18168_vm1, %v1396_v34, %v1397_v40  ;;  %v15794_v45 = vmax.f32 %v1150_v35, 0.0  ;;  %v15798_v13 = vadd.s32 32, %v15580_v52 }
 0x14f   : > { %18450 = vst [vmem:[#allocation33_spill] sm:$0xff] %v15787_v26  ;;  %v15800_v62 = vpack.c.bf16 %v1262_v38, %v1263_v17  ;;  %v1239_v25 = vrot.slane %v1207_v43, 7  ;;  %v1237_v28 = vrot.slane %v1205_v9, 7  ;;  %v1398_v27 = vrot.slane %v1205_v9, 1 }
 0x150   : > { %v1206_v21 = vmax.f32 %v1142_v8, 0.0  ;;  %v1400_v12 = vrot.slane %v1207_v43, 1  ;;  %v1240_v18 = vrot.slane %v15794_v45, 7  ;;  %v1401_v54 = vrot.slane %v15794_v45, 1  ;;  %v12669_v10 = vpop.f32.mrb[24].mxu0 }
 0x151   : > { %18451 = vst [vmem:[#allocation34_spill] sm:$0xff] %v15800_v62  ;;  %v15805_v34 = vpack.c.bf16 %v15794_v45, %v1207_v43  ;;  %v1422_v38 = vsel %vm18168_vm1, %v1397_v40, %v1398_v27  ;;  %v1163_v17 = vadd.f32 %v12669_v10, %v15577_v46  ;;  %v1154_v60 = vpop.f32.mrb[25].mxu0  ;;  %v1261_v59 = vsel %vm18169_vm2, %v1236_v55, %v1237_v28 }
 0x152   : > { %v1238_v29 = vrot.slane %v1206_v21, 7  ;;  %v1399_v35 = vrot.slane %v1206_v21, 1  ;;  %v15807_v2 = vpack.c.bf16 %v1206_v21, %v1205_v9  ;;  %v15812_v8 = vpack.c.bf16 %v1422_v38, %v1423_v3  ;;  %v12670_v51 = vpop.f32.mrb[26].mxu0 }
 0x153   : > { %18452 = vst [vmem:[#allocation35_spill] sm:$0xff] %v15805_v34  ;;  %v1258_v43 = vsel %vm18169_vm2, %v1239_v25, %v1240_v18  ;;  %v1155_v45 = vadd.f32 %v15577_v46, %v1154_v60  ;;  %v1211_v10 = vmax.f32 %v1163_v17, 0.0  ;;  %v1166_v55 = vadd.f32 %v12670_v51, %v15577_v46  ;;  %v1157_v21 = vpop.f32.mrb[27].mxu0 }
 0x154   : > { %18453 = vst [vmem:[#allocation36_spill] sm:$0xff] %v15807_v2  ;;  %12903 = vmatprep.mubr.bf16.mxu1 %v15807_v2  ;;  %v1260_v9 = vsel %vm18169_vm2, %v1237_v28, %v1238_v29  ;;  %v1420_v40 = vsel %vm18168_vm1, %v1399_v35, %v1400_v12  ;;  %v1421_v3 = vsel %vm18168_vm1, %v1398_v27, %v1399_v35  ;;  %v18455_v51 = vand.u32 15, %v15580_v52 }
 0x155   : > { %12904 = vmatmul.mubr.bf16.gmra.mrb[20].mxu1 %v15805_v34  ;;  %v15828_v38 = vpack.c.bf16 %v1260_v9, %v1261_v59  ;;  %v15830_v60 = vpack.c.bf16 %v1420_v40, %v1421_v3  ;;  %v1209_v50 = vmax.f32 %v1155_v45, 0.0  ;;  %v1158_v33 = vadd.f32 %v15577_v46, %v1157_v21 }
 0x156   : > { %v1259_v28 = vsel %vm18169_vm2, %v1238_v29, %v1239_v25  ;;  %v1419_v2 = vsel %vm18168_vm1, %v1400_v12, %v1401_v54  ;;  %v15837_v27 = vmax.f32 %v1166_v55, 0.0  ;;  %vm15841_vm3 = vcmp.ne.s32.totalorder %v18455_v51, 0 }
 0x157   : > { %18454 = vst [vmem:[#allocation37_spill] sm:$0xff] %v15830_v60  ;;  %v15846_v59 = vadd.s32 40, %v15580_v52  ;;  %v15849_v17 = vadd.s32 48, %v15580_v52  ;;  %v15851_v45 = vpack.c.bf16 %v1258_v43, %v1259_v28  ;;  %v1243_v25 = vrot.slane %v1211_v10, 7  ;;  %vm15917_vm8 = vmpackc.low %vm18238_vm7, %vm15841_vm3 }
 0x158   : > { %v1241_v29 = vrot.slane %v1209_v50, 7  ;;  %v1402_v9 = vrot.slane %v1209_v50, 1  ;;  %v1210_v12 = vmax.f32 %v1158_v33, 0.0  ;;  %v18458_v40 = vand.u32 15, %v15665_v48 }
 0x159   : > { %v1404_v55 = vrot.slane %v1211_v10, 1  ;;  %v1244_v21 = vrot.slane %v15837_v27, 7  ;;  %v1405_v51 = vrot.slane %v15837_v27, 1  ;;  %v15862_v34 = vpack.c.bf16 %v15837_v27, %v1211_v10 }
 0x15a   : > { %vm15855_vm4 = vcmp.ne.s32.totalorder %v18458_v40, 15  ;;  %v18462_v43 = vand.u32 15, %v15668_v49  ;;  %v1242_v33 = vrot.slane %v1210_v12, 7  ;;  %v1403_v48 = vrot.slane %v1210_v12, 1  ;;  %v12673_v40 = vpop.f32.mrb[28].mxu0 }
 0x15b   : > { %18461 = vst [vmem:[#allocation38_spill] sm:$0xff] %v15862_v34  ;;  %v15870_v61 = vpack.c.bf16 %v1210_v12, %v1209_v50  ;;  %v1418_v20 = vsel %vm18168_vm1, %v1401_v54, %v1402_v9  ;;  %v1179_v47 = vadd.f32 %v12673_v40, %v15577_v46  ;;  %v1170_v4 = vpop.f32.mrb[29].mxu0  ;;  %v1257_v49 = vsel %vm18169_vm2, %v1240_v18, %v1241_v29  ;;  %vm15930_vm9 = vmpackc.low %vm15855_vm4, %vm18238_vm7 }
 0x15c   : > { %vm15866_vm5 = vcmp.ne.s32.totalorder %v18462_v43, 0  ;;  %v15875_v11 = vpack.c.bf16 %v1418_v20, %v1419_v2  ;;  %v1254_v10 = vsel %vm18169_vm2, %v1243_v25, %v1244_v21  ;;  %v1171_v27 = vadd.f32 %v15577_v46, %v1170_v4  ;;  %v12674_v43 = vpop.f32.mrb[30].mxu0 }
 0x15d   : > { %18465 = vst [vmem:[#allocation39_spill] sm:$0xff] %v15870_v61  ;;  %12907 = vmatprep.mubr.bf16.mxu1 %v15870_v61  ;;  %v1256_v50 = vsel %vm18169_vm2, %v1241_v29, %v1242_v33  ;;  %v1416_v54 = vsel %vm18168_vm1, %v1403_v48, %v1404_v55  ;;  %v1417_v2 = vsel %vm18168_vm1, %v1402_v9, %v1403_v48  ;;  %v1215_v20 = vmax.f32 %v1179_v47, 0.0  ;;  %v1173_v12 = vpop.f32.mrb[31].mxu0  ;;  %vm15947_vm10 = vmpackc.low %vm18238_vm7, %vm15866_vm5 }
 0x15e   : > { %v1182_v18 = vadd.f32 %v12674_v43, %v15577_v46  ;;  %12908 = vmatmul.mubr.bf16.gmra.mrb[24].mxu1 %v15862_v34  ;;  %v15891_v40 = vpack.c.bf16 %v1256_v50, %v1257_v49  ;;  %v15893_v4 = vpack.c.bf16 %v1416_v54, %v1417_v2  ;;  %v1213_v61 = vmax.f32 %v1171_v27, 0.0 }
 0x15f   : > { %v1174_v23 = vadd.f32 %v15577_v46, %v1173_v12  ;;  %v18466_v29 = vand.u32 15, %v15754_v39  ;;  %v1255_v47 = vsel %vm18169_vm2, %v1242_v33, %v1243_v25  ;;  %v1415_v9 = vsel %vm18168_vm1, %v1404_v55, %v1405_v51 }
 0x160   : > { %v1216_v48 = vmax.f32 %v1182_v18, 0.0  ;;  %v306_v49 = vand.u32 15, %v15798_v13  ;;  %v313_v43 = vand.u32 15, %v15846_v59  ;;  %v15908_v27 = vpack.c.bf16 %v1254_v10, %v1255_v47  ;;  %v14989_v18 = vld [vmem:[#allocation4 + $0x48] sm:$0xff]  }
 0x161   : > { %vm15898_vm6 = vcmp.ne.s32.totalorder %v18466_v29, 15  ;;  %v1247_v46 = vrot.slane %v1215_v20, 7  ;;  %v1245_v50 = vrot.slane %v1213_v61, 7  ;;  %v1406_v39 = vrot.slane %v1213_v61, 1 }
 0x162   : > { %v1214_v54 = vmax.f32 %v1174_v23, 0.0  ;;  %v1408_v2 = vrot.slane %v1215_v20, 1  ;;  %v1248_v12 = vrot.slane %v1216_v48, 7  ;;  %v1409_v29 = vrot.slane %v1216_v48, 1  ;;  %vm15991_vm13 = vmpackc.low %vm15898_vm6, %vm18238_vm7 }
 0x163   : > { %v15910_v34 = vpack.c.bf16 %v1216_v48, %v1215_v20  ;;  %v18470_v13 = vmov 0  ;;  %v1414_v23 = vsel %vm18168_vm1, %v1405_v51, %v1406_v39  ;;  %v18473_v59 = vrot.slane %v15584_v58, 7 }
 0x164   : > { %v1246_v25 = vrot.slane %v1214_v54, 7  ;;  %v1407_v33 = vrot.slane %v1214_v54, 1  ;;  %v15912_v0 = vpack.c.bf16 %v1214_v54, %v1213_v61  ;;  %v18471_v13 = vsel %vm15917_vm8, 4294967295, %v18470_v13 }
 0x165   : > { %18469 = vst [vmem:[#allocation40_spill] sm:$0xff] %v15910_v34  ;;  %18472 = vst [vmem:[#allocation41_spill] sm:$0xff] %v18471_v13  ;;  %v1281_v55 = vsel %vm18169_vm2, %v1248_v12, %v18473_v59  ;;  %v18474_v61 = vmov 0  ;;  %v15934_v35 = vpack.c.bf16 %v1414_v23, %v1415_v9  ;;  %v1253_v10 = vsel %vm18169_vm2, %v1244_v21, %v1245_v50  ;;  %v14991_v59 = vld [vmem:[#allocation4 + $0x50] sm:$0xff]   ;;  %v15001_v13 = vld [vmem:[#allocation4 + $0x78] sm:$0xff]  }
 0x166   : > { %v18475_v61 = vsel %vm15930_vm9, 4294967295, %v18474_v61  ;;  %v1411_v51 = vsel %vm18168_vm1, %v1408_v2, %v1409_v29  ;;  %v15941_v20 = vpack.c.bf16 %v15605_v24, %v1281_v55  ;;  %12911 = vmatprep.mubr.bf16.mxu1 %v15912_v0  ;;  %v18478_v3 = vmov 0  ;;  %v14990_v55 = vld [vmem:[#allocation4 + $0x188] sm:$0xff]  }
 0x167   : > { %18476 = vst [vmem:[#allocation42_spill] sm:$0xff] %v18475_v61  ;;  %v18479_v3 = vsel %vm15947_vm10, 4294967295, %v18478_v3  ;;  %v1252_v47 = vsel %vm18169_vm2, %v1245_v50, %v1246_v25  ;;  %v1412_v21 = vsel %vm18168_vm1, %v1407_v33, %v1408_v2  ;;  %v1413_v24 = vsel %vm18168_vm1, %v1406_v39, %v1407_v33  ;;  %12912 = vmatmul.mubr.bf16.gmra.mrb[28].mxu1 %v15910_v34 }
 0x168   : > { %18477 = vst [vmem:[#allocation43_spill] sm:$0xff] %v15941_v20  ;;  %v320_v9 = vand.u32 15, %v15849_v17  ;;  %v15959_v28 = vpack.c.bf16 %v1252_v47, %v1253_v10  ;;  %v15961_v48 = vpack.c.bf16 %v1412_v21, %v1413_v24  ;;  %v18480_v54 = vrot.slane %v15584_v58, 1  ;;  %12692 = vmatmul.mubr.msk.bf16.vlgmr.msra.gmra.mrb[32].mxu0 %vm15917_vm8, %v15941_v20  ;;  %12931 = vmatprep.mubr.msk.bf16.mxu1 %vm15930_vm9, %v15617_v37  ;;  %v14993_v47 = vld [vmem:[#allocation4 + $0x58] sm:$0xff]   ;;  %v14992_v21 = vld [vmem:[#allocation4 + $0x190] sm:$0xff]   ;;  %v16105_v20 = vld [vmem:[#allocation4 + $0x80] sm:$0xff]  }
 0x169   : > { %v249_v50 = vadd.s32 56, %v15580_v52  ;;  %v1250_v39 = vsel %vm18169_vm2, %v1247_v46, %v1248_v12  ;;  %v1251_v58 = vsel %vm18169_vm2, %v1246_v25, %v1247_v46  ;;  %12695 = vmatprep.mubr.msk.bf16.mxu0 %vm15947_vm10, %v15623_v41  ;;  %12724 = vmatpush3.bf16.msra.mxu0 %v15571_v44  ;;  %vm662_vm11 = vcmp.ne.s32.totalorder %v306_v49, 0 }
 0x16a   : > { %v1442_v23 = vsel %vm18168_vm1, %v1409_v29, %v18480_v54  ;;  %v250_v2 = vadd.s32 64, %v15580_v52  ;;  %v15985_v29 = vpack.c.bf16 %v1250_v39, %v1251_v58  ;;  %vm695_vm12 = vcmp.ne.s32.totalorder %v313_v43, 15  ;;  %12725 = vmatprep.subr.bf16.mxu0 %v14989_v18  ;;  %vm15997_vm15 = vmpackc.low %vm18238_vm7, %vm662_vm11 }
 0x16b   : > { %v15974_v17 = vpack.c.bf16 %v1442_v23, %v1411_v51  ;;  %v251_v33 = vadd.s32 72, %v15580_v52  ;;  %v18482_v46 = vmov 0  ;;  %vm664_vm14 = vcmp.ne.s32.totalorder %v320_v9, 0  ;;  %vm16002_vm0 = vmpackc.low %vm695_vm12, %vm18238_vm7  ;;  %v14995_v23 = vld [vmem:[#allocation4 + $0x60] sm:$0xff]  }
 0x16c   : > { %v18483_v46 = vsel %vm15991_vm13, 4294967295, %v18482_v46  ;;  %v252_v44 = vadd.s32 80, %v15580_v52  ;;  %v18485_v49 = vmov 0  ;;  %v327_v43 = vand.u32 15, %v249_v50  ;;  %vm16007_vm3 = vmpackc.low %vm18238_vm7, %vm664_vm14 }
 0x16d   : > { %18481 = vst [vmem:[#allocation44_spill] sm:$0xff] %v15974_v17  ;;  %18484 = vst [vmem:[#allocation45_spill] sm:$0xff] %v18483_v46  ;;  %v18486_v49 = vsel %vm15997_vm15, 4294967295, %v18485_v49  ;;  %v18488_v12 = vmov 0  ;;  %12726 = vmatpush3.bf16.msra.mxu0 %v14989_v18  ;;  %v334_v57 = vand.u32 15, %v250_v2  ;;  %v18491_v25 = vmov 0 }
 0x16e   : > { %18487 = vst [vmem:[#allocation46_spill] sm:$0xff] %v18486_v49  ;;  %v18489_v12 = vsel %vm16002_vm0, 4294967295, %v18488_v12  ;;  %v18492_v25 = vsel %vm16007_vm3, 4294967295, %v18491_v25  ;;  %v341_v10 = vand.u32 15, %v251_v33  ;;  %12727 = vmatprep.subr.bf16.mxu0 %v14991_v59  ;;  %v348_v51 = vand.u32 15, %v252_v44  ;;  %v14994_v44 = vld [vmem:[#allocation4 + $0x198] sm:$0xff]  }
 0x16f   : > { %18490 = vst [vmem:[#allocation47_spill] sm:$0xff] %v18489_v12  ;;  %18493 = vst [vmem:[#allocation48_spill] sm:$0xff] %v18492_v25  ;;  %12932 = vmatmul.mubr.msk.bf16.vlgmr.msra.gmra.mrb[0].mxu1 %vm15991_vm13, %v15636_v1  ;;  %vm697_vm4 = vcmp.ne.s32.totalorder %v327_v43, 15  ;;  %v253_v18 = vadd.s32 88, %v15580_v52  ;;  %vm666_vm5 = vcmp.ne.s32.totalorder %v334_v57, 0  ;;  %v254_v24 = vadd.s32 96, %v15580_v52 }
 0x170   : > { %12964 = vmatpush3.bf16.msra.mxu1 %v15751_v42  ;;  %12696 = vmatmul.mubr.msk.bf16.gmra.mrb[36].mxu0 %vm15997_vm15, %v15653_v31  ;;  %vm699_vm6 = vcmp.ne.s32.totalorder %v341_v10, 15  ;;  %v255_v42 = vadd.s32 104, %v15580_v52  ;;  %vm16028_vm11 = vmpackc.low %vm697_vm4, %vm18238_vm7  ;;  %v18494_v9 = vmov 0  ;;  %vm668_vm12 = vcmp.ne.s32.totalorder %v348_v51, 0  ;;  %v14997_v57 = vld [vmem:[#allocation4 + $0x68] sm:$0xff]   ;;  %v15010_v49 = vld [vmem:[#allocation4 + $0x1d8] sm:$0xff]  }
 0x171   : > { %12935 = vmatprep.mubr.msk.bf16.mxu1 %vm16002_vm0, %v15655_v32  ;;  %12699 = vmatprep.mubr.msk.bf16.mxu0 %vm16007_vm3, %v15670_v53  ;;  %v18495_v9 = vsel %vm16028_vm11, 4294967295, %v18494_v9  ;;  %v256_v54 = vadd.s32 112, %v15580_v52  ;;  %vm16034_vm14 = vmpackc.low %vm18238_vm7, %vm666_vm5  ;;  %v18497_v50 = vmov 0  ;;  %v355_v39 = vand.u32 15, %v253_v18  ;;  %v18564_v25 = vld [vmem:[#allocation27_spill] sm:$0xff] }
 0x172   : > { %12965 = vmatprep.subr.bf16.mxu1 %v14990_v55  ;;  %12728 = vmatpush3.bf16.msra.mxu0 %v14991_v59  ;;  %18496 = vst [vmem:[#allocation49_spill] sm:$0xff] %v18495_v9  ;;  %v18498_v50 = vsel %vm16034_vm14, 4294967295, %v18497_v50  ;;  %vm16039_vm1 = vmpackc.low %vm699_vm6, %vm18238_vm7  ;;  %v18500_v58 = vmov 0  ;;  %v362_v2 = vand.u32 15, %v254_v24  ;;  %v18503_v33 = vmov 0 }
 0x173   : > { %12729 = vmatprep.subr.bf16.mxu0 %v14993_v47  ;;  %18499 = vst [vmem:[#allocation50_spill] sm:$0xff] %v18498_v50  ;;  %v18501_v58 = vsel %vm16039_vm1, 4294967295, %v18500_v58  ;;  %vm16044_vm4 = vmpackc.low %vm18238_vm7, %vm668_vm12  ;;  %v369_v59 = vand.u32 15, %v255_v42  ;;  %v376_v43 = vand.u32 15, %v256_v54  ;;  %vm701_vm5 = vcmp.ne.s32.totalorder %v355_v39, 15  ;;  %v14999_v42 = vld [vmem:[#allocation4 + $0x70] sm:$0xff]  }
 0x174   : > { %12966 = vmatpush3.bf16.msra.mxu1 %v14990_v55  ;;  %18502 = vst [vmem:[#allocation51_spill] sm:$0xff] %v18501_v58  ;;  %v18504_v33 = vsel %vm16044_vm4, 4294967295, %v18503_v33  ;;  %v257_v55 = vadd.s32 120, %v15580_v52  ;;  %vm670_vm6 = vcmp.ne.s32.totalorder %v362_v2, 0  ;;  %v258_v10 = vadd.s32 128, %v15580_v52  ;;  %vm16064_vm2 = vmpackc.low %vm701_vm5, %vm18238_vm7  ;;  %v15017_v50 = vld [vmem:[#allocation4 + $0xb8] sm:$0xff]  }
 0x175   : > { %12967 = vmatprep.subr.bf16.mxu1 %v14992_v21  ;;  %18505 = vst [vmem:[#allocation52_spill] sm:$0xff] %v18504_v33  ;;  %vm703_vm12 = vcmp.ne.s32.totalorder %v369_v59, 15  ;;  %v259_v51 = vadd.s32 136, %v15580_v52  ;;  %v18506_v18 = vmov 0  ;;  %vm672_vm8 = vcmp.ne.s32.totalorder %v376_v43, 0  ;;  %v14998_v43 = vld [vmem:[#allocation4 + $0x1a8] sm:$0xff]  }
 0x176   : > { %12730 = vmatpush3.bf16.msra.mxu0 %v14993_v47  ;;  %v14996_v47 = vld [vmem:[#allocation4 + $0x1a0] sm:$0xff]   ;;  %v18507_v18 = vsel %vm16064_vm2, 4294967295, %v18506_v18  ;;  %v260_v24 = vadd.s32 144, %v15580_v52  ;;  %v383_v54 = vand.u32 15, %v257_v55  ;;  %v390_v39 = vand.u32 15, %v258_v10  ;;  %vm16080_vm5 = vmpackc.low %vm18238_vm7, %vm672_vm8  ;;  %v18565_v33 = vld [vmem:[#allocation30_spill] sm:$0xff] }
 0x177   : > { %12936 = vmatmul.mubr.msk.bf16.gmra.mrb[4].mxu1 %vm16028_vm11, %v15682_v5  ;;  %12731 = vmatprep.subr.bf16.mxu0 %v14995_v23  ;;  %18508 = vst [vmem:[#allocation53_spill] sm:$0xff] %v18507_v18  ;;  %vm16075_vm11 = vmpackc.low %vm703_vm12, %vm18238_vm7  ;;  %v18515_v2 = vmov 0  ;;  %v397_v59 = vand.u32 15, %v259_v51  ;;  %v263_v10 = vadd.s32 168, %v15580_v52  ;;  %v15000_v51 = vld [vmem:[#allocation4 + $0x1b0] sm:$0xff]  }
 0x178   : > { %12700 = vmatmul.mubr.msk.bf16.gmra.mrb[40].mxu0 %vm16034_vm14, %v15698_v63  ;;  %12939 = vmatprep.mubr.msk.bf16.mxu1 %vm16039_vm1, %v15700_v6  ;;  %vm16070_vm1 = vmpackc.low %vm18238_vm7, %vm670_vm6  ;;  %v18516_v2 = vsel %vm16080_vm5, 4294967295, %v18515_v2  ;;  %v404_v55 = vand.u32 15, %v260_v24  ;;  %vm705_vm8 = vcmp.ne.s32.totalorder %v383_v54, 15  ;;  %vm674_vm6 = vcmp.ne.s32.totalorder %v390_v39, 0 }
 0x179   : > { %12703 = vmatprep.mubr.msk.bf16.mxu0 %vm16044_vm4, %v15711_v56  ;;  %12968 = vmatpush3.bf16.msra.mxu1 %v14992_v21  ;;  %v18509_v21 = vmov 0  ;;  %vm707_vm12 = vcmp.ne.s32.totalorder %v397_v59, 15  ;;  %v18517_v24 = vmov 0  ;;  %v264_v54 = vadd.s32 176, %v15580_v52  ;;  %vm16108_vm0 = vmpackc.low %vm18238_vm7, %vm674_vm6 }
 0x17a   : > { %12969 = vmatprep.subr.bf16.mxu1 %v14994_v44  ;;  %12732 = vmatpush3.bf16.msra.mxu0 %v14995_v23  ;;  %v18510_v21 = vsel %vm16070_vm1, 4294967295, %v18509_v21  ;;  %v18512_v23 = vmov 0  ;;  %vm16113_vm13 = vmpackc.low %vm707_vm12, %vm18238_vm7  ;;  %v425_v34 = vand.u32 15, %v263_v10  ;;  %v15004_v10 = vld [vmem:[#allocation4 + $0x1c0] sm:$0xff]  }
 0x17b   : > { %12733 = vmatprep.subr.bf16.mxu0 %v14997_v57  ;;  %18511 = vst [vmem:[#allocation54_spill] sm:$0xff] %v18510_v21  ;;  %v18513_v23 = vsel %vm16075_vm11, 4294967295, %v18512_v23  ;;  %v18568_v21 = vld [vmem:[#allocation32_spill] sm:$0xff] }
 0x17c   : > { %18514 = vst [vmem:[#allocation55_spill] sm:$0xff] %v18513_v23  ;;  %v15002_v23 = vld [vmem:[#allocation4 + $0x1b8] sm:$0xff]   ;;  %vm711_vm12 = vcmp.ne.s32.totalorder %v425_v34, 15  ;;  %v18533_v34 = vmov 0 }
 0x17d   : > { %12970 = vmatpush3.bf16.msra.mxu1 %v14994_v44  ;;  %v261_v44 = vadd.s32 152, %v15580_v52 }
 0x17e   : > { %12971 = vmatprep.subr.bf16.mxu1 %v14996_v47  ;;  %12734 = vmatpush3.bf16.msra.mxu0 %v14997_v57  ;;  %v262_v57 = vadd.s32 160, %v15580_v52 }
 0x17f   : > { %12940 = vmatmul.mubr.msk.bf16.gmra.mrb[8].mxu1 %vm16064_vm2, %v15723_v36  ;;  %12735 = vmatprep.subr.bf16.mxu0 %v14999_v42  ;;  %vm16100_vm2 = vmpackc.low %vm705_vm8, %vm18238_vm7  ;;  %v411_v39 = vand.u32 15, %v261_v44  ;;  %v432_v44 = vand.u32 15, %v264_v54  ;;  %v18528_v54 = vmov 0 }
 0x180   : > { %12704 = vmatmul.mubr.msk.bf16.gmra.mrb[44].mxu0 %vm16070_vm1, %v15739_v30  ;;  %12943 = vmatprep.mubr.msk.bf16.mxu1 %vm16075_vm11, %v15741_v22  ;;  %v18518_v24 = vsel %vm16100_vm2, 4294967295, %v18517_v24  ;;  %vm676_vm11 = vcmp.ne.s32.totalorder %v404_v55, 0  ;;  %v418_v59 = vand.u32 15, %v262_v57  ;;  %v18525_v55 = vmov 0 }
 0x181   : > { %12707 = vmatprep.mubr.msk.bf16.mxu0 %vm16080_vm5, %v15756_v19  ;;  %12972 = vmatpush3.bf16.msra.mxu1 %v14996_v47  ;;  %18519 = vst [vmem:[#allocation56_spill] sm:$0xff] %v18518_v24  ;;  %v18520_v47 = vmov 0  ;;  %vm16118_vm8 = vmpackc.low %vm18238_vm7, %vm676_vm11  ;;  %vm709_vm11 = vcmp.ne.s32.totalorder %v411_v39, 15  ;;  %v267_v57 = vadd.s32 200, %v15580_v52  ;;  %v268_v39 = vadd.s32 208, %v15580_v52 }
 0x182   : > { %12973 = vmatprep.subr.bf16.mxu1 %v14998_v43  ;;  %12736 = vmatpush3.bf16.msra.mxu0 %v14999_v42  ;;  %v18521_v47 = vsel %vm16108_vm0, 4294967295, %v18520_v47  ;;  %v18522_v42 = vmov 0  ;;  %v18526_v55 = vsel %vm16118_vm8, 4294967295, %v18525_v55  ;;  %vm678_vm6 = vcmp.ne.s32.totalorder %v418_v59, 0 }
 0x183   : > { %12737 = vmatprep.subr.bf16.mxu0 %v15001_v13  ;;  %v18523_v42 = vsel %vm16113_vm13, 4294967295, %v18522_v42  ;;  %18527 = vst [vmem:[#allocation58_spill] sm:$0xff] %v18526_v55  ;;  %vm16145_vm9 = vmpackc.low %vm18238_vm7, %vm678_vm6  ;;  %v460_v24 = vand.u32 15, %v268_v39  ;;  %v18542_v39 = vmov 0 }
 0x184   : > { %18524 = vst [vmem:[#allocation57_spill] sm:$0xff] %v18523_v42  ;;  %v18531_v42 = vmov 0 }
 0x185   : > { %12974 = vmatpush3.bf16.msra.mxu1 %v14998_v43  ;;  %v265_v43 = vadd.s32 184, %v15580_v52  ;;  %v18532_v42 = vsel %vm16145_vm9, 4294967295, %v18531_v42 }
 0x186   : > { %12975 = vmatprep.subr.bf16.mxu1 %v15000_v51  ;;  %12738 = vmatpush3.bf16.msra.mxu0 %v15001_v13  ;;  %v266_v13 = vadd.s32 192, %v15580_v52 }
 0x187   : > { %12944 = vmatmul.mubr.msk.bf16.gmra.mrb[12].mxu1 %vm16100_vm2, %v15769_v15  ;;  %12771 = vmatprep.subr.bf16.mxu0 %v16105_v20  ;;  %vm16139_vm2 = vmpackc.low %vm709_vm11, %vm18238_vm7  ;;  %v439_v59 = vand.u32 15, %v265_v43  ;;  %v270_v43 = vadd.s32 224, %v15580_v52 }
 0x188   : > { %12708 = vmatmul.mubr.msk.bf16.gmra.mrb[48].mxu0 %vm16108_vm0, %v15785_v14  ;;  %12947 = vmatprep.mubr.msk.bf16.mxu1 %vm16113_vm13, %v15787_v26  ;;  %v18529_v54 = vsel %vm16139_vm2, 4294967295, %v18528_v54  ;;  %vm680_vm13 = vcmp.ne.s32.totalorder %v432_v44, 0  ;;  %v18536_v26 = vmov 0  ;;  %v453_v44 = vand.u32 15, %v267_v57 }
 0x189   : > { %12711 = vmatprep.mubr.msk.bf16.mxu0 %vm16118_vm8, %v15800_v62  ;;  %12976 = vmatpush3.bf16.msra.mxu1 %v15000_v51  ;;  %18530 = vst [vmem:[#allocation59_spill] sm:$0xff] %v18529_v54  ;;  %vm16150_vm8 = vmpackc.low %vm711_vm12, %vm18238_vm7  ;;  %v446_v51 = vand.u32 15, %v266_v13  ;;  %vm713_vm6 = vcmp.ne.s32.totalorder %v439_v59, 15  ;;  %v271_v13 = vadd.s32 232, %v15580_v52  ;;  %v18539_v57 = vmov 0 }
 0x18a   : > { %12977 = vmatprep.subr.bf16.mxu1 %v15002_v23  ;;  %v18534_v34 = vsel %vm16150_vm8, 4294967295, %v18533_v34  ;;  %vm16155_vm11 = vmpackc.low %vm18238_vm7, %vm680_vm13  ;;  %vm715_vm12 = vcmp.ne.s32.totalorder %v453_v44, 15  ;;  %v474_v44 = vand.u32 15, %v270_v43  ;;  %v18552_v43 = vmov 0 }
 0x18b   : > { %18535 = vst [vmem:[#allocation60_spill] sm:$0xff] %v18534_v34  ;;  %v18537_v26 = vsel %vm16155_vm11, 4294967295, %v18536_v26  ;;  %vm682_vm13 = vcmp.ne.s32.totalorder %v446_v51, 0  ;;  %v18544_v51 = vmov 0  ;;  %v18547_v34 = vmov 0 }
 0x18c   : > { %18538 = vst [vmem:[#allocation61_spill] sm:$0xff] %v18537_v26 }
 0x18d   : > { %12978 = vmatpush3.bf16.msra.mxu1 %v15002_v23  ;;  %v269_v23 = vadd.s32 216, %v15580_v52 }
 0x18e   : > { %13011 = vmatprep.subr.bf16.mxu1 %v15004_v10 }
 0x18f   : > { %12948 = vmatmul.mubr.msk.bf16.gmra.mrb[16].mxu1 %vm16139_vm2, %v15812_v8  ;;  %vm16175_vm2 = vmpackc.low %vm713_vm6, %vm18238_vm7  ;;  %v467_v59 = vand.u32 15, %v269_v23  ;;  %v18549_v23 = vmov 0 }
 0x190   : > { %12712 = vmatmul.mubr.msk.bf16.gmra.mrb[52].mxu0 %vm16145_vm9, %v15828_v38  ;;  %12951 = vmatprep.mubr.msk.bf16.mxu1 %vm16150_vm8, %v15830_v60  ;;  %v18540_v57 = vsel %vm16175_vm2, 4294967295, %v18539_v57  ;;  %vm684_vm9 = vcmp.ne.s32.totalorder %v460_v24, 0  ;;  %vm16180_vm8 = vmpackc.low %vm18238_vm7, %vm682_vm13  ;;  %v481_v60 = vand.u32 15, %v271_v13  ;;  %v273_v24 = vadd.s32 248, %v15580_v52 }
 0x191   : > { %12715 = vmatprep.mubr.msk.bf16.mxu0 %vm16155_vm11, %v15851_v45  ;;  %18541 = vst [vmem:[#allocation62_spill] sm:$0xff] %v18540_v57  ;;  %v18543_v39 = vsel %vm16180_vm8, 4294967295, %v18542_v39  ;;  %vm16185_vm11 = vmpackc.low %vm715_vm12, %vm18238_vm7  ;;  %vm717_vm6 = vcmp.ne.s32.totalorder %v467_v59, 15  ;;  %v18554_v13 = vmov 0 }
 0x192   : > { %v18545_v51 = vsel %vm16185_vm11, 4294967295, %v18544_v51  ;;  %vm16190_vm0 = vmpackc.low %vm18238_vm7, %vm684_vm9  ;;  %vm686_vm9 = vcmp.ne.s32.totalorder %v474_v44, 0  ;;  %vm719_vm13 = vcmp.ne.s32.totalorder %v481_v60, 15  ;;  %v495_v59 = vand.u32 15, %v273_v24  ;;  %v15005_v24 = vld [vmem:[#allocation4 + $0x88] sm:$0xff]  }
 0x193   : > { %18546 = vst [vmem:[#allocation63_spill] sm:$0xff] %v18545_v51  ;;  %v18548_v34 = vsel %vm16190_vm0, 4294967295, %v18547_v34  ;;  %vm16208_vm12 = vmpackc.low %vm717_vm6, %vm18238_vm7  ;;  %v18557_v60 = vmov 0   ;;  %v18558_v44 = vmov 0 }
 0x194   : > { %v18550_v23 = vsel %vm16208_vm12, 4294967295, %v18549_v23  ;;  %vm721_vm6 = vcmp.ne.s32.totalorder %v495_v59, 15  ;;  %v15007_v59 = vld [vmem:[#allocation4 + $0x90] sm:$0xff]  }
 0x195   : > { %18551 = vst [vmem:[#allocation64_spill] sm:$0xff] %v18550_v23 }
 0x197   : > { %12952 = vmatmul.mubr.msk.bf16.gmra.mrb[20].mxu1 %vm16175_vm2, %v15875_v11  ;;  %vm16213_vm2 = vmpackc.low %vm18238_vm7, %vm686_vm9 }
 0x198   : > { %12716 = vmatmul.mubr.msk.bf16.gmra.mrb[56].mxu0 %vm16180_vm8, %v15891_v40  ;;  %12955 = vmatprep.mubr.msk.bf16.mxu1 %vm16185_vm11, %v15893_v4  ;;  %v18553_v43 = vsel %vm16213_vm2, 4294967295, %v18552_v43  ;;  %vm16218_vm11 = vmpackc.low %vm719_vm13, %vm18238_vm7  ;;  %vm18567_vm13 = vnez %v18521_v47 }
 0x199   : > { %12719 = vmatprep.mubr.msk.bf16.mxu0 %vm16190_vm0, %v15908_v27  ;;  %v18555_v13 = vsel %vm16218_vm11, 4294967295, %v18554_v13  ;;  %vm16233_vm9 = vmpackc.low %vm721_vm6, %vm18238_vm7  ;;  %vm18569_vm6 = vnez %v18526_v55  ;;  %vm18571_vm7 = vnez %v18532_v42  ;;  %v272_v55 = vadd.s32 240, %v15580_v52  ;;  %v15022_v52 = vld [vmem:[#allocation4 + $0x208] sm:$0xff]  }
 0x19a   : > { %18556 = vst [vmem:[#allocation65_spill] sm:$0xff] %v18555_v13  ;;  %v18559_v44 = vsel %vm16233_vm9, 4294967295, %v18558_v44  ;;  %v15006_v13 = vld [vmem:[#allocation4 + $0x1c8] sm:$0xff]  }
 0x19b   : > { %18560 = vst [vmem:[#allocation66_spill] sm:$0xff] %v18559_v44  ;;  %v15009_v44 = vld [vmem:[#allocation4 + $0x98] sm:$0xff]  }
 0x19f   : > { %12956 = vmatmul.mubr.msk.bf16.gmra.mrb[24].mxu1 %vm16208_vm12, %v15934_v35 }
 0x1a0   : > { %12720 = vmatmul.mubr.msk.bf16.gmra.mrb[60].mxu0 %vm16213_vm2, %v15959_v28  ;;  %12959 = vmatprep.mubr.msk.bf16.mxu1 %vm16218_vm11, %v15961_v48 }
 0x1a1   : > { %12739 = vmatprep.mubr.bf16.mxu0 %v18557_v60 }
 0x1a7   : > { %12960 = vmatmul.mubr.msk.bf16.gmra.mrb[28].mxu1 %vm16233_vm9, %v15974_v17  ;;  %v18562_v17 = vld [vmem:[#allocation24_spill] sm:$0xff]  ;;  %vm18573_vm9 = vnez %v18537_v26  ;;  %v18578_v26 = vmov 0 }
 0x1a8   : > { %12740 = vmatmul.mubr.bf16.vlgmr.msra.gmra.mrb[32].mxu0 %v15594_v16  ;;  %12979 = vmatprep.mubr.msk.bf16.mxu1 %vm15947_vm10, %v15623_v41  ;;  %v18561_v16 = vld [vmem:[#allocation25_spill] sm:$0xff] }
 0x1a9   : > { %12743 = vmatprep.mubr.bf16.mxu0 %v15590_v7  ;;  %12772 = vmatpush3.bf16.msra.mxu0 %v16105_v20  ;;  %v15008_v20 = vld [vmem:[#allocation4 + $0x1d0] sm:$0xff]  }
 0x1aa   : > { %12773 = vmatprep.subr.bf16.mxu0 %v15005_v24 }
 0x1ad   : > { %12774 = vmatpush3.bf16.msra.mxu0 %v15005_v24  ;;  %v15011_v24 = vld [vmem:[#allocation4 + $0xa0] sm:$0xff]  }
 0x1ae   : > { %12775 = vmatprep.subr.bf16.mxu0 %v15007_v59 }
 0x1af   : > { %12980 = vmatmul.mubr.msk.bf16.vlgmr.msra.gmra.mrb[0].mxu1 %vm15997_vm15, %v15653_v31  ;;  %v18563_v31 = vld [vmem:[#allocation28_spill] sm:$0xff] }
 0x1b0   : > { %13012 = vmatpush3.bf16.msra.mxu1 %v15004_v10  ;;  %12744 = vmatmul.mubr.bf16.gmra.mrb[36].mxu0 %v18561_v16  ;;  %v15013_v10 = vld [vmem:[#allocation4 + $0xa8] sm:$0xff]  }
 0x1b1   : > { %12983 = vmatprep.mubr.msk.bf16.mxu1 %vm16007_vm3, %v15670_v53  ;;  %12747 = vmatprep.mubr.bf16.mxu0 %v18562_v17 }
 0x1b2   : > { %13013 = vmatprep.subr.bf16.mxu1 %v15006_v13  ;;  %12776 = vmatpush3.bf16.msra.mxu0 %v15007_v59  ;;  %v15014_v59 = vld [vmem:[#allocation4 + $0x1e8] sm:$0xff]  }
 0x1b3   : > { %12777 = vmatprep.subr.bf16.mxu0 %v15009_v44 }
 0x1b4   : > { %13014 = vmatpush3.bf16.msra.mxu1 %v15006_v13  ;;  %v15012_v13 = vld [vmem:[#allocation4 + $0x1e0] sm:$0xff]  }
 0x1b5   : > { %13015 = vmatprep.subr.bf16.mxu1 %v15008_v20 }
 0x1b6   : > { %12778 = vmatpush3.bf16.msra.mxu0 %v15009_v44  ;;  %v15015_v44 = vld [vmem:[#allocation4 + $0xb0] sm:$0xff]  }
 0x1b7   : > { %12984 = vmatmul.mubr.msk.bf16.gmra.mrb[4].mxu1 %vm16034_vm14, %v15698_v63  ;;  %12779 = vmatprep.subr.bf16.mxu0 %v15011_v24 }
 0x1b8   : > { %12748 = vmatmul.mubr.bf16.gmra.mrb[40].mxu0 %v18563_v31  ;;  %12987 = vmatprep.mubr.msk.bf16.mxu1 %vm16044_vm4, %v15711_v56 }
 0x1b9   : > { %12751 = vmatprep.mubr.bf16.mxu0 %v18564_v25  ;;  %13016 = vmatpush3.bf16.msra.mxu1 %v15008_v20  ;;  %v18566_v20 = vld [vmem:[#allocation29_spill] sm:$0xff] }
 0x1ba   : > { %13017 = vmatprep.subr.bf16.mxu1 %v15010_v49  ;;  %12780 = vmatpush3.bf16.msra.mxu0 %v15011_v24  ;;  %v15019_v24 = vld [vmem:[#allocation4 + $0xc0] sm:$0xff]  }
 0x1bb   : > { %12781 = vmatprep.subr.bf16.mxu0 %v15013_v10 }
 0x1bd   : > { %13018 = vmatpush3.bf16.msra.mxu1 %v15010_v49  ;;  %v15016_v49 = vld [vmem:[#allocation4 + $0x1f0] sm:$0xff]  }
 0x1be   : > { %13019 = vmatprep.subr.bf16.mxu1 %v15012_v13  ;;  %12782 = vmatpush3.bf16.msra.mxu0 %v15013_v10  ;;  %v15018_v10 = vld [vmem:[#allocation4 + $0x1f8] sm:$0xff]  }
 0x1bf   : > { %12988 = vmatmul.mubr.msk.bf16.gmra.mrb[8].mxu1 %vm16070_vm1, %v15739_v30  ;;  %12783 = vmatprep.subr.bf16.mxu0 %v15015_v44 }
 0x1c0   : > { %12752 = vmatmul.mubr.bf16.gmra.mrb[44].mxu0 %v18565_v33  ;;  %12991 = vmatprep.mubr.msk.bf16.mxu1 %vm16080_vm5, %v15756_v19 }
 0x1c1   : > { %12755 = vmatprep.mubr.bf16.mxu0 %v18566_v20  ;;  %13020 = vmatpush3.bf16.msra.mxu1 %v15012_v13  ;;  %v18570_v13 = vld [vmem:[#allocation31_spill] sm:$0xff] }
 0x1c2   : > { %13021 = vmatprep.subr.bf16.mxu1 %v15014_v59  ;;  %12784 = vmatpush3.bf16.msra.mxu0 %v15015_v44  ;;  %v15020_v44 = vld [vmem:[#allocation4 + $0x200] sm:$0xff]  }
 0x1c3   : > { %12785 = vmatprep.subr.bf16.mxu0 %v15017_v50 }
 0x1c5   : > { %13022 = vmatpush3.bf16.msra.mxu1 %v15014_v59  ;;  %v18574_v59 = vld [vmem:[#allocation35_spill] sm:$0xff] }
 0x1c6   : > { %13023 = vmatprep.subr.bf16.mxu1 %v15016_v49  ;;  %12786 = vmatpush3.bf16.msra.mxu0 %v15017_v50  ;;  %v18572_v50 = vld [vmem:[#allocation36_spill] sm:$0xff] }
 0x1c7   : > { %12992 = vmatmul.mubr.msk.bf16.gmra.mrb[12].mxu1 %vm18567_vm13, %v15785_v14  ;;  %12819 = vmatprep.subr.bf16.mxu0 %v15019_v24 }
 0x1c8   : > { %12756 = vmatmul.mubr.bf16.gmra.mrb[48].mxu0 %v18568_v21  ;;  %12995 = vmatprep.mubr.msk.bf16.mxu1 %vm18569_vm6, %v15800_v62  ;;  %v488_v62 = vand.u32 15, %v272_v55  ;;  %vm18577_vm6 = vmmov 1   ;;  %v15021_v55 = vld [vmem:[#allocation4 + $0xc8] sm:$0xff]  }
 0x1c9   : > { %12759 = vmatprep.mubr.bf16.mxu0 %v18570_v13  ;;  %13024 = vmatpush3.bf16.msra.mxu1 %v15016_v49  ;;  %v18575_v49 = vld [vmem:[#allocation39_spill] sm:$0xff] }
 0x1ca   : > { %13025 = vmatprep.subr.bf16.mxu1 %v15018_v10 }
 0x1cd   : > { %13026 = vmatpush3.bf16.msra.mxu1 %v15018_v10  ;;  %v18576_v10 = vld [vmem:[#allocation38_spill] sm:$0xff] }
 0x1ce   : > { %13059 = vmatprep.subr.bf16.mxu1 %v15020_v44 }
 0x1cf   : > { %12996 = vmatmul.mubr.msk.bf16.gmra.mrb[16].mxu1 %vm18571_vm7, %v15828_v38  ;;  %vm688_vm7 = vcmp.ne.s32.totalorder %v488_v62, 0  ;;  %v15023_v62 = vld [vmem:[#allocation4 + $0xd0] sm:$0xff]  }
 0x1d0   : > { %12760 = vmatmul.mubr.bf16.gmra.mrb[52].mxu0 %v18572_v50  ;;  %12999 = vmatprep.mubr.msk.bf16.mxu1 %vm18573_vm9, %v15851_v45  ;;  %vm16296_vm9 = vmpackc.low %vm18577_vm6, %vm688_vm7  ;;  %vm18581_vm7 = vnez %v18475_v61  ;;  %vm18582_vm6 = vnez %v18483_v46 }
 0x1d1   : > { %12763 = vmatprep.mubr.bf16.mxu0 %v18574_v59  ;;  %v18579_v26 = vsel %vm16296_vm9, 4294967295, %v18578_v26 }
 0x1d2   : > { %18580 = vst [vmem:[#allocation25_spill] sm:$0xff] %v18579_v26  ;;  %v15025_v26 = vld [vmem:[#allocation4 + $0xd8] sm:$0xff]  }
 0x1d7   : > { %13000 = vmatmul.mubr.msk.bf16.gmra.mrb[20].mxu1 %vm16180_vm8, %v15891_v40 }
 0x1d8   : > { %12764 = vmatmul.mubr.bf16.gmra.mrb[56].mxu0 %v18575_v49  ;;  %13003 = vmatprep.mubr.msk.bf16.mxu1 %vm16190_vm0, %v15908_v27  ;;  %vm18586_vm0 = vnez %v18507_v18 }
 0x1d9   : > { %12767 = vmatprep.mubr.bf16.mxu0 %v18576_v10 }
 0x1df   : > { %13004 = vmatmul.mubr.msk.bf16.gmra.mrb[24].mxu1 %vm16213_vm2, %v15959_v28  ;;  %vm18585_vm2 = vnez %v18501_v58 }
 0x1e0   : > { %12768 = vmatmul.mubr.bf16.gmra.mrb[60].mxu0 %v15912_v0  ;;  %13007 = vmatprep.mubr.msk.bf16.mxu1 %vm16296_vm9, %v15985_v29  ;;  %vm18583_vm9 = vnez %v18489_v12 }
 0x1e1   : > { %12787 = vmatprep.mubr.bf16.mxu0 %v18557_v60 }
 0x1e7   : > { %13008 = vmatmul.mubr.bf16.gmra.mrb[28].mxu1 %v18557_v60 }
 0x1e8   : > { %12788 = vmatmul.mubr.msk.bf16.vlgmr.msra.gmra.mrb[32].mxu0 %vm18581_vm7, %v15617_v37  ;;  %13027 = vmatprep.mubr.bf16.mxu1 %v15590_v7  ;;  %vm18584_vm7 = vnez %v18495_v9  ;;  %v15024_v7 = vld [vmem:[#allocation4 + $0x210] sm:$0xff]   ;;  %v15027_v37 = vld [vmem:[#allocation4 + $0xe0] sm:$0xff]  }
 0x1e9   : > { %12791 = vmatprep.mubr.msk.bf16.mxu0 %vm18582_vm6, %v15636_v1  ;;  %12820 = vmatpush3.bf16.msra.mxu0 %v15019_v24  ;;  %v15029_v24 = vld [vmem:[#allocation4 + $0xe8] sm:$0xff]  }
 0x1ea   : > { %12821 = vmatprep.subr.bf16.mxu0 %v15021_v55 }
 0x1ed   : > { %12822 = vmatpush3.bf16.msra.mxu0 %v15021_v55  ;;  %v15032_v55 = vld [vmem:[#allocation4 + $0x230] sm:$0xff]  }
 0x1ee   : > { %12823 = vmatprep.subr.bf16.mxu0 %v15023_v62 }
 0x1ef   : > { %13028 = vmatmul.mubr.bf16.vlgmr.msra.gmra.mrb[0].mxu1 %v18561_v16  ;;  %v15026_v16 = vld [vmem:[#allocation4 + $0x218] sm:$0xff]  }
 0x1f0   : > { %13060 = vmatpush3.bf16.msra.mxu1 %v15020_v44  ;;  %12792 = vmatmul.mubr.msk.bf16.gmra.mrb[36].mxu0 %vm18583_vm9, %v15655_v32  ;;  %v18589_v44 = vld [vmem:[#allocation56_spill] sm:$0xff] }
 0x1f1   : > { %13031 = vmatprep.mubr.bf16.mxu1 %v18562_v17  ;;  %12795 = vmatprep.mubr.msk.bf16.mxu0 %vm18584_vm7, %v15682_v5  ;;  %v15033_v17 = vld [vmem:[#allocation4 + $0xf8] sm:$0xff]   ;;  %vm18590_vm13 = vnez %v18589_v44 }
 0x1f2   : > { %13061 = vmatprep.subr.bf16.mxu1 %v15022_v52  ;;  %12824 = vmatpush3.bf16.msra.mxu0 %v15023_v62  ;;  %v15034_v62 = vld [vmem:[#allocation4 + $0x238] sm:$0xff]  }
 0x1f3   : > { %12825 = vmatprep.subr.bf16.mxu0 %v15025_v26 }
 0x1f4   : > { %13062 = vmatpush3.bf16.msra.mxu1 %v15022_v52  ;;  %v15028_v52 = vld [vmem:[#allocation4 + $0x220] sm:$0xff]  }
 0x1f5   : > { %13063 = vmatprep.subr.bf16.mxu1 %v15024_v7 }
 0x1f6   : > { %12826 = vmatpush3.bf16.msra.mxu0 %v15025_v26  ;;  %v15031_v26 = vld [vmem:[#allocation4 + $0xf0] sm:$0xff]  }
 0x1f7   : > { %13032 = vmatmul.mubr.bf16.gmra.mrb[4].mxu1 %v18563_v31  ;;  %12827 = vmatprep.subr.bf16.mxu0 %v15027_v37  ;;  %v15030_v31 = vld [vmem:[#allocation4 + $0x228] sm:$0xff]  }
 0x1f8   : > { %12796 = vmatmul.mubr.msk.bf16.gmra.mrb[40].mxu0 %vm18585_vm2, %v15700_v6  ;;  %13035 = vmatprep.mubr.bf16.mxu1 %v18564_v25  ;;  %v18587_v25 = vld [vmem:[#allocation55_spill] sm:$0xff] }
 0x1f9   : > { %12799 = vmatprep.mubr.msk.bf16.mxu0 %vm18586_vm0, %v15723_v36  ;;  %13064 = vmatpush3.bf16.msra.mxu1 %v15024_v7  ;;  %vm18588_vm8 = vnez %v18587_v25  ;;  %v18592_v7 = vld [vmem:[#allocation57_spill] sm:$0xff] }
 0x1fa   : > { %13065 = vmatprep.subr.bf16.mxu1 %v15026_v16  ;;  %12828 = vmatpush3.bf16.msra.mxu0 %v15027_v37  ;;  %vm18593_vm5 = vnez %v18592_v7  ;;  %v18595_v37 = vld [vmem:[#allocation37_spill] sm:$0xff] }
 0x1fb   : > { %12829 = vmatprep.subr.bf16.mxu0 %v15029_v24 }
 0x1fd   : > { %13066 = vmatpush3.bf16.msra.mxu1 %v15026_v16  ;;  %v18596_v16 = vld [vmem:[#allocation60_spill] sm:$0xff] }
 0x1fe   : > { %13067 = vmatprep.subr.bf16.mxu1 %v15028_v52  ;;  %12830 = vmatpush3.bf16.msra.mxu0 %v15029_v24  ;;  %v15037_v24 = vld [vmem:[%s18117_s1 + $0x50] sm:$0xff]  }
 0x1ff   : > { %13036 = vmatmul.mubr.bf16.gmra.mrb[8].mxu1 %v18565_v33  ;;  %12831 = vmatprep.subr.bf16.mxu0 %v15031_v26  ;;  %v15035_v33 = vld [vmem:[%s18117_s1 + $0x40] sm:$0xff]  }
 0x200   : > { %12800 = vmatmul.mubr.msk.bf16.gmra.mrb[44].mxu0 %vm18588_vm8, %v15741_v22  ;;  %13039 = vmatprep.mubr.bf16.mxu1 %v18566_v20  ;;  %v18591_v20 = vld [vmem:[#allocation33_spill] sm:$0xff]  ;;  %vm18597_vm8 = vnez %v18596_v16 }
 0x201   : > { %12803 = vmatprep.mubr.msk.bf16.mxu0 %vm18590_vm13, %v15769_v15  ;;  %13068 = vmatpush3.bf16.msra.mxu1 %v15028_v52  ;;  %vm18594_vm13 = vnez %v18529_v54  ;;  %v18608_v52 = vld [vmem:[#allocation50_spill] sm:$0xff] }
 0x202   : > { %13069 = vmatprep.subr.bf16.mxu1 %v15030_v31  ;;  %12832 = vmatpush3.bf16.msra.mxu0 %v15031_v26  ;;  %v15039_v26 = vld [vmem:[%s18117_s1 + $0x60] sm:$0xff]  }
 0x203   : > { %12833 = vmatprep.subr.bf16.mxu0 %v15033_v17 }
 0x205   : > { %13070 = vmatpush3.bf16.msra.mxu1 %v15030_v31 }
 0x206   : > { %13071 = vmatprep.subr.bf16.mxu1 %v15032_v55  ;;  %12834 = vmatpush3.bf16.msra.mxu0 %v15033_v17  ;;  %v4149_v17 = vld [vmem:[%s15326_s14 + $0x10] sm:$0xff] }
 0x207   : > { %13040 = vmatmul.mubr.bf16.gmra.mrb[12].mxu1 %v18568_v21  ;;  %13107 = vmatprep.subr.bf16.mxu0 %v15035_v33 }
 0x208   : > { %12804 = vmatmul.mubr.msk.bf16.gmra.mrb[48].mxu0 %vm18593_vm5, %v18591_v20  ;;  %13043 = vmatprep.mubr.bf16.mxu1 %v18570_v13  ;;  %vm18598_vm5 = vnez %v18540_v57  ;;  %v18601_v13 = vld [vmem:[#allocation40_spill] sm:$0xff] }
 0x209   : > { %12807 = vmatprep.mubr.msk.bf16.mxu0 %vm18594_vm13, %v15812_v8  ;;  %13072 = vmatpush3.bf16.msra.mxu1 %v15032_v55  ;;  %vm18599_vm13 = vnez %v18545_v51 }
 0x20a   : > { %13073 = vmatprep.subr.bf16.mxu1 %v15034_v62 }
 0x20d   : > { %13074 = vmatpush3.bf16.msra.mxu1 %v15034_v62 }
 0x20f   : > { %13044 = vmatmul.mubr.bf16.gmra.mrb[16].mxu1 %v18572_v50  ;;  %v18602_v50 = vld [vmem:[#allocation43_spill] sm:$0xff] }
 0x210   : > { %12808 = vmatmul.mubr.msk.bf16.gmra.mrb[52].mxu0 %vm18597_vm8, %v18595_v37  ;;  %13047 = vmatprep.mubr.bf16.mxu1 %v18574_v59  ;;  %v18603_v59 = vld [vmem:[#allocation41_spill] sm:$0xff] }
 0x211   : > { %12811 = vmatprep.mubr.msk.bf16.mxu0 %vm18598_vm5, %v15875_v11  ;;  %vm18604_vm5 = vnez %v18603_v59  ;;  %v15082_v59 = vld [vmem:[#allocation4 + $0x378] sm:$0xff]  }
 0x217   : > { %13048 = vmatmul.mubr.bf16.gmra.mrb[20].mxu1 %v18575_v49  ;;  %v15036_v49 = vld [vmem:[%s18117_s1 + $0x48] sm:$0xff]  }
 0x218   : > { %12812 = vmatmul.mubr.msk.bf16.gmra.mrb[56].mxu0 %vm18599_vm13, %v15893_v4  ;;  %13051 = vmatprep.mubr.bf16.mxu1 %v18576_v10  ;;  %v18606_v10 = vld [vmem:[#allocation46_spill] sm:$0xff] }
 0x219   : > { %12815 = vmatprep.mubr.msk.bf16.mxu0 %vm16208_vm12, %v15934_v35 }
 0x21f   : > { %13052 = vmatmul.mubr.bf16.gmra.mrb[24].mxu1 %v15912_v0  ;;  %v18605_v0 = vld [vmem:[#allocation26_spill] sm:$0xff] }
 0x220   : > { %12816 = vmatmul.mubr.msk.bf16.gmra.mrb[60].mxu0 %vm16218_vm11, %v15961_v48  ;;  %13055 = vmatprep.mubr.bf16.mxu1 %v18601_v13 }
 0x221   : > { %12835 = vmatprep.mubr.msk.bf16.mxu0 %vm18604_vm5, %v18602_v50 }
 0x227   : > { %13056 = vmatmul.mubr.bf16.gmra.mrb[28].mxu1 %v18557_v60 }
 0x228   : > { %12836 = vmatmul.mubr.msk.bf16.vlgmr.msra.gmra.mrb[32].mxu0 %vm15947_vm10, %v15623_v41  ;;  %13075 = vmatprep.mubr.msk.bf16.mxu1 %vm18582_vm6, %v15636_v1  ;;  %v15038_v41 = vld [vmem:[%s18117_s1 + $0x58] sm:$0xff]   ;;  %v18607_v1 = vld [vmem:[#allocation48_spill] sm:$0xff]  ;;  %vm18615_vm6 = vnez %v18592_v7 }
 0x229   : > { %12839 = vmatprep.mubr.msk.bf16.mxu0 %vm15997_vm15, %v18605_v0  ;;  %13108 = vmatpush3.bf16.msra.mxu0 %v15035_v33 }
 0x22a   : > { %13109 = vmatprep.subr.bf16.mxu0 %v15036_v49 }
 0x22d   : > { %13110 = vmatpush3.bf16.msra.mxu0 %v15036_v49 }
 0x22e   : > { %13111 = vmatprep.subr.bf16.mxu0 %v15037_v24 }
 0x22f   : > { %13076 = vmatmul.mubr.msk.bf16.vlgmr.msra.gmra.mrb[0].mxu1 %vm18583_vm9, %v15655_v32  ;;  %v15040_v32 = vld [vmem:[%s18117_s1 + $0x68] sm:$0xff]   ;;  %vm18613_vm9 = vnez %v18589_v44 }
 0x230   : > { %12840 = vmatmul.mubr.msk.bf16.gmra.mrb[36].mxu0 %vm16007_vm3, %v15670_v53  ;;  %13079 = vmatprep.mubr.msk.bf16.mxu1 %vm18584_vm7, %v15682_v5  ;;  %v18609_v53 = vld [vmem:[#allocation52_spill] sm:$0xff]  ;;  %v18610_v5 = vld [vmem:[#allocation54_spill] sm:$0xff]  ;;  %vm18611_vm7 = vnez %v18587_v25 }
 0x231   : > { %12843 = vmatprep.mubr.msk.bf16.mxu0 %vm16034_vm14, %v15698_v63  ;;  %13112 = vmatpush3.bf16.msra.mxu0 %v15037_v24  ;;  %v18617_v63 = vld [vmem:[#allocation58_spill] sm:$0xff] }
 0x232   : > { %13113 = vmatprep.subr.bf16.mxu0 %v15038_v41  ;;  %v4150_v24 = vld [vmem:[%s15326_s14 + $0x18] sm:$0xff] }
 0x235   : > { %13114 = vmatpush3.bf16.msra.mxu0 %v15038_v41 }
 0x236   : > { %13115 = vmatprep.subr.bf16.mxu0 %v15039_v26 }
 0x237   : > { %13080 = vmatmul.mubr.msk.bf16.gmra.mrb[4].mxu1 %vm18585_vm2, %v15700_v6  ;;  %vm18612_vm2 = vnez %v18516_v2  ;;  %v18630_v6 = vld [vmem:[#allocation66_spill] sm:$0xff] }
 0x238   : > { %12844 = vmatmul.mubr.msk.bf16.gmra.mrb[40].mxu0 %vm16044_vm4, %v15711_v56  ;;  %13083 = vmatprep.mubr.msk.bf16.mxu1 %vm18586_vm0, %v15723_v36  ;;  %vm18614_vm0 = vnez %v18521_v47  ;;  %v15041_v36 = vld [vmem:[%s18117_s1 + $0x70] sm:$0xff]   ;;  %v15042_v56 = vld [vmem:[%s18117_s1 + $0x78] sm:$0xff]  }
 0x239   : > { %12847 = vmatprep.mubr.msk.bf16.mxu0 %vm16070_vm1, %v15739_v30  ;;  %13116 = vmatpush3.bf16.msra.mxu0 %v15039_v26  ;;  %v18616_v30 = vld [vmem:[#allocation34_spill] sm:$0xff]  ;;  %vm18618_vm1 = vnez %v18617_v63 }
 0x23a   : > { %13117 = vmatprep.subr.bf16.mxu0 %v15040_v32 }
 0x23d   : > { %13118 = vmatpush3.bf16.msra.mxu0 %v15040_v32 }
 0x23e   : > { %13119 = vmatprep.subr.bf16.mxu0 %v15041_v36 }
 0x23f   : > { %13084 = vmatmul.mubr.msk.bf16.gmra.mrb[8].mxu1 %vm18611_vm7, %v15741_v22  ;;  %vm18619_vm7 = vnez %v18529_v54 }
 0x240   : > { %12848 = vmatmul.mubr.msk.bf16.gmra.mrb[44].mxu0 %vm18612_vm2, %v15756_v19  ;;  %13087 = vmatprep.mubr.msk.bf16.mxu1 %vm18613_vm9, %v15769_v15  ;;  %vm18620_vm2 = vnez %v18532_v42  ;;  %v18627_v15 = vld [vmem:[#allocation25_spill] sm:$0xff] }
 0x241   : > { %12851 = vmatprep.mubr.msk.bf16.mxu0 %vm18614_vm0, %v15785_v14  ;;  %v18621_v14 = vld [vmem:[#allocation61_spill] sm:$0xff]  ;;  %13120 = vmatpush3.bf16.msra.mxu0 %v15041_v36 }
 0x242   : > { %vm18622_vm9 = vnez %v18621_v14  ;;  %13121 = vmatprep.subr.bf16.mxu0 %v15042_v56 }
 0x245   : > { %13122 = vmatpush3.bf16.msra.mxu0 %v15042_v56 }
 0x247   : > { %13088 = vmatmul.mubr.msk.bf16.gmra.mrb[12].mxu1 %vm18615_vm6, %v18591_v20  ;;  %vm18623_vm6 = vnez %v18540_v57 }
 0x248   : > { %12852 = vmatmul.mubr.msk.bf16.gmra.mrb[48].mxu0 %vm18618_vm1, %v18616_v30  ;;  %13091 = vmatprep.mubr.msk.bf16.mxu1 %vm18619_vm7, %v15812_v8  ;;  %vm18624_vm1 = vnez %v18543_v39  ;;  %vm18625_vm7 = vnez %v18548_v34 }
 0x249   : > { %12855 = vmatprep.mubr.msk.bf16.mxu0 %vm18620_vm2, %v15828_v38  ;;  %v16491_v38 = vld [vmem:[%s18120_s4] ss:$0 sm:$0xff] }
 0x24f   : > { %13092 = vmatmul.mubr.msk.bf16.gmra.mrb[16].mxu1 %vm18597_vm8, %v18595_v37  ;;  %vm18626_vm8 = vnez %v18553_v43  ;;  %v4147_v37 = vld [vmem:[%s15326_s14] sm:$0xff] }
 0x250   : > { %12856 = vmatmul.mubr.msk.bf16.gmra.mrb[52].mxu0 %vm18622_vm9, %v15851_v45  ;;  %13095 = vmatprep.mubr.msk.bf16.mxu1 %vm18623_vm6, %v15875_v11  ;;  %vm18628_vm6 = vnez %v18627_v15  ;;  %v18629_v11 = vld [vmem:[#allocation44_spill] sm:$0xff] }
 0x251   : > { %12859 = vmatprep.mubr.msk.bf16.mxu0 %vm18624_vm1, %v15891_v40 }
 0x257   : > { %13096 = vmatmul.mubr.msk.bf16.gmra.mrb[20].mxu1 %vm18599_vm13, %v15893_v4  ;;  %vm18631_vm13 = vnez %v18630_v6 }
 0x258   : > { %12860 = vmatmul.mubr.msk.bf16.gmra.mrb[56].mxu0 %vm18625_vm7, %v15908_v27  ;;  %13099 = vmatprep.mubr.msk.bf16.mxu1 %vm16208_vm12, %v15934_v35 }
 0x259   : > { %12863 = vmatprep.mubr.msk.bf16.mxu0 %vm18626_vm8, %v15959_v28 }
 0x25f   : > { %13100 = vmatmul.mubr.msk.bf16.gmra.mrb[24].mxu1 %vm16218_vm11, %v15961_v48 }
 0x260   : > { %12864 = vmatmul.mubr.msk.bf16.gmra.mrb[60].mxu0 %vm18628_vm6, %v15985_v29  ;;  %13103 = vmatprep.mubr.msk.bf16.mxu1 %vm18631_vm13, %v18629_v11  ;;  %v4148_v11 = vld [vmem:[%s15326_s14 + $0x8] sm:$0xff] }
 0x267   : > { %13104 = vmatmul.mubr.bf16.gmra.mrb[28].mxu1 %v18557_v60 }
 0x2fb   : > { %v12837_v22 = vpop.f32.mrb[32].mxu0 }
 0x2fc   : > { %v2583_v19 = vpop.f32.mrb[33].mxu0  ;;  %v14067_v40 = vadd.f32 %v12837_v22, %v16491_v38 }
 0x2fd   : > { %v12838_v8 = vpop.f32.mrb[34].mxu0  ;;  %v14069_v4 = vadd.f32 %v16491_v38, %v2583_v19 }
 0x2fe   : > { %v2586_v45 = vpop.f32.mrb[35].mxu0  ;;  %v14071_v35 = vadd.f32 %v12838_v8, %v16491_v38 }
 0x2ff   : > { %v14073_v31 = vadd.f32 %v16491_v38, %v2586_v45 }
 0x302   : > { %v13077_v27 = vpop.f32.mrb[0].mxu1 }
 0x303   : > { %v14068_v28 = vadd.f32 %v14067_v40, %v13077_v27  ;;  %v12841_v48 = vpop.f32.mrb[36].mxu0  ;;  %v3956_v29 = vpop.f32.mrb[1].mxu1 }
 0x304   : > { %v14070_v55 = vadd.f32 %v14069_v4, %v3956_v29  ;;  %v2599_v33 = vpop.f32.mrb[37].mxu0  ;;  %v13078_v62 = vpop.f32.mrb[2].mxu1  ;;  %v14075_v22 = vadd.f32 %v12841_v48, %v16491_v38  ;;  %v4153_v48 = vld [vmem:[%s15326_s14 + $0x30] sm:$0xff] }
 0x305   : > { %v4117_v20 = vmax.f32 %v14068_v28, 0.0  ;;  %v14072_v13 = vadd.f32 %v14071_v35, %v13078_v62  ;;  %v12842_v50 = vpop.f32.mrb[38].mxu0  ;;  %v3959_v49 = vpop.f32.mrb[3].mxu1  ;;  %v14077_v45 = vadd.f32 %v16491_v38, %v2599_v33  ;;  %v18632_v33 = vld [vmem:[#allocation7_spill] sm:$0xff] }
 0x306   : > { %v4115_v0 = vmax.f32 %v14070_v55, 0.0  ;;  %v14074_v41 = vadd.f32 %v14073_v31, %v3959_v49  ;;  %v2602_v26 = vpop.f32.mrb[39].mxu0  ;;  %v14079_v35 = vadd.f32 %v12842_v50, %v16491_v38  ;;  %v4151_v50 = vld [vmem:[%s15326_s14 + $0x20] sm:$0xff] }
 0x307   : > { %v4181_v32 = vadd.f32 %v4149_v17, %v4117_v20  ;;  %v4118_v30 = vmax.f32 %v14072_v13, 0.0  ;;  %v14081_v17 = vadd.f32 %v16491_v38, %v2602_v26  ;;  %v18634_v13 = vld [vmem:[#allocation8_spill] sm:$0xff]  ;;  %v4154_v26 = vld [vmem:[%s15326_s14 + $0x38] sm:$0xff] }
 0x308   : > { %v4179_v36 = vadd.f32 %v4147_v37, %v4115_v0  ;;  %v4116_v56 = vmax.f32 %v14074_v41, 0.0 }
 0x309   : > { %4213 = vst [vmem:[%s15326_s14 + $0x10] sm:$0xff] %v4181_v32  ;;  %v4182_v19 = vadd.f32 %v4150_v24, %v4118_v30  ;;  %v4260_v8 = vpack.c.bf16 %v4118_v30, %v4117_v20 }
 0x30a   : > { %4211 = vst [vmem:[%s15326_s14] sm:$0xff] %v4179_v36  ;;  %v4180_v40 = vadd.f32 %v4148_v11, %v4116_v56  ;;  %v4259_v4 = vpack.c.bf16 %v4116_v56, %v4115_v0  ;;  %v13081_v27 = vpop.f32.mrb[4].mxu1 }
 0x30b   : > { %4214 = vst [vmem:[%s15326_s14 + $0x18] sm:$0xff] %v4182_v19  ;;  %v14076_v28 = vadd.f32 %v14075_v22, %v13081_v27  ;;  %v12845_v29 = vpop.f32.mrb[40].mxu0  ;;  %v3972_v31 = vpop.f32.mrb[5].mxu1  ;;  %v16514_v49 = vadd.bf16 %v4260_v8, %v18634_v13  ;;  %v4152_v19 = vld [vmem:[%s15326_s14 + $0x28] sm:$0xff] }
 0x30c   : > { %4212 = vst [vmem:[%s15326_s14 + $0x8] sm:$0xff] %v4180_v40  ;;  %v14078_v55 = vadd.f32 %v14077_v45, %v3972_v31  ;;  %v2615_v62 = vpop.f32.mrb[41].mxu0  ;;  %v13082_v20 = vpop.f32.mrb[6].mxu1  ;;  %v16511_v37 = vadd.bf16 %v4259_v4, %v18632_v33  ;;  %v14083_v40 = vadd.f32 %v12845_v29, %v16491_v38  ;;  %v4157_v29 = vld [vmem:[%s15326_s14 + $0x50] sm:$0xff] }
 0x30d   : > { %18635 = vst [vmem:[#allocation28_spill] sm:$0xff] %v16514_v49  ;;  %v4121_v0 = vmax.f32 %v14076_v28, 0.0  ;;  %v14080_v24 = vadd.f32 %v14079_v35, %v13082_v20  ;;  %v12846_v41 = vpop.f32.mrb[42].mxu0  ;;  %v3975_v32 = vpop.f32.mrb[7].mxu1  ;;  %v14085_v35 = vadd.f32 %v16491_v38, %v2615_v62  ;;  %v18636_v62 = vld [vmem:[#allocation9_spill] sm:$0xff] }
 0x30e   : > { %18633 = vst [vmem:[#allocation24_spill] sm:$0xff] %v16511_v37  ;;  %v4119_v30 = vmax.f32 %v14078_v55, 0.0  ;;  %v14082_v11 = vadd.f32 %v14081_v17, %v3975_v32  ;;  %v2618_v36 = vpop.f32.mrb[43].mxu0  ;;  %13123 = vmatprep.mubr.bf16.mxu0 %v16511_v37 }
 0x30f   : > { %v4185_v56 = vadd.f32 %v4153_v48, %v4121_v0  ;;  %v4122_v22 = vmax.f32 %v14080_v24, 0.0  ;;  %13124 = vmatmul.mubr.bf16.vlgmr.msra.gmra.mrb[64].mxu0 %v16514_v49  ;;  %v14087_v48 = vadd.f32 %v12846_v41, %v16491_v38  ;;  %v14089_v13 = vadd.f32 %v16491_v38, %v2618_v36  ;;  %v4158_v36 = vld [vmem:[%s15326_s14 + $0x58] sm:$0xff] }
 0x310   : > { %v4183_v8 = vadd.f32 %v4151_v50, %v4119_v30  ;;  %v4120_v45 = vmax.f32 %v14082_v11, 0.0 }
 0x311   : > { %4217 = vst [vmem:[%s15326_s14 + $0x30] sm:$0xff] %v4185_v56  ;;  %v4186_v4 = vadd.f32 %v4154_v26, %v4122_v22  ;;  %v4262_v27 = vpack.c.bf16 %v4122_v22, %v4121_v0  ;;  %v4155_v26 = vld [vmem:[%s15326_s14 + $0x40] sm:$0xff]  ;;  %v18638_v22 = vld [vmem:[#allocation10_spill] sm:$0xff] }
 0x312   : > { %4215 = vst [vmem:[%s15326_s14 + $0x20] sm:$0xff] %v4183_v8  ;;  %v4184_v28 = vadd.f32 %v4152_v19, %v4120_v45  ;;  %v4261_v31 = vpack.c.bf16 %v4120_v45, %v4119_v30  ;;  %v13085_v17 = vpop.f32.mrb[8].mxu1 }
 0x313   : > { %4218 = vst [vmem:[%s15326_s14 + $0x38] sm:$0xff] %v4186_v4  ;;  %v14084_v55 = vadd.f32 %v14083_v40, %v13085_v17  ;;  %v12849_v20 = vpop.f32.mrb[44].mxu0  ;;  %v3988_v33 = vpop.f32.mrb[9].mxu1  ;;  %v16535_v19 = vadd.bf16 %v4262_v27, %v18638_v22 }
 0x314   : > { %4216 = vst [vmem:[%s15326_s14 + $0x28] sm:$0xff] %v4184_v28  ;;  %v14086_v50 = vadd.f32 %v14085_v35, %v3988_v33  ;;  %v2631_v0 = vpop.f32.mrb[45].mxu0  ;;  %v13086_v24 = vpop.f32.mrb[10].mxu1  ;;  %v16531_v32 = vadd.bf16 %v4261_v31, %v18636_v62  ;;  %v4156_v28 = vld [vmem:[%s15326_s14 + $0x48] sm:$0xff]  ;;  %v14091_v27 = vadd.f32 %v12849_v20, %v16491_v38  ;;  %v4161_v20 = vld [vmem:[%s15326_s14 + $0x70] sm:$0xff] }
 0x315   : > { %v4125_v30 = vmax.f32 %v14084_v55, 0.0  ;;  %v14088_v11 = vadd.f32 %v14087_v48, %v13086_v24  ;;  %v12850_v41 = vpop.f32.mrb[46].mxu0  ;;  %v3991_v56 = vpop.f32.mrb[11].mxu1  ;;  %18639 = vst [vmem:[#allocation30_spill] sm:$0xff] %v16535_v19  ;;  %v14093_v33 = vadd.f32 %v16491_v38, %v2631_v0  ;;  %v18640_v0 = vld [vmem:[#allocation11_spill] sm:$0xff] }
 0x316   : > { %18637 = vst [vmem:[#allocation27_spill] sm:$0xff] %v16531_v32  ;;  %v4123_v8 = vmax.f32 %v14086_v50, 0.0  ;;  %v14090_v45 = vadd.f32 %v14089_v13, %v3991_v56  ;;  %v2634_v40 = vpop.f32.mrb[47].mxu0  ;;  %13127 = vmatprep.mubr.bf16.mxu0 %v16531_v32  ;;  %v14095_v24 = vadd.f32 %v12850_v41, %v16491_v38 }
 0x317   : > { %v4189_v4 = vadd.f32 %v4157_v29, %v4125_v30  ;;  %v4126_v35 = vmax.f32 %v14088_v11, 0.0  ;;  %13128 = vmatmul.mubr.bf16.gmra.mrb[68].mxu0 %v16535_v19  ;;  %v14097_v56 = vadd.f32 %v16491_v38, %v2634_v40  ;;  %v4162_v40 = vld [vmem:[%s15326_s14 + $0x78] sm:$0xff] }
 0x318   : > { %v4187_v31 = vadd.f32 %v4155_v26, %v4123_v8  ;;  %v4124_v17 = vmax.f32 %v14090_v45, 0.0 }
 0x319   : > { %4221 = vst [vmem:[%s15326_s14 + $0x50] sm:$0xff] %v4189_v4  ;;  %v4190_v48 = vadd.f32 %v4158_v36, %v4126_v35  ;;  %v4264_v55 = vpack.c.bf16 %v4126_v35, %v4125_v30  ;;  %v4159_v4 = vld [vmem:[%s15326_s14 + $0x60] sm:$0xff] }
 0x31a   : > { %4219 = vst [vmem:[%s15326_s14 + $0x40] sm:$0xff] %v4187_v31  ;;  %v4188_v13 = vadd.f32 %v4156_v28, %v4124_v17  ;;  %v4263_v50 = vpack.c.bf16 %v4124_v17, %v4123_v8  ;;  %v13089_v29 = vpop.f32.mrb[12].mxu1  ;;  %v18642_v31 = vld [vmem:[#allocation12_spill] sm:$0xff] }
 0x31b   : > { %4222 = vst [vmem:[%s15326_s14 + $0x58] sm:$0xff] %v4190_v48  ;;  %v14092_v62 = vadd.f32 %v14091_v27, %v13089_v29  ;;  %v12853_v26 = vpop.f32.mrb[48].mxu0  ;;  %v4004_v11 = vpop.f32.mrb[13].mxu1  ;;  %v16555_v17 = vadd.bf16 %v4264_v55, %v18642_v31  ;;  %v4160_v29 = vld [vmem:[%s15326_s14 + $0x68] sm:$0xff] }
 0x31c   : > { %4220 = vst [vmem:[%s15326_s14 + $0x48] sm:$0xff] %v4188_v13  ;;  %v14094_v22 = vadd.f32 %v14093_v33, %v4004_v11  ;;  %v2647_v30 = vpop.f32.mrb[49].mxu0  ;;  %v13090_v36 = vpop.f32.mrb[14].mxu1  ;;  %v16551_v45 = vadd.bf16 %v4263_v50, %v18640_v0  ;;  %v14099_v55 = vadd.f32 %v12853_v26, %v16491_v38  ;;  %v4165_v26 = vld [vmem:[%s15326_s14 + $0x90] sm:$0xff] }
 0x31d   : > { %v4129_v8 = vmax.f32 %v14092_v62, 0.0  ;;  %v14096_v35 = vadd.f32 %v14095_v24, %v13090_v36  ;;  %v12854_v41 = vpop.f32.mrb[50].mxu0  ;;  %v4007_v28 = vpop.f32.mrb[15].mxu1  ;;  %18643 = vst [vmem:[#allocation32_spill] sm:$0xff] %v16555_v17 }
 0x31e   : > { %18641 = vst [vmem:[#allocation29_spill] sm:$0xff] %v16551_v45  ;;  %v4127_v27 = vmax.f32 %v14094_v22, 0.0  ;;  %v14098_v48 = vadd.f32 %v14097_v56, %v4007_v28  ;;  %v2650_v33 = vpop.f32.mrb[51].mxu0  ;;  %13131 = vmatprep.mubr.bf16.mxu0 %v16551_v45  ;;  %v14101_v56 = vadd.f32 %v16491_v38, %v2647_v30  ;;  %v18644_v30 = vld [vmem:[#allocation13_spill] sm:$0xff] }
 0x31f   : > { %v4193_v13 = vadd.f32 %v4161_v20, %v4129_v8  ;;  %v4130_v50 = vmax.f32 %v14096_v35, 0.0  ;;  %13132 = vmatmul.mubr.bf16.gmra.mrb[72].mxu0 %v16555_v17  ;;  %v14103_v35 = vadd.f32 %v12854_v41, %v16491_v38 }
 0x320   : > { %v4191_v62 = vadd.f32 %v4159_v4, %v4127_v27  ;;  %v4128_v24 = vmax.f32 %v14098_v48, 0.0  ;;  %v14105_v48 = vadd.f32 %v16491_v38, %v2650_v33  ;;  %v4166_v33 = vld [vmem:[%s15326_s14 + $0x98] sm:$0xff] }
 0x321   : > { %4225 = vst [vmem:[%s15326_s14 + $0x70] sm:$0xff] %v4193_v13  ;;  %v4194_v11 = vadd.f32 %v4162_v40, %v4130_v50  ;;  %v4266_v22 = vpack.c.bf16 %v4130_v50, %v4129_v8 }
 0x322   : > { %4223 = vst [vmem:[%s15326_s14 + $0x60] sm:$0xff] %v4191_v62  ;;  %v4192_v36 = vadd.f32 %v4160_v29, %v4128_v24  ;;  %v4265_v0 = vpack.c.bf16 %v4128_v24, %v4127_v27  ;;  %v13093_v20 = vpop.f32.mrb[16].mxu1  ;;  %v4163_v29 = vld [vmem:[%s15326_s14 + $0x80] sm:$0xff] }
 0x323   : > { %4226 = vst [vmem:[%s15326_s14 + $0x78] sm:$0xff] %v4194_v11  ;;  %v14100_v28 = vadd.f32 %v14099_v55, %v13093_v20  ;;  %v12857_v4 = vpop.f32.mrb[52].mxu0  ;;  %v4020_v31 = vpop.f32.mrb[17].mxu1  ;;  %v18646_v55 = vld [vmem:[#allocation14_spill] sm:$0xff] }
 0x324   : > { %4224 = vst [vmem:[%s15326_s14 + $0x68] sm:$0xff] %v4192_v36  ;;  %v14102_v40 = vadd.f32 %v14101_v56, %v4020_v31  ;;  %v2663_v8 = vpop.f32.mrb[53].mxu0  ;;  %v13094_v13 = vpop.f32.mrb[18].mxu1  ;;  %v16571_v50 = vadd.bf16 %v4265_v0, %v18644_v30  ;;  %v16575_v11 = vadd.bf16 %v4266_v22, %v18646_v55  ;;  %v4164_v30 = vld [vmem:[%s15326_s14 + $0x88] sm:$0xff]  ;;  %v14107_v22 = vadd.f32 %v12857_v4, %v16491_v38  ;;  %v4169_v4 = vld [vmem:[%s15326_s14 + $0xb0] sm:$0xff] }
 0x325   : > { %v4133_v27 = vmax.f32 %v14100_v28, 0.0  ;;  %v14104_v62 = vadd.f32 %v14103_v35, %v13094_v13  ;;  %v12858_v41 = vpop.f32.mrb[54].mxu0  ;;  %v4023_v24 = vpop.f32.mrb[19].mxu1 }
 0x326   : > { %18645 = vst [vmem:[#allocation31_spill] sm:$0xff] %v16571_v50  ;;  %18647 = vst [vmem:[#allocation36_spill] sm:$0xff] %v16575_v11  ;;  %v4131_v36 = vmax.f32 %v14102_v40, 0.0  ;;  %v14106_v20 = vadd.f32 %v14105_v48, %v4023_v24  ;;  %v2666_v56 = vpop.f32.mrb[55].mxu0  ;;  %13135 = vmatprep.mubr.bf16.mxu0 %v16571_v50  ;;  %v14109_v48 = vadd.f32 %v16491_v38, %v2663_v8  ;;  %v18648_v8 = vld [vmem:[#allocation15_spill] sm:$0xff] }
 0x327   : > { %v4197_v31 = vadd.f32 %v4165_v26, %v4133_v27  ;;  %v4134_v0 = vmax.f32 %v14104_v62, 0.0  ;;  %13136 = vmatmul.mubr.bf16.gmra.mrb[76].mxu0 %v16575_v11  ;;  %v14111_v62 = vadd.f32 %v12858_v41, %v16491_v38 }
 0x328   : > { %v4195_v28 = vadd.f32 %v4163_v29, %v4131_v36  ;;  %v4132_v35 = vmax.f32 %v14106_v20, 0.0 }
 0x329   : > { %4229 = vst [vmem:[%s15326_s14 + $0x90] sm:$0xff] %v4197_v31  ;;  %v4198_v13 = vadd.f32 %v4166_v33, %v4134_v0  ;;  %v4268_v40 = vpack.c.bf16 %v4134_v0, %v4133_v27  ;;  %v14113_v31 = vadd.f32 %v16491_v38, %v2666_v56  ;;  %v4170_v56 = vld [vmem:[%s15326_s14 + $0xb8] sm:$0xff] }
 0x32a   : > { %4227 = vst [vmem:[%s15326_s14 + $0x80] sm:$0xff] %v4195_v28  ;;  %v4196_v24 = vadd.f32 %v4164_v30, %v4132_v35  ;;  %v4267_v55 = vpack.c.bf16 %v4132_v35, %v4131_v36  ;;  %v13097_v26 = vpop.f32.mrb[20].mxu1  ;;  %v4167_v28 = vld [vmem:[%s15326_s14 + $0xa0] sm:$0xff] }
 0x32b   : > { %4230 = vst [vmem:[%s15326_s14 + $0x98] sm:$0xff] %v4198_v13  ;;  %v14108_v11 = vadd.f32 %v14107_v22, %v13097_v26  ;;  %v12861_v29 = vpop.f32.mrb[56].mxu0  ;;  %v4036_v20 = vpop.f32.mrb[21].mxu1  ;;  %v18650_v13 = vld [vmem:[#allocation16_spill] sm:$0xff] }
 0x32c   : > { %4228 = vst [vmem:[%s15326_s14 + $0x88] sm:$0xff] %v4196_v24  ;;  %v14110_v33 = vadd.f32 %v14109_v48, %v4036_v20  ;;  %v2679_v27 = vpop.f32.mrb[57].mxu0  ;;  %v13098_v0 = vpop.f32.mrb[22].mxu1  ;;  %v16591_v30 = vadd.bf16 %v4267_v55, %v18648_v8  ;;  %v16595_v26 = vadd.bf16 %v4268_v40, %v18650_v13  ;;  %v4168_v8 = vld [vmem:[%s15326_s14 + $0xa8] sm:$0xff]  ;;  %v14115_v40 = vadd.f32 %v12861_v29, %v16491_v38  ;;  %v4173_v29 = vld [vmem:[%s15326_s14 + $0xd0] sm:$0xff] }
 0x32d   : > { %v4137_v36 = vmax.f32 %v14108_v11, 0.0  ;;  %v14112_v35 = vadd.f32 %v14111_v62, %v13098_v0  ;;  %v12862_v41 = vpop.f32.mrb[58].mxu0  ;;  %v4039_v22 = vpop.f32.mrb[23].mxu1 }
 0x32e   : > { %18649 = vst [vmem:[#allocation35_spill] sm:$0xff] %v16591_v30  ;;  %18651 = vst [vmem:[#allocation39_spill] sm:$0xff] %v16595_v26  ;;  %v4135_v24 = vmax.f32 %v14110_v33, 0.0  ;;  %v14114_v50 = vadd.f32 %v14113_v31, %v4039_v22  ;;  %v2682_v48 = vpop.f32.mrb[59].mxu0  ;;  %13139 = vmatprep.mubr.bf16.mxu0 %v16591_v30  ;;  %v14117_v31 = vadd.f32 %v16491_v38, %v2679_v27  ;;  %v18652_v27 = vld [vmem:[#allocation17_spill] sm:$0xff] }
 0x32f   : > { %v4201_v20 = vadd.f32 %v4169_v4, %v4137_v36  ;;  %v4138_v55 = vmax.f32 %v14112_v35, 0.0  ;;  %13140 = vmatmul.mubr.bf16.gmra.mrb[80].mxu0 %v16595_v26  ;;  %v14119_v35 = vadd.f32 %v12862_v41, %v16491_v38 }
 0x330   : > { %v4199_v11 = vadd.f32 %v4167_v28, %v4135_v24  ;;  %v4136_v62 = vmax.f32 %v14114_v50, 0.0 }
 0x331   : > { %4233 = vst [vmem:[%s15326_s14 + $0xb0] sm:$0xff] %v4201_v20  ;;  %v4202_v0 = vadd.f32 %v4170_v56, %v4138_v55  ;;  %v4270_v33 = vpack.c.bf16 %v4138_v55, %v4137_v36  ;;  %v14121_v20 = vadd.f32 %v16491_v38, %v2682_v48  ;;  %v4174_v48 = vld [vmem:[%s15326_s14 + $0xd8] sm:$0xff] }
 0x332   : > { %4231 = vst [vmem:[%s15326_s14 + $0xa0] sm:$0xff] %v4199_v11  ;;  %v4200_v22 = vadd.f32 %v4168_v8, %v4136_v62  ;;  %v4269_v13 = vpack.c.bf16 %v4136_v62, %v4135_v24  ;;  %v13101_v4 = vpop.f32.mrb[24].mxu1  ;;  %v4171_v11 = vld [vmem:[%s15326_s14 + $0xc0] sm:$0xff] }
 0x333   : > { %4234 = vst [vmem:[%s15326_s14 + $0xb8] sm:$0xff] %v4202_v0  ;;  %v14116_v26 = vadd.f32 %v14115_v40, %v13101_v4  ;;  %v12865_v28 = vpop.f32.mrb[60].mxu0  ;;  %v4052_v50 = vpop.f32.mrb[25].mxu1  ;;  %v18654_v0 = vld [vmem:[#allocation18_spill] sm:$0xff] }
 0x334   : > { %4232 = vst [vmem:[%s15326_s14 + $0xa8] sm:$0xff] %v4200_v22  ;;  %v14118_v56 = vadd.f32 %v14117_v31, %v4052_v50  ;;  %v2695_v36 = vpop.f32.mrb[61].mxu0  ;;  %v13102_v55 = vpop.f32.mrb[26].mxu1  ;;  %v16611_v8 = vadd.bf16 %v4269_v13, %v18652_v27  ;;  %v16615_v4 = vadd.bf16 %v4270_v33, %v18654_v0  ;;  %v4172_v27 = vld [vmem:[%s15326_s14 + $0xc8] sm:$0xff]  ;;  %v14123_v33 = vadd.f32 %v12865_v28, %v16491_v38  ;;  %v4177_v28 = vld [vmem:[%s15326_s14 + $0xf0] sm:$0xff] }
 0x335   : > { %v4141_v24 = vmax.f32 %v14116_v26, 0.0  ;;  %v14120_v62 = vadd.f32 %v14119_v35, %v13102_v55  ;;  %v12866_v41 = vpop.f32.mrb[62].mxu0  ;;  %v4055_v40 = vpop.f32.mrb[27].mxu1 }
 0x336   : > { %18653 = vst [vmem:[#allocation38_spill] sm:$0xff] %v16611_v8  ;;  %18655 = vst [vmem:[#allocation33_spill] sm:$0xff] %v16615_v4  ;;  %v4139_v22 = vmax.f32 %v14118_v56, 0.0  ;;  %v14122_v30 = vadd.f32 %v14121_v20, %v4055_v40  ;;  %v2698_v31 = vpop.f32.mrb[63].mxu0  ;;  %13143 = vmatprep.mubr.bf16.mxu0 %v16611_v8  ;;  %v14125_v20 = vadd.f32 %v16491_v38, %v2695_v36 }
 0x337   : > { %v4205_v50 = vadd.f32 %v4173_v29, %v4141_v24  ;;  %v4142_v13 = vmax.f32 %v14120_v62, 0.0  ;;  %13144 = vmatmul.mubr.bf16.gmra.mrb[84].mxu0 %v16615_v4  ;;  %v14127_v62 = vadd.f32 %v12866_v41, %v16491_v38 }
 0x338   : > { %v4203_v26 = vadd.f32 %v4171_v11, %v4139_v22  ;;  %v4140_v35 = vmax.f32 %v14122_v30, 0.0  ;;  %v14129_v30 = vadd.f32 %v16491_v38, %v2698_v31 }
 0x339   : > { %4237 = vst [vmem:[%s15326_s14 + $0xd0] sm:$0xff] %v4205_v50  ;;  %v4206_v55 = vadd.f32 %v4174_v48, %v4142_v13  ;;  %v4272_v56 = vpack.c.bf16 %v4142_v13, %v4141_v24  ;;  %v18656_v50 = vld [vmem:[#allocation19_spill] sm:$0xff] }
 0x33a   : > { %4235 = vst [vmem:[%s15326_s14 + $0xc0] sm:$0xff] %v4203_v26  ;;  %v4204_v40 = vadd.f32 %v4172_v27, %v4140_v35  ;;  %v4271_v0 = vpack.c.bf16 %v4140_v35, %v4139_v22  ;;  %v13105_v29 = vpop.f32.mrb[28].mxu1  ;;  %v4175_v22 = vld [vmem:[%s15326_s14 + $0xe0] sm:$0xff]  ;;  %v18658_v35 = vld [vmem:[#allocation20_spill] sm:$0xff] }
 0x33b   : > { %4238 = vst [vmem:[%s15326_s14 + $0xd8] sm:$0xff] %v4206_v55  ;;  %v14124_v4 = vadd.f32 %v14123_v33, %v13105_v29  ;;  %v4068_v11 = vpop.f32.mrb[29].mxu1  ;;  %v16635_v41 = vadd.bf16 %v4272_v56, %v18658_v35  ;;  %v4178_v55 = vld [vmem:[%s15326_s14 + $0xf8] sm:$0xff]  ;;  %v15048_v35 = vld [vmem:[#allocation4 + $0x268] sm:$0xff]  }
 0x33c   : > { %4236 = vst [vmem:[%s15326_s14 + $0xc8] sm:$0xff] %v4204_v40  ;;  %v14126_v48 = vadd.f32 %v14125_v20, %v4068_v11  ;;  %v13106_v24 = vpop.f32.mrb[30].mxu1  ;;  %v16631_v13 = vadd.bf16 %v4271_v0, %v18656_v50  ;;  %v4176_v40 = vld [vmem:[%s15326_s14 + $0xe8] sm:$0xff] }
 0x33d   : > { %v4145_v36 = vmax.f32 %v14124_v4, 0.0  ;;  %v14128_v27 = vadd.f32 %v14127_v62, %v13106_v24  ;;  %v4071_v26 = vpop.f32.mrb[31].mxu1  ;;  %18659 = vst [vmem:[#allocation40_spill] sm:$0xff] %v16635_v41 }
 0x33e   : > { %18657 = vst [vmem:[#allocation37_spill] sm:$0xff] %v16631_v13  ;;  %v4143_v33 = vmax.f32 %v14126_v48, 0.0  ;;  %v14130_v38 = vadd.f32 %v14129_v30, %v4071_v26  ;;  %13147 = vmatprep.mubr.bf16.mxu0 %v16631_v13  ;;  %v18660_v48 = vld [vmem:[#allocation21_spill] sm:$0xff]  ;;  %v18662_v30 = vld [vmem:[#allocation22_spill] sm:$0xff]  ;;  %v15047_v26 = vld [vmem:[#allocation4 + $0x260] sm:$0xff]  }
 0x33f   : > { %v4209_v31 = vadd.f32 %v4177_v28, %v4145_v36  ;;  %v4146_v20 = vmax.f32 %v14128_v27, 0.0  ;;  %13148 = vmatmul.mubr.bf16.gmra.mrb[88].mxu0 %v16635_v41  ;;  %v15043_v28 = vld [vmem:[#allocation4 + $0x240] sm:$0xff]   ;;  %v15046_v27 = vld [vmem:[#allocation4 + $0x258] sm:$0xff]  }
 0x340   : > { %v4207_v4 = vadd.f32 %v4175_v22, %v4143_v33  ;;  %v4144_v0 = vmax.f32 %v14130_v38, 0.0  ;;  %13155 = vmatprep.subr.bf16.mxu0 %v15043_v28  ;;  %v15045_v22 = vld [vmem:[#allocation4 + $0x250] sm:$0xff]   ;;  %v16654_v38 = vld [vmem:[#allocation4 + $0x280] sm:$0xff]  }
 0x341   : > { %4241 = vst [vmem:[%s15326_s14 + $0xf0] sm:$0xff] %v4209_v31  ;;  %v4210_v29 = vadd.f32 %v4178_v55, %v4146_v20  ;;  %v4274_v62 = vpack.c.bf16 %v4146_v20, %v4145_v36  ;;  %13156 = vmatpush3.bf16.msra.mxu0 %v15043_v28  ;;  %v15044_v36 = vld [vmem:[#allocation4 + $0x248] sm:$0xff]   ;;  %v15050_v55 = vld [vmem:[#allocation4 + $0x278] sm:$0xff]   ;;  %v16660_v31 = vld [vmem:[%s18118_s2 + $0x1] ss:$0 sm:$0xff] }
 0x342   : > { %4239 = vst [vmem:[%s15326_s14 + $0xe0] sm:$0xff] %v4207_v4  ;;  %v4208_v56 = vadd.f32 %v4176_v40, %v4144_v0  ;;  %v4273_v11 = vpack.c.bf16 %v4144_v0, %v4143_v33  ;;  %13157 = vmatprep.subr.bf16.mxu0 %v15044_v36  ;;  %v15049_v33 = vld [vmem:[#allocation4 + $0x270] sm:$0xff]  }
 0x343   : > { %4242 = vst [vmem:[%s15326_s14 + $0xf8] sm:$0xff] %v4210_v29  ;;  %v16649_v50 = vadd.bf16 %v4274_v62, %v18662_v30 }
 0x344   : > { %4240 = vst [vmem:[%s15326_s14 + $0xe8] sm:$0xff] %v4208_v56  ;;  %v16646_v24 = vadd.bf16 %v4273_v11, %v18660_v48 }
 0x345   : > { %18663 = vst [vmem:[#allocation26_spill] sm:$0xff] %v16649_v50  ;;  %13158 = vmatpush3.bf16.msra.mxu0 %v15044_v36 }
 0x346   : > { %18661 = vst [vmem:[#allocation43_spill] sm:$0xff] %v16646_v24  ;;  %13151 = vmatprep.mubr.bf16.mxu0 %v16646_v24  ;;  %13159 = vmatprep.subr.bf16.mxu0 %v15045_v22 }
 0x347   : > { %13152 = vmatmul.mubr.bf16.gmra.mrb[92].mxu0 %v16649_v50  ;;  %v18664_v50 = vld [vmem:[#allocation23_spill] sm:$0xff] }
 0x348   : > { %13171 = vmatprep.mubr.bf16.mxu0 %v18557_v60  ;;  %vm18665_vm13 = vcmp.lt.s32.totalorder %v18664_v50, 1  ;;  %vm18666_vm6 = vcmp.lt.s32.totalorder %v18664_v50, 7 }
 0x349   : > { %13160 = vmatpush3.bf16.msra.mxu0 %v15045_v22  ;;  %vm18668_vm11 = vmmov %vm18665_vm13 }
 0x34a   : > { %13161 = vmatprep.subr.bf16.mxu0 %v15046_v27  ;;  %vm18669_vm12 = vmmov %vm18666_vm6 }
 0x34b   : > { %vm18670_vm8 = vmmov %vm18666_vm6 }
 0x34d   : > { %13162 = vmatpush3.bf16.msra.mxu0 %v15046_v27 }
 0x34e   : > { %13163 = vmatprep.subr.bf16.mxu0 %v15047_v26 }
 0x351   : > { %13164 = vmatpush3.bf16.msra.mxu0 %v15047_v26 }
 0x352   : > { %13165 = vmatprep.subr.bf16.mxu0 %v15048_v35 }
 0x355   : > { %13166 = vmatpush3.bf16.msra.mxu0 %v15048_v35 }
 0x356   : > { %13167 = vmatprep.subr.bf16.mxu0 %v15049_v33 }
 0x359   : > { %13168 = vmatpush3.bf16.msra.mxu0 %v15049_v33 }
 0x35a   : > { %13169 = vmatprep.subr.bf16.mxu0 %v15050_v55 }
 0x35d   : > { %13170 = vmatpush3.bf16.msra.mxu0 %v15050_v55 }
 0x35e   : > { %13203 = vmatprep.subr.bf16.mxu0 %v16654_v38 }
 0x3e2   : > { %v13125_v20 = vpop.f32.mrb[64].mxu0 }
 0x3e3   : > { %v4439_v40 = vadd.f32 %v13125_v20, %v16660_v31  ;;  %v4430_v4 = vpop.f32.mrb[65].mxu0 }
 0x3e4   : > { %v4431_v0 = vadd.f32 %v16660_v31, %v4430_v4  ;;  %v13126_v29 = vpop.f32.mrb[66].mxu0 }
 0x3e5   : > { %v4559_v62 = vmax.f32 %v4439_v40, 0.0  ;;  %v4442_v56 = vadd.f32 %v13126_v29, %v16660_v31  ;;  %v4433_v11 = vpop.f32.mrb[67].mxu0 }
 0x3e6   : > { %v16665_v48 = vmax.f32 %v4431_v0, 0.0  ;;  %v4434_v30 = vadd.f32 %v16660_v31, %v4433_v11 }
 0x3e7   : > { %v4560_v28 = vmax.f32 %v4442_v56, 0.0  ;;  %v4591_v36 = vrot.slane %v4559_v62, 7  ;;  %v4687_v22 = vrot.slane %v4559_v62, 1 }
 0x3e8   : > { %v4558_v27 = vmax.f32 %v4434_v30, 0.0  ;;  %v18289_v20 = vrot.slane %v16665_v48, 1 }
 0x3e9   : > { %v4592_v35 = vrot.slane %v4560_v28, 7  ;;  %v4688_v33 = vrot.slane %v4560_v28, 1  ;;  %v16669_v55 = vpack.c.bf16 %v4560_v28, %v4559_v62  ;;  %v18667_v62 = vrot.slane %v16665_v48, 7 }
 0x3ea   : > { %v4590_v40 = vrot.slane %v4558_v27, 7  ;;  %v4686_v4 = vrot.slane %v4558_v27, 1  ;;  %v16673_v29 = vpack.c.bf16 %v4558_v27, %v16665_v48  ;;  %v13129_v0 = vpop.f32.mrb[68].mxu0 }
 0x3eb   : > { %v4455_v11 = vadd.f32 %v13129_v0, %v16660_v31  ;;  %v4446_v56 = vpop.f32.mrb[69].mxu0  ;;  %v4649_v30 = vsel %vm18665_vm13, %v4591_v36, %v4592_v35  ;;  %v4745_v26 = vsel %vm18666_vm6, %v4687_v22, %v4688_v33  ;;  %vm18674_vm13 = vmmov %vm18666_vm6 }
 0x3ec   : > { %v16684_v28 = vsel %vm18668_vm11, %v18667_v62, %v4590_v40  ;;  %v4746_v27 = vsel %vm18669_vm12, %v4686_v4, %v4687_v22  ;;  %v4747_v0 = vsel %vm18670_vm8, %v18289_v20, %v4686_v4  ;;  %v4447_v24 = vadd.f32 %v16660_v31, %v4446_v56  ;;  %v13130_v41 = vpop.f32.mrb[70].mxu0  ;;  %vm18672_vm8 = vmmov %vm18668_vm11 }
 0x3ed   : > { %v16693_v13 = vpack.c.bf16 %v4746_v27, %v4747_v0  ;;  %v4563_v8 = vmax.f32 %v4455_v11, 0.0  ;;  %v4458_v17 = vadd.f32 %v13130_v41, %v16660_v31  ;;  %v4449_v45 = vpop.f32.mrb[71].mxu0  ;;  %v4650_v62 = vsel %vm18668_vm11, %v4590_v40, %v4591_v36  ;;  %vm18673_vm12 = vmmov %vm18672_vm8 }
 0x3ee   : > { %v4561_v19 = vmax.f32 %v4447_v24, 0.0  ;;  %v4450_v22 = vadd.f32 %v16660_v31, %v4449_v45  ;;  %v16699_v32 = vpack.c.bf16 %v4649_v30, %v4650_v62  ;;  %vm18675_vm11 = vmmov %vm18672_vm8 }
 0x3ef   : > { %18671 = vst [vmem:[#allocation46_spill] sm:$0xff] %v16693_v13  ;;  %v4564_v49 = vmax.f32 %v4458_v17, 0.0  ;;  %v4595_v37 = vrot.slane %v4563_v8, 7  ;;  %v4691_v6 = vrot.slane %v4563_v8, 1 }
 0x3f0   : > { %v4593_v4 = vrot.slane %v4561_v19, 7  ;;  %v4689_v20 = vrot.slane %v4561_v19, 1  ;;  %v4562_v56 = vmax.f32 %v4450_v22, 0.0 }
 0x3f1   : > { %v4596_v27 = vrot.slane %v4564_v49, 7  ;;  %v4692_v0 = vrot.slane %v4564_v49, 1  ;;  %v16701_v11 = vpack.c.bf16 %v4564_v49, %v4563_v8 }
 0x3f2   : > { %v4594_v41 = vrot.slane %v4562_v56, 7  ;;  %v4690_v15 = vrot.slane %v4562_v56, 1  ;;  %v13133_v21 = vpop.f32.mrb[72].mxu0  ;;  %v4648_v24 = vsel %vm18672_vm8, %v4592_v35, %v4593_v4  ;;  %v16705_v36 = vpack.c.bf16 %v4562_v56, %v4561_v19 }
 0x3f3   : > { %v4471_v45 = vadd.f32 %v13133_v21, %v16660_v31  ;;  %v4462_v17 = vpop.f32.mrb[73].mxu0  ;;  %v4645_v40 = vsel %vm18673_vm12, %v4595_v37, %v4596_v27  ;;  %v4744_v30 = vsel %vm18674_vm13, %v4688_v33, %v4689_v20  ;;  %v4741_v49 = vsel %vm18666_vm6, %v4691_v6, %v4692_v0  ;;  %vm18677_vm12 = vmmov %vm18666_vm6 }
 0x3f4   : > { %v4463_v8 = vadd.f32 %v16660_v31, %v4462_v17  ;;  %v13134_v62 = vpop.f32.mrb[74].mxu0  ;;  %v4647_v35 = vsel %vm18675_vm11, %v4593_v4, %v4594_v41  ;;  %v4646_v19 = vsel %vm18672_vm8, %v4594_v41, %v4595_v37  ;;  %v16719_v21 = vpack.c.bf16 %v4744_v30, %v4745_v26  ;;  %vm18678_vm13 = vmmov %vm18666_vm6 }
 0x3f5   : > { %v4567_v22 = vmax.f32 %v4471_v45, 0.0  ;;  %v4474_v56 = vadd.f32 %v13134_v62, %v16660_v31  ;;  %v4465_v23 = vpop.f32.mrb[75].mxu0  ;;  %v16722_v51 = vpack.c.bf16 %v4647_v35, %v4648_v24  ;;  %v16724_v33 = vpack.c.bf16 %v4645_v40, %v4646_v19  ;;  %vm18681_vm6 = vmmov %vm18672_vm8 }
 0x3f6   : > { %18676 = vst [vmem:[#allocation48_spill] sm:$0xff] %v16719_v21  ;;  %v4565_v57 = vmax.f32 %v4463_v8, 0.0  ;;  %v4466_v17 = vadd.f32 %v16660_v31, %v4465_v23  ;;  %v4742_v16 = vsel %vm18677_vm12, %v4690_v15, %v4691_v6  ;;  %v4743_v4 = vsel %vm18678_vm13, %v4689_v20, %v4690_v15  ;;  %vm18682_vm11 = vmmov %vm18681_vm6 }
 0x3f7   : > { %v4568_v37 = vmax.f32 %v4474_v56, 0.0  ;;  %v16731_v26 = vpack.c.bf16 %v4742_v16, %v4743_v4  ;;  %v4599_v41 = vrot.slane %v4567_v22, 7  ;;  %v4695_v24 = vrot.slane %v4567_v22, 1  ;;  %vm18683_vm8 = vmmov %vm18677_vm12 }
 0x3f8   : > { %v4597_v45 = vrot.slane %v4565_v57, 7  ;;  %v4693_v30 = vrot.slane %v4565_v57, 1  ;;  %v4566_v62 = vmax.f32 %v4466_v17, 0.0  ;;  %vm18684_vm12 = vmmov %vm18683_vm8 }
 0x3f9   : > { %18679 = vst [vmem:[#allocation50_spill] sm:$0xff] %v16731_v26  ;;  %v4600_v35 = vrot.slane %v4568_v37, 7  ;;  %v4696_v40 = vrot.slane %v4568_v37, 1  ;;  %v16733_v19 = vpack.c.bf16 %v4568_v37, %v4567_v22  ;;  %vm18685_vm13 = vmmov %vm18681_vm6 }
 0x3fa   : > { %v4598_v8 = vrot.slane %v4566_v62, 7  ;;  %v4694_v23 = vrot.slane %v4566_v62, 1  ;;  %v13137_v54 = vpop.f32.mrb[76].mxu0  ;;  %v4644_v6 = vsel %vm18681_vm6, %v4596_v27, %v4597_v45  ;;  %v16737_v7 = vpack.c.bf16 %v4566_v62, %v4565_v57 }
 0x3fb   : > { %18680 = vst [vmem:[#allocation52_spill] sm:$0xff] %v16733_v19  ;;  %v4487_v16 = vadd.f32 %v13137_v54, %v16660_v31  ;;  %v4478_v15 = vpop.f32.mrb[77].mxu0  ;;  %v4641_v20 = vsel %vm18682_vm11, %v4599_v41, %v4600_v35  ;;  %v4740_v56 = vsel %vm18683_vm8, %v4692_v0, %v4693_v30  ;;  %v4737_v22 = vsel %vm18684_vm12, %v4695_v24, %v4696_v40  ;;  %vm18687_vm11 = vmmov %vm18683_vm8 }
 0x3fc   : > { %v4479_v17 = vadd.f32 %v16660_v31, %v4478_v15  ;;  %v13138_v4 = vpop.f32.mrb[78].mxu0  ;;  %v4643_v27 = vsel %vm18685_vm13, %v4597_v45, %v4598_v8  ;;  %v4642_v57 = vsel %vm18681_vm6, %v4598_v8, %v4599_v41  ;;  %v16751_v54 = vpack.c.bf16 %v4740_v56, %v4741_v49  ;;  %vm18690_vm12 = vmmov %vm18681_vm6 }
 0x3fd   : > { %v4571_v37 = vmax.f32 %v4487_v16, 0.0  ;;  %v4490_v62 = vadd.f32 %v13138_v4, %v16660_v31  ;;  %v4481_v44 = vpop.f32.mrb[79].mxu0  ;;  %v16754_v25 = vpack.c.bf16 %v4643_v27, %v4644_v6  ;;  %v16756_v0 = vpack.c.bf16 %v4641_v20, %v4642_v57  ;;  %vm18692_vm13 = vmmov %vm18681_vm6 }
 0x3fe   : > { %18686 = vst [vmem:[#allocation54_spill] sm:$0xff] %v16751_v54  ;;  %v4569_v18 = vmax.f32 %v4479_v17, 0.0  ;;  %v4482_v15 = vadd.f32 %v16660_v31, %v4481_v44  ;;  %v4738_v58 = vsel %vm18687_vm11, %v4694_v23, %v4695_v24  ;;  %v4739_v45 = vsel %vm18683_vm8, %v4693_v30, %v4694_v23  ;;  %vm18693_vm6 = vmmov %vm18683_vm8 }
 0x3ff   : > { %v4572_v41 = vmax.f32 %v4490_v62, 0.0  ;;  %v16763_v49 = vpack.c.bf16 %v4738_v58, %v4739_v45  ;;  %v4603_v8 = vrot.slane %v4571_v37, 7  ;;  %v4699_v6 = vrot.slane %v4571_v37, 1  ;;  %vm18694_vm11 = vmmov %vm18693_vm6 }
 0x400   : > { %v4601_v16 = vrot.slane %v4569_v18, 7  ;;  %v4697_v56 = vrot.slane %v4569_v18, 1  ;;  %v4570_v4 = vmax.f32 %v4482_v15, 0.0  ;;  %vm18695_vm8 = vmmov %vm18690_vm12 }
 0x401   : > { %18688 = vst [vmem:[#allocation34_spill] sm:$0xff] %v16763_v49  ;;  %v4604_v27 = vrot.slane %v4572_v41, 7  ;;  %v4700_v20 = vrot.slane %v4572_v41, 1  ;;  %v16765_v57 = vpack.c.bf16 %v4572_v41, %v4571_v37 }
 0x402   : > { %v4602_v17 = vrot.slane %v4570_v4, 7  ;;  %v4698_v44 = vrot.slane %v4570_v4, 1  ;;  %v13141_v9 = vpop.f32.mrb[80].mxu0  ;;  %v4640_v24 = vsel %vm18690_vm12, %v4600_v35, %v4601_v16  ;;  %v16769_v54 = vpack.c.bf16 %v4570_v4, %v4569_v18  ;;  %vm18696_vm12 = vmmov %vm18695_vm8 }
 0x403   : > { %18689 = vst [vmem:[#allocation58_spill] sm:$0xff] %v16765_v57  ;;  %v4503_v58 = vadd.f32 %v13141_v9, %v16660_v31  ;;  %v4494_v30 = vpop.f32.mrb[81].mxu0  ;;  %v4637_v23 = vsel %vm18692_vm13, %v4603_v8, %v4604_v27  ;;  %v4736_v62 = vsel %vm18693_vm6, %v4696_v40, %v4697_v56  ;;  %v4733_v37 = vsel %vm18694_vm11, %v4699_v6, %v4700_v20  ;;  %vm18698_vm13 = vmmov %vm18693_vm6 }
 0x404   : > { %18691 = vst [vmem:[#allocation61_spill] sm:$0xff] %v16769_v54  ;;  %v4495_v15 = vadd.f32 %v16660_v31, %v4494_v30  ;;  %v13142_v45 = vpop.f32.mrb[82].mxu0  ;;  %v4639_v35 = vsel %vm18695_vm8, %v4601_v16, %v4602_v17  ;;  %v4638_v18 = vsel %vm18696_vm12, %v4602_v17, %v4603_v8  ;;  %v16783_v9 = vpack.c.bf16 %v4736_v62, %v4737_v22  ;;  %vm18701_vm11 = vmmov %vm18695_vm8 }
 0x405   : > { %v4575_v41 = vmax.f32 %v4503_v58, 0.0  ;;  %v4506_v4 = vadd.f32 %v13142_v45, %v16660_v31  ;;  %v4497_v49 = vpop.f32.mrb[83].mxu0  ;;  %v16786_v12 = vpack.c.bf16 %v4639_v35, %v4640_v24  ;;  %v16788_v40 = vpack.c.bf16 %v4637_v23, %v4638_v18  ;;  %vm18703_vm12 = vmmov %vm18693_vm6  ;;  %v18764_v50 = vld [vmem:[#allocation54_spill] sm:$0xff] }
 0x406   : > { %18697 = vst [vmem:[#allocation44_spill] sm:$0xff] %v16783_v9  ;;  %v4573_v26 = vmax.f32 %v4495_v15, 0.0  ;;  %v4498_v30 = vadd.f32 %v16660_v31, %v4497_v49  ;;  %v4734_v46 = vsel %vm18698_vm13, %v4698_v44, %v4699_v6  ;;  %v4735_v16 = vsel %vm18693_vm6, %v4697_v56, %v4698_v44  ;;  %vm18704_vm13 = vmmov %vm18693_vm6 }
 0x407   : > { %v4576_v8 = vmax.f32 %v4506_v4, 0.0  ;;  %v16795_v22 = vpack.c.bf16 %v4734_v46, %v4735_v16  ;;  %v4607_v17 = vrot.slane %v4575_v41, 7  ;;  %v4703_v24 = vrot.slane %v4575_v41, 1  ;;  %vm18705_vm6 = vmmov %vm18695_vm8 }
 0x408   : > { %v4605_v58 = vrot.slane %v4573_v26, 7  ;;  %v4701_v62 = vrot.slane %v4573_v26, 1  ;;  %v4574_v45 = vmax.f32 %v4498_v30, 0.0 }
 0x409   : > { %18699 = vst [vmem:[#allocation7_spill] sm:$0xff] %v16795_v22  ;;  %v4608_v35 = vrot.slane %v4576_v8, 7  ;;  %v4704_v23 = vrot.slane %v4576_v8, 1  ;;  %v16797_v18 = vpack.c.bf16 %v4576_v8, %v4575_v41 }
 0x40a   : > { %v4606_v15 = vrot.slane %v4574_v45, 7  ;;  %v4702_v49 = vrot.slane %v4574_v45, 1  ;;  %v13145_v9 = vpop.f32.mrb[84].mxu0  ;;  %v4636_v6 = vsel %vm18701_vm11, %v4604_v27, %v4605_v58  ;;  %v16801_v21 = vpack.c.bf16 %v4574_v45, %v4573_v26  ;;  %vm18706_vm11 = vmmov %vm18705_vm6 }
 0x40b   : > { %18700 = vst [vmem:[#allocation8_spill] sm:$0xff] %v16797_v18  ;;  %v4519_v46 = vadd.f32 %v13145_v9, %v16660_v31  ;;  %v4510_v56 = vpop.f32.mrb[85].mxu0  ;;  %v4633_v44 = vsel %vm18695_vm8, %v4607_v17, %v4608_v35  ;;  %v4732_v4 = vsel %vm18703_vm12, %v4700_v20, %v4701_v62  ;;  %v4729_v41 = vsel %vm18704_vm13, %v4703_v24, %v4704_v23  ;;  %vm18708_vm8 = vmmov %vm18703_vm12 }
 0x40c   : > { %18702 = vst [vmem:[#allocation9_spill] sm:$0xff] %v16801_v21  ;;  %v4511_v30 = vadd.f32 %v16660_v31, %v4510_v56  ;;  %v13146_v16 = vpop.f32.mrb[86].mxu0  ;;  %v4635_v27 = vsel %vm18705_vm6, %v4605_v58, %v4606_v15  ;;  %v4634_v26 = vsel %vm18706_vm11, %v4606_v15, %v4607_v17  ;;  %v16815_v9 = vpack.c.bf16 %v4732_v4, %v4733_v37  ;;  %vm18709_vm12 = vmmov %vm18708_vm8 }
 0x40d   : > { %v4579_v8 = vmax.f32 %v4519_v46, 0.0  ;;  %v4522_v45 = vadd.f32 %v13146_v16, %v16660_v31  ;;  %v4513_v22 = vpop.f32.mrb[87].mxu0  ;;  %v16818_v61 = vpack.c.bf16 %v4635_v27, %v4636_v6  ;;  %v16820_v20 = vpack.c.bf16 %v4633_v44, %v4634_v26  ;;  %vm18712_vm13 = vmmov %vm18705_vm6 }
 0x40e   : > { %18707 = vst [vmem:[#allocation10_spill] sm:$0xff] %v16815_v9  ;;  %v4577_v13 = vmax.f32 %v4511_v30, 0.0  ;;  %v4514_v56 = vadd.f32 %v16660_v31, %v4513_v22  ;;  %v4730_v18 = vsel %vm18708_vm8, %v4702_v49, %v4703_v24  ;;  %v4731_v58 = vsel %vm18709_vm12, %v4701_v62, %v4702_v49  ;;  %vm18714_vm11 = vmmov %vm18708_vm8 }
 0x40f   : > { %v4580_v17 = vmax.f32 %v4522_v45, 0.0  ;;  %v16827_v37 = vpack.c.bf16 %v4730_v18, %v4731_v58  ;;  %v4611_v15 = vrot.slane %v4579_v8, 7  ;;  %v4707_v6 = vrot.slane %v4579_v8, 1  ;;  %vm18715_vm12 = vmmov %vm18705_vm6 }
 0x410   : > { %v4609_v46 = vrot.slane %v4577_v13, 7  ;;  %v4705_v4 = vrot.slane %v4577_v13, 1  ;;  %v4578_v16 = vmax.f32 %v4514_v56, 0.0 }
 0x411   : > { %18710 = vst [vmem:[#allocation11_spill] sm:$0xff] %v16827_v37  ;;  %v4612_v27 = vrot.slane %v4580_v17, 7  ;;  %v4708_v44 = vrot.slane %v4580_v17, 1  ;;  %v16829_v26 = vpack.c.bf16 %v4580_v17, %v4579_v8 }
 0x412   : > { %v4610_v30 = vrot.slane %v4578_v16, 7  ;;  %v4706_v22 = vrot.slane %v4578_v16, 1  ;;  %v13149_v9 = vpop.f32.mrb[88].mxu0  ;;  %v4632_v24 = vsel %vm18712_vm13, %v4608_v35, %v4609_v46  ;;  %v16833_v21 = vpack.c.bf16 %v4578_v16, %v4577_v13  ;;  %vm18716_vm13 = vmmov %vm18705_vm6 }
 0x413   : > { %18711 = vst [vmem:[#allocation12_spill] sm:$0xff] %v16829_v26  ;;  %v4535_v62 = vadd.f32 %v13149_v9, %v16660_v31  ;;  %v4526_v18 = vpop.f32.mrb[89].mxu0  ;;  %v4629_v49 = vsel %vm18705_vm6, %v4611_v15, %v4612_v27  ;;  %v4728_v45 = vsel %vm18714_vm11, %v4704_v23, %v4705_v4  ;;  %v4725_v8 = vsel %vm18708_vm8, %v4707_v6, %v4708_v44  ;;  %vm18718_vm6 = vmmov %vm18708_vm8 }
 0x414   : > { %18713 = vst [vmem:[#allocation13_spill] sm:$0xff] %v16833_v21  ;;  %v4527_v56 = vadd.f32 %v16660_v31, %v4526_v18  ;;  %v13150_v58 = vpop.f32.mrb[90].mxu0  ;;  %v4631_v35 = vsel %vm18715_vm12, %v4609_v46, %v4610_v30  ;;  %v4630_v13 = vsel %vm18716_vm13, %v4610_v30, %v4611_v15  ;;  %v16847_v9 = vpack.c.bf16 %v4728_v45, %v4729_v41  ;;  %vm18719_vm11 = vmmov %vm18718_vm6 }
 0x415   : > { %v4583_v17 = vmax.f32 %v4535_v62, 0.0  ;;  %v4538_v16 = vadd.f32 %v13150_v58, %v16660_v31  ;;  %v4529_v37 = vpop.f32.mrb[91].mxu0  ;;  %v16850_v26 = vpack.c.bf16 %v4631_v35, %v4632_v24  ;;  %v16852_v23 = vpack.c.bf16 %v4629_v49, %v4630_v13  ;;  %vm18722_vm8 = vmmov %vm18715_vm12 }
 0x416   : > { %18717 = vst [vmem:[#allocation14_spill] sm:$0xff] %v16847_v9  ;;  %v4581_v21 = vmax.f32 %v4527_v56, 0.0  ;;  %v4530_v18 = vadd.f32 %v16660_v31, %v4529_v37  ;;  %v4726_v57 = vsel %vm18718_vm6, %v4706_v22, %v4707_v6  ;;  %v4727_v46 = vsel %vm18719_vm11, %v4705_v4, %v4706_v22  ;;  %vm18724_vm12 = vmmov %vm18722_vm8 }
 0x417   : > { %v4584_v15 = vmax.f32 %v4538_v16, 0.0  ;;  %v16859_v41 = vpack.c.bf16 %v4726_v57, %v4727_v46  ;;  %v4615_v30 = vrot.slane %v4583_v17, 7  ;;  %v4711_v24 = vrot.slane %v4583_v17, 1  ;;  %vm18725_vm13 = vmmov %vm18718_vm6 }
 0x418   : > { %v4613_v62 = vrot.slane %v4581_v21, 7  ;;  %v4709_v45 = vrot.slane %v4581_v21, 1  ;;  %v4582_v58 = vmax.f32 %v4530_v18, 0.0  ;;  %vm18726_vm11 = vmmov %vm18722_vm8 }
 0x419   : > { %18720 = vst [vmem:[#allocation15_spill] sm:$0xff] %v16859_v41  ;;  %v4616_v35 = vrot.slane %v4584_v15, 7  ;;  %v4712_v49 = vrot.slane %v4584_v15, 1  ;;  %v16861_v13 = vpack.c.bf16 %v4584_v15, %v4583_v17 }
 0x41a   : > { %v4614_v56 = vrot.slane %v4582_v58, 7  ;;  %v4710_v37 = vrot.slane %v4582_v58, 1  ;;  %v13153_v9 = vpop.f32.mrb[92].mxu0  ;;  %v4628_v6 = vsel %vm18722_vm8, %v4612_v27, %v4613_v62  ;;  %v16865_v54 = vpack.c.bf16 %v4582_v58, %v4581_v21 }
 0x41b   : > { %18721 = vst [vmem:[#allocation16_spill] sm:$0xff] %v16861_v13  ;;  %v4551_v57 = vadd.f32 %v13153_v9, %v16660_v31  ;;  %v4542_v4 = vpop.f32.mrb[93].mxu0  ;;  %v4625_v22 = vsel %vm18724_vm12, %v4615_v30, %v4616_v35  ;;  %v4724_v16 = vsel %vm18725_vm13, %v4708_v44, %v4709_v45  ;;  %v4721_v17 = vsel %vm18718_vm6, %v4711_v24, %v4712_v49  ;;  %vm18727_vm12 = vmmov %vm18718_vm6 }
 0x41c   : > { %18723 = vst [vmem:[#allocation17_spill] sm:$0xff] %v16865_v54  ;;  %v4543_v18 = vadd.f32 %v16660_v31, %v4542_v4  ;;  %v13154_v46 = vpop.f32.mrb[94].mxu0  ;;  %v4627_v27 = vsel %vm18726_vm11, %v4613_v62, %v4614_v56  ;;  %v4626_v21 = vsel %vm18722_vm8, %v4614_v56, %v4615_v30  ;;  %v16879_v9 = vpack.c.bf16 %v4724_v16, %v4725_v8  ;;  %vm18728_vm13 = vmmov %vm18718_vm6 }
 0x41d   : > { %v4587_v15 = vmax.f32 %v4551_v57, 0.0  ;;  %v4554_v58 = vadd.f32 %v13154_v46, %v16660_v31  ;;  %v4545_v41 = vpop.f32.mrb[95].mxu0  ;;  %v16882_v13 = vpack.c.bf16 %v4627_v27, %v4628_v6  ;;  %v16884_v44 = vpack.c.bf16 %v4625_v22, %v4626_v21  ;;  %vm18730_vm6 = vmmov %vm18722_vm8 }
 0x41e   : > { %v4585_v54 = vmax.f32 %v4543_v18, 0.0  ;;  %v4546_v4 = vadd.f32 %v16660_v31, %v4545_v41  ;;  %v4722_v19 = vsel %vm18727_vm12, %v4710_v37, %v4711_v24  ;;  %v4723_v62 = vsel %vm18728_vm13, %v4709_v45, %v4710_v37  ;;  %vm18733_vm11 = vmmov %vm18730_vm6 }
 0x41f   : > { %v4588_v30 = vmax.f32 %v4554_v58, 0.0  ;;  %v16891_v8 = vpack.c.bf16 %v4722_v19, %v4723_v62  ;;  %v4619_v56 = vrot.slane %v4587_v15, 7  ;;  %v4715_v6 = vrot.slane %v4587_v15, 1  ;;  %vm18734_vm8 = vmmov %vm18727_vm12 }
 0x420   : > { %v4617_v57 = vrot.slane %v4585_v54, 7  ;;  %v4713_v16 = vrot.slane %v4585_v54, 1  ;;  %v4586_v46 = vmax.f32 %v4546_v4, 0.0  ;;  %v18732_v45 = vrot.slane %v16665_v48, 7  ;;  %vm18735_vm12 = vmmov %vm18730_vm6 }
 0x421   : > { %v4620_v27 = vrot.slane %v4588_v30, 7  ;;  %v4716_v22 = vrot.slane %v4588_v30, 1  ;;  %v16893_v21 = vpack.c.bf16 %v4588_v30, %v4587_v15  ;;  %vm18736_vm13 = vmmov %vm18734_vm8 }
 0x422   : > { %v4618_v18 = vrot.slane %v4586_v46, 7  ;;  %v4714_v31 = vrot.slane %v4586_v46, 1  ;;  %v4624_v41 = vsel %vm18730_vm6, %v4616_v35, %v4617_v57  ;;  %v16897_v24 = vpack.c.bf16 %v4586_v46, %v4585_v54  ;;  %v15052_v35 = vld [vmem:[#allocation4 + $0x288] sm:$0xff]  }
 0x423   : > { %18729 = vst [vmem:[#allocation18_spill] sm:$0xff] %v16893_v21  ;;  %v4652_v19 = vsel %vm18733_vm11, %v4620_v27, %v18732_v45  ;;  %v4720_v37 = vsel %vm18734_vm8, %v4712_v49, %v4713_v16  ;;  %v4621_v58 = vsel %vm18735_vm12, %v4619_v56, %v4620_v27  ;;  %v4717_v15 = vsel %vm18736_vm13, %v4715_v6, %v4716_v22  ;;  %vm18737_vm11 = vmmov %vm18734_vm8 }
 0x424   : > { %18731 = vst [vmem:[#allocation19_spill] sm:$0xff] %v16897_v24  ;;  %v16910_v4 = vpack.c.bf16 %v16684_v28, %v4652_v19  ;;  %v4623_v54 = vsel %vm18730_vm6, %v4617_v57, %v4618_v18  ;;  %v16914_v62 = vpack.c.bf16 %v4720_v37, %v4721_v17  ;;  %v4718_v30 = vsel %vm18737_vm11, %v4714_v31, %v4715_v6  ;;  %vm18738_vm12 = vmmov %vm18730_vm6  ;;  %v15061_v19 = vld [vmem:[#allocation4 + $0x2d0] sm:$0xff]   ;;  %v15062_v37 = vld [vmem:[#allocation4 + $0x2d8] sm:$0xff]  }
 0x425   : > { %v16918_v46 = vpack.c.bf16 %v4623_v54, %v4624_v41  ;;  %v4719_v49 = vsel %vm18734_vm8, %v4713_v16, %v4714_v31  ;;  %v4622_v27 = vsel %vm18738_vm12, %v4618_v18, %v4619_v56  ;;  %v18739_v28 = vrot.slane %v16665_v48, 1  ;;  %vm18740_vm13 = vmmov %vm18734_vm8  ;;  %v15053_v48 = vld [vmem:[#allocation4 + $0x290] sm:$0xff]   ;;  %v15054_v56 = vld [vmem:[#allocation4 + $0x298] sm:$0xff]  }
 0x426   : > { %13172 = vmatmul.mubr.msk.bf16.vlgmr.msra.gmra.mrb[96].mxu0 %vm18604_vm5, %v16910_v4  ;;  %v16931_v17 = vpack.c.bf16 %v4718_v30, %v4719_v49  ;;  %v16933_v57 = vpack.c.bf16 %v4621_v58, %v4622_v27  ;;  %v15056_v16 = vld [vmem:[#allocation4 + $0x2a8] sm:$0xff]   ;;  %v15058_v18 = vld [vmem:[#allocation4 + $0x2b8] sm:$0xff]   ;;  %vm18742_vm6 = vnez %v18610_v5  ;;  %vm18743_vm11 = vnez %v18516_v2  ;;  %v15059_v31 = vld [vmem:[#allocation4 + $0x2c0] sm:$0xff]  }
 0x427   : > { %v4748_v45 = vsel %vm18740_vm13, %v4716_v22, %v18739_v28  ;;  %13204 = vmatpush3.bf16.msra.mxu0 %v16654_v38  ;;  %13175 = vmatprep.mubr.msk.bf16.mxu0 %vm15947_vm10, %v16699_v32  ;;  %v15055_v38 = vld [vmem:[#allocation4 + $0x2a0] sm:$0xff]   ;;  %v15057_v22 = vld [vmem:[#allocation4 + $0x2b0] sm:$0xff]   ;;  %vm18744_vm8 = vnez %v18617_v63  ;;  %vm18745_vm12 = vnez %v18553_v43  ;;  %v15060_v41 = vld [vmem:[#allocation4 + $0x2c8] sm:$0xff]  }
 0x428   : > { %v16935_v6 = vpack.c.bf16 %v4748_v45, %v4717_v15  ;;  %13205 = vmatprep.subr.bf16.mxu0 %v15052_v35  ;;  %v15063_v58 = vld [vmem:[#allocation4 + $0x2e0] sm:$0xff]   ;;  %v15064_v15 = vld [vmem:[#allocation4 + $0x2e8] sm:$0xff]   ;;  %v15065_v54 = vld [vmem:[#allocation4 + $0x2f0] sm:$0xff]  }
 0x429   : > { %v15066_v30 = vld [vmem:[#allocation4 + $0x2f8] sm:$0xff]   ;;  %v18747_v49 = vld [vmem:[#allocation61_spill] sm:$0xff]  ;;  %v15067_v28 = vld [vmem:[#allocation4 + $0x300] sm:$0xff]  }
 0x42a   : > { %18741 = vst [vmem:[#allocation20_spill] sm:$0xff] %v16935_v6  ;;  %v18748_v27 = vld [vmem:[#allocation58_spill] sm:$0xff]  ;;  %v18749_v45 = vld [vmem:[#allocation9_spill] sm:$0xff]  ;;  %v15072_v6 = vld [vmem:[#allocation4 + $0x328] sm:$0xff]  }
 0x42b   : > { %13206 = vmatpush3.bf16.msra.mxu0 %v15052_v35  ;;  %v18746_v35 = vld [vmem:[#allocation52_spill] sm:$0xff] }
 0x42c   : > { %13207 = vmatprep.subr.bf16.mxu0 %v15053_v48 }
 0x42e   : > { %13176 = vmatmul.mubr.msk.bf16.gmra.mrb[100].mxu0 %vm15997_vm15, %v16722_v51 }
 0x42f   : > { %13179 = vmatprep.mubr.msk.bf16.mxu0 %vm16007_vm3, %v16724_v33  ;;  %13208 = vmatpush3.bf16.msra.mxu0 %v15053_v48  ;;  %v18750_v48 = vld [vmem:[#allocation8_spill] sm:$0xff] }
 0x430   : > { %13209 = vmatprep.subr.bf16.mxu0 %v15054_v56 }
 0x433   : > { %13210 = vmatpush3.bf16.msra.mxu0 %v15054_v56  ;;  %v18751_v56 = vld [vmem:[#allocation13_spill] sm:$0xff] }
 0x434   : > { %13211 = vmatprep.subr.bf16.mxu0 %v15055_v38 }
 0x436   : > { %13180 = vmatmul.mubr.msk.bf16.gmra.mrb[104].mxu0 %vm16034_vm14, %v16754_v25 }
 0x437   : > { %13183 = vmatprep.mubr.msk.bf16.mxu0 %vm16044_vm4, %v16756_v0  ;;  %13212 = vmatpush3.bf16.msra.mxu0 %v15055_v38  ;;  %v18752_v38 = vld [vmem:[#allocation12_spill] sm:$0xff] }
 0x438   : > { %13213 = vmatprep.subr.bf16.mxu0 %v15056_v16 }
 0x43b   : > { %13214 = vmatpush3.bf16.msra.mxu0 %v15056_v16  ;;  %v18753_v16 = vld [vmem:[#allocation17_spill] sm:$0xff] }
 0x43c   : > { %13215 = vmatprep.subr.bf16.mxu0 %v15057_v22 }
 0x43e   : > { %13184 = vmatmul.mubr.msk.bf16.gmra.mrb[108].mxu0 %vm18742_vm6, %v16786_v12 }
 0x43f   : > { %13187 = vmatprep.mubr.msk.bf16.mxu0 %vm18743_vm11, %v16788_v40  ;;  %13216 = vmatpush3.bf16.msra.mxu0 %v15057_v22  ;;  %v18754_v22 = vld [vmem:[#allocation16_spill] sm:$0xff] }
 0x440   : > { %13217 = vmatprep.subr.bf16.mxu0 %v15058_v18 }
 0x443   : > { %13218 = vmatpush3.bf16.msra.mxu0 %v15058_v18  ;;  %v15068_v18 = vld [vmem:[#allocation4 + $0x308] sm:$0xff]  }
 0x444   : > { %13251 = vmatprep.subr.bf16.mxu0 %v15059_v31 }
 0x446   : > { %13188 = vmatmul.mubr.msk.bf16.gmra.mrb[112].mxu0 %vm18614_vm0, %v16818_v61 }
 0x447   : > { %13191 = vmatprep.mubr.msk.bf16.mxu0 %vm18744_vm8, %v16820_v20 }
 0x44e   : > { %13192 = vmatmul.mubr.msk.bf16.gmra.mrb[116].mxu0 %vm18620_vm2, %v16850_v26 }
 0x44f   : > { %13195 = vmatprep.mubr.msk.bf16.mxu0 %vm18622_vm9, %v16852_v23 }
 0x456   : > { %13196 = vmatmul.mubr.msk.bf16.gmra.mrb[120].mxu0 %vm18624_vm1, %v16882_v13 }
 0x457   : > { %13199 = vmatprep.mubr.msk.bf16.mxu0 %vm18625_vm7, %v16884_v44 }
 0x45e   : > { %13200 = vmatmul.mubr.msk.bf16.gmra.mrb[124].mxu0 %vm18745_vm12, %v16918_v46 }
 0x45f   : > { %13219 = vmatprep.mubr.bf16.mxu0 %v18557_v60 }
 0x466   : > { %13220 = vmatmul.mubr.bf16.vlgmr.msra.gmra.mrb[96].mxu0 %v16673_v29 }
 0x467   : > { %13252 = vmatpush3.bf16.msra.mxu0 %v15059_v31  ;;  %13223 = vmatprep.mubr.bf16.mxu0 %v16669_v55  ;;  %v18755_v31 = vld [vmem:[#allocation46_spill] sm:$0xff] }
 0x468   : > { %13253 = vmatprep.subr.bf16.mxu0 %v15060_v41 }
 0x46b   : > { %13254 = vmatpush3.bf16.msra.mxu0 %v15060_v41  ;;  %v18756_v41 = vld [vmem:[#allocation42_spill] sm:$0xff] }
 0x46c   : > { %13255 = vmatprep.subr.bf16.mxu0 %v15061_v19  ;;  %vm18757_vm13 = vnez %v18756_v41  ;;  %v18771_v41 = vld [vmem:[#allocation53_spill] sm:$0xff] }
 0x46e   : > { %13224 = vmatmul.mubr.bf16.gmra.mrb[100].mxu0 %v16705_v36 }
 0x46f   : > { %13227 = vmatprep.mubr.bf16.mxu0 %v16701_v11  ;;  %13256 = vmatpush3.bf16.msra.mxu0 %v15061_v19  ;;  %v18758_v19 = vld [vmem:[#allocation48_spill] sm:$0xff] }
 0x470   : > { %13257 = vmatprep.subr.bf16.mxu0 %v15062_v37 }
 0x473   : > { %13258 = vmatpush3.bf16.msra.mxu0 %v15062_v37  ;;  %v18759_v37 = vld [vmem:[#allocation45_spill] sm:$0xff] }
 0x474   : > { %13259 = vmatprep.subr.bf16.mxu0 %v15063_v58  ;;  %vm18760_vm12 = vnez %v18759_v37  ;;  %v18767_v37 = vld [vmem:[#allocation34_spill] sm:$0xff] }
 0x476   : > { %13228 = vmatmul.mubr.bf16.gmra.mrb[104].mxu0 %v16737_v7 }
 0x477   : > { %13231 = vmatprep.mubr.bf16.mxu0 %v18746_v35  ;;  %13260 = vmatpush3.bf16.msra.mxu0 %v15063_v58  ;;  %v15069_v58 = vld [vmem:[#allocation4 + $0x310] sm:$0xff]  }
 0x478   : > { %13261 = vmatprep.subr.bf16.mxu0 %v15064_v15 }
 0x47b   : > { %13262 = vmatpush3.bf16.msra.mxu0 %v15064_v15  ;;  %v15070_v15 = vld [vmem:[#allocation4 + $0x318] sm:$0xff]  }
 0x47c   : > { %13263 = vmatprep.subr.bf16.mxu0 %v15065_v54 }
 0x47e   : > { %13232 = vmatmul.mubr.bf16.gmra.mrb[108].mxu0 %v18747_v49 }
 0x47f   : > { %13235 = vmatprep.mubr.bf16.mxu0 %v18748_v27  ;;  %13264 = vmatpush3.bf16.msra.mxu0 %v15065_v54  ;;  %v18761_v54 = vld [vmem:[#allocation50_spill] sm:$0xff] }
 0x480   : > { %13265 = vmatprep.subr.bf16.mxu0 %v15066_v30 }
 0x483   : > { %13266 = vmatpush3.bf16.msra.mxu0 %v15066_v30  ;;  %v18762_v30 = vld [vmem:[#allocation47_spill] sm:$0xff] }
 0x484   : > { %13299 = vmatprep.subr.bf16.mxu0 %v15067_v28  ;;  %vm18763_vm7 = vnez %v18762_v30  ;;  %v15073_v30 = vld [vmem:[#allocation4 + $0x330] sm:$0xff]  }
 0x486   : > { %13236 = vmatmul.mubr.bf16.gmra.mrb[112].mxu0 %v18749_v45 }
 0x487   : > { %13239 = vmatprep.mubr.bf16.mxu0 %v18750_v48 }
 0x48e   : > { %13240 = vmatmul.mubr.bf16.gmra.mrb[116].mxu0 %v18751_v56 }
 0x48f   : > { %13243 = vmatprep.mubr.bf16.mxu0 %v18752_v38 }
 0x496   : > { %13244 = vmatmul.mubr.bf16.gmra.mrb[120].mxu0 %v18753_v16 }
 0x497   : > { %13247 = vmatprep.mubr.bf16.mxu0 %v18754_v22 }
 0x49e   : > { %13248 = vmatmul.mubr.bf16.gmra.mrb[124].mxu0 %v16897_v24 }
 0x49f   : > { %13267 = vmatprep.mubr.bf16.mxu0 %v18557_v60  ;;  %v18765_v60 = vld [vmem:[#allocation49_spill] sm:$0xff] }
 0x4a0   : > { %vm18766_vm1 = vnez %v18765_v60  ;;  %v15074_v60 = vld [vmem:[#allocation4 + $0x338] sm:$0xff]  }
 0x4a6   : > { %13268 = vmatmul.mubr.msk.bf16.vlgmr.msra.gmra.mrb[96].mxu0 %vm18757_vm13, %v18755_v31  ;;  %vm18772_vm13 = vnez %v18771_v41  ;;  %v18779_v41 = vld [vmem:[#allocation11_spill] sm:$0xff] }
 0x4a7   : > { %13300 = vmatpush3.bf16.msra.mxu0 %v15067_v28  ;;  %13271 = vmatprep.mubr.msk.bf16.mxu0 %vm18760_vm12, %v18758_v19  ;;  %v15071_v28 = vld [vmem:[#allocation4 + $0x320] sm:$0xff]  }
 0x4a8   : > { %13301 = vmatprep.subr.bf16.mxu0 %v15068_v18  ;;  %v18768_v19 = vld [vmem:[#allocation51_spill] sm:$0xff] }
 0x4a9   : > { %vm18769_vm12 = vnez %v18768_v19  ;;  %v15075_v19 = vld [vmem:[#allocation4 + $0x340] sm:$0xff]  }
 0x4ab   : > { %13302 = vmatpush3.bf16.msra.mxu0 %v15068_v18  ;;  %v18770_v18 = vld [vmem:[#allocation44_spill] sm:$0xff] }
 0x4ac   : > { %13303 = vmatprep.subr.bf16.mxu0 %v15069_v58 }
 0x4ae   : > { %13272 = vmatmul.mubr.msk.bf16.gmra.mrb[100].mxu0 %vm18763_vm7, %v18761_v54  ;;  %v18777_v54 = vld [vmem:[#allocation56_spill] sm:$0xff] }
 0x4af   : > { %13275 = vmatprep.mubr.msk.bf16.mxu0 %vm18766_vm1, %v18764_v50  ;;  %13304 = vmatpush3.bf16.msra.mxu0 %v15069_v58  ;;  %v18773_v58 = vld [vmem:[#allocation7_spill] sm:$0xff]  ;;  %vm18778_vm7 = vnez %v18777_v54  ;;  %v18788_v54 = vld [vmem:[#allocation62_spill] sm:$0xff] }
 0x4b0   : > { %13305 = vmatprep.subr.bf16.mxu0 %v15070_v15  ;;  %v18774_v50 = vld [vmem:[#allocation55_spill] sm:$0xff] }
 0x4b1   : > { %vm18775_vm1 = vnez %v18774_v50  ;;  %v18786_v50 = vld [vmem:[#allocation60_spill] sm:$0xff] }
 0x4b3   : > { %13306 = vmatpush3.bf16.msra.mxu0 %v15070_v15  ;;  %v18776_v15 = vld [vmem:[#allocation10_spill] sm:$0xff] }
 0x4b4   : > { %13307 = vmatprep.subr.bf16.mxu0 %v15071_v28 }
 0x4b6   : > { %13276 = vmatmul.mubr.msk.bf16.gmra.mrb[104].mxu0 %vm18769_vm12, %v18767_v37  ;;  %v18785_v37 = vld [vmem:[#allocation15_spill] sm:$0xff] }
 0x4b7   : > { %13279 = vmatprep.mubr.msk.bf16.mxu0 %vm18772_vm13, %v18770_v18  ;;  %13308 = vmatpush3.bf16.msra.mxu0 %v15071_v28  ;;  %v18780_v28 = vld [vmem:[#allocation57_spill] sm:$0xff]  ;;  %v18783_v18 = vld [vmem:[#allocation59_spill] sm:$0xff] }
 0x4b8   : > { %13309 = vmatprep.subr.bf16.mxu0 %v15072_v6  ;;  %vm18781_vm13 = vnez %v18780_v28  ;;  %vm18784_vm12 = vnez %v18783_v18  ;;  %v18794_v28 = vld [vmem:[#allocation65_spill] sm:$0xff]  ;;  %v18830_v18 = vld [vmem:[#allocation66_spill] sm:$0xff] }
 0x4bb   : > { %13310 = vmatpush3.bf16.msra.mxu0 %v15072_v6  ;;  %v18782_v6 = vld [vmem:[#allocation14_spill] sm:$0xff] }
 0x4bc   : > { %13311 = vmatprep.subr.bf16.mxu0 %v15073_v30 }
 0x4be   : > { %13280 = vmatmul.mubr.msk.bf16.gmra.mrb[108].mxu0 %vm18775_vm1, %v18773_v58  ;;  %vm18787_vm1 = vnez %v18786_v50  ;;  %v15076_v50 = vld [vmem:[#allocation4 + $0x348] sm:$0xff]  }
 0x4bf   : > { %13283 = vmatprep.mubr.msk.bf16.mxu0 %vm18778_vm7, %v18776_v15  ;;  %13312 = vmatpush3.bf16.msra.mxu0 %v15073_v30  ;;  %vm18789_vm7 = vnez %v18788_v54  ;;  %v18790_v30 = vld [vmem:[#allocation63_spill] sm:$0xff]  ;;  %v15100_v54 = vld [vmem:[#allocation4 + $0x408] sm:$0xff]  }
 0x4c0   : > { %13313 = vmatprep.subr.bf16.mxu0 %v15074_v60  ;;  %vm18791_vm9 = vnez %v18790_v30 }
 0x4c3   : > { %13314 = vmatpush3.bf16.msra.mxu0 %v15074_v60  ;;  %v18792_v60 = vld [vmem:[#allocation64_spill] sm:$0xff] }
 0x4c4   : > { %13347 = vmatprep.subr.bf16.mxu0 %v15075_v19  ;;  %vm18793_vm2 = vnez %v18792_v60  ;;  %v15077_v60 = vld [vmem:[#allocation4 + $0x350] sm:$0xff]  }
 0x4c6   : > { %13284 = vmatmul.mubr.msk.bf16.gmra.mrb[112].mxu0 %vm18781_vm13, %v18779_v41  ;;  %vm18795_vm13 = vnez %v18794_v28  ;;  %v15078_v28 = vld [vmem:[#allocation4 + $0x358] sm:$0xff]  }
 0x4c7   : > { %13287 = vmatprep.mubr.msk.bf16.mxu0 %vm18784_vm12, %v18782_v6 }
 0x4ce   : > { %13288 = vmatmul.mubr.msk.bf16.gmra.mrb[116].mxu0 %vm18787_vm1, %v18785_v37 }
 0x4cf   : > { %13291 = vmatprep.mubr.msk.bf16.mxu0 %vm18789_vm7, %v16879_v9 }
 0x4d6   : > { %13292 = vmatmul.mubr.msk.bf16.gmra.mrb[120].mxu0 %vm18791_vm9, %v16891_v8 }
 0x4d7   : > { %13295 = vmatprep.mubr.msk.bf16.mxu0 %vm18793_vm2, %v16914_v62 }
 0x4de   : > { %13296 = vmatmul.mubr.msk.bf16.gmra.mrb[124].mxu0 %vm18795_vm13, %v16931_v17 }
 0x4df   : > { %13315 = vmatprep.mubr.msk.bf16.mxu0 %vm18604_vm5, %v16910_v4  ;;  %v15079_v4 = vld [vmem:[#allocation4 + $0x360] sm:$0xff]   ;;  %vm18796_vm5 = vnez %v18532_v42  ;;  %v15189_v42 = vld [vmem:[#allocation4 + $0x690] sm:$0xff]  }
 0x4e6   : > { %13316 = vmatmul.mubr.msk.bf16.vlgmr.msra.gmra.mrb[96].mxu0 %vm15947_vm10, %v16699_v32 }
 0x4e7   : > { %13348 = vmatpush3.bf16.msra.mxu0 %v15075_v19  ;;  %13319 = vmatprep.mubr.msk.bf16.mxu0 %vm15997_vm15, %v16722_v51  ;;  %v15080_v19 = vld [vmem:[#allocation4 + $0x368] sm:$0xff]  }
 0x4e8   : > { %13349 = vmatprep.subr.bf16.mxu0 %v15076_v50 }
 0x4eb   : > { %13350 = vmatpush3.bf16.msra.mxu0 %v15076_v50  ;;  %v15081_v50 = vld [vmem:[#allocation4 + $0x370] sm:$0xff]  }
 0x4ec   : > { %13351 = vmatprep.subr.bf16.mxu0 %v15077_v60 }
 0x4ee   : > { %13320 = vmatmul.mubr.msk.bf16.gmra.mrb[100].mxu0 %vm16007_vm3, %v16724_v33 }
 0x4ef   : > { %13323 = vmatprep.mubr.msk.bf16.mxu0 %vm16034_vm14, %v16754_v25  ;;  %13352 = vmatpush3.bf16.msra.mxu0 %v15077_v60  ;;  %v15084_v60 = vld [vmem:[#allocation4 + $0x388] sm:$0xff]  }
 0x4f0   : > { %13353 = vmatprep.subr.bf16.mxu0 %v15078_v28 }
 0x4f3   : > { %13354 = vmatpush3.bf16.msra.mxu0 %v15078_v28  ;;  %v15083_v28 = vld [vmem:[#allocation4 + $0x380] sm:$0xff]  }
 0x4f4   : > { %13355 = vmatprep.subr.bf16.mxu0 %v15079_v4 }
 0x4f6   : > { %13324 = vmatmul.mubr.msk.bf16.gmra.mrb[104].mxu0 %vm16044_vm4, %v16756_v0  ;;  %vm18800_vm4 = vnez %v18553_v43 }
 0x4f7   : > { %13327 = vmatprep.mubr.msk.bf16.mxu0 %vm18742_vm6, %v16786_v12  ;;  %13356 = vmatpush3.bf16.msra.mxu0 %v15079_v4  ;;  %vm18799_vm6 = vnez %v18548_v34  ;;  %v15085_v4 = vld [vmem:[#allocation4 + $0x390] sm:$0xff]  }
 0x4f8   : > { %13357 = vmatprep.subr.bf16.mxu0 %v15080_v19 }
 0x4fb   : > { %13358 = vmatpush3.bf16.msra.mxu0 %v15080_v19  ;;  %v15086_v19 = vld [vmem:[#allocation4 + $0x398] sm:$0xff]  }
 0x4fc   : > { %13359 = vmatprep.subr.bf16.mxu0 %v15081_v50 }
 0x4fe   : > { %13328 = vmatmul.mubr.msk.bf16.gmra.mrb[108].mxu0 %vm18743_vm11, %v16788_v40  ;;  %vm18797_vm11 = vnez %v18621_v14 }
 0x4ff   : > { %13331 = vmatprep.mubr.msk.bf16.mxu0 %vm18614_vm0, %v16818_v61  ;;  %13360 = vmatpush3.bf16.msra.mxu0 %v15081_v50  ;;  %vm18798_vm0 = vnez %v18543_v39  ;;  %v15087_v50 = vld [vmem:[#allocation4 + $0x3a0] sm:$0xff]  }
 0x500   : > { %13361 = vmatprep.subr.bf16.mxu0 %v15082_v59 }
 0x503   : > { %13362 = vmatpush3.bf16.msra.mxu0 %v15082_v59  ;;  %v18801_v59 = vld [vmem:[#allocation25_spill] sm:$0xff] }
 0x504   : > { %13395 = vmatprep.subr.bf16.mxu0 %v15083_v28 }
 0x506   : > { %13332 = vmatmul.mubr.msk.bf16.gmra.mrb[112].mxu0 %vm18744_vm8, %v16820_v20  ;;  %vm18802_vm8 = vnez %v18801_v59 }
 0x507   : > { %13335 = vmatprep.mubr.msk.bf16.mxu0 %vm18796_vm5, %v16850_v26 }
 0x50e   : > { %13336 = vmatmul.mubr.msk.bf16.gmra.mrb[116].mxu0 %vm18797_vm11, %v16852_v23 }
 0x50f   : > { %13339 = vmatprep.mubr.msk.bf16.mxu0 %vm18798_vm0, %v16882_v13 }
 0x516   : > { %13340 = vmatmul.mubr.msk.bf16.gmra.mrb[120].mxu0 %vm18799_vm6, %v16884_v44 }
 0x517   : > { %13343 = vmatprep.mubr.msk.bf16.mxu0 %vm18800_vm4, %v16918_v46 }
 0x51e   : > { %13344 = vmatmul.mubr.msk.bf16.gmra.mrb[124].mxu0 %vm18802_vm8, %v16933_v57 }
 0x51f   : > { %13363 = vmatprep.mubr.bf16.mxu0 %v16673_v29  ;;  %v15088_v29 = vld [vmem:[#allocation4 + $0x3a8] sm:$0xff]  }
 0x526   : > { %13364 = vmatmul.mubr.bf16.vlgmr.msra.gmra.mrb[96].mxu0 %v16669_v55 }
 0x527   : > { %13396 = vmatpush3.bf16.msra.mxu0 %v15083_v28  ;;  %13367 = vmatprep.mubr.bf16.mxu0 %v16705_v36  ;;  %v15089_v28 = vld [vmem:[#allocation4 + $0x3b0] sm:$0xff]  }
 0x528   : > { %13397 = vmatprep.subr.bf16.mxu0 %v15084_v60 }
 0x52b   : > { %13398 = vmatpush3.bf16.msra.mxu0 %v15084_v60  ;;  %v15090_v60 = vld [vmem:[#allocation4 + $0x3b8] sm:$0xff]  }
 0x52c   : > { %13399 = vmatprep.subr.bf16.mxu0 %v15085_v4 }
 0x52e   : > { %13368 = vmatmul.mubr.bf16.gmra.mrb[100].mxu0 %v16701_v11 }
 0x52f   : > { %13371 = vmatprep.mubr.bf16.mxu0 %v16737_v7  ;;  %13400 = vmatpush3.bf16.msra.mxu0 %v15085_v4  ;;  %v15091_v4 = vld [vmem:[#allocation4 + $0x3c0] sm:$0xff]  }
 0x530   : > { %13401 = vmatprep.subr.bf16.mxu0 %v15086_v19 }
 0x533   : > { %13402 = vmatpush3.bf16.msra.mxu0 %v15086_v19  ;;  %v18803_v19 = vld [vmem:[#allocation42_spill] sm:$0xff] }
 0x534   : > { %13403 = vmatprep.subr.bf16.mxu0 %v15087_v50  ;;  %vm18804_vm8 = vnez %v18803_v19  ;;  %v18815_v19 = vld [vmem:[#allocation51_spill] sm:$0xff] }
 0x536   : > { %13372 = vmatmul.mubr.bf16.gmra.mrb[104].mxu0 %v18746_v35 }
 0x537   : > { %13375 = vmatprep.mubr.bf16.mxu0 %v18747_v49  ;;  %13404 = vmatpush3.bf16.msra.mxu0 %v15087_v50  ;;  %v15092_v50 = vld [vmem:[#allocation4 + $0x3c8] sm:$0xff]  }
 0x538   : > { %13405 = vmatprep.subr.bf16.mxu0 %v15088_v29 }
 0x53b   : > { %13406 = vmatpush3.bf16.msra.mxu0 %v15088_v29  ;;  %v18805_v29 = vld [vmem:[#allocation48_spill] sm:$0xff] }
 0x53c   : > { %13407 = vmatprep.subr.bf16.mxu0 %v15089_v28 }
 0x53e   : > { %13376 = vmatmul.mubr.bf16.gmra.mrb[108].mxu0 %v18748_v27 }
 0x53f   : > { %13379 = vmatprep.mubr.bf16.mxu0 %v18749_v45  ;;  %13408 = vmatpush3.bf16.msra.mxu0 %v15089_v28  ;;  %v18806_v28 = vld [vmem:[#allocation45_spill] sm:$0xff] }
 0x540   : > { %13409 = vmatprep.subr.bf16.mxu0 %v15090_v60  ;;  %vm18807_vm4 = vnez %v18806_v28  ;;  %v18818_v28 = vld [vmem:[#allocation53_spill] sm:$0xff] }
 0x543   : > { %13410 = vmatpush3.bf16.msra.mxu0 %v15090_v60  ;;  %v18808_v60 = vld [vmem:[#allocation50_spill] sm:$0xff] }
 0x544   : > { %13443 = vmatprep.subr.bf16.mxu0 %v15091_v4 }
 0x546   : > { %13380 = vmatmul.mubr.bf16.gmra.mrb[112].mxu0 %v18750_v48 }
 0x547   : > { %13383 = vmatprep.mubr.bf16.mxu0 %v18751_v56 }
 0x54e   : > { %13384 = vmatmul.mubr.bf16.gmra.mrb[116].mxu0 %v18752_v38  ;;  %v18809_v38 = vld [vmem:[#allocation47_spill] sm:$0xff] }
 0x54f   : > { %13387 = vmatprep.mubr.bf16.mxu0 %v18753_v16  ;;  %vm18810_vm6 = vnez %v18809_v38  ;;  %v18812_v16 = vld [vmem:[#allocation49_spill] sm:$0xff]  ;;  %v15096_v38 = vld [vmem:[#allocation4 + $0x3e8] sm:$0xff]  }
 0x550   : > { %vm18813_vm0 = vnez %v18812_v16  ;;  %v15097_v16 = vld [vmem:[#allocation4 + $0x3f0] sm:$0xff]  }
 0x556   : > { %13388 = vmatmul.mubr.bf16.gmra.mrb[120].mxu0 %v18754_v22  ;;  %v15093_v22 = vld [vmem:[#allocation4 + $0x3d0] sm:$0xff]  }
 0x557   : > { %13391 = vmatprep.mubr.bf16.mxu0 %v16897_v24  ;;  %v15094_v24 = vld [vmem:[#allocation4 + $0x3d8] sm:$0xff]  }
 0x55e   : > { %13392 = vmatmul.mubr.bf16.gmra.mrb[124].mxu0 %v16893_v21  ;;  %v18811_v21 = vld [vmem:[#allocation54_spill] sm:$0xff] }
 0x55f   : > { %13411 = vmatprep.mubr.msk.bf16.mxu0 %vm18804_vm8, %v18755_v31  ;;  %v18814_v31 = vld [vmem:[#allocation34_spill] sm:$0xff]  ;;  %vm18816_vm8 = vnez %v18815_v19 }
 0x560   : > { %v15098_v19 = vld [vmem:[#allocation4 + $0x3f8] sm:$0xff]  }
 0x566   : > { %13412 = vmatmul.mubr.msk.bf16.vlgmr.msra.gmra.mrb[96].mxu0 %vm18807_vm4, %v18805_v29 }
 0x567   : > { %13444 = vmatpush3.bf16.msra.mxu0 %v15091_v4  ;;  %13415 = vmatprep.mubr.msk.bf16.mxu0 %vm18810_vm6, %v18808_v60  ;;  %v15095_v4 = vld [vmem:[#allocation4 + $0x3e0] sm:$0xff]   ;;  %v18817_v60 = vld [vmem:[#allocation44_spill] sm:$0xff]  ;;  %vm18819_vm6 = vnez %v18818_v28 }
 0x568   : > { %13445 = vmatprep.subr.bf16.mxu0 %v15092_v50  ;;  %v15099_v28 = vld [vmem:[#allocation4 + $0x400] sm:$0xff]  }
 0x56b   : > { %13446 = vmatpush3.bf16.msra.mxu0 %v15092_v50  ;;  %v18820_v50 = vld [vmem:[#allocation55_spill] sm:$0xff] }
 0x56c   : > { %13447 = vmatprep.subr.bf16.mxu0 %v15093_v22  ;;  %vm18821_vm4 = vnez %v18820_v50 }
 0x56e   : > { %13416 = vmatmul.mubr.msk.bf16.gmra.mrb[100].mxu0 %vm18813_vm0, %v18811_v21 }
 0x56f   : > { %13419 = vmatprep.mubr.msk.bf16.mxu0 %vm18816_vm8, %v18814_v31  ;;  %13448 = vmatpush3.bf16.msra.mxu0 %v15093_v22  ;;  %v18822_v22 = vld [vmem:[#allocation56_spill] sm:$0xff] }
 0x570   : > { %13449 = vmatprep.subr.bf16.mxu0 %v15094_v24  ;;  %vm18823_vm8 = vnez %v18822_v22 }
 0x573   : > { %13450 = vmatpush3.bf16.msra.mxu0 %v15094_v24  ;;  %v18824_v24 = vld [vmem:[#allocation57_spill] sm:$0xff] }
 0x574   : > { %13451 = vmatprep.subr.bf16.mxu0 %v15095_v4  ;;  %vm18825_vm0 = vnez %v18824_v24 }
 0x576   : > { %13420 = vmatmul.mubr.msk.bf16.gmra.mrb[104].mxu0 %vm18819_vm6, %v18817_v60 }
 0x577   : > { %13423 = vmatprep.mubr.msk.bf16.mxu0 %vm18821_vm4, %v18773_v58  ;;  %13452 = vmatpush3.bf16.msra.mxu0 %v15095_v4  ;;  %v18829_v4 = vld [vmem:[#allocation20_spill] sm:$0xff] }
 0x578   : > { %13453 = vmatprep.subr.bf16.mxu0 %v15096_v38 }
 0x57b   : > { %13454 = vmatpush3.bf16.msra.mxu0 %v15096_v38 }
 0x57c   : > { %13455 = vmatprep.subr.bf16.mxu0 %v15097_v16 }
 0x57e   : > { %13424 = vmatmul.mubr.msk.bf16.gmra.mrb[108].mxu0 %vm18823_vm8, %v18776_v15 }
 0x57f   : > { %13427 = vmatprep.mubr.msk.bf16.mxu0 %vm18825_vm0, %v18779_v41  ;;  %13456 = vmatpush3.bf16.msra.mxu0 %v15097_v16 }
 0x580   : > { %13457 = vmatprep.subr.bf16.mxu0 %v15098_v19 }
 0x583   : > { %13458 = vmatpush3.bf16.msra.mxu0 %v15098_v19  ;;  %v15101_v19 = vld [vmem:[#allocation4 + $0x410] sm:$0xff]  }
 0x584   : > { %13491 = vmatprep.subr.bf16.mxu0 %v15099_v28 }
 0x586   : > { %13428 = vmatmul.mubr.msk.bf16.gmra.mrb[112].mxu0 %vm18784_vm12, %v18782_v6  ;;  %vm18831_vm12 = vnez %v18830_v18  ;;  %v15102_v18 = vld [vmem:[#allocation4 + $0x418] sm:$0xff]  }
 0x587   : > { %13431 = vmatprep.mubr.msk.bf16.mxu0 %vm18787_vm1, %v18785_v37 }
 0x58e   : > { %13432 = vmatmul.mubr.msk.bf16.gmra.mrb[116].mxu0 %vm18789_vm7, %v16879_v9 }
 0x58f   : > { %13435 = vmatprep.mubr.msk.bf16.mxu0 %vm18791_vm9, %v16891_v8 }
 0x596   : > { %13436 = vmatmul.mubr.msk.bf16.gmra.mrb[120].mxu0 %vm18793_vm2, %v16914_v62 }
 0x597   : > { %13439 = vmatprep.mubr.msk.bf16.mxu0 %vm18795_vm13, %v16931_v17 }
 0x59e   : > { %13440 = vmatmul.mubr.msk.bf16.gmra.mrb[124].mxu0 %vm18831_vm12, %v18829_v4 }
 0x59f   : > { %13459 = vmatprep.mubr.msk.bf16.mxu0 %vm15947_vm10, %v16699_v32  ;;  %vm18832_vm10 = vnez %v18609_v53  ;;  %v15104_v32 = vld [vmem:[#allocation4 + $0x428] sm:$0xff]  }
 0x5a6   : > { %13460 = vmatmul.mubr.msk.bf16.vlgmr.msra.gmra.mrb[96].mxu0 %vm15997_vm15, %v16722_v51  ;;  %v15103_v51 = vld [vmem:[#allocation4 + $0x420] sm:$0xff]   ;;  %vm18834_vm15 = vnez %v18516_v2 }
 0x5a7   : > { %13492 = vmatpush3.bf16.msra.mxu0 %v15099_v28  ;;  %13463 = vmatprep.mubr.msk.bf16.mxu0 %vm16007_vm3, %v16724_v33  ;;  %vm18833_vm3 = vnez %v18610_v5  ;;  %v15106_v33 = vld [vmem:[#allocation4 + $0x438] sm:$0xff]  }
 0x5a8   : > { %13493 = vmatprep.subr.bf16.mxu0 %v15100_v54  ;;  %v18846_v28 = vld [vmem:[#allocation18_spill] sm:$0xff] }
 0x5ab   : > { %13494 = vmatpush3.bf16.msra.mxu0 %v15100_v54  ;;  %v18843_v54 = vld [vmem:[#allocation17_spill] sm:$0xff] }
 0x5ac   : > { %13495 = vmatprep.subr.bf16.mxu0 %v15101_v19 }
 0x5ae   : > { %13464 = vmatmul.mubr.msk.bf16.gmra.mrb[100].mxu0 %vm16034_vm14, %v16754_v25  ;;  %v15105_v25 = vld [vmem:[#allocation4 + $0x430] sm:$0xff]   ;;  %vm18836_vm14 = vnez %v18617_v63 }
 0x5af   : > { %13467 = vmatprep.mubr.msk.bf16.mxu0 %vm18832_vm10, %v16756_v0  ;;  %13496 = vmatpush3.bf16.msra.mxu0 %v15101_v19  ;;  %vm18835_vm10 = vnez %v18521_v47  ;;  %v15115_v0 = vld [vmem:[%s18117_s1 + $0x80] sm:$0xff]  }
 0x5b0   : > { %13497 = vmatprep.subr.bf16.mxu0 %v15102_v18  ;;  %13587 = vmatprep.subr.bf16.mxu1 %v15115_v0  ;;  %v18850_v19 = vld [vmem:[#allocation47_spill] sm:$0xff] }
 0x5b1   : > { %13588 = vmatpush3.bf16.msra.mxu1 %v15115_v0 }
 0x5b3   : > { %13498 = vmatpush3.bf16.msra.mxu0 %v15102_v18  ;;  %v18845_v18 = vld [vmem:[#allocation19_spill] sm:$0xff] }
 0x5b4   : > { %13499 = vmatprep.subr.bf16.mxu0 %v15103_v51 }
 0x5b6   : > { %13468 = vmatmul.mubr.msk.bf16.gmra.mrb[104].mxu0 %vm18833_vm3, %v16786_v12  ;;  %v15107_v12 = vld [vmem:[#allocation4 + $0x440] sm:$0xff]   ;;  %vm18840_vm3 = vnez %v18801_v59 }
 0x5b7   : > { %13471 = vmatprep.mubr.msk.bf16.mxu0 %vm18834_vm15, %v16788_v40  ;;  %13500 = vmatpush3.bf16.msra.mxu0 %v15103_v51  ;;  %vm18839_vm15 = vnez %v18553_v43  ;;  %v15116_v40 = vld [vmem:[%s18117_s1 + $0x88] sm:$0xff]   ;;  %v18854_v51 = vld [vmem:[#allocation51_spill] sm:$0xff] }
 0x5b8   : > { %13501 = vmatprep.subr.bf16.mxu0 %v15104_v32  ;;  %13589 = vmatprep.subr.bf16.mxu1 %v15116_v40 }
 0x5b9   : > { %13590 = vmatpush3.bf16.msra.mxu1 %v15116_v40  ;;  %v7383_v40 = vld [vmem:[%s15326_s14] sm:$0xff] }
 0x5bb   : > { %13502 = vmatpush3.bf16.msra.mxu0 %v15104_v32 }
 0x5bc   : > { %13503 = vmatprep.subr.bf16.mxu0 %v15105_v25 }
 0x5be   : > { %13472 = vmatmul.mubr.msk.bf16.gmra.mrb[108].mxu0 %vm18835_vm10, %v16818_v61  ;;  %vm18837_vm10 = vnez %v18543_v39  ;;  %v18841_v61 = vmov 0  }
 0x5bf   : > { %13475 = vmatprep.mubr.msk.bf16.mxu0 %vm18836_vm14, %v16820_v20  ;;  %13504 = vmatpush3.bf16.msra.mxu0 %v15105_v25  ;;  %vm18838_vm14 = vnez %v18548_v34  ;;  %v15117_v20 = vld [vmem:[%s18117_s1 + $0x90] sm:$0xff]  }
 0x5c0   : > { %13505 = vmatprep.subr.bf16.mxu0 %v15106_v33  ;;  %13591 = vmatprep.subr.bf16.mxu1 %v15117_v20  ;;  %v7385_v25 = vld [vmem:[%s15326_s14 + $0x10] sm:$0xff] }
 0x5c1   : > { %13592 = vmatpush3.bf16.msra.mxu1 %v15117_v20 }
 0x5c3   : > { %13506 = vmatpush3.bf16.msra.mxu0 %v15106_v33 }
 0x5c4   : > { %13539 = vmatprep.subr.bf16.mxu0 %v15107_v12 }
 0x5c6   : > { %13476 = vmatmul.mubr.msk.bf16.gmra.mrb[112].mxu0 %vm18796_vm5, %v16850_v26  ;;  %v15108_v26 = vld [vmem:[#allocation4 + $0x448] sm:$0xff]  }
 0x5c7   : > { %13479 = vmatprep.mubr.msk.bf16.mxu0 %vm18797_vm11, %v16852_v23  ;;  %v15118_v23 = vld [vmem:[%s18117_s1 + $0x98] sm:$0xff]  }
 0x5c8   : > { %13593 = vmatprep.subr.bf16.mxu1 %v15118_v23 }
 0x5c9   : > { %13594 = vmatpush3.bf16.msra.mxu1 %v15118_v23  ;;  %v7386_v23 = vld [vmem:[%s15326_s14 + $0x18] sm:$0xff] }
 0x5ce   : > { %13480 = vmatmul.mubr.msk.bf16.gmra.mrb[116].mxu0 %vm18837_vm10, %v16882_v13  ;;  %v15119_v13 = vld [vmem:[%s18117_s1 + $0xa0] sm:$0xff]   ;;  %vm18855_vm10 = vnez %v18854_v51 }
 0x5cf   : > { %13483 = vmatprep.mubr.msk.bf16.mxu0 %vm18838_vm14, %v16884_v44  ;;  %v15110_v44 = vld [vmem:[#allocation4 + $0x458] sm:$0xff]   ;;  %13595 = vmatprep.subr.bf16.mxu1 %v15119_v13 }
 0x5d0   : > { %13596 = vmatpush3.bf16.msra.mxu1 %v15119_v13 }
 0x5d6   : > { %13484 = vmatmul.mubr.msk.bf16.gmra.mrb[120].mxu0 %vm18839_vm15, %v16918_v46  ;;  %v15121_v46 = vld [vmem:[%s18117_s1 + $0xb0] sm:$0xff]   ;;  %vm18851_vm15 = vnez %v18850_v19 }
 0x5d7   : > { %13487 = vmatprep.mubr.msk.bf16.mxu0 %vm18840_vm3, %v16933_v57  ;;  %v15112_v57 = vld [vmem:[#allocation4 + $0x468] sm:$0xff]  }
 0x5de   : > { %13488 = vmatmul.mubr.bf16.gmra.mrb[124].mxu0 %v18841_v61 }
 0x5df   : > { %13507 = vmatprep.mubr.bf16.mxu0 %v16669_v55  ;;  %v15109_v55 = vld [vmem:[#allocation4 + $0x450] sm:$0xff]  }
 0x5e6   : > { %13508 = vmatmul.mubr.bf16.vlgmr.msra.gmra.mrb[96].mxu0 %v16705_v36  ;;  %v15120_v36 = vld [vmem:[%s18117_s1 + $0xa8] sm:$0xff]  }
 0x5e7   : > { %13540 = vmatpush3.bf16.msra.mxu0 %v15107_v12  ;;  %13511 = vmatprep.mubr.bf16.mxu0 %v16701_v11  ;;  %v15111_v11 = vld [vmem:[#allocation4 + $0x460] sm:$0xff]  }
 0x5e8   : > { %13541 = vmatprep.subr.bf16.mxu0 %v15108_v26  ;;  %13597 = vmatprep.subr.bf16.mxu1 %v15120_v36 }
 0x5e9   : > { %13598 = vmatpush3.bf16.msra.mxu1 %v15120_v36  ;;  %v7384_v36 = vld [vmem:[%s15326_s14 + $0x8] sm:$0xff] }
 0x5ea   : > { %13599 = vmatprep.subr.bf16.mxu1 %v15121_v46 }
 0x5eb   : > { %13542 = vmatpush3.bf16.msra.mxu0 %v15108_v26 }
 0x5ec   : > { %13543 = vmatprep.subr.bf16.mxu0 %v15109_v55 }
 0x5ed   : > { %13600 = vmatpush3.bf16.msra.mxu1 %v15121_v46 }
 0x5ee   : > { %13512 = vmatmul.mubr.bf16.gmra.mrb[100].mxu0 %v16737_v7  ;;  %v15113_v7 = vld [vmem:[#allocation4 + $0x470] sm:$0xff]  }
 0x5ef   : > { %13515 = vmatprep.mubr.bf16.mxu0 %v18746_v35  ;;  %13544 = vmatpush3.bf16.msra.mxu0 %v15109_v55  ;;  %v15114_v35 = vld [vmem:[#allocation4 + $0x478] sm:$0xff]  }
 0x5f0   : > { %13545 = vmatprep.subr.bf16.mxu0 %v15110_v44 }
 0x5f3   : > { %13546 = vmatpush3.bf16.msra.mxu0 %v15110_v44 }
 0x5f4   : > { %13547 = vmatprep.subr.bf16.mxu0 %v15111_v11 }
 0x5f6   : > { %13516 = vmatmul.mubr.bf16.gmra.mrb[104].mxu0 %v18747_v49  ;;  %v18842_v49 = vld [vmem:[#allocation12_spill] sm:$0xff] }
 0x5f7   : > { %13519 = vmatprep.mubr.bf16.mxu0 %v18748_v27  ;;  %13548 = vmatpush3.bf16.msra.mxu0 %v15111_v11  ;;  %v18844_v27 = vld [vmem:[#allocation16_spill] sm:$0xff] }
 0x5f8   : > { %13549 = vmatprep.subr.bf16.mxu0 %v15112_v57 }
 0x5fb   : > { %13550 = vmatpush3.bf16.msra.mxu0 %v15112_v57 }
 0x5fc   : > { %13551 = vmatprep.subr.bf16.mxu0 %v15113_v7 }
 0x5fe   : > { %13520 = vmatmul.mubr.bf16.gmra.mrb[108].mxu0 %v18749_v45  ;;  %v18847_v45 = vld [vmem:[#allocation45_spill] sm:$0xff] }
 0x5ff   : > { %13523 = vmatprep.mubr.bf16.mxu0 %v18750_v48  ;;  %13552 = vmatpush3.bf16.msra.mxu0 %v15113_v7  ;;  %vm18848_vm3 = vnez %v18847_v45  ;;  %v18849_v48 = vld [vmem:[#allocation50_spill] sm:$0xff] }
 0x600   : > { %13553 = vmatprep.subr.bf16.mxu0 %v15114_v35 }
 0x603   : > { %13554 = vmatpush3.bf16.msra.mxu0 %v15114_v35 }
 0x606   : > { %13524 = vmatmul.mubr.bf16.gmra.mrb[112].mxu0 %v18751_v56  ;;  %v18852_v56 = vld [vmem:[#allocation49_spill] sm:$0xff] }
 0x607   : > { %13527 = vmatprep.mubr.bf16.mxu0 %v18842_v49  ;;  %vm18853_vm14 = vnez %v18852_v56 }
 0x60e   : > { %13528 = vmatmul.mubr.bf16.gmra.mrb[116].mxu0 %v18843_v54 }
 0x60f   : > { %13531 = vmatprep.mubr.bf16.mxu0 %v18844_v27  ;;  %v18862_v27 = vld [vmem:[#allocation24_spill] sm:$0xff] }
 0x616   : > { %13532 = vmatmul.mubr.bf16.gmra.mrb[120].mxu0 %v18845_v18 }
 0x617   : > { %13535 = vmatprep.mubr.bf16.mxu0 %v18846_v28  ;;  %v18863_v28 = vld [vmem:[#allocation28_spill] sm:$0xff] }
 0x61e   : > { %13536 = vmatmul.mubr.bf16.gmra.mrb[124].mxu0 %v18841_v61 }
 0x61f   : > { %13555 = vmatprep.mubr.msk.bf16.mxu0 %vm18848_vm3, %v18805_v29 }
 0x626   : > { %13556 = vmatmul.mubr.msk.bf16.vlgmr.msra.gmra.mrb[96].mxu0 %vm18851_vm15, %v18849_v48 }
 0x627   : > { %13559 = vmatprep.mubr.msk.bf16.mxu0 %vm18853_vm14, %v18811_v21  ;;  %v18857_v21 = vld [vmem:[#allocation59_spill] sm:$0xff] }
 0x628   : > { %vm18858_vm14 = vnez %v18857_v21 }
 0x62e   : > { %13560 = vmatmul.mubr.msk.bf16.gmra.mrb[100].mxu0 %vm18855_vm10, %v18814_v31 }
 0x62f   : > { %13563 = vmatprep.mubr.msk.bf16.mxu0 %vm18819_vm6, %v18817_v60 }
 0x636   : > { %13564 = vmatmul.mubr.msk.bf16.gmra.mrb[104].mxu0 %vm18821_vm4, %v18773_v58 }
 0x637   : > { %13567 = vmatprep.mubr.msk.bf16.mxu0 %vm18823_vm8, %v18776_v15 }
 0x63e   : > { %13568 = vmatmul.mubr.msk.bf16.gmra.mrb[108].mxu0 %vm18825_vm0, %v18779_v41 }
 0x63f   : > { %13571 = vmatprep.mubr.msk.bf16.mxu0 %vm18858_vm14, %v18782_v6 }
 0x646   : > { %13572 = vmatmul.mubr.msk.bf16.gmra.mrb[112].mxu0 %vm18787_vm1, %v18785_v37 }
 0x647   : > { %13575 = vmatprep.mubr.msk.bf16.mxu0 %vm18789_vm7, %v16879_v9  ;;  %v15122_v9 = vld [vmem:[%s18117_s1 + $0xb8] sm:$0xff]  }
 0x648   : > { %13601 = vmatprep.subr.bf16.mxu1 %v15122_v9 }
 0x649   : > { %13602 = vmatpush3.bf16.msra.mxu1 %v15122_v9 }
 0x64e   : > { %13576 = vmatmul.mubr.msk.bf16.gmra.mrb[116].mxu0 %vm18791_vm9, %v16891_v8  ;;  %v17289_v8 = vld [vmem:[%s18120_s4 + $0x1] ss:$0 sm:$0xff] }
 0x64f   : > { %13579 = vmatprep.mubr.msk.bf16.mxu0 %vm18793_vm2, %v16914_v62 }
 0x656   : > { %13580 = vmatmul.mubr.msk.bf16.gmra.mrb[120].mxu0 %vm18795_vm13, %v16931_v17 }
 0x657   : > { %13583 = vmatprep.mubr.msk.bf16.mxu0 %vm18831_vm12, %v18829_v4 }
 0x65e   : > { %13584 = vmatmul.mubr.bf16.gmra.mrb[124].mxu0 %v18841_v61 }
 0x6f9   : > { %v13557_v62 = vpop.f32.mrb[96].mxu0 }
 0x6fa   : > { %v14131_v17 = vadd.f32 %v13557_v62, %v17289_v8  ;;  %v7192_v37 = vpop.f32.mrb[97].mxu0 }
 0x6fb   : > { %v14132_v15 = vadd.f32 %v17289_v8, %v7192_v37  ;;  %v13558_v6 = vpop.f32.mrb[98].mxu0  ;;  %v7389_v37 = vld [vmem:[%s15326_s14 + $0x30] sm:$0xff] }
 0x6fc   : > { %v7353_v60 = vmax.f32 %v14131_v17, 0.0  ;;  %v14133_v31 = vadd.f32 %v13558_v6, %v17289_v8  ;;  %v7195_v4 = vpop.f32.mrb[99].mxu0 }
 0x6fd   : > { %v7351_v33 = vmax.f32 %v14132_v15, 0.0  ;;  %v14134_v12 = vadd.f32 %v17289_v8, %v7195_v4 }
 0x6fe   : > { %v7417_v0 = vadd.f32 %v7385_v25, %v7353_v60  ;;  %v7354_v20 = vmax.f32 %v14133_v31, 0.0  ;;  %v7387_v31 = vld [vmem:[%s15326_s14 + $0x20] sm:$0xff] }
 0x6ff   : > { %v7415_v26 = vadd.f32 %v7383_v40, %v7351_v33  ;;  %v7352_v55 = vmax.f32 %v14134_v12, 0.0 }
 0x700   : > { %7449 = vst [vmem:[%s15326_s14 + $0x10] sm:$0xff] %v7417_v0  ;;  %v7418_v13 = vadd.f32 %v7386_v23, %v7354_v20  ;;  %v7496_v44 = vpack.c.bf16 %v7354_v20, %v7353_v60  ;;  %v7388_v20 = vld [vmem:[%s15326_s14 + $0x28] sm:$0xff] }
 0x701   : > { %7447 = vst [vmem:[%s15326_s14] sm:$0xff] %v7415_v26  ;;  %v7416_v11 = vadd.f32 %v7384_v36, %v7352_v55  ;;  %v7495_v46 = vpack.c.bf16 %v7352_v55, %v7351_v33  ;;  %v13561_v57 = vpop.f32.mrb[100].mxu0  ;;  %v7390_v33 = vld [vmem:[%s15326_s14 + $0x38] sm:$0xff] }
 0x702   : > { %7450 = vst [vmem:[%s15326_s14 + $0x18] sm:$0xff] %v7418_v13  ;;  %v14135_v7 = vadd.f32 %v13561_v57, %v17289_v8  ;;  %v7208_v35 = vpop.f32.mrb[101].mxu0  ;;  %v7512_v48 = vadd.bf16 %v7496_v44, %v18863_v28 }
 0x703   : > { %7448 = vst [vmem:[%s15326_s14 + $0x8] sm:$0xff] %v7416_v11  ;;  %v14136_v49 = vadd.f32 %v17289_v8, %v7208_v35  ;;  %v13562_v54 = vpop.f32.mrb[102].mxu0  ;;  %v7511_v18 = vadd.bf16 %v7495_v46, %v18862_v27  ;;  %v18864_v46 = vld [vmem:[#allocation27_spill] sm:$0xff] }
 0x704   : > { %v7357_v9 = vmax.f32 %v14135_v7, 0.0  ;;  %v14137_v62 = vadd.f32 %v13562_v54, %v17289_v8  ;;  %v7211_v17 = vpop.f32.mrb[103].mxu0  ;;  %v18865_v54 = vld [vmem:[#allocation30_spill] sm:$0xff] }
 0x705   : > { %v7355_v15 = vmax.f32 %v14136_v49, 0.0  ;;  %v14138_v6 = vadd.f32 %v17289_v8, %v7211_v17  ;;  %13603 = vmatprep.mubr.bf16.mxu1 %v7511_v18  ;;  %v7393_v18 = vld [vmem:[%s15326_s14 + $0x50] sm:$0xff] }
 0x706   : > { %v7421_v60 = vadd.f32 %v7389_v37, %v7357_v9  ;;  %v7358_v4 = vmax.f32 %v14137_v62, 0.0  ;;  %13604 = vmatmul.mubr.bf16.vlgmr.msra.gmra.mrb[32].mxu1 %v7512_v48  ;;  %v7391_v62 = vld [vmem:[%s15326_s14 + $0x40] sm:$0xff] }
 0x707   : > { %v7419_v25 = vadd.f32 %v7387_v31, %v7355_v15  ;;  %v7356_v12 = vmax.f32 %v14138_v6, 0.0 }
 0x708   : > { %7453 = vst [vmem:[%s15326_s14 + $0x30] sm:$0xff] %v7421_v60  ;;  %v7422_v0 = vadd.f32 %v7390_v33, %v7358_v4  ;;  %v7498_v40 = vpack.c.bf16 %v7358_v4, %v7357_v9  ;;  %v7392_v4 = vld [vmem:[%s15326_s14 + $0x48] sm:$0xff] }
 0x709   : > { %7451 = vst [vmem:[%s15326_s14 + $0x20] sm:$0xff] %v7419_v25  ;;  %v7420_v26 = vadd.f32 %v7388_v20, %v7356_v12  ;;  %v7497_v23 = vpack.c.bf16 %v7356_v12, %v7355_v15  ;;  %v13565_v55 = vpop.f32.mrb[104].mxu0  ;;  %v7394_v15 = vld [vmem:[%s15326_s14 + $0x58] sm:$0xff] }
 0x70a   : > { %7454 = vst [vmem:[%s15326_s14 + $0x38] sm:$0xff] %v7422_v0  ;;  %v14139_v13 = vadd.f32 %v13565_v55, %v17289_v8  ;;  %v7224_v44 = vpop.f32.mrb[105].mxu0  ;;  %v7514_v27 = vadd.bf16 %v7498_v40, %v18865_v54  ;;  %v7395_v54 = vld [vmem:[%s15326_s14 + $0x60] sm:$0xff] }
 0x70b   : > { %7452 = vst [vmem:[%s15326_s14 + $0x28] sm:$0xff] %v7420_v26  ;;  %v14140_v36 = vadd.f32 %v17289_v8, %v7224_v44  ;;  %v13566_v11 = vpop.f32.mrb[106].mxu0  ;;  %v7513_v57 = vadd.bf16 %v7497_v23, %v18864_v46  ;;  %v18866_v23 = vld [vmem:[#allocation29_spill] sm:$0xff] }
 0x70c   : > { %v7361_v7 = vmax.f32 %v14139_v13, 0.0  ;;  %v14141_v35 = vadd.f32 %v13566_v11, %v17289_v8  ;;  %v7227_v49 = vpop.f32.mrb[107].mxu0  ;;  %v18867_v11 = vld [vmem:[#allocation32_spill] sm:$0xff] }
 0x70d   : > { %v7359_v28 = vmax.f32 %v14140_v36, 0.0  ;;  %v14142_v48 = vadd.f32 %v17289_v8, %v7227_v49  ;;  %13607 = vmatprep.mubr.bf16.mxu1 %v7513_v57  ;;  %v7397_v57 = vld [vmem:[%s15326_s14 + $0x70] sm:$0xff] }
 0x70e   : > { %v7425_v9 = vadd.f32 %v7393_v18, %v7361_v7  ;;  %v7362_v17 = vmax.f32 %v14141_v35, 0.0  ;;  %13608 = vmatmul.mubr.bf16.gmra.mrb[36].mxu1 %v7514_v27 }
 0x70f   : > { %v7423_v37 = vadd.f32 %v7391_v62, %v7359_v28  ;;  %v7360_v6 = vmax.f32 %v14142_v48, 0.0 }
 0x710   : > { %7457 = vst [vmem:[%s15326_s14 + $0x50] sm:$0xff] %v7425_v9  ;;  %v7426_v60 = vadd.f32 %v7394_v15, %v7362_v17  ;;  %v7500_v31 = vpack.c.bf16 %v7362_v17, %v7361_v7  ;;  %v7396_v17 = vld [vmem:[%s15326_s14 + $0x68] sm:$0xff] }
 0x711   : > { %7455 = vst [vmem:[%s15326_s14 + $0x40] sm:$0xff] %v7423_v37  ;;  %v7424_v25 = vadd.f32 %v7392_v4, %v7360_v6  ;;  %v7499_v33 = vpack.c.bf16 %v7360_v6, %v7359_v28  ;;  %v13569_v12 = vpop.f32.mrb[108].mxu0  ;;  %v7398_v28 = vld [vmem:[%s15326_s14 + $0x78] sm:$0xff] }
 0x712   : > { %7458 = vst [vmem:[%s15326_s14 + $0x58] sm:$0xff] %v7426_v60  ;;  %v14143_v0 = vadd.f32 %v13569_v12, %v17289_v8  ;;  %v7240_v40 = vpop.f32.mrb[109].mxu0  ;;  %v7516_v46 = vadd.bf16 %v7500_v31, %v18867_v11  ;;  %v7399_v11 = vld [vmem:[%s15326_s14 + $0x80] sm:$0xff] }
 0x713   : > { %7456 = vst [vmem:[%s15326_s14 + $0x48] sm:$0xff] %v7424_v25  ;;  %v14144_v20 = vadd.f32 %v17289_v8, %v7240_v40  ;;  %v13570_v26 = vpop.f32.mrb[110].mxu0  ;;  %v7515_v55 = vadd.bf16 %v7499_v33, %v18866_v23  ;;  %v18868_v33 = vld [vmem:[#allocation31_spill] sm:$0xff] }
 0x714   : > { %v7365_v13 = vmax.f32 %v14143_v0, 0.0  ;;  %v14145_v44 = vadd.f32 %v13570_v26, %v17289_v8  ;;  %v7243_v36 = vpop.f32.mrb[111].mxu0  ;;  %v18869_v26 = vld [vmem:[#allocation36_spill] sm:$0xff] }
 0x715   : > { %v7363_v7 = vmax.f32 %v14144_v20, 0.0  ;;  %v14146_v35 = vadd.f32 %v17289_v8, %v7243_v36  ;;  %13611 = vmatprep.mubr.bf16.mxu1 %v7515_v55  ;;  %v7401_v55 = vld [vmem:[%s15326_s14 + $0x90] sm:$0xff] }
 0x716   : > { %v7429_v49 = vadd.f32 %v7397_v57, %v7365_v13  ;;  %v7366_v27 = vmax.f32 %v14145_v44, 0.0  ;;  %13612 = vmatmul.mubr.bf16.gmra.mrb[40].mxu1 %v7516_v46 }
 0x717   : > { %v7427_v18 = vadd.f32 %v7395_v54, %v7363_v7  ;;  %v7364_v48 = vmax.f32 %v14146_v35, 0.0 }
 0x718   : > { %7461 = vst [vmem:[%s15326_s14 + $0x70] sm:$0xff] %v7429_v49  ;;  %v7430_v9 = vadd.f32 %v7398_v28, %v7366_v27  ;;  %v7502_v62 = vpack.c.bf16 %v7366_v27, %v7365_v13  ;;  %v7400_v27 = vld [vmem:[%s15326_s14 + $0x88] sm:$0xff] }
 0x719   : > { %7459 = vst [vmem:[%s15326_s14 + $0x60] sm:$0xff] %v7427_v18  ;;  %v7428_v37 = vadd.f32 %v7396_v17, %v7364_v48  ;;  %v7501_v15 = vpack.c.bf16 %v7364_v48, %v7363_v7  ;;  %v13573_v6 = vpop.f32.mrb[112].mxu0  ;;  %v7402_v7 = vld [vmem:[%s15326_s14 + $0x98] sm:$0xff] }
 0x71a   : > { %7462 = vst [vmem:[%s15326_s14 + $0x78] sm:$0xff] %v7430_v9  ;;  %v14147_v60 = vadd.f32 %v13573_v6, %v17289_v8  ;;  %v7256_v31 = vpop.f32.mrb[113].mxu0  ;;  %v7518_v23 = vadd.bf16 %v7502_v62, %v18869_v26  ;;  %v7403_v26 = vld [vmem:[%s15326_s14 + $0xa0] sm:$0xff] }
 0x71b   : > { %7460 = vst [vmem:[%s15326_s14 + $0x68] sm:$0xff] %v7428_v37  ;;  %v14148_v4 = vadd.f32 %v17289_v8, %v7256_v31  ;;  %v13574_v25 = vpop.f32.mrb[114].mxu0  ;;  %v7517_v12 = vadd.bf16 %v7501_v15, %v18868_v33  ;;  %v18870_v15 = vld [vmem:[#allocation35_spill] sm:$0xff] }
 0x71c   : > { %v7369_v0 = vmax.f32 %v14147_v60, 0.0  ;;  %v14149_v40 = vadd.f32 %v13574_v25, %v17289_v8  ;;  %v7259_v20 = vpop.f32.mrb[115].mxu0  ;;  %v18871_v25 = vld [vmem:[#allocation39_spill] sm:$0xff] }
 0x71d   : > { %v7367_v13 = vmax.f32 %v14148_v4, 0.0  ;;  %v14150_v44 = vadd.f32 %v17289_v8, %v7259_v20  ;;  %13615 = vmatprep.mubr.bf16.mxu1 %v7517_v12  ;;  %v7405_v12 = vld [vmem:[%s15326_s14 + $0xb0] sm:$0xff] }
 0x71e   : > { %v7433_v36 = vadd.f32 %v7401_v55, %v7369_v0  ;;  %v7370_v46 = vmax.f32 %v14149_v40, 0.0  ;;  %13616 = vmatmul.mubr.bf16.gmra.mrb[44].mxu1 %v7518_v23 }
 0x71f   : > { %v7431_v57 = vadd.f32 %v7399_v11, %v7367_v13  ;;  %v7368_v35 = vmax.f32 %v14150_v44, 0.0 }
 0x720   : > { %7465 = vst [vmem:[%s15326_s14 + $0x90] sm:$0xff] %v7433_v36  ;;  %v7434_v49 = vadd.f32 %v7402_v7, %v7370_v46  ;;  %v7504_v54 = vpack.c.bf16 %v7370_v46, %v7369_v0  ;;  %v7404_v46 = vld [vmem:[%s15326_s14 + $0xa8] sm:$0xff] }
 0x721   : > { %7463 = vst [vmem:[%s15326_s14 + $0x80] sm:$0xff] %v7431_v57  ;;  %v7432_v18 = vadd.f32 %v7400_v27, %v7368_v35  ;;  %v7503_v28 = vpack.c.bf16 %v7368_v35, %v7367_v13  ;;  %v13577_v48 = vpop.f32.mrb[116].mxu0  ;;  %v7406_v13 = vld [vmem:[%s15326_s14 + $0xb8] sm:$0xff] }
 0x722   : > { %7466 = vst [vmem:[%s15326_s14 + $0x98] sm:$0xff] %v7434_v49  ;;  %v14151_v9 = vadd.f32 %v13577_v48, %v17289_v8  ;;  %v7272_v62 = vpop.f32.mrb[117].mxu0  ;;  %v7520_v33 = vadd.bf16 %v7504_v54, %v18871_v25  ;;  %v7407_v25 = vld [vmem:[%s15326_s14 + $0xc0] sm:$0xff] }
 0x723   : > { %7464 = vst [vmem:[%s15326_s14 + $0x88] sm:$0xff] %v7432_v18  ;;  %v14152_v17 = vadd.f32 %v17289_v8, %v7272_v62  ;;  %v13578_v37 = vpop.f32.mrb[118].mxu0  ;;  %v7519_v6 = vadd.bf16 %v7503_v28, %v18870_v15  ;;  %v18872_v28 = vld [vmem:[#allocation38_spill] sm:$0xff] }
 0x724   : > { %v7373_v60 = vmax.f32 %v14151_v9, 0.0  ;;  %v14153_v31 = vadd.f32 %v13578_v37, %v17289_v8  ;;  %v7275_v4 = vpop.f32.mrb[119].mxu0  ;;  %v18873_v37 = vld [vmem:[#allocation33_spill] sm:$0xff] }
 0x725   : > { %v7371_v0 = vmax.f32 %v14152_v17, 0.0  ;;  %v14154_v40 = vadd.f32 %v17289_v8, %v7275_v4  ;;  %13619 = vmatprep.mubr.bf16.mxu1 %v7519_v6  ;;  %v7409_v6 = vld [vmem:[%s15326_s14 + $0xd0] sm:$0xff] }
 0x726   : > { %v7437_v20 = vadd.f32 %v7405_v12, %v7373_v60  ;;  %v7374_v23 = vmax.f32 %v14153_v31, 0.0  ;;  %13620 = vmatmul.mubr.bf16.gmra.mrb[48].mxu1 %v7520_v33 }
 0x727   : > { %v7435_v55 = vadd.f32 %v7403_v26, %v7371_v0  ;;  %v7372_v44 = vmax.f32 %v14154_v40, 0.0 }
 0x728   : > { %7469 = vst [vmem:[%s15326_s14 + $0xb0] sm:$0xff] %v7437_v20  ;;  %v7438_v36 = vadd.f32 %v7406_v13, %v7374_v23  ;;  %v7506_v11 = vpack.c.bf16 %v7374_v23, %v7373_v60  ;;  %v7408_v23 = vld [vmem:[%s15326_s14 + $0xc8] sm:$0xff] }
 0x729   : > { %7467 = vst [vmem:[%s15326_s14 + $0xa0] sm:$0xff] %v7435_v55  ;;  %v7436_v57 = vadd.f32 %v7404_v46, %v7372_v44  ;;  %v7505_v7 = vpack.c.bf16 %v7372_v44, %v7371_v0  ;;  %v13581_v35 = vpop.f32.mrb[120].mxu0  ;;  %v7410_v0 = vld [vmem:[%s15326_s14 + $0xd8] sm:$0xff] }
 0x72a   : > { %7470 = vst [vmem:[%s15326_s14 + $0xb8] sm:$0xff] %v7438_v36  ;;  %v14155_v49 = vadd.f32 %v13581_v35, %v17289_v8  ;;  %v7288_v54 = vpop.f32.mrb[121].mxu0  ;;  %v7522_v15 = vadd.bf16 %v7506_v11, %v18873_v37  ;;  %v7411_v37 = vld [vmem:[%s15326_s14 + $0xe0] sm:$0xff] }
 0x72b   : > { %7468 = vst [vmem:[%s15326_s14 + $0xa8] sm:$0xff] %v7436_v57  ;;  %v14156_v27 = vadd.f32 %v17289_v8, %v7288_v54  ;;  %v13582_v18 = vpop.f32.mrb[122].mxu0  ;;  %v7521_v48 = vadd.bf16 %v7505_v7, %v18872_v28  ;;  %v18874_v7 = vld [vmem:[#allocation37_spill] sm:$0xff] }
 0x72c   : > { %v7377_v9 = vmax.f32 %v14155_v49, 0.0  ;;  %v14157_v62 = vadd.f32 %v13582_v18, %v17289_v8  ;;  %v7291_v17 = vpop.f32.mrb[123].mxu0  ;;  %v18875_v18 = vld [vmem:[#allocation40_spill] sm:$0xff] }
 0x72d   : > { %v7375_v60 = vmax.f32 %v14156_v27, 0.0  ;;  %v14158_v31 = vadd.f32 %v17289_v8, %v7291_v17  ;;  %13623 = vmatprep.mubr.bf16.mxu1 %v7521_v48  ;;  %v7413_v48 = vld [vmem:[%s15326_s14 + $0xf0] sm:$0xff] }
 0x72e   : > { %v7441_v4 = vadd.f32 %v7409_v6, %v7377_v9  ;;  %v7378_v33 = vmax.f32 %v14157_v62, 0.0  ;;  %13624 = vmatmul.mubr.bf16.gmra.mrb[52].mxu1 %v7522_v15 }
 0x72f   : > { %v7439_v12 = vadd.f32 %v7407_v25, %v7375_v60  ;;  %v7376_v40 = vmax.f32 %v14158_v31, 0.0 }
 0x730   : > { %7473 = vst [vmem:[%s15326_s14 + $0xd0] sm:$0xff] %v7441_v4  ;;  %v7442_v20 = vadd.f32 %v7410_v0, %v7378_v33  ;;  %v7508_v26 = vpack.c.bf16 %v7378_v33, %v7377_v9  ;;  %v7412_v33 = vld [vmem:[%s15326_s14 + $0xe8] sm:$0xff] }
 0x731   : > { %7471 = vst [vmem:[%s15326_s14 + $0xc0] sm:$0xff] %v7439_v12  ;;  %v7440_v55 = vadd.f32 %v7408_v23, %v7376_v40  ;;  %v7507_v13 = vpack.c.bf16 %v7376_v40, %v7375_v60  ;;  %v13585_v44 = vpop.f32.mrb[124].mxu0  ;;  %v7414_v60 = vld [vmem:[%s15326_s14 + $0xf8] sm:$0xff]  ;;  %v15123_v23 = vld [vmem:[#allocation4 + $0x480] sm:$0xff]  }
 0x732   : > { %7474 = vst [vmem:[%s15326_s14 + $0xd8] sm:$0xff] %v7442_v20  ;;  %v14159_v36 = vadd.f32 %v13585_v44, %v17289_v8  ;;  %v7304_v11 = vpop.f32.mrb[125].mxu0  ;;  %v7524_v28 = vadd.bf16 %v7508_v26, %v18875_v18  ;;  %v18877_v20 = vld [vmem:[#allocation26_spill] sm:$0xff]  ;;  %13635 = vmatprep.subr.bf16.mxu1 %v15123_v23 }
 0x733   : > { %7472 = vst [vmem:[%s15326_s14 + $0xc8] sm:$0xff] %v7440_v55  ;;  %v14160_v46 = vadd.f32 %v17289_v8, %v7304_v11  ;;  %v13586_v57 = vpop.f32.mrb[126].mxu0  ;;  %v7523_v35 = vadd.bf16 %v7507_v13, %v18874_v7  ;;  %13636 = vmatpush3.bf16.msra.mxu1 %v15123_v23  ;;  %v15124_v55 = vld [vmem:[#allocation4 + $0x488] sm:$0xff]   ;;  %v15125_v13 = vld [vmem:[#allocation4 + $0x490] sm:$0xff]   ;;  %v15126_v44 = vld [vmem:[#allocation4 + $0x498] sm:$0xff]  }
 0x734   : > { %v7381_v49 = vmax.f32 %v14159_v36, 0.0  ;;  %v14161_v54 = vadd.f32 %v13586_v57, %v17289_v8  ;;  %v7307_v27 = vpop.f32.mrb[127].mxu0  ;;  %13637 = vmatprep.subr.bf16.mxu1 %v15124_v55  ;;  %v15127_v36 = vld [vmem:[#allocation4 + $0x4a0] sm:$0xff]   ;;  %v15128_v11 = vld [vmem:[#allocation4 + $0x4a8] sm:$0xff]   ;;  %v15130_v57 = vld [vmem:[#allocation4 + $0x4b8] sm:$0xff]  }
 0x735   : > { %v7379_v9 = vmax.f32 %v14160_v46, 0.0  ;;  %v14162_v62 = vadd.f32 %v17289_v8, %v7307_v27  ;;  %13627 = vmatprep.mubr.bf16.mxu1 %v7523_v35  ;;  %v18876_v8 = vld [vmem:[#allocation43_spill] sm:$0xff]  ;;  %v15129_v46 = vld [vmem:[#allocation4 + $0x4b0] sm:$0xff]  }
 0x736   : > { %v7445_v17 = vadd.f32 %v7413_v48, %v7381_v49  ;;  %v7382_v15 = vmax.f32 %v14161_v54, 0.0  ;;  %13628 = vmatmul.mubr.bf16.gmra.mrb[56].mxu1 %v7524_v28  ;;  %v17404_v7 = vld [vmem:[#allocation4 + $0x4c0] sm:$0xff]  }
 0x737   : > { %v7443_v6 = vadd.f32 %v7411_v37, %v7379_v9  ;;  %v7380_v31 = vmax.f32 %v14162_v62, 0.0  ;;  %13638 = vmatpush3.bf16.msra.mxu1 %v15124_v55  ;;  %v17410_v35 = vld [vmem:[%s18118_s2 + $0x2] ss:$0 sm:$0xff] }
 0x738   : > { %7477 = vst [vmem:[%s15326_s14 + $0xf0] sm:$0xff] %v7445_v17  ;;  %v7446_v4 = vadd.f32 %v7414_v60, %v7382_v15  ;;  %v7510_v25 = vpack.c.bf16 %v7382_v15, %v7381_v49  ;;  %13639 = vmatprep.subr.bf16.mxu1 %v15125_v13 }
 0x739   : > { %7475 = vst [vmem:[%s15326_s14 + $0xe0] sm:$0xff] %v7443_v6  ;;  %v7444_v12 = vadd.f32 %v7412_v33, %v7380_v31  ;;  %v7509_v0 = vpack.c.bf16 %v7380_v31, %v7379_v9 }
 0x73a   : > { %7478 = vst [vmem:[%s15326_s14 + $0xf8] sm:$0xff] %v7446_v4  ;;  %v7526_v26 = vadd.bf16 %v7510_v25, %v18877_v20 }
 0x73b   : > { %7476 = vst [vmem:[%s15326_s14 + $0xe8] sm:$0xff] %v7444_v12  ;;  %v7525_v40 = vadd.bf16 %v7509_v0, %v18876_v8  ;;  %13640 = vmatpush3.bf16.msra.mxu1 %v15125_v13  ;;  %v18878_v13 = vld [vmem:[#allocation23_spill] sm:$0xff] }
 0x73c   : > { %13641 = vmatprep.subr.bf16.mxu1 %v15126_v44  ;;  %vm18879_vm12 = vcmp.lt.s32.totalorder %v18878_v13, 1  ;;  %vm18880_vm13 = vcmp.lt.s32.totalorder %v18878_v13, 7  ;;  %v15134_v13 = vld [vmem:[#allocation4 + $0x4d8] sm:$0xff]  }
 0x73d   : > { %13631 = vmatprep.mubr.bf16.mxu1 %v7525_v40  ;;  %vm18881_vm2 = vmmov %vm18879_vm12 }
 0x73e   : > { %13632 = vmatmul.mubr.bf16.gmra.mrb[60].mxu1 %v7526_v26  ;;  %vm18882_vm9 = vmmov %vm18880_vm13 }
 0x73f   : > { %13651 = vmatprep.mubr.bf16.mxu1 %v18841_v61  ;;  %13642 = vmatpush3.bf16.msra.mxu1 %v15126_v44  ;;  %vm18883_vm7 = vmmov %vm18882_vm9 }
 0x740   : > { %13643 = vmatprep.subr.bf16.mxu1 %v15127_v36 }
 0x743   : > { %13644 = vmatpush3.bf16.msra.mxu1 %v15127_v36 }
 0x744   : > { %13645 = vmatprep.subr.bf16.mxu1 %v15128_v11 }
 0x747   : > { %13646 = vmatpush3.bf16.msra.mxu1 %v15128_v11 }
 0x748   : > { %13647 = vmatprep.subr.bf16.mxu1 %v15129_v46 }
 0x74b   : > { %13648 = vmatpush3.bf16.msra.mxu1 %v15129_v46 }
 0x74c   : > { %13649 = vmatprep.subr.bf16.mxu1 %v15130_v57 }
 0x74f   : > { %13650 = vmatpush3.bf16.msra.mxu1 %v15130_v57 }
 0x750   : > { %13683 = vmatprep.subr.bf16.mxu1 %v17404_v7 }
 0x7d9   : > { %v13605_v49 = vpop.f32.mrb[32].mxu1 }
 0x7da   : > { %v7675_v54 = vadd.f32 %v13605_v49, %v17410_v35  ;;  %v7666_v27 = vpop.f32.mrb[33].mxu1 }
 0x7db   : > { %v7667_v18 = vadd.f32 %v17410_v35, %v7666_v27  ;;  %v13606_v28 = vpop.f32.mrb[34].mxu1 }
 0x7dc   : > { %v7795_v48 = vmax.f32 %v7675_v54, 0.0  ;;  %v7678_v9 = vadd.f32 %v13606_v28, %v17410_v35  ;;  %v7669_v62 = vpop.f32.mrb[35].mxu1 }
 0x7dd   : > { %v17415_v17 = vmax.f32 %v7667_v18, 0.0  ;;  %v7670_v37 = vadd.f32 %v17410_v35, %v7669_v62 }
 0x7de   : > { %v7796_v15 = vmax.f32 %v7678_v9, 0.0  ;;  %v7827_v6 = vrot.slane %v7795_v48, 7  ;;  %v7923_v60 = vrot.slane %v7795_v48, 1 }
 0x7df   : > { %v7794_v31 = vmax.f32 %v7670_v37, 0.0  ;;  %v18372_v4 = vrot.slane %v17415_v17, 7  ;;  %v18371_v0 = vrot.slane %v17415_v17, 1 }
 0x7e0   : > { %v7828_v25 = vrot.slane %v7796_v15, 7  ;;  %v7924_v33 = vrot.slane %v7796_v15, 1  ;;  %v17419_v12 = vpack.c.bf16 %v7796_v15, %v7795_v48 }
 0x7e1   : > { %v7826_v8 = vrot.slane %v7794_v31, 7  ;;  %v7922_v40 = vrot.slane %v7794_v31, 1  ;;  %v17423_v20 = vpack.c.bf16 %v7794_v31, %v17415_v17  ;;  %v13609_v26 = vpop.f32.mrb[36].mxu1 }
 0x7e2   : > { %v7691_v23 = vadd.f32 %v13609_v26, %v17410_v35  ;;  %v7682_v55 = vpop.f32.mrb[37].mxu1  ;;  %v7885_v44 = vsel %vm18879_vm12, %v7827_v6, %v7828_v25  ;;  %v7981_v36 = vsel %vm18880_vm13, %v7923_v60, %v7924_v33  ;;  %vm18887_vm12 = vmmov %vm18880_vm13 }
 0x7e3   : > { %v17434_v11 = vsel %vm18881_vm2, %v18372_v4, %v7826_v8  ;;  %v7982_v46 = vsel %vm18882_vm9, %v7922_v40, %v7923_v60  ;;  %v7983_v57 = vsel %vm18883_vm7, %v18371_v0, %v7922_v40  ;;  %v7683_v49 = vadd.f32 %v17410_v35, %v7682_v55  ;;  %v13610_v54 = vpop.f32.mrb[38].mxu1  ;;  %vm18885_vm9 = vmmov %vm18881_vm2 }
 0x7e4   : > { %v17443_v27 = vpack.c.bf16 %v7982_v46, %v7983_v57  ;;  %v7799_v18 = vmax.f32 %v7691_v23, 0.0  ;;  %v7694_v28 = vadd.f32 %v13610_v54, %v17410_v35  ;;  %v7685_v48 = vpop.f32.mrb[39].mxu1  ;;  %v7886_v9 = vsel %vm18881_vm2, %v7826_v8, %v7827_v6  ;;  %vm18886_vm7 = vmmov %vm18881_vm2 }
 0x7e5   : > { %v7797_v62 = vmax.f32 %v7683_v49, 0.0  ;;  %v7686_v37 = vadd.f32 %v17410_v35, %v7685_v48  ;;  %v17449_v15 = vpack.c.bf16 %v7885_v44, %v7886_v9  ;;  %vm18888_vm13 = vmmov %vm18887_vm12 }
 0x7e6   : > { %18884 = vst [vmem:[#allocation21_spill] sm:$0xff] %v17443_v27  ;;  %v7800_v60 = vmax.f32 %v7694_v28, 0.0  ;;  %v7831_v31 = vrot.slane %v7799_v18, 7  ;;  %v7927_v0 = vrot.slane %v7799_v18, 1 }
 0x7e7   : > { %v7829_v40 = vrot.slane %v7797_v62, 7  ;;  %v7925_v26 = vrot.slane %v7797_v62, 1  ;;  %v7798_v55 = vmax.f32 %v7686_v37, 0.0 }
 0x7e8   : > { %v7832_v46 = vrot.slane %v7800_v60, 7  ;;  %v7928_v57 = vrot.slane %v7800_v60, 1  ;;  %v17451_v23 = vpack.c.bf16 %v7800_v60, %v7799_v18 }
 0x7e9   : > { %v7830_v54 = vrot.slane %v7798_v55, 7  ;;  %v7926_v4 = vrot.slane %v7798_v55, 1  ;;  %v13613_v58 = vpop.f32.mrb[40].mxu1  ;;  %v7884_v6 = vsel %vm18885_vm9, %v7828_v25, %v7829_v40  ;;  %v17455_v8 = vpack.c.bf16 %v7798_v55, %v7797_v62  ;;  %vm18889_vm9 = vmmov %vm18881_vm2 }
 0x7ea   : > { %v7707_v44 = vadd.f32 %v13613_v58, %v17410_v35  ;;  %v7698_v49 = vpop.f32.mrb[41].mxu1  ;;  %v7881_v28 = vsel %vm18886_vm7, %v7831_v31, %v7832_v46  ;;  %v7980_v48 = vsel %vm18887_vm12, %v7924_v33, %v7925_v26  ;;  %v7977_v18 = vsel %vm18888_vm13, %v7927_v0, %v7928_v57  ;;  %vm18891_vm7 = vmmov %vm18887_vm12 }
 0x7eb   : > { %v7699_v9 = vadd.f32 %v17410_v35, %v7698_v49  ;;  %v13614_v37 = vpop.f32.mrb[42].mxu1  ;;  %v7883_v25 = vsel %vm18881_vm2, %v7829_v40, %v7830_v54  ;;  %v7882_v62 = vsel %vm18889_vm9, %v7830_v54, %v7831_v31  ;;  %v17469_v58 = vpack.c.bf16 %v7980_v48, %v7981_v36  ;;  %vm18892_vm12 = vmmov %vm18891_vm7 }
 0x7ec   : > { %v7803_v60 = vmax.f32 %v7707_v44, 0.0  ;;  %v7710_v55 = vadd.f32 %v13614_v37, %v17410_v35  ;;  %v7701_v59 = vpop.f32.mrb[43].mxu1  ;;  %v17472_v41 = vpack.c.bf16 %v7883_v25, %v7884_v6  ;;  %v17474_v33 = vpack.c.bf16 %v7881_v28, %v7882_v62  ;;  %vm18894_vm13 = vmmov %vm18881_vm2 }
 0x7ed   : > { %18890 = vst [vmem:[#allocation22_spill] sm:$0xff] %v17469_v58  ;;  %v7801_v16 = vmax.f32 %v7699_v9, 0.0  ;;  %v7702_v49 = vadd.f32 %v17410_v35, %v7701_v59  ;;  %v7978_v30 = vsel %vm18891_vm7, %v7926_v4, %v7927_v0  ;;  %v7979_v40 = vsel %vm18892_vm12, %v7925_v26, %v7926_v4  ;;  %vm18895_vm9 = vmmov %vm18891_vm7 }
 0x7ee   : > { %v7804_v31 = vmax.f32 %v7710_v55, 0.0  ;;  %v17481_v36 = vpack.c.bf16 %v7978_v30, %v7979_v40  ;;  %v7835_v54 = vrot.slane %v7803_v60, 7  ;;  %v7931_v6 = vrot.slane %v7803_v60, 1  ;;  %vm18896_vm12 = vmmov %vm18881_vm2 }
 0x7ef   : > { %v7833_v44 = vrot.slane %v7801_v16, 7  ;;  %v7929_v48 = vrot.slane %v7801_v16, 1  ;;  %v7802_v37 = vmax.f32 %v7702_v49, 0.0 }
 0x7f0   : > { %18893 = vst [vmem:[#allocation52_spill] sm:$0xff] %v17481_v36  ;;  %v7836_v25 = vrot.slane %v7804_v31, 7  ;;  %v7932_v28 = vrot.slane %v7804_v31, 1  ;;  %v17483_v62 = vpack.c.bf16 %v7804_v31, %v7803_v60 }
 0x7f1   : > { %v7834_v9 = vrot.slane %v7802_v37, 7  ;;  %v7930_v59 = vrot.slane %v7802_v37, 1  ;;  %v13617_v29 = vpop.f32.mrb[44].mxu1  ;;  %v7880_v0 = vsel %vm18894_vm13, %v7832_v46, %v7833_v44  ;;  %v17487_v38 = vpack.c.bf16 %v7802_v37, %v7801_v16  ;;  %vm18897_vm13 = vmmov %vm18881_vm2 }
 0x7f2   : > { %v7723_v30 = vadd.f32 %v13617_v29, %v17410_v35  ;;  %v7714_v4 = vpop.f32.mrb[45].mxu1  ;;  %v7877_v26 = vsel %vm18881_vm2, %v7835_v54, %v7836_v25  ;;  %v7976_v55 = vsel %vm18895_vm9, %v7928_v57, %v7929_v48  ;;  %v7973_v60 = vsel %vm18891_vm7, %v7931_v6, %v7932_v28  ;;  %vm18899_vm2 = vmmov %vm18891_vm7 }
 0x7f3   : > { %v7715_v49 = vadd.f32 %v17410_v35, %v7714_v4  ;;  %v13618_v40 = vpop.f32.mrb[46].mxu1  ;;  %v7879_v46 = vsel %vm18896_vm12, %v7833_v44, %v7834_v9  ;;  %v7878_v16 = vsel %vm18897_vm13, %v7834_v9, %v7835_v54  ;;  %v17501_v29 = vpack.c.bf16 %v7976_v55, %v7977_v18  ;;  %vm18900_vm9 = vmmov %vm18899_vm2 }
 0x7f4   : > { %v7807_v31 = vmax.f32 %v7723_v30, 0.0  ;;  %v7726_v37 = vadd.f32 %v13618_v40, %v17410_v35  ;;  %v7717_v21 = vpop.f32.mrb[47].mxu1  ;;  %v17504_v24 = vpack.c.bf16 %v7879_v46, %v7880_v0  ;;  %v17506_v57 = vpack.c.bf16 %v7877_v26, %v7878_v16  ;;  %vm18903_vm7 = vmmov %vm18896_vm12 }
 0x7f5   : > { %18898 = vst [vmem:[#allocation61_spill] sm:$0xff] %v17501_v29  ;;  %v7805_v22 = vmax.f32 %v7715_v49, 0.0  ;;  %v7718_v4 = vadd.f32 %v17410_v35, %v7717_v21  ;;  %v7974_v50 = vsel %vm18899_vm2, %v7930_v59, %v7931_v6  ;;  %v7975_v44 = vsel %vm18900_vm9, %v7929_v48, %v7930_v59  ;;  %vm18905_vm12 = vmmov %vm18903_vm7 }
 0x7f6   : > { %v7808_v54 = vmax.f32 %v7726_v37, 0.0  ;;  %v17513_v18 = vpack.c.bf16 %v7974_v50, %v7975_v44  ;;  %v7839_v9 = vrot.slane %v7807_v31, 7  ;;  %v7935_v0 = vrot.slane %v7807_v31, 1  ;;  %vm18906_vm13 = vmmov %vm18899_vm2 }
 0x7f7   : > { %v7837_v30 = vrot.slane %v7805_v22, 7  ;;  %v7933_v55 = vrot.slane %v7805_v22, 1  ;;  %v7806_v40 = vmax.f32 %v7718_v4, 0.0  ;;  %vm18907_vm9 = vmmov %vm18903_vm7 }
 0x7f8   : > { %18901 = vst [vmem:[#allocation58_spill] sm:$0xff] %v17513_v18  ;;  %v7840_v46 = vrot.slane %v7808_v54, 7  ;;  %v7936_v26 = vrot.slane %v7808_v54, 1  ;;  %v17515_v16 = vpack.c.bf16 %v7808_v54, %v7807_v31 }
 0x7f9   : > { %v7838_v49 = vrot.slane %v7806_v40, 7  ;;  %v7934_v21 = vrot.slane %v7806_v40, 1  ;;  %v13621_v32 = vpop.f32.mrb[48].mxu1  ;;  %v7876_v6 = vsel %vm18903_vm7, %v7836_v25, %v7837_v30  ;;  %v17519_v51 = vpack.c.bf16 %v7806_v40, %v7805_v22 }
 0x7fa   : > { %18902 = vst [vmem:[#allocation9_spill] sm:$0xff] %v17515_v16  ;;  %v7739_v50 = vadd.f32 %v13621_v32, %v17410_v35  ;;  %v7730_v48 = vpop.f32.mrb[49].mxu1  ;;  %v7873_v59 = vsel %vm18905_vm12, %v7839_v9, %v7840_v46  ;;  %v7972_v37 = vsel %vm18906_vm13, %v7932_v28, %v7933_v55  ;;  %v7969_v31 = vsel %vm18899_vm2, %v7935_v0, %v7936_v26  ;;  %vm18909_vm12 = vmmov %vm18899_vm2 }
 0x7fb   : > { %18904 = vst [vmem:[#allocation8_spill] sm:$0xff] %v17519_v51  ;;  %v7731_v4 = vadd.f32 %v17410_v35, %v7730_v48  ;;  %v13622_v44 = vpop.f32.mrb[50].mxu1  ;;  %v7875_v25 = vsel %vm18907_vm9, %v7837_v30, %v7838_v49  ;;  %v7874_v22 = vsel %vm18903_vm7, %v7838_v49, %v7839_v9  ;;  %v17533_v32 = vpack.c.bf16 %v7972_v37, %v7973_v60  ;;  %vm18910_vm13 = vmmov %vm18899_vm2 }
 0x7fc   : > { %v7811_v54 = vmax.f32 %v7739_v50, 0.0  ;;  %v7742_v40 = vadd.f32 %v13622_v44, %v17410_v35  ;;  %v7733_v18 = vpop.f32.mrb[51].mxu1  ;;  %v17536_v56 = vpack.c.bf16 %v7875_v25, %v7876_v6  ;;  %v17538_v28 = vpack.c.bf16 %v7873_v59, %v7874_v22  ;;  %vm18913_vm2 = vmmov %vm18903_vm7 }
 0x7fd   : > { %18908 = vst [vmem:[#allocation13_spill] sm:$0xff] %v17533_v32  ;;  %v7809_v29 = vmax.f32 %v7731_v4, 0.0  ;;  %v7734_v48 = vadd.f32 %v17410_v35, %v7733_v18  ;;  %v7970_v19 = vsel %vm18909_vm12, %v7934_v21, %v7935_v0  ;;  %v7971_v30 = vsel %vm18910_vm13, %v7933_v55, %v7934_v21  ;;  %vm18915_vm9 = vmmov %vm18913_vm2 }
 0x7fe   : > { %v7812_v9 = vmax.f32 %v7742_v40, 0.0  ;;  %v17545_v60 = vpack.c.bf16 %v7970_v19, %v7971_v30  ;;  %v7843_v49 = vrot.slane %v7811_v54, 7  ;;  %v7939_v6 = vrot.slane %v7811_v54, 1  ;;  %vm18916_vm7 = vmmov %vm18909_vm12 }
 0x7ff   : > { %v7841_v50 = vrot.slane %v7809_v29, 7  ;;  %v7937_v37 = vrot.slane %v7809_v29, 1  ;;  %v7810_v44 = vmax.f32 %v7734_v48, 0.0  ;;  %vm18917_vm12 = vmmov %vm18916_vm7 }
 0x800   : > { %18911 = vst [vmem:[#allocation46_spill] sm:$0xff] %v17545_v60  ;;  %v7844_v25 = vrot.slane %v7812_v9, 7  ;;  %v7940_v59 = vrot.slane %v7812_v9, 1  ;;  %v17547_v22 = vpack.c.bf16 %v7812_v9, %v7811_v54  ;;  %vm18918_vm13 = vmmov %vm18913_vm2 }
 0x801   : > { %v7842_v4 = vrot.slane %v7810_v44, 7  ;;  %v7938_v18 = vrot.slane %v7810_v44, 1  ;;  %v13625_v32 = vpop.f32.mrb[52].mxu1  ;;  %v7872_v0 = vsel %vm18913_vm2, %v7840_v46, %v7841_v50  ;;  %v17551_v36 = vpack.c.bf16 %v7810_v44, %v7809_v29 }
 0x802   : > { %18912 = vst [vmem:[#allocation7_spill] sm:$0xff] %v17547_v22  ;;  %v7755_v19 = vadd.f32 %v13625_v32, %v17410_v35  ;;  %v7746_v55 = vpop.f32.mrb[53].mxu1  ;;  %v7869_v21 = vsel %vm18915_vm9, %v7843_v49, %v7844_v25  ;;  %v7968_v40 = vsel %vm18916_vm7, %v7936_v26, %v7937_v37  ;;  %v7965_v54 = vsel %vm18917_vm12, %v7939_v6, %v7940_v59  ;;  %vm18920_vm9 = vmmov %vm18916_vm7 }
 0x803   : > { %18914 = vst [vmem:[#allocation10_spill] sm:$0xff] %v17551_v36  ;;  %v7747_v48 = vadd.f32 %v17410_v35, %v7746_v55  ;;  %v13626_v30 = vpop.f32.mrb[54].mxu1  ;;  %v7871_v46 = vsel %vm18918_vm13, %v7841_v50, %v7842_v4  ;;  %v7870_v29 = vsel %vm18913_vm2, %v7842_v4, %v7843_v49  ;;  %v17565_v32 = vpack.c.bf16 %v7968_v40, %v7969_v31  ;;  %vm18923_vm12 = vmmov %vm18913_vm2 }
 0x804   : > { %v7815_v9 = vmax.f32 %v7755_v19, 0.0  ;;  %v7758_v44 = vadd.f32 %v13626_v30, %v17410_v35  ;;  %v7749_v60 = vpop.f32.mrb[55].mxu1  ;;  %v17568_v45 = vpack.c.bf16 %v7871_v46, %v7872_v0  ;;  %v17570_v26 = vpack.c.bf16 %v7869_v21, %v7870_v29  ;;  %vm18925_vm13 = vmmov %vm18913_vm2 }
 0x805   : > { %18919 = vst [vmem:[#allocation11_spill] sm:$0xff] %v17565_v32  ;;  %v7813_v58 = vmax.f32 %v7747_v48, 0.0  ;;  %v7750_v55 = vadd.f32 %v17410_v35, %v7749_v60  ;;  %v7966_v27 = vsel %vm18920_vm9, %v7938_v18, %v7939_v6  ;;  %v7967_v50 = vsel %vm18916_vm7, %v7937_v37, %v7938_v18  ;;  %vm18926_vm2 = vmmov %vm18916_vm7 }
 0x806   : > { %v7816_v49 = vmax.f32 %v7758_v44, 0.0  ;;  %v17577_v31 = vpack.c.bf16 %v7966_v27, %v7967_v50  ;;  %v7847_v4 = vrot.slane %v7815_v9, 7  ;;  %v7943_v0 = vrot.slane %v7815_v9, 1  ;;  %vm18927_vm9 = vmmov %vm18926_vm2 }
 0x807   : > { %v7845_v19 = vrot.slane %v7813_v58, 7  ;;  %v7941_v40 = vrot.slane %v7813_v58, 1  ;;  %v7814_v30 = vmax.f32 %v7750_v55, 0.0  ;;  %vm18928_vm7 = vmmov %vm18923_vm12 }
 0x808   : > { %18921 = vst [vmem:[#allocation14_spill] sm:$0xff] %v17577_v31  ;;  %v7848_v46 = vrot.slane %v7816_v49, 7  ;;  %v7944_v21 = vrot.slane %v7816_v49, 1  ;;  %v17579_v29 = vpack.c.bf16 %v7816_v49, %v7815_v9 }
 0x809   : > { %v7846_v48 = vrot.slane %v7814_v30, 7  ;;  %v7942_v60 = vrot.slane %v7814_v30, 1  ;;  %v13629_v32 = vpop.f32.mrb[56].mxu1  ;;  %v7868_v6 = vsel %vm18923_vm12, %v7844_v25, %v7845_v19  ;;  %v17583_v22 = vpack.c.bf16 %v7814_v30, %v7813_v58  ;;  %vm18929_vm12 = vmmov %vm18928_vm7 }
 0x80a   : > { %18922 = vst [vmem:[#allocation15_spill] sm:$0xff] %v17579_v29  ;;  %v7771_v27 = vadd.f32 %v13629_v32, %v17410_v35  ;;  %v7762_v37 = vpop.f32.mrb[57].mxu1  ;;  %v7865_v18 = vsel %vm18925_vm13, %v7847_v4, %v7848_v46  ;;  %v7964_v44 = vsel %vm18926_vm2, %v7940_v59, %v7941_v40  ;;  %v7961_v9 = vsel %vm18927_vm9, %v7943_v0, %v7944_v21  ;;  %vm18931_vm13 = vmmov %vm18926_vm2 }
 0x80b   : > { %18924 = vst [vmem:[#allocation48_spill] sm:$0xff] %v17583_v22  ;;  %v7763_v55 = vadd.f32 %v17410_v35, %v7762_v37  ;;  %v13630_v50 = vpop.f32.mrb[58].mxu1  ;;  %v7867_v25 = vsel %vm18928_vm7, %v7845_v19, %v7846_v48  ;;  %v7866_v58 = vsel %vm18929_vm12, %v7846_v48, %v7847_v4  ;;  %v17597_v32 = vpack.c.bf16 %v7964_v44, %v7965_v54  ;;  %vm18934_vm9 = vmmov %vm18928_vm7 }
 0x80c   : > { %v7819_v49 = vmax.f32 %v7771_v27, 0.0  ;;  %v7774_v30 = vadd.f32 %v13630_v50, %v17410_v35  ;;  %v7765_v31 = vpop.f32.mrb[59].mxu1  ;;  %v17600_v29 = vpack.c.bf16 %v7867_v25, %v7868_v6  ;;  %v17602_v59 = vpack.c.bf16 %v7865_v18, %v7866_v58  ;;  %vm18936_vm12 = vmmov %vm18926_vm2 }
 0x80d   : > { %18930 = vst [vmem:[#allocation54_spill] sm:$0xff] %v17597_v32  ;;  %v7817_v22 = vmax.f32 %v7763_v55, 0.0  ;;  %v7766_v37 = vadd.f32 %v17410_v35, %v7765_v31  ;;  %v7962_v36 = vsel %vm18931_vm13, %v7942_v60, %v7943_v0  ;;  %v7963_v19 = vsel %vm18926_vm2, %v7941_v40, %v7942_v60  ;;  %vm18937_vm13 = vmmov %vm18926_vm2 }
 0x80e   : > { %v7820_v4 = vmax.f32 %v7774_v30, 0.0  ;;  %v17609_v54 = vpack.c.bf16 %v7962_v36, %v7963_v19  ;;  %v7851_v48 = vrot.slane %v7819_v49, 7  ;;  %v7947_v6 = vrot.slane %v7819_v49, 1  ;;  %vm18938_vm2 = vmmov %vm18928_vm7 }
 0x80f   : > { %v7849_v27 = vrot.slane %v7817_v22, 7  ;;  %v7945_v44 = vrot.slane %v7817_v22, 1  ;;  %v7818_v50 = vmax.f32 %v7766_v37, 0.0 }
 0x810   : > { %18932 = vst [vmem:[#allocation34_spill] sm:$0xff] %v17609_v54  ;;  %v7852_v25 = vrot.slane %v7820_v4, 7  ;;  %v7948_v18 = vrot.slane %v7820_v4, 1  ;;  %v17611_v58 = vpack.c.bf16 %v7820_v4, %v7819_v49 }
 0x811   : > { %v7850_v55 = vrot.slane %v7818_v50, 7  ;;  %v7946_v31 = vrot.slane %v7818_v50, 1  ;;  %v13633_v32 = vpop.f32.mrb[60].mxu1  ;;  %v7864_v0 = vsel %vm18934_vm9, %v7848_v46, %v7849_v27  ;;  %v17615_v16 = vpack.c.bf16 %v7818_v50, %v7817_v22  ;;  %vm18939_vm9 = vmmov %vm18938_vm2  ;;  %v19056_v14 = vld [vmem:[#allocation15_spill] sm:$0xff] }
 0x812   : > { %18933 = vst [vmem:[#allocation44_spill] sm:$0xff] %v17611_v58  ;;  %v7787_v36 = vadd.f32 %v13633_v32, %v17410_v35  ;;  %v7778_v40 = vpop.f32.mrb[61].mxu1  ;;  %v7861_v60 = vsel %vm18928_vm7, %v7851_v48, %v7852_v25  ;;  %v7960_v30 = vsel %vm18936_vm12, %v7944_v21, %v7945_v44  ;;  %v7957_v49 = vsel %vm18937_vm13, %v7947_v6, %v7948_v18  ;;  %vm18940_vm7 = vmmov %vm18936_vm12 }
 0x813   : > { %18935 = vst [vmem:[#allocation20_spill] sm:$0xff] %v17615_v16  ;;  %v7779_v37 = vadd.f32 %v17410_v35, %v7778_v40  ;;  %v13634_v19 = vpop.f32.mrb[62].mxu1  ;;  %v7863_v46 = vsel %vm18938_vm2, %v7849_v27, %v7850_v55  ;;  %v7862_v22 = vsel %vm18939_vm9, %v7850_v55, %v7851_v48  ;;  %v17629_v32 = vpack.c.bf16 %v7960_v30, %v7961_v9  ;;  %vm18941_vm12 = vmmov %vm18940_vm7 }
 0x814   : > { %v7823_v4 = vmax.f32 %v7787_v36, 0.0  ;;  %v7790_v50 = vadd.f32 %v13634_v19, %v17410_v35  ;;  %v7781_v54 = vpop.f32.mrb[63].mxu1  ;;  %v17632_v58 = vpack.c.bf16 %v7863_v46, %v7864_v0  ;;  %v17634_v21 = vpack.c.bf16 %v7861_v60, %v7862_v22  ;;  %vm18943_vm13 = vmmov %vm18938_vm2 }
 0x815   : > { %v7821_v16 = vmax.f32 %v7779_v37, 0.0  ;;  %v7782_v40 = vadd.f32 %v17410_v35, %v7781_v54  ;;  %v7958_v51 = vsel %vm18940_vm7, %v7946_v31, %v7947_v6  ;;  %v7959_v27 = vsel %vm18941_vm12, %v7945_v44, %v7946_v31  ;;  %vm18946_vm9 = vmmov %vm18940_vm7 }
 0x816   : > { %v7824_v48 = vmax.f32 %v7790_v50, 0.0  ;;  %v17641_v9 = vpack.c.bf16 %v7958_v51, %v7959_v27  ;;  %v7855_v55 = vrot.slane %v7823_v4, 7  ;;  %v7951_v0 = vrot.slane %v7823_v4, 1  ;;  %vm18947_vm7 = vmmov %vm18938_vm2 }
 0x817   : > { %v7853_v36 = vrot.slane %v7821_v16, 7  ;;  %v7949_v30 = vrot.slane %v7821_v16, 1  ;;  %v7822_v19 = vmax.f32 %v7782_v40, 0.0  ;;  %v18945_v44 = vrot.slane %v17415_v17, 7  ;;  %vm18948_vm12 = vmmov %vm18946_vm9 }
 0x818   : > { %v7856_v46 = vrot.slane %v7824_v48, 7  ;;  %v7952_v60 = vrot.slane %v7824_v48, 1  ;;  %v17643_v22 = vpack.c.bf16 %v7824_v48, %v7823_v4 }
 0x819   : > { %v7854_v37 = vrot.slane %v7822_v19, 7  ;;  %v7950_v35 = vrot.slane %v7822_v19, 1  ;;  %v7860_v54 = vsel %vm18943_vm13, %v7852_v25, %v7853_v36  ;;  %v17647_v6 = vpack.c.bf16 %v7822_v19, %v7821_v16  ;;  %v15132_v25 = vld [vmem:[#allocation4 + $0x4c8] sm:$0xff]   ;;  %vm18949_vm13 = vmmov %vm18938_vm2 }
 0x81a   : > { %18942 = vst [vmem:[#allocation12_spill] sm:$0xff] %v17643_v22  ;;  %v7888_v51 = vsel %vm18938_vm2, %v7856_v46, %v18945_v44  ;;  %v7956_v31 = vsel %vm18946_vm9, %v7948_v18, %v7949_v30  ;;  %v7857_v50 = vsel %vm18947_vm7, %v7855_v55, %v7856_v46  ;;  %v7953_v4 = vsel %vm18948_vm12, %v7951_v0, %v7952_v60  ;;  %vm18950_vm2 = vmmov %vm18946_vm9 }
 0x81b   : > { %18944 = vst [vmem:[#allocation17_spill] sm:$0xff] %v17647_v6  ;;  %v17660_v40 = vpack.c.bf16 %v17434_v11, %v7888_v51  ;;  %v7859_v16 = vsel %vm18949_vm13, %v7853_v36, %v7854_v37  ;;  %v17664_v27 = vpack.c.bf16 %v7956_v31, %v7957_v49  ;;  %v7954_v48 = vsel %vm18950_vm2, %v7950_v35, %v7951_v0  ;;  %vm18951_vm9 = vmmov %vm18950_vm2  ;;  %v18954_v36 = vld [vmem:[#allocation41_spill] sm:$0xff]  ;;  %v15142_v31 = vld [vmem:[#allocation4 + $0x518] sm:$0xff]  }
 0x81c   : > { %v17668_v19 = vpack.c.bf16 %v7859_v16, %v7860_v54  ;;  %v7955_v18 = vsel %vm18951_vm9, %v7949_v30, %v7950_v35  ;;  %v7858_v46 = vsel %vm18947_vm7, %v7854_v37, %v7855_v55  ;;  %v18952_v11 = vrot.slane %v17415_v17, 1  ;;  %vm18953_vm12 = vmmov %vm18950_vm2  ;;  %v15133_v17 = vld [vmem:[#allocation4 + $0x4d0] sm:$0xff]   ;;  %v15136_v55 = vld [vmem:[#allocation4 + $0x4e8] sm:$0xff]  }
 0x81d   : > { %vm18955_vm13 = vnez %v18954_v36  ;;  %v17681_v49 = vpack.c.bf16 %v7954_v48, %v7955_v18  ;;  %v17683_v0 = vpack.c.bf16 %v7857_v50, %v7858_v46  ;;  %vm18957_vm2 = vnez %v18479_v3  ;;  %v15137_v30 = vld [vmem:[#allocation4 + $0x4f0] sm:$0xff]   ;;  %v15139_v37 = vld [vmem:[#allocation4 + $0x500] sm:$0xff]   ;;  %v15140_v35 = vld [vmem:[#allocation4 + $0x508] sm:$0xff]  }
 0x81e   : > { %v7984_v44 = vsel %vm18953_vm12, %v7952_v60, %v18952_v11  ;;  %13652 = vmatmul.mubr.msk.bf16.vlgmr.msra.gmra.mrb[64].mxu1 %vm18955_vm13, %v17660_v40  ;;  %vm18958_vm9 = vnez %v18606_v10  ;;  %vm18959_vm7 = vnez %v18607_v1  ;;  %vm18960_vm12 = vnez %v18608_v52  ;;  %v15138_v60 = vld [vmem:[#allocation4 + $0x4f8] sm:$0xff]   ;;  %v15141_v51 = vld [vmem:[#allocation4 + $0x510] sm:$0xff]   ;;  %v15143_v50 = vld [vmem:[#allocation4 + $0x520] sm:$0xff]  }
 0x81f   : > { %v17685_v54 = vpack.c.bf16 %v7984_v44, %v7953_v4  ;;  %13684 = vmatpush3.bf16.msra.mxu1 %v17404_v7  ;;  %13655 = vmatprep.mubr.msk.bf16.mxu1 %vm18957_vm2, %v17449_v15  ;;  %v15135_v7 = vld [vmem:[#allocation4 + $0x4e0] sm:$0xff]   ;;  %vm18961_vm2 = vnez %v18609_v53  ;;  %v15144_v4 = vld [vmem:[#allocation4 + $0x528] sm:$0xff]   ;;  %v15146_v16 = vld [vmem:[#allocation4 + $0x538] sm:$0xff]  }
 0x820   : > { %13685 = vmatprep.subr.bf16.mxu1 %v15132_v25  ;;  %v18969_v48 = vld [vmem:[#allocation8_spill] sm:$0xff]  ;;  %v18970_v18 = vld [vmem:[#allocation9_spill] sm:$0xff]  ;;  %v15147_v46 = vld [vmem:[#allocation4 + $0x540] sm:$0xff]  }
 0x821   : > { %18956 = vst [vmem:[#allocation16_spill] sm:$0xff] %v17685_v54  ;;  %v18971_v11 = vld [vmem:[#allocation10_spill] sm:$0xff]  ;;  %v18972_v44 = vld [vmem:[#allocation7_spill] sm:$0xff]  ;;  %v15152_v54 = vld [vmem:[#allocation4 + $0x568] sm:$0xff]  }
 0x822   : > { %v15160_v36 = vld [vmem:[#allocation4 + $0x5a8] sm:$0xff]  }
 0x823   : > { %13686 = vmatpush3.bf16.msra.mxu1 %v15132_v25  ;;  %v15145_v25 = vld [vmem:[#allocation4 + $0x530] sm:$0xff]  }
 0x824   : > { %13687 = vmatprep.subr.bf16.mxu1 %v15133_v17 }
 0x826   : > { %13656 = vmatmul.mubr.msk.bf16.gmra.mrb[68].mxu1 %vm18958_vm9, %v17472_v41  ;;  %vm18963_vm9 = vnez %v18516_v2 }
 0x827   : > { %13659 = vmatprep.mubr.msk.bf16.mxu1 %vm18959_vm7, %v17474_v33  ;;  %13688 = vmatpush3.bf16.msra.mxu1 %v15133_v17  ;;  %vm18962_vm7 = vnez %v18610_v5  ;;  %v18973_v17 = vld [vmem:[#allocation48_spill] sm:$0xff] }
 0x828   : > { %13689 = vmatprep.subr.bf16.mxu1 %v15134_v13 }
 0x82b   : > { %13690 = vmatpush3.bf16.msra.mxu1 %v15134_v13  ;;  %v18974_v13 = vld [vmem:[#allocation15_spill] sm:$0xff] }
 0x82c   : > { %13691 = vmatprep.subr.bf16.mxu1 %v15135_v7 }
 0x82e   : > { %13660 = vmatmul.mubr.msk.bf16.gmra.mrb[72].mxu1 %vm18960_vm12, %v17504_v24  ;;  %vm18965_vm12 = vnez %v18617_v63 }
 0x82f   : > { %13663 = vmatprep.mubr.msk.bf16.mxu1 %vm18961_vm2, %v17506_v57  ;;  %13692 = vmatpush3.bf16.msra.mxu1 %v15135_v7  ;;  %vm18964_vm2 = vnez %v18521_v47  ;;  %v18975_v7 = vld [vmem:[#allocation20_spill] sm:$0xff] }
 0x830   : > { %13693 = vmatprep.subr.bf16.mxu1 %v15136_v55 }
 0x833   : > { %13694 = vmatpush3.bf16.msra.mxu1 %v15136_v55  ;;  %v18976_v55 = vld [vmem:[#allocation44_spill] sm:$0xff] }
 0x834   : > { %13695 = vmatprep.subr.bf16.mxu1 %v15137_v30 }
 0x836   : > { %13664 = vmatmul.mubr.msk.bf16.gmra.mrb[76].mxu1 %vm18962_vm7, %v17536_v56  ;;  %vm18967_vm7 = vnez %v18548_v34 }
 0x837   : > { %13667 = vmatprep.mubr.msk.bf16.mxu1 %vm18963_vm9, %v17538_v28  ;;  %13696 = vmatpush3.bf16.msra.mxu1 %v15137_v30  ;;  %vm18966_vm9 = vnez %v18543_v39  ;;  %v15148_v30 = vld [vmem:[#allocation4 + $0x548] sm:$0xff]   ;;  %v15191_v39 = vld [vmem:[#allocation4 + $0x6a0] sm:$0xff]  }
 0x838   : > { %13697 = vmatprep.subr.bf16.mxu1 %v15138_v60 }
 0x83b   : > { %13698 = vmatpush3.bf16.msra.mxu1 %v15138_v60  ;;  %v18977_v60 = vld [vmem:[#allocation21_spill] sm:$0xff] }
 0x83c   : > { %13731 = vmatprep.subr.bf16.mxu1 %v15139_v37 }
 0x83e   : > { %13668 = vmatmul.mubr.msk.bf16.gmra.mrb[80].mxu1 %vm18964_vm2, %v17568_v45  ;;  %vm18968_vm2 = vnez %v18553_v43 }
 0x83f   : > { %13671 = vmatprep.mubr.msk.bf16.mxu1 %vm18965_vm12, %v17570_v26 }
 0x846   : > { %13672 = vmatmul.mubr.msk.bf16.gmra.mrb[84].mxu1 %vm18796_vm5, %v17600_v29 }
 0x847   : > { %13675 = vmatprep.mubr.msk.bf16.mxu1 %vm18797_vm11, %v17602_v59 }
 0x84e   : > { %13676 = vmatmul.mubr.msk.bf16.gmra.mrb[88].mxu1 %vm18966_vm9, %v17632_v58 }
 0x84f   : > { %13679 = vmatprep.mubr.msk.bf16.mxu1 %vm18967_vm7, %v17634_v21 }
 0x856   : > { %13680 = vmatmul.mubr.msk.bf16.gmra.mrb[92].mxu1 %vm18968_vm2, %v17668_v19 }
 0x857   : > { %13699 = vmatprep.mubr.bf16.mxu1 %v18841_v61 }
 0x85e   : > { %13700 = vmatmul.mubr.bf16.vlgmr.msra.gmra.mrb[64].mxu1 %v17423_v20 }
 0x85f   : > { %13732 = vmatpush3.bf16.msra.mxu1 %v15139_v37  ;;  %13703 = vmatprep.mubr.bf16.mxu1 %v17419_v12  ;;  %v18978_v37 = vld [vmem:[#allocation42_spill] sm:$0xff] }
 0x860   : > { %13733 = vmatprep.subr.bf16.mxu1 %v15140_v35  ;;  %vm18979_vm2 = vnez %v18978_v37  ;;  %v18995_v37 = vld [vmem:[#allocation14_spill] sm:$0xff] }
 0x863   : > { %13734 = vmatpush3.bf16.msra.mxu1 %v15140_v35  ;;  %v18980_v35 = vld [vmem:[#allocation22_spill] sm:$0xff] }
 0x864   : > { %13735 = vmatprep.subr.bf16.mxu1 %v15141_v51 }
 0x866   : > { %13704 = vmatmul.mubr.bf16.gmra.mrb[68].mxu1 %v17455_v8 }
 0x867   : > { %13707 = vmatprep.mubr.bf16.mxu1 %v17451_v23  ;;  %13736 = vmatpush3.bf16.msra.mxu1 %v15141_v51  ;;  %v18987_v51 = vld [vmem:[#allocation58_spill] sm:$0xff] }
 0x868   : > { %13737 = vmatprep.subr.bf16.mxu1 %v15142_v31 }
 0x86b   : > { %13738 = vmatpush3.bf16.msra.mxu1 %v15142_v31  ;;  %v15149_v31 = vld [vmem:[#allocation4 + $0x550] sm:$0xff]  }
 0x86c   : > { %13739 = vmatprep.subr.bf16.mxu1 %v15143_v50 }
 0x86e   : > { %13708 = vmatmul.mubr.bf16.gmra.mrb[72].mxu1 %v17487_v38 }
 0x86f   : > { %13711 = vmatprep.mubr.bf16.mxu1 %v17483_v62  ;;  %13740 = vmatpush3.bf16.msra.mxu1 %v15143_v50  ;;  %v15150_v50 = vld [vmem:[#allocation4 + $0x558] sm:$0xff]  }
 0x870   : > { %13741 = vmatprep.subr.bf16.mxu1 %v15144_v4 }
 0x873   : > { %13742 = vmatpush3.bf16.msra.mxu1 %v15144_v4  ;;  %v18982_v4 = vld [vmem:[#allocation52_spill] sm:$0xff] }
 0x874   : > { %13743 = vmatprep.subr.bf16.mxu1 %v15145_v25 }
 0x876   : > { %13712 = vmatmul.mubr.bf16.gmra.mrb[76].mxu1 %v18969_v48 }
 0x877   : > { %13715 = vmatprep.mubr.bf16.mxu1 %v18970_v18  ;;  %13744 = vmatpush3.bf16.msra.mxu1 %v15145_v25  ;;  %v15153_v25 = vld [vmem:[#allocation4 + $0x570] sm:$0xff]  }
 0x878   : > { %13745 = vmatprep.subr.bf16.mxu1 %v15146_v16 }
 0x87b   : > { %13746 = vmatpush3.bf16.msra.mxu1 %v15146_v16  ;;  %v18984_v16 = vld [vmem:[#allocation61_spill] sm:$0xff] }
 0x87c   : > { %13779 = vmatprep.subr.bf16.mxu1 %v15147_v46 }
 0x87e   : > { %13716 = vmatmul.mubr.bf16.gmra.mrb[80].mxu1 %v18971_v11 }
 0x87f   : > { %13719 = vmatprep.mubr.bf16.mxu1 %v18972_v44 }
 0x886   : > { %13720 = vmatmul.mubr.bf16.gmra.mrb[84].mxu1 %v18973_v17 }
 0x887   : > { %13723 = vmatprep.mubr.bf16.mxu1 %v18974_v13 }
 0x88e   : > { %13724 = vmatmul.mubr.bf16.gmra.mrb[88].mxu1 %v18975_v7 }
 0x88f   : > { %13727 = vmatprep.mubr.bf16.mxu1 %v18976_v55 }
 0x896   : > { %13728 = vmatmul.mubr.bf16.gmra.mrb[92].mxu1 %v17647_v6 }
 0x897   : > { %13747 = vmatprep.mubr.bf16.mxu1 %v18841_v61  ;;  %v18985_v61 = vld [vmem:[#allocation49_spill] sm:$0xff] }
 0x898   : > { %vm18986_vm7 = vnez %v18985_v61  ;;  %v15154_v61 = vld [vmem:[#allocation4 + $0x578] sm:$0xff]  }
 0x89e   : > { %13748 = vmatmul.mubr.msk.bf16.vlgmr.msra.gmra.mrb[64].mxu1 %vm18979_vm2, %v18977_v60 }
 0x89f   : > { %13780 = vmatpush3.bf16.msra.mxu1 %v15147_v46  ;;  %13751 = vmatprep.mubr.msk.bf16.mxu1 %vm18848_vm3, %v18980_v35  ;;  %v15151_v46 = vld [vmem:[#allocation4 + $0x560] sm:$0xff]  }
 0x8a0   : > { %13781 = vmatprep.subr.bf16.mxu1 %v15148_v30  ;;  %v15155_v35 = vld [vmem:[#allocation4 + $0x580] sm:$0xff]  }
 0x8a3   : > { %13782 = vmatpush3.bf16.msra.mxu1 %v15148_v30  ;;  %v18989_v30 = vld [vmem:[#allocation13_spill] sm:$0xff] }
 0x8a4   : > { %13783 = vmatprep.subr.bf16.mxu1 %v15149_v31 }
 0x8a6   : > { %13752 = vmatmul.mubr.msk.bf16.gmra.mrb[68].mxu1 %vm18851_vm15, %v18982_v4  ;;  %v19001_v4 = vld [vmem:[#allocation62_spill] sm:$0xff] }
 0x8a7   : > { %13755 = vmatprep.mubr.msk.bf16.mxu1 %vm18986_vm7, %v18984_v16  ;;  %13784 = vmatpush3.bf16.msra.mxu1 %v15149_v31  ;;  %v18991_v31 = vld [vmem:[#allocation46_spill] sm:$0xff]  ;;  %v15156_v16 = vld [vmem:[#allocation4 + $0x588] sm:$0xff]  }
 0x8a8   : > { %13785 = vmatprep.subr.bf16.mxu1 %v15150_v50 }
 0x8ab   : > { %13786 = vmatpush3.bf16.msra.mxu1 %v15150_v50  ;;  %v18993_v50 = vld [vmem:[#allocation11_spill] sm:$0xff] }
 0x8ac   : > { %13787 = vmatprep.subr.bf16.mxu1 %v15151_v46 }
 0x8ae   : > { %13756 = vmatmul.mubr.msk.bf16.gmra.mrb[72].mxu1 %vm18855_vm10, %v18987_v51  ;;  %v18999_v51 = vld [vmem:[#allocation34_spill] sm:$0xff] }
 0x8af   : > { %13759 = vmatprep.mubr.msk.bf16.mxu1 %vm18819_vm6, %v18989_v30  ;;  %13788 = vmatpush3.bf16.msra.mxu1 %v15151_v46  ;;  %v19007_v46 = vld [vmem:[#allocation65_spill] sm:$0xff]  ;;  %v19046_v30 = vld [vmem:[#allocation66_spill] sm:$0xff] }
 0x8b0   : > { %13789 = vmatprep.subr.bf16.mxu1 %v15152_v54 }
 0x8b3   : > { %13790 = vmatpush3.bf16.msra.mxu1 %v15152_v54  ;;  %v18997_v54 = vld [vmem:[#allocation54_spill] sm:$0xff] }
 0x8b4   : > { %13791 = vmatprep.subr.bf16.mxu1 %v15153_v25 }
 0x8b6   : > { %13760 = vmatmul.mubr.msk.bf16.gmra.mrb[76].mxu1 %vm18821_vm4, %v18991_v31 }
 0x8b7   : > { %13763 = vmatprep.mubr.msk.bf16.mxu1 %vm18823_vm8, %v18993_v50  ;;  %13792 = vmatpush3.bf16.msra.mxu1 %v15153_v25  ;;  %vm19002_vm8 = vnez %v19001_v4  ;;  %v19003_v25 = vld [vmem:[#allocation63_spill] sm:$0xff] }
 0x8b8   : > { %13793 = vmatprep.subr.bf16.mxu1 %v15154_v61  ;;  %vm19004_vm4 = vnez %v19003_v25 }
 0x8bb   : > { %13794 = vmatpush3.bf16.msra.mxu1 %v15154_v61  ;;  %v19005_v61 = vld [vmem:[#allocation64_spill] sm:$0xff] }
 0x8bc   : > { %13827 = vmatprep.subr.bf16.mxu1 %v15155_v35  ;;  %vm19006_vm6 = vnez %v19005_v61  ;;  %v15157_v61 = vld [vmem:[#allocation4 + $0x590] sm:$0xff]  }
 0x8be   : > { %13764 = vmatmul.mubr.msk.bf16.gmra.mrb[80].mxu1 %vm18825_vm0, %v18995_v37  ;;  %vm19008_vm0 = vnez %v19007_v46  ;;  %v15158_v46 = vld [vmem:[#allocation4 + $0x598] sm:$0xff]  }
 0x8bf   : > { %13767 = vmatprep.mubr.msk.bf16.mxu1 %vm18858_vm14, %v18997_v54 }
 0x8c6   : > { %13768 = vmatmul.mubr.msk.bf16.gmra.mrb[84].mxu1 %vm18787_vm1, %v18999_v51 }
 0x8c7   : > { %13771 = vmatprep.mubr.msk.bf16.mxu1 %vm19002_vm8, %v17629_v32  ;;  %vm19009_vm8 = vnez %v18479_v3 }
 0x8ce   : > { %13772 = vmatmul.mubr.msk.bf16.gmra.mrb[88].mxu1 %vm19004_vm4, %v17641_v9  ;;  %vm19010_vm4 = vnez %v18606_v10 }
 0x8cf   : > { %13775 = vmatprep.mubr.msk.bf16.mxu1 %vm19006_vm6, %v17664_v27 }
 0x8d6   : > { %13776 = vmatmul.mubr.msk.bf16.gmra.mrb[92].mxu1 %vm19008_vm0, %v17681_v49  ;;  %vm19011_vm0 = vnez %v18607_v1 }
 0x8d7   : > { %13795 = vmatprep.mubr.msk.bf16.mxu1 %vm18955_vm13, %v17660_v40  ;;  %vm19012_vm13 = vnez %v18608_v52  ;;  %v15159_v40 = vld [vmem:[#allocation4 + $0x5a0] sm:$0xff]  }
 0x8de   : > { %13796 = vmatmul.mubr.msk.bf16.vlgmr.msra.gmra.mrb[64].mxu1 %vm19009_vm8, %v17449_v15  ;;  %vm19014_vm8 = vnez %v18610_v5  ;;  %v15193_v5 = vld [vmem:[#allocation4 + $0x6b0] sm:$0xff]  }
 0x8df   : > { %13828 = vmatpush3.bf16.msra.mxu1 %v15155_v35  ;;  %13799 = vmatprep.mubr.msk.bf16.mxu1 %vm19010_vm4, %v17472_v41  ;;  %vm19013_vm4 = vnez %v18609_v53  ;;  %v15161_v35 = vld [vmem:[#allocation4 + $0x5b0] sm:$0xff]   ;;  %v15187_v53 = vld [vmem:[#allocation4 + $0x680] sm:$0xff]  }
 0x8e0   : > { %13829 = vmatprep.subr.bf16.mxu1 %v15156_v16 }
 0x8e3   : > { %13830 = vmatpush3.bf16.msra.mxu1 %v15156_v16  ;;  %v15162_v16 = vld [vmem:[#allocation4 + $0x5b8] sm:$0xff]  }
 0x8e4   : > { %13831 = vmatprep.subr.bf16.mxu1 %v15157_v61 }
 0x8e6   : > { %13800 = vmatmul.mubr.msk.bf16.gmra.mrb[68].mxu1 %vm19011_vm0, %v17474_v33  ;;  %vm19016_vm0 = vnez %v18521_v47 }
 0x8e7   : > { %13803 = vmatprep.mubr.msk.bf16.mxu1 %vm19012_vm13, %v17504_v24  ;;  %13832 = vmatpush3.bf16.msra.mxu1 %v15157_v61  ;;  %vm19015_vm13 = vnez %v18516_v2  ;;  %v19019_v61 = vld [vmem:[#allocation25_spill] sm:$0xff] }
 0x8e8   : > { %13833 = vmatprep.subr.bf16.mxu1 %v15158_v46 }
 0x8eb   : > { %13834 = vmatpush3.bf16.msra.mxu1 %v15158_v46  ;;  %v15163_v46 = vld [vmem:[#allocation4 + $0x5c0] sm:$0xff]  }
 0x8ec   : > { %13835 = vmatprep.subr.bf16.mxu1 %v15159_v40 }
 0x8ee   : > { %13804 = vmatmul.mubr.msk.bf16.gmra.mrb[72].mxu1 %vm19013_vm4, %v17506_v57 }
 0x8ef   : > { %13807 = vmatprep.mubr.msk.bf16.mxu1 %vm19014_vm8, %v17536_v56  ;;  %13836 = vmatpush3.bf16.msra.mxu1 %v15159_v40  ;;  %v15164_v40 = vld [vmem:[#allocation4 + $0x5c8] sm:$0xff]  }
 0x8f0   : > { %13837 = vmatprep.subr.bf16.mxu1 %v15160_v36 }
 0x8f3   : > { %13838 = vmatpush3.bf16.msra.mxu1 %v15160_v36  ;;  %v15165_v36 = vld [vmem:[#allocation4 + $0x5d0] sm:$0xff]  }
 0x8f4   : > { %13839 = vmatprep.subr.bf16.mxu1 %v15161_v35 }
 0x8f6   : > { %13808 = vmatmul.mubr.msk.bf16.gmra.mrb[76].mxu1 %vm19015_vm13, %v17538_v28  ;;  %vm19018_vm13 = vnez %v18553_v43  ;;  %v15192_v43 = vld [vmem:[#allocation4 + $0x6a8] sm:$0xff]  }
 0x8f7   : > { %13811 = vmatprep.mubr.msk.bf16.mxu1 %vm19016_vm0, %v17568_v45  ;;  %13840 = vmatpush3.bf16.msra.mxu1 %v15161_v35  ;;  %vm19017_vm0 = vnez %v18548_v34  ;;  %v15166_v35 = vld [vmem:[#allocation4 + $0x5d8] sm:$0xff]  }
 0x8f8   : > { %13841 = vmatprep.subr.bf16.mxu1 %v15162_v16  ;;  %v15190_v34 = vld [vmem:[#allocation4 + $0x698] sm:$0xff]  }
 0x8fb   : > { %13842 = vmatpush3.bf16.msra.mxu1 %v15162_v16  ;;  %v15167_v16 = vld [vmem:[#allocation4 + $0x5e0] sm:$0xff]  }
 0x8fc   : > { %13875 = vmatprep.subr.bf16.mxu1 %v15163_v46 }
 0x8fe   : > { %13812 = vmatmul.mubr.msk.bf16.gmra.mrb[80].mxu1 %vm18965_vm12, %v17570_v26  ;;  %vm19020_vm12 = vnez %v19019_v61 }
 0x8ff   : > { %13815 = vmatprep.mubr.msk.bf16.mxu1 %vm18796_vm5, %v17600_v29 }
 0x906   : > { %13816 = vmatmul.mubr.msk.bf16.gmra.mrb[84].mxu1 %vm18797_vm11, %v17602_v59 }
 0x907   : > { %13819 = vmatprep.mubr.msk.bf16.mxu1 %vm18966_vm9, %v17632_v58 }
 0x90e   : > { %13820 = vmatmul.mubr.msk.bf16.gmra.mrb[88].mxu1 %vm19017_vm0, %v17634_v21 }
 0x90f   : > { %13823 = vmatprep.mubr.msk.bf16.mxu1 %vm19018_vm13, %v17668_v19 }
 0x916   : > { %13824 = vmatmul.mubr.msk.bf16.gmra.mrb[92].mxu1 %vm19020_vm12, %v17683_v0 }
 0x917   : > { %13843 = vmatprep.mubr.bf16.mxu1 %v17423_v20  ;;  %v15168_v20 = vld [vmem:[#allocation4 + $0x5e8] sm:$0xff]  }
 0x91e   : > { %13844 = vmatmul.mubr.bf16.vlgmr.msra.gmra.mrb[64].mxu1 %v17419_v12 }
 0x91f   : > { %13876 = vmatpush3.bf16.msra.mxu1 %v15163_v46  ;;  %13847 = vmatprep.mubr.bf16.mxu1 %v17455_v8  ;;  %v15169_v46 = vld [vmem:[#allocation4 + $0x5f0] sm:$0xff]  }
 0x920   : > { %13877 = vmatprep.subr.bf16.mxu1 %v15164_v40 }
 0x923   : > { %13878 = vmatpush3.bf16.msra.mxu1 %v15164_v40  ;;  %v15170_v40 = vld [vmem:[#allocation4 + $0x5f8] sm:$0xff]  }
 0x924   : > { %13879 = vmatprep.subr.bf16.mxu1 %v15165_v36 }
 0x926   : > { %13848 = vmatmul.mubr.bf16.gmra.mrb[68].mxu1 %v17451_v23 }
 0x927   : > { %13851 = vmatprep.mubr.bf16.mxu1 %v17487_v38  ;;  %13880 = vmatpush3.bf16.msra.mxu1 %v15165_v36  ;;  %v15171_v36 = vld [vmem:[#allocation4 + $0x600] sm:$0xff]  }
 0x928   : > { %13881 = vmatprep.subr.bf16.mxu1 %v15166_v35 }
 0x92b   : > { %13882 = vmatpush3.bf16.msra.mxu1 %v15166_v35  ;;  %v15178_v35 = vld [vmem:[#allocation4 + $0x638] sm:$0xff]  }
 0x92c   : > { %13883 = vmatprep.subr.bf16.mxu1 %v15167_v16 }
 0x92e   : > { %13852 = vmatmul.mubr.bf16.gmra.mrb[72].mxu1 %v17483_v62 }
 0x92f   : > { %13855 = vmatprep.mubr.bf16.mxu1 %v18969_v48  ;;  %13884 = vmatpush3.bf16.msra.mxu1 %v15167_v16  ;;  %v15172_v16 = vld [vmem:[#allocation4 + $0x608] sm:$0xff]  }
 0x930   : > { %13885 = vmatprep.subr.bf16.mxu1 %v15168_v20 }
 0x933   : > { %13886 = vmatpush3.bf16.msra.mxu1 %v15168_v20  ;;  %v19022_v20 = vld [vmem:[#allocation22_spill] sm:$0xff] }
 0x934   : > { %13887 = vmatprep.subr.bf16.mxu1 %v15169_v46 }
 0x936   : > { %13856 = vmatmul.mubr.bf16.gmra.mrb[76].mxu1 %v18970_v18 }
 0x937   : > { %13859 = vmatprep.mubr.bf16.mxu1 %v18971_v11  ;;  %13888 = vmatpush3.bf16.msra.mxu1 %v15169_v46  ;;  %v19031_v46 = vld [vmem:[#allocation53_spill] sm:$0xff] }
 0x938   : > { %13889 = vmatprep.subr.bf16.mxu1 %v15170_v40 }
 0x93b   : > { %13890 = vmatpush3.bf16.msra.mxu1 %v15170_v40  ;;  %v19024_v40 = vld [vmem:[#allocation52_spill] sm:$0xff] }
 0x93c   : > { %13923 = vmatprep.subr.bf16.mxu1 %v15171_v36 }
 0x93e   : > { %13860 = vmatmul.mubr.bf16.gmra.mrb[80].mxu1 %v18972_v44 }
 0x93f   : > { %13863 = vmatprep.mubr.bf16.mxu1 %v18973_v17 }
 0x946   : > { %13864 = vmatmul.mubr.bf16.gmra.mrb[84].mxu1 %v18974_v13  ;;  %v15176_v13 = vld [vmem:[#allocation4 + $0x628] sm:$0xff]  }
 0x947   : > { %13867 = vmatprep.mubr.bf16.mxu1 %v18975_v7  ;;  %v15177_v7 = vld [vmem:[#allocation4 + $0x630] sm:$0xff]  }
 0x94e   : > { %13868 = vmatmul.mubr.bf16.gmra.mrb[88].mxu1 %v18976_v55  ;;  %v15173_v55 = vld [vmem:[#allocation4 + $0x610] sm:$0xff]  }
 0x94f   : > { %13871 = vmatprep.mubr.bf16.mxu1 %v17647_v6  ;;  %v15174_v6 = vld [vmem:[#allocation4 + $0x618] sm:$0xff]  }
 0x956   : > { %13872 = vmatmul.mubr.bf16.gmra.mrb[92].mxu1 %v17643_v22  ;;  %v19026_v22 = vld [vmem:[#allocation61_spill] sm:$0xff] }
 0x957   : > { %13891 = vmatprep.mubr.msk.bf16.mxu1 %vm18979_vm2, %v18977_v60  ;;  %v19028_v60 = vld [vmem:[#allocation58_spill] sm:$0xff]  ;;  %vm19032_vm2 = vnez %v19031_v46  ;;  %v15179_v46 = vld [vmem:[#allocation4 + $0x640] sm:$0xff]  }
 0x95e   : > { %13892 = vmatmul.mubr.msk.bf16.vlgmr.msra.gmra.mrb[64].mxu1 %vm18848_vm3, %v19022_v20 }
 0x95f   : > { %13924 = vmatpush3.bf16.msra.mxu1 %v15171_v36  ;;  %13895 = vmatprep.mubr.msk.bf16.mxu1 %vm18851_vm15, %v19024_v40  ;;  %v15175_v36 = vld [vmem:[#allocation4 + $0x620] sm:$0xff]   ;;  %v19030_v40 = vld [vmem:[#allocation13_spill] sm:$0xff] }
 0x960   : > { %13925 = vmatprep.subr.bf16.mxu1 %v15172_v16 }
 0x963   : > { %13926 = vmatpush3.bf16.msra.mxu1 %v15172_v16  ;;  %v19033_v16 = vld [vmem:[#allocation55_spill] sm:$0xff] }
 0x964   : > { %13927 = vmatprep.subr.bf16.mxu1 %v15173_v55  ;;  %vm19034_vm15 = vnez %v19033_v16 }
 0x966   : > { %13896 = vmatmul.mubr.msk.bf16.gmra.mrb[68].mxu1 %vm18986_vm7, %v19026_v22 }
 0x967   : > { %13899 = vmatprep.mubr.msk.bf16.mxu1 %vm18855_vm10, %v19028_v60  ;;  %13928 = vmatpush3.bf16.msra.mxu1 %v15173_v55  ;;  %v19035_v55 = vld [vmem:[#allocation56_spill] sm:$0xff] }
 0x968   : > { %13929 = vmatprep.subr.bf16.mxu1 %v15174_v6  ;;  %vm19036_vm10 = vnez %v19035_v55 }
 0x96b   : > { %13930 = vmatpush3.bf16.msra.mxu1 %v15174_v6  ;;  %v19037_v6 = vld [vmem:[#allocation57_spill] sm:$0xff] }
 0x96c   : > { %13931 = vmatprep.subr.bf16.mxu1 %v15175_v36  ;;  %vm19038_vm7 = vnez %v19037_v6 }
 0x96e   : > { %13900 = vmatmul.mubr.msk.bf16.gmra.mrb[72].mxu1 %vm19032_vm2, %v19030_v40 }
 0x96f   : > { %13903 = vmatprep.mubr.msk.bf16.mxu1 %vm19034_vm15, %v18991_v31  ;;  %13932 = vmatpush3.bf16.msra.mxu1 %v15175_v36  ;;  %v19045_v36 = vld [vmem:[#allocation16_spill] sm:$0xff] }
 0x970   : > { %13933 = vmatprep.subr.bf16.mxu1 %v15176_v13 }
 0x973   : > { %13934 = vmatpush3.bf16.msra.mxu1 %v15176_v13  ;;  %v19039_v13 = vld [vmem:[#allocation60_spill] sm:$0xff] }
 0x974   : > { %13935 = vmatprep.subr.bf16.mxu1 %v15177_v7 }
 0x976   : > { %13904 = vmatmul.mubr.msk.bf16.gmra.mrb[76].mxu1 %vm19036_vm10, %v18993_v50  ;;  %vm19040_vm10 = vnez %v19001_v4  ;;  %v15180_v4 = vld [vmem:[#allocation4 + $0x648] sm:$0xff]  }
 0x977   : > { %13907 = vmatprep.mubr.msk.bf16.mxu1 %vm19038_vm7, %v18995_v37  ;;  %13936 = vmatpush3.bf16.msra.mxu1 %v15177_v7  ;;  %vm19041_vm7 = vnez %v19003_v25  ;;  %v19042_v7 = vld [vmem:[#allocation64_spill] sm:$0xff] }
 0x978   : > { %13937 = vmatprep.subr.bf16.mxu1 %v15178_v35 }
 0x97b   : > { %13938 = vmatpush3.bf16.msra.mxu1 %v15178_v35  ;;  %v19043_v35 = vld [vmem:[#allocation65_spill] sm:$0xff] }
 0x97c   : > { %13971 = vmatprep.subr.bf16.mxu1 %v15179_v46  ;;  %vm19044_vm15 = vnez %v19043_v35  ;;  %v15181_v35 = vld [vmem:[#allocation4 + $0x650] sm:$0xff]  }
 0x97e   : > { %13908 = vmatmul.mubr.msk.bf16.gmra.mrb[80].mxu1 %vm18858_vm14, %v18997_v54  ;;  %vm19047_vm14 = vnez %v19046_v30  ;;  %v15182_v30 = vld [vmem:[#allocation4 + $0x658] sm:$0xff]  }
 0x97f   : > { %13911 = vmatprep.mubr.msk.bf16.mxu1 %vm18787_vm1, %v18999_v51  ;;  %vm19048_vm1 = vnez %v18479_v3  ;;  %v15183_v3 = vld [vmem:[#allocation4 + $0x660] sm:$0xff]  }
 0x986   : > { %13912 = vmatmul.mubr.msk.bf16.gmra.mrb[84].mxu1 %vm19040_vm10, %v17629_v32 }
 0x987   : > { %13915 = vmatprep.mubr.msk.bf16.mxu1 %vm19041_vm7, %v17641_v9  ;;  %vm19049_vm7 = vnez %v18606_v10  ;;  %v15184_v10 = vld [vmem:[#allocation4 + $0x668] sm:$0xff]  }
 0x98e   : > { %13916 = vmatmul.mubr.msk.bf16.gmra.mrb[88].mxu1 %vm19006_vm6, %v17664_v27  ;;  %vm19050_vm6 = vnez %v18607_v1  ;;  %v15185_v1 = vld [vmem:[#allocation4 + $0x670] sm:$0xff]  }
 0x98f   : > { %13919 = vmatprep.mubr.msk.bf16.mxu1 %vm19044_vm15, %v17681_v49 }
 0x996   : > { %13920 = vmatmul.mubr.msk.bf16.gmra.mrb[92].mxu1 %vm19047_vm14, %v19045_v36  ;;  %vm19051_vm14 = vnez %v18608_v52  ;;  %v15186_v52 = vld [vmem:[#allocation4 + $0x678] sm:$0xff]  }
 0x997   : > { %13939 = vmatprep.mubr.msk.bf16.mxu1 %vm19048_vm1, %v17449_v15  ;;  %vm19052_vm1 = vnez %v18516_v2  ;;  %v19055_v2 = vmov 0   ;;  %v19063_v15 = vld [vmem:[#allocation47_spill] sm:$0xff] }
 0x99e   : > { %13940 = vmatmul.mubr.msk.bf16.vlgmr.msra.gmra.mrb[64].mxu1 %vm19049_vm7, %v17472_v41  ;;  %vm19075_vm7 = vnez %v19039_v13 }
 0x99f   : > { %13972 = vmatpush3.bf16.msra.mxu1 %v15179_v46  ;;  %13943 = vmatprep.mubr.msk.bf16.mxu1 %vm19050_vm6, %v17474_v33  ;;  %v10628_v33 = vld [vmem:[%s15326_s14 + $0x48] sm:$0xff] }
 0x9a0   : > { %13973 = vmatprep.subr.bf16.mxu1 %v15180_v4 }
 0x9a3   : > { %13974 = vmatpush3.bf16.msra.mxu1 %v15180_v4 }
 0x9a4   : > { %13975 = vmatprep.subr.bf16.mxu1 %v15181_v35 }
 0x9a6   : > { %13944 = vmatmul.mubr.msk.bf16.gmra.mrb[68].mxu1 %vm19051_vm14, %v17504_v24  ;;  %vm19053_vm14 = vnez %v18521_v47  ;;  %v15188_v47 = vld [vmem:[#allocation4 + $0x688] sm:$0xff]  }
 0x9a7   : > { %13947 = vmatprep.mubr.msk.bf16.mxu1 %vm19013_vm4, %v17506_v57  ;;  %13976 = vmatpush3.bf16.msra.mxu1 %v15181_v35  ;;  %vm19054_vm4 = vnez %v18617_v63  ;;  %v15194_v63 = vld [vmem:[#allocation4 + $0x6b8] sm:$0xff]   ;;  %v19057_v24 = vld [vmem:[#allocation20_spill] sm:$0xff] }
 0x9a8   : > { %13977 = vmatprep.subr.bf16.mxu1 %v15182_v30 }
 0x9ab   : > { %13978 = vmatpush3.bf16.msra.mxu1 %v15182_v30  ;;  %v10620_v30 = vld [vmem:[%s15326_s14 + $0x8] sm:$0xff] }
 0x9ac   : > { %13979 = vmatprep.subr.bf16.mxu1 %v15183_v3 }
 0x9ae   : > { %13948 = vmatmul.mubr.msk.bf16.gmra.mrb[72].mxu1 %vm19014_vm8, %v17536_v56  ;;  %v19060_v56 = vld [vmem:[#allocation12_spill] sm:$0xff]  ;;  %vm19072_vm8 = vnez %v19037_v6 }
 0x9af   : > { %13951 = vmatprep.mubr.msk.bf16.mxu1 %vm19052_vm1, %v17538_v28  ;;  %13980 = vmatpush3.bf16.msra.mxu1 %v15183_v3  ;;  %v10626_v3 = vld [vmem:[%s15326_s14 + $0x38] sm:$0xff] }
 0x9b0   : > { %13981 = vmatprep.subr.bf16.mxu1 %v15184_v10 }
 0x9b3   : > { %13982 = vmatpush3.bf16.msra.mxu1 %v15184_v10 }
 0x9b4   : > { %13983 = vmatprep.subr.bf16.mxu1 %v15185_v1 }
 0x9b6   : > { %13952 = vmatmul.mubr.msk.bf16.gmra.mrb[76].mxu1 %vm19053_vm14, %v17568_v45  ;;  %v19059_v45 = vld [vmem:[#allocation17_spill] sm:$0xff] }
 0x9b7   : > { %13955 = vmatprep.mubr.msk.bf16.mxu1 %vm19054_vm4, %v17570_v26  ;;  %13984 = vmatpush3.bf16.msra.mxu1 %v15185_v1  ;;  %v19080_v26 = vld [vmem:[#allocation66_spill] sm:$0xff] }
 0x9b8   : > { %13985 = vmatprep.subr.bf16.mxu1 %v15186_v52 }
 0x9bb   : > { %13986 = vmatpush3.bf16.msra.mxu1 %v15186_v52  ;;  %v10624_v52 = vld [vmem:[%s15326_s14 + $0x28] sm:$0xff] }
 0x9bc   : > { %14019 = vmatprep.subr.bf16.mxu1 %v15187_v53 }
 0x9be   : > { %13956 = vmatmul.mubr.msk.bf16.gmra.mrb[80].mxu1 %vm18796_vm5, %v17600_v29  ;;  %v18015_v29 = vld [vmem:[%s18120_s4 + $0x2] ss:$0 sm:$0xff] }
 0x9bf   : > { %13959 = vmatprep.mubr.msk.bf16.mxu1 %vm18797_vm11, %v17602_v59  ;;  %vm19070_vm11 = vnez %v19033_v16  ;;  %v10625_v16 = vld [vmem:[%s15326_s14 + $0x30] sm:$0xff] }
 0x9c6   : > { %13960 = vmatmul.mubr.msk.bf16.gmra.mrb[84].mxu1 %vm18966_vm9, %v17632_v58 }
 0x9c7   : > { %13963 = vmatprep.mubr.msk.bf16.mxu1 %vm19017_vm0, %v17634_v21  ;;  %vm19064_vm0 = vnez %v19063_v15  ;;  %v10630_v15 = vld [vmem:[%s15326_s14 + $0x58] sm:$0xff] }
 0x9ce   : > { %13964 = vmatmul.mubr.msk.bf16.gmra.mrb[88].mxu1 %vm19018_vm13, %v17668_v19  ;;  %vm19078_vm13 = vnez %v19042_v7  ;;  %v10623_v7 = vld [vmem:[%s15326_s14 + $0x20] sm:$0xff] }
 0x9cf   : > { %13967 = vmatprep.mubr.msk.bf16.mxu1 %vm19020_vm12, %v17683_v0  ;;  %vm19077_vm12 = vnez %v19003_v25 }
 0x9d6   : > { %13968 = vmatmul.mubr.bf16.gmra.mrb[92].mxu1 %v19055_v2 }
 0x9d7   : > { %13987 = vmatprep.mubr.bf16.mxu1 %v17419_v12  ;;  %v19062_v12 = vld [vmem:[#allocation52_spill] sm:$0xff] }
 0x9de   : > { %13988 = vmatmul.mubr.bf16.vlgmr.msra.gmra.mrb[64].mxu1 %v17455_v8  ;;  %v19067_v8 = vld [vmem:[#allocation51_spill] sm:$0xff] }
 0x9df   : > { %14020 = vmatpush3.bf16.msra.mxu1 %v15187_v53  ;;  %13991 = vmatprep.mubr.bf16.mxu1 %v17451_v23  ;;  %v19065_v23 = vld [vmem:[#allocation49_spill] sm:$0xff]  ;;  %vm19068_vm6 = vnez %v19067_v8 }
 0x9e0   : > { %14021 = vmatprep.subr.bf16.mxu1 %v15188_v47  ;;  %vm19066_vm5 = vnez %v19065_v23 }
 0x9e3   : > { %14022 = vmatpush3.bf16.msra.mxu1 %v15188_v47 }
 0x9e4   : > { %14023 = vmatprep.subr.bf16.mxu1 %v15189_v42 }
 0x9e6   : > { %13992 = vmatmul.mubr.bf16.gmra.mrb[68].mxu1 %v17487_v38  ;;  %v19058_v38 = vld [vmem:[#allocation44_spill] sm:$0xff] }
 0x9e7   : > { %13995 = vmatprep.mubr.bf16.mxu1 %v17483_v62  ;;  %14024 = vmatpush3.bf16.msra.mxu1 %v15189_v42  ;;  %v19073_v62 = vld [vmem:[#allocation59_spill] sm:$0xff] }
 0x9e8   : > { %14025 = vmatprep.subr.bf16.mxu1 %v15190_v34  ;;  %vm19074_vm9 = vnez %v19073_v62 }
 0x9eb   : > { %14026 = vmatpush3.bf16.msra.mxu1 %v15190_v34 }
 0x9ec   : > { %14027 = vmatprep.subr.bf16.mxu1 %v15191_v39 }
 0x9ee   : > { %13996 = vmatmul.mubr.bf16.gmra.mrb[72].mxu1 %v18969_v48 }
 0x9ef   : > { %13999 = vmatprep.mubr.bf16.mxu1 %v18970_v18  ;;  %14028 = vmatpush3.bf16.msra.mxu1 %v15191_v39 }
 0x9f0   : > { %14029 = vmatprep.subr.bf16.mxu1 %v15192_v43 }
 0x9f3   : > { %14030 = vmatpush3.bf16.msra.mxu1 %v15192_v43 }
 0x9f4   : > { %14031 = vmatprep.subr.bf16.mxu1 %v15193_v5 }
 0x9f6   : > { %14000 = vmatmul.mubr.bf16.gmra.mrb[76].mxu1 %v18971_v11  ;;  %v10619_v11 = vld [vmem:[%s15326_s14] sm:$0xff] }
 0x9f7   : > { %14003 = vmatprep.mubr.bf16.mxu1 %v18972_v44  ;;  %14032 = vmatpush3.bf16.msra.mxu1 %v15193_v5 }
 0x9f8   : > { %14033 = vmatprep.subr.bf16.mxu1 %v15194_v63 }
 0x9fb   : > { %14034 = vmatpush3.bf16.msra.mxu1 %v15194_v63 }
 0x9fe   : > { %14004 = vmatmul.mubr.bf16.gmra.mrb[80].mxu1 %v18973_v17 }
 0x9ff   : > { %14007 = vmatprep.mubr.bf16.mxu1 %v19056_v14  ;;  %v10629_v14 = vld [vmem:[%s15326_s14 + $0x50] sm:$0xff] }
 0xa06   : > { %14008 = vmatmul.mubr.bf16.gmra.mrb[84].mxu1 %v19057_v24 }
 0xa07   : > { %14011 = vmatprep.mubr.bf16.mxu1 %v19058_v38 }
 0xa0e   : > { %14012 = vmatmul.mubr.bf16.gmra.mrb[88].mxu1 %v19059_v45 }
 0xa0f   : > { %14015 = vmatprep.mubr.bf16.mxu1 %v19060_v56  ;;  %v10627_v56 = vld [vmem:[%s15326_s14 + $0x40] sm:$0xff] }
 0xa16   : > { %14016 = vmatmul.mubr.bf16.gmra.mrb[92].mxu1 %v19055_v2 }
 0xa17   : > { %14035 = vmatprep.mubr.msk.bf16.mxu1 %vm18848_vm3, %v19022_v20  ;;  %vm19071_vm3 = vnez %v19035_v55 }
 0xa1e   : > { %14036 = vmatmul.mubr.msk.bf16.vlgmr.msra.gmra.mrb[64].mxu1 %vm19064_vm0, %v19062_v12 }
 0xa1f   : > { %14039 = vmatprep.mubr.msk.bf16.mxu1 %vm19066_vm5, %v19026_v22 }
 0xa26   : > { %14040 = vmatmul.mubr.msk.bf16.gmra.mrb[68].mxu1 %vm19068_vm6, %v19028_v60 }
 0xa27   : > { %14043 = vmatprep.mubr.msk.bf16.mxu1 %vm19032_vm2, %v19030_v40  ;;  %vm19081_vm2 = vnez %v19080_v26 }
 0xa2e   : > { %14044 = vmatmul.mubr.msk.bf16.gmra.mrb[72].mxu1 %vm19070_vm11, %v18991_v31 }
 0xa2f   : > { %14047 = vmatprep.mubr.msk.bf16.mxu1 %vm19071_vm3, %v18993_v50 }
 0xa36   : > { %14048 = vmatmul.mubr.msk.bf16.gmra.mrb[76].mxu1 %vm19072_vm8, %v18995_v37  ;;  %v10622_v37 = vld [vmem:[%s15326_s14 + $0x18] sm:$0xff] }
 0xa37   : > { %14051 = vmatprep.mubr.msk.bf16.mxu1 %vm19074_vm9, %v18997_v54 }
 0xa3e   : > { %14052 = vmatmul.mubr.msk.bf16.gmra.mrb[80].mxu1 %vm19075_vm7, %v18999_v51 }
 0xa3f   : > { %14055 = vmatprep.mubr.msk.bf16.mxu1 %vm19040_vm10, %v17629_v32 }
 0xa46   : > { %14056 = vmatmul.mubr.msk.bf16.gmra.mrb[84].mxu1 %vm19077_vm12, %v17641_v9 }
 0xa47   : > { %14059 = vmatprep.mubr.msk.bf16.mxu1 %vm19078_vm13, %v17664_v27 }
 0xa4e   : > { %14060 = vmatmul.mubr.msk.bf16.gmra.mrb[88].mxu1 %vm19044_vm15, %v17681_v49  ;;  %v10621_v49 = vld [vmem:[%s15326_s14 + $0x10] sm:$0xff] }
 0xa4f   : > { %14063 = vmatprep.mubr.msk.bf16.mxu1 %vm19081_vm2, %v19045_v36 }
 0xa56   : > { %14064 = vmatmul.mubr.bf16.gmra.mrb[92].mxu1 %v19055_v2 }
 0xaf1   : > { %v14037_v59 = vpop.f32.mrb[64].mxu1 }
 0xaf2   : > { %v14163_v58 = vadd.f32 %v14037_v59, %v18015_v29  ;;  %v10428_v32 = vpop.f32.mrb[65].mxu1 }
 0xaf3   : > { %v14164_v21 = vadd.f32 %v18015_v29, %v10428_v32  ;;  %v14038_v9 = vpop.f32.mrb[66].mxu1 }
 0xaf4   : > { %v10589_v22 = vmax.f32 %v14163_v58, 0.0  ;;  %v14165_v27 = vadd.f32 %v14038_v9, %v18015_v29  ;;  %v10431_v19 = vpop.f32.mrb[67].mxu1 }
 0xaf5   : > { %v10587_v0 = vmax.f32 %v14164_v21, 0.0  ;;  %v14166_v48 = vadd.f32 %v18015_v29, %v10431_v19 }
 0xaf6   : > { %v10653_v18 = vadd.f32 %v10621_v49, %v10589_v22  ;;  %v10590_v44 = vmax.f32 %v14165_v27, 0.0  ;;  %v10633_v22 = vld [vmem:[%s15326_s14 + $0x70] sm:$0xff] }
 0xaf7   : > { %v10651_v17 = vadd.f32 %v10619_v11, %v10587_v0  ;;  %v10588_v51 = vmax.f32 %v14166_v48, 0.0  ;;  %v10631_v0 = vld [vmem:[%s15326_s14 + $0x60] sm:$0xff]  ;;  %v10634_v11 = vld [vmem:[%s15326_s14 + $0x78] sm:$0xff] }
 0xaf8   : > { %10685 = vst [vmem:[%s15326_s14 + $0x10] sm:$0xff] %v10653_v18  ;;  %v10654_v4 = vadd.f32 %v10622_v37, %v10590_v44  ;;  %v10632_v37 = vld [vmem:[%s15326_s14 + $0x68] sm:$0xff] }
 0xaf9   : > { %10683 = vst [vmem:[%s15326_s14] sm:$0xff] %v10651_v17  ;;  %v10652_v31 = vadd.f32 %v10620_v30, %v10588_v51  ;;  %v14041_v50 = vpop.f32.mrb[68].mxu1 }
 0xafa   : > { %10686 = vst [vmem:[%s15326_s14 + $0x18] sm:$0xff] %v10654_v4  ;;  %v14167_v54 = vadd.f32 %v14041_v50, %v18015_v29  ;;  %v10444_v25 = vpop.f32.mrb[69].mxu1 }
 0xafb   : > { %10684 = vst [vmem:[%s15326_s14 + $0x8] sm:$0xff] %v10652_v31  ;;  %v14168_v61 = vadd.f32 %v18015_v29, %v10444_v25  ;;  %v14042_v20 = vpop.f32.mrb[70].mxu1 }
 0xafc   : > { %v10593_v46 = vmax.f32 %v14167_v54, 0.0  ;;  %v14169_v40 = vadd.f32 %v14042_v20, %v18015_v29  ;;  %v10447_v60 = vpop.f32.mrb[71].mxu1 }
 0xafd   : > { %v10591_v55 = vmax.f32 %v14168_v61, 0.0  ;;  %v14170_v6 = vadd.f32 %v18015_v29, %v10447_v60 }
 0xafe   : > { %v10657_v13 = vadd.f32 %v10625_v16, %v10593_v46  ;;  %v10594_v35 = vmax.f32 %v14169_v40, 0.0  ;;  %v10637_v46 = vld [vmem:[%s15326_s14 + $0x90] sm:$0xff] }
 0xaff   : > { %v10655_v36 = vadd.f32 %v10623_v7, %v10591_v55  ;;  %v10592_v10 = vmax.f32 %v14170_v6, 0.0  ;;  %v10635_v55 = vld [vmem:[%s15326_s14 + $0x80] sm:$0xff]  ;;  %v10638_v7 = vld [vmem:[%s15326_s14 + $0x98] sm:$0xff] }
 0xb00   : > { %10689 = vst [vmem:[%s15326_s14 + $0x30] sm:$0xff] %v10657_v13  ;;  %v10658_v1 = vadd.f32 %v10626_v3, %v10594_v35  ;;  %v10636_v3 = vld [vmem:[%s15326_s14 + $0x88] sm:$0xff] }
 0xb01   : > { %10687 = vst [vmem:[%s15326_s14 + $0x20] sm:$0xff] %v10655_v36  ;;  %v10656_v53 = vadd.f32 %v10624_v52, %v10592_v10  ;;  %v14045_v2 = vpop.f32.mrb[72].mxu1 }
 0xb02   : > { %10690 = vst [vmem:[%s15326_s14 + $0x38] sm:$0xff] %v10658_v1  ;;  %v14171_v47 = vadd.f32 %v14045_v2, %v18015_v29  ;;  %v10460_v42 = vpop.f32.mrb[73].mxu1 }
 0xb03   : > { %10688 = vst [vmem:[%s15326_s14 + $0x28] sm:$0xff] %v10656_v53  ;;  %v14172_v34 = vadd.f32 %v18015_v29, %v10460_v42  ;;  %v14046_v39 = vpop.f32.mrb[74].mxu1 }
 0xb04   : > { %v10597_v43 = vmax.f32 %v14171_v47, 0.0  ;;  %v14173_v5 = vadd.f32 %v14046_v39, %v18015_v29  ;;  %v10463_v63 = vpop.f32.mrb[75].mxu1 }
 0xb05   : > { %v10595_v24 = vmax.f32 %v14172_v34, 0.0  ;;  %v14174_v38 = vadd.f32 %v18015_v29, %v10463_v63 }
 0xb06   : > { %v10661_v45 = vadd.f32 %v10629_v14, %v10597_v43  ;;  %v10598_v41 = vmax.f32 %v14173_v5, 0.0  ;;  %v10641_v43 = vld [vmem:[%s15326_s14 + $0xb0] sm:$0xff] }
 0xb07   : > { %v10659_v12 = vadd.f32 %v10627_v56, %v10595_v24  ;;  %v10596_v23 = vmax.f32 %v14174_v38, 0.0  ;;  %v10639_v24 = vld [vmem:[%s15326_s14 + $0xa0] sm:$0xff]  ;;  %v10642_v56 = vld [vmem:[%s15326_s14 + $0xb8] sm:$0xff] }
 0xb08   : > { %10693 = vst [vmem:[%s15326_s14 + $0x50] sm:$0xff] %v10661_v45  ;;  %v10662_v8 = vadd.f32 %v10630_v15, %v10598_v41  ;;  %v10640_v15 = vld [vmem:[%s15326_s14 + $0xa8] sm:$0xff] }
 0xb09   : > { %10691 = vst [vmem:[%s15326_s14 + $0x40] sm:$0xff] %v10659_v12  ;;  %v10660_v62 = vadd.f32 %v10628_v33, %v10596_v23  ;;  %v14049_v57 = vpop.f32.mrb[76].mxu1 }
 0xb0a   : > { %10694 = vst [vmem:[%s15326_s14 + $0x58] sm:$0xff] %v10662_v8  ;;  %v14175_v28 = vadd.f32 %v14049_v57, %v18015_v29  ;;  %v10476_v26 = vpop.f32.mrb[77].mxu1 }
 0xb0b   : > { %10692 = vst [vmem:[%s15326_s14 + $0x48] sm:$0xff] %v10660_v62  ;;  %v14176_v59 = vadd.f32 %v18015_v29, %v10476_v26  ;;  %v14050_v58 = vpop.f32.mrb[78].mxu1 }
 0xb0c   : > { %v10601_v32 = vmax.f32 %v14175_v28, 0.0  ;;  %v14177_v21 = vadd.f32 %v14050_v58, %v18015_v29  ;;  %v10479_v9 = vpop.f32.mrb[79].mxu1 }
 0xb0d   : > { %v10599_v27 = vmax.f32 %v14176_v59, 0.0  ;;  %v14178_v19 = vadd.f32 %v18015_v29, %v10479_v9 }
 0xb0e   : > { %v10665_v49 = vadd.f32 %v10633_v22, %v10601_v32  ;;  %v10602_v48 = vmax.f32 %v14177_v21, 0.0  ;;  %v10645_v32 = vld [vmem:[%s15326_s14 + $0xd0] sm:$0xff] }
 0xb0f   : > { %v10663_v18 = vadd.f32 %v10631_v0, %v10599_v27  ;;  %v10600_v44 = vmax.f32 %v14178_v19, 0.0  ;;  %v10643_v27 = vld [vmem:[%s15326_s14 + $0xc0] sm:$0xff]  ;;  %v10646_v0 = vld [vmem:[%s15326_s14 + $0xd8] sm:$0xff] }
 0xb10   : > { %10697 = vst [vmem:[%s15326_s14 + $0x70] sm:$0xff] %v10665_v49  ;;  %v10666_v17 = vadd.f32 %v10634_v11, %v10602_v48  ;;  %v10644_v11 = vld [vmem:[%s15326_s14 + $0xc8] sm:$0xff] }
 0xb11   : > { %10695 = vst [vmem:[%s15326_s14 + $0x60] sm:$0xff] %v10663_v18  ;;  %v10664_v51 = vadd.f32 %v10632_v37, %v10600_v44  ;;  %v14053_v4 = vpop.f32.mrb[80].mxu1 }
 0xb12   : > { %10698 = vst [vmem:[%s15326_s14 + $0x78] sm:$0xff] %v10666_v17  ;;  %v14179_v30 = vadd.f32 %v14053_v4, %v18015_v29  ;;  %v10492_v31 = vpop.f32.mrb[81].mxu1 }
 0xb13   : > { %10696 = vst [vmem:[%s15326_s14 + $0x68] sm:$0xff] %v10664_v51  ;;  %v14180_v50 = vadd.f32 %v18015_v29, %v10492_v31  ;;  %v14054_v54 = vpop.f32.mrb[82].mxu1 }
 0xb14   : > { %v10605_v25 = vmax.f32 %v14179_v30, 0.0  ;;  %v14181_v61 = vadd.f32 %v14054_v54, %v18015_v29  ;;  %v10495_v20 = vpop.f32.mrb[83].mxu1 }
 0xb15   : > { %v10603_v40 = vmax.f32 %v14180_v50, 0.0  ;;  %v14182_v60 = vadd.f32 %v18015_v29, %v10495_v20 }
 0xb16   : > { %v10669_v16 = vadd.f32 %v10637_v46, %v10605_v25  ;;  %v10606_v6 = vmax.f32 %v14181_v61, 0.0  ;;  %v10649_v25 = vld [vmem:[%s15326_s14 + $0xf0] sm:$0xff] }
 0xb17   : > { %v10667_v13 = vadd.f32 %v10635_v55, %v10603_v40  ;;  %v10604_v35 = vmax.f32 %v14182_v60, 0.0  ;;  %v10647_v40 = vld [vmem:[%s15326_s14 + $0xe0] sm:$0xff]  ;;  %v10650_v55 = vld [vmem:[%s15326_s14 + $0xf8] sm:$0xff] }
 0xb18   : > { %10701 = vst [vmem:[%s15326_s14 + $0x90] sm:$0xff] %v10669_v16  ;;  %v10670_v36 = vadd.f32 %v10638_v7, %v10606_v6  ;;  %v10648_v7 = vld [vmem:[%s15326_s14 + $0xe8] sm:$0xff] }
 0xb19   : > { %10699 = vst [vmem:[%s15326_s14 + $0x80] sm:$0xff] %v10667_v13  ;;  %v10668_v10 = vadd.f32 %v10636_v3, %v10604_v35  ;;  %v14057_v1 = vpop.f32.mrb[84].mxu1 }
 0xb1a   : > { %10702 = vst [vmem:[%s15326_s14 + $0x98] sm:$0xff] %v10670_v36  ;;  %v14183_v52 = vadd.f32 %v14057_v1, %v18015_v29  ;;  %v10508_v53 = vpop.f32.mrb[85].mxu1 }
 0xb1b   : > { %10700 = vst [vmem:[%s15326_s14 + $0x88] sm:$0xff] %v10668_v10  ;;  %v14184_v2 = vadd.f32 %v18015_v29, %v10508_v53  ;;  %v14058_v47 = vpop.f32.mrb[86].mxu1 }
 0xb1c   : > { %v10609_v42 = vmax.f32 %v14183_v52, 0.0  ;;  %v14185_v34 = vadd.f32 %v14058_v47, %v18015_v29  ;;  %v10511_v39 = vpop.f32.mrb[87].mxu1 }
 0xb1d   : > { %v10607_v5 = vmax.f32 %v14184_v2, 0.0  ;;  %v14186_v63 = vadd.f32 %v18015_v29, %v10511_v39 }
 0xb1e   : > { %v10673_v14 = vadd.f32 %v10641_v43, %v10609_v42  ;;  %v10610_v38 = vmax.f32 %v14185_v34, 0.0 }
 0xb1f   : > { %v10671_v45 = vadd.f32 %v10639_v24, %v10607_v5  ;;  %v10608_v41 = vmax.f32 %v14186_v63, 0.0 }
 0xb20   : > { %10705 = vst [vmem:[%s15326_s14 + $0xb0] sm:$0xff] %v10673_v14  ;;  %v10674_v12 = vadd.f32 %v10642_v56, %v10610_v38 }
 0xb21   : > { %10703 = vst [vmem:[%s15326_s14 + $0xa0] sm:$0xff] %v10671_v45  ;;  %v10672_v23 = vadd.f32 %v10640_v15, %v10608_v41  ;;  %v14061_v8 = vpop.f32.mrb[88].mxu1 }
 0xb22   : > { %10706 = vst [vmem:[%s15326_s14 + $0xb8] sm:$0xff] %v10674_v12  ;;  %v14187_v33 = vadd.f32 %v14061_v8, %v18015_v29  ;;  %v10524_v62 = vpop.f32.mrb[89].mxu1 }
 0xb23   : > { %10704 = vst [vmem:[%s15326_s14 + $0xa8] sm:$0xff] %v10672_v23  ;;  %v14188_v57 = vadd.f32 %v18015_v29, %v10524_v62  ;;  %v14062_v28 = vpop.f32.mrb[90].mxu1 }
 0xb24   : > { %v10613_v26 = vmax.f32 %v14187_v33, 0.0  ;;  %v14189_v59 = vadd.f32 %v14062_v28, %v18015_v29  ;;  %v10527_v58 = vpop.f32.mrb[91].mxu1 }
 0xb25   : > { %v10611_v21 = vmax.f32 %v14188_v57, 0.0  ;;  %v14190_v9 = vadd.f32 %v18015_v29, %v10527_v58 }
 0xb26   : > { %v10677_v22 = vadd.f32 %v10645_v32, %v10613_v26  ;;  %v10614_v19 = vmax.f32 %v14189_v59, 0.0 }
 0xb27   : > { %v10675_v49 = vadd.f32 %v10643_v27, %v10611_v21  ;;  %v10612_v48 = vmax.f32 %v14190_v9, 0.0 }
 0xb28   : > { %10709 = vst [vmem:[%s15326_s14 + $0xd0] sm:$0xff] %v10677_v22  ;;  %v10678_v18 = vadd.f32 %v10646_v0, %v10614_v19 }
 0xb29   : > { %10707 = vst [vmem:[%s15326_s14 + $0xc0] sm:$0xff] %v10675_v49  ;;  %v10676_v44 = vadd.f32 %v10644_v11, %v10612_v48  ;;  %v14065_v17 = vpop.f32.mrb[92].mxu1 }
 0xb2a   : > { %10710 = vst [vmem:[%s15326_s14 + $0xd8] sm:$0xff] %v10678_v18  ;;  %v14191_v37 = vadd.f32 %v14065_v17, %v18015_v29  ;;  %v10540_v51 = vpop.f32.mrb[93].mxu1 }
 0xb2b   : > { %10708 = vst [vmem:[%s15326_s14 + $0xc8] sm:$0xff] %v10676_v44  ;;  %v14192_v4 = vadd.f32 %v18015_v29, %v10540_v51  ;;  %v14066_v30 = vpop.f32.mrb[94].mxu1 }
 0xb2c   : > { %v10617_v31 = vmax.f32 %v14191_v37, 0.0  ;;  %v14193_v50 = vadd.f32 %v14066_v30, %v18015_v29  ;;  %v10543_v54 = vpop.f32.mrb[95].mxu1 }
 0xb2d   : > { %v10615_v61 = vmax.f32 %v14192_v4, 0.0  ;;  %v14194_v20 = vadd.f32 %v18015_v29, %v10543_v54 }
 0xb2e   : > { %v10681_v46 = vadd.f32 %v10649_v25, %v10617_v31  ;;  %v10618_v60 = vmax.f32 %v14193_v50, 0.0 }
 0xb2f   : > { %v10679_v16 = vadd.f32 %v10647_v40, %v10615_v61  ;;  %v10616_v6 = vmax.f32 %v14194_v20, 0.0 }
 0xb30   : > { %10713 = vst [vmem:[%s15326_s14 + $0xf0] sm:$0xff] %v10681_v46  ;;  %v10682_v13 = vadd.f32 %v10650_v55, %v10618_v60 }
 0xb31   : > { %10711 = vst [vmem:[%s15326_s14 + $0xe0] sm:$0xff] %v10679_v16  ;;  %v10680_v35 = vadd.f32 %v10648_v7, %v10616_v6 }
 0xb32   : > { %10714 = vst [vmem:[%s15326_s14 + $0xf8] sm:$0xff] %v10682_v13 }
 0xb33   : > { %10712 = vst [vmem:[%s15326_s14 + $0xe8] sm:$0xff] %v10680_v35 }
 0xb34 PF: > { %s16_s18 = sadd.s32 1, %s15233_s18  }
 0xb35   : > { %p13_p3 = scmp.ge.s32.totalorder %s16_s18, 4  }
 0xb37   :  { %15 = sbr.rel (!%p13_p3) target bundleno = 1 (0x1), region = 115 }
 0xb3e   :  { %10736 = vsyncpa [#allocation5], 1 }
 0xb3f   :  { %10738 = vsyncpa [#allocation5 + $0x1], 1 }

</bundles_post_ra>
